<compile_context>
chip_gen: v7x
topology: tpu7x:2x2x1
jax: 0.10.0
libtpu: 0.0.40
codegen_flags: <defaults>
</compile_context>

<pallas_src>
import jax
import jax.numpy as jnp
from jax.experimental import pallas as pl
from jax.experimental.pallas import tpu as pltpu


# --------------------------- attention-pool kernel ---------------------------

def _attn_pool_kernel(x_ref, w1t_ref, b1_ref, w2_ref, b2_ref, o_ref):
    # x_ref : (B, S, D)   w1t_ref: (H, D)  (fc weight, transposed)
    # b1_ref: (1, H)      w2_ref : (1, H)  (score vector)   b2_ref: (1, 1)
    # o_ref : (B, 1, D)
    x = x_ref[...]
    B = x.shape[0]
    H, D = w1t_ref.shape
    # One batched MXU matmul for the whole block (no per-row grid steps).
    w1b = jnp.broadcast_to(w1t_ref[...], (B, H, D))
    u = jnp.tanh(jnp.einsum("bsd,bhd->bsh", x, w1b,
                            preferred_element_type=jnp.float32) + b1_ref[...])
    # Score: VPU multiply + lane reduce instead of an N=1 MXU matmul.
    score = jnp.sum(u * w2_ref[...], axis=-1, keepdims=True) + b2_ref[...]  # (B,S,1)
    # Softmax over S (axis 1); denominator via the (otherwise idle) EUP slot.
    m = jnp.max(score, axis=1, keepdims=True)
    e = jnp.exp(score - m)
    alpha = e * pl.reciprocal(jnp.sum(e, axis=1, keepdims=True), approx=True)
    o_ref[...] = jnp.sum(alpha * x, axis=1, keepdims=True)                   # (B,1,D)


def attn_pool(x, w1, b1, w2, b2):
    """x: (B, S, D) -> (B, D): softmax_S(w2 . tanh(x @ W1 + b1)) weighted sum of x."""
    B, S, D = x.shape
    out = pl.pallas_call(
        _attn_pool_kernel,
        out_shape=jax.ShapeDtypeStruct((B, 1, D), jnp.float32),
        in_specs=[pl.BlockSpec(memory_space=pltpu.MemorySpace.VMEM)] * 5,
        out_specs=pl.BlockSpec(memory_space=pltpu.MemorySpace.VMEM),
    )(x, w1.T, b1, w2.reshape(1, -1), b2)
    return out[:, 0, :]


# ------------------------ fused bidirectional GRU stack -----------------------

def _make_bigru_kernel(T, B):
    def kernel(x_ref, wih_ref, whh_ref, bgi_ref, bhn_ref, o_ref, hsf_ref, hsb_ref):
        # x_ref  : (T*B, Din), time-major rows (row = t*B + b)
        # wih_ref: (L*2*3, Din, Hh)   layer-major, then direction, then gate [r,z,n]
        # whh_ref: (L*2*3, Hh, Hh)    bgi_ref: (L*2*3, 1, Hh)  (r/z biases pre-folded)
        # bhn_ref: (L*2, 1, Hh)       (hidden bias of n gate, stays inside r*(...))
        # o_ref  : (T*B, 2*Hh)        hsf_ref / hsb_ref: (T*B, Hh) staging per direction
        L = wih_ref.shape[0] // 6
        Hh = wih_ref.shape[-1]
        inp = x_ref[...]                                     # layer-0 input (T*B, Din)
        for l in range(L):
            # Hoisted input projection: one (T*B,Din)@(Din,Hh) matmul per gate and
            # direction covers every timestep (removed from the serial recurrence).
            gi = [[jnp.dot(inp, wih_ref[(l * 2 + d) * 3 + g],
                           preferred_element_type=jnp.float32)
                   + bgi_ref[(l * 2 + d) * 3 + g]
                   for g in range(3)]
                  for d in range(2)]
            h = [jnp.zeros((B, Hh), jnp.float32), jnp.zeros((B, Hh), jnp.float32)]
            # Recurrence: fwd + bwd fused, fully unrolled at trace time (T static &
            # small) -> static row offsets, no flips, LLO sees across timesteps.
            for step in range(T):
                for d in range(2):
                    t = step if d == 0 else T - 1 - step
                    row = slice(t * B, (t + 1) * B)
                    base = (l * 2 + d) * 3
                    gh_r = jnp.dot(h[d], whh_ref[base + 0],
                                   preferred_element_type=jnp.float32)
                    gh_z = jnp.dot(h[d], whh_ref[base + 1],
                                   preferred_element_type=jnp.float32)
                    gh_n = jnp.dot(h[d], whh_ref[base + 2],
                                   preferred_element_type=jnp.float32) + bhn_ref[l * 2 + d]
                    r = jax.nn.sigmoid(gi[d][0][row] + gh_r)
                    z = jax.nn.sigmoid(gi[d][1][row] + gh_z)
                    n = jnp.tanh(gi[d][2][row] + r * gh_n)
                    h[d] = (1.0 - z) * n + z * h[d]
                    dst = hsf_ref if d == 0 else hsb_ref
                    dst[row] = h[d]
            # Lane-dense concatenated layer output; feeds the next layer (or o_ref).
            inp = jnp.concatenate([hsf_ref[...], hsb_ref[...]], axis=-1)     # (T*B, 2Hh)
            # TODO(synk): nn.GRU inter-layer dropout (p=0.2) is training-mode only;
            # eval semantics (no dropout) are implemented here.
        o_ref[...] = inp
        # TODO(synk): at realistic T/D, stream x / outputs in time chunks
        # (emit_pipeline) instead of holding the full sequence in VMEM.
    return kernel


def bigru(x, params):
    """Bidirectional multi-layer GRU, batch_first. x: (B, T, Din) -> (B, T, 2*Hh)."""
    wih, whh, bgi, bhn = params
    B, T, Din = x.shape
    L, _, _, _, Hh = wih.shape
    xt = jnp.transpose(x, (1, 0, 2)).reshape(T * B, Din)      # time-major, once per stack
    out = pl.pallas_call(
        _make_bigru_kernel(T, B),
        out_shape=jax.ShapeDtypeStruct((T * B, 2 * Hh), jnp.float32),
        in_specs=[pl.BlockSpec(memory_space=pltpu.MemorySpace.VMEM)] * 5,
        out_specs=pl.BlockSpec(memory_space=pltpu.MemorySpace.VMEM),
        scratch_shapes=[pltpu.VMEM((T * B, Hh), jnp.float32),
                        pltpu.VMEM((T * B, Hh), jnp.float32)],
    )(xt,
      wih.reshape(L * 6, Din, Hh),
      whh.reshape(L * 6, Hh, Hh),
      bgi.reshape(L * 6, 1, Hh),
      bhn.reshape(L * 2, 1, Hh))
    return jnp.transpose(out.reshape(T, B, 2 * Hh), (1, 0, 2))


# ----------------------------- parameter helpers ------------------------------

def init_linear(key, din, dout, scale=0.1):
    kw, kb = jax.random.split(key)
    w = scale * jax.random.normal(kw, (din, dout), jnp.float32)
    b = scale * jax.random.normal(kb, (1, dout), jnp.float32)
    return w, b


def init_bigru(key, din, hh, num_layers=2, scale=0.1):
    # Stacked (layer, direction, gate) weights for the fused GRU-stack kernel.
    # Gate order [r, z, n]; bgi = [b_ih_r + b_hh_r, b_ih_z + b_hh_z, b_ih_n],
    # bhn = b_hh_n kept separate (it lives inside r * (W_hn h + b_hn)).
    assert din == 2 * hh, "fused layer stacking requires input_dim == hidden_dim"
    k = jax.random.split(key, 4)
    wih = scale * jax.random.normal(k[0], (num_layers, 2, 3, din, hh), jnp.float32)
    whh = scale * jax.random.normal(k[1], (num_layers, 2, 3, hh, hh), jnp.float32)
    bih = scale * jax.random.normal(k[2], (num_layers, 2, 3, 1, hh), jnp.float32)
    bhh = scale * jax.random.normal(k[3], (num_layers, 2, 3, 1, hh), jnp.float32)
    bgi = bih.at[:, :, 0].add(bhh[:, :, 0]).at[:, :, 1].add(bhh[:, :, 1])
    bhn = bhh[:, :, 2]                                        # (L, 2, 1, hh)
    return wih, whh, bgi, bhn


def init_mash_rnn_params(key, d, num_layers=2):
    hh = d // 2
    ks = jax.random.split(key, 15)
    return {
        "word": {"fc": init_linear(ks[0], d, d),
                 "upw": init_linear(ks[1], d, 1)},
        "sent": {"fc": init_linear(ks[2], d, d),
                 "upw": init_linear(ks[3], d, 1),
                 "fc1": init_linear(ks[4], d, d),
                 "ups": init_linear(ks[5], d, 1),
                 "gru": init_bigru(ks[6], d, hh, num_layers)},
        "para": {"fc1a": init_linear(ks[7], d, d), "fc1b": init_linear(ks[8], d, 1),
                 "fc2a": init_linear(ks[9], d, d), "fc2b": init_linear(ks[10], d, 1),
                 "fc3a": init_linear(ks[11], d, d), "fc3b": init_linear(ks[12], d, 1),
                 "gru_sent": init_bigru(ks[13], d, hh, num_layers),
                 "gru_para": init_bigru(ks[14], d, hh, num_layers)},
    }


# --------------------------------- encoders -----------------------------------

def word_encoder(X, p):
    P, S, W, D = X.shape
    x = X.reshape(1, P * S * W, D)                     # torch: X.view(1, x1, -1)
    return attn_pool(x, *p["fc"], *p["upw"])           # (1, D)


def sent_encoder(X, p):
    P, S, W, D = X.shape
    x = X.reshape(P * S, W, D)                         # torch: X.view(x1, x2, x3)
    first = attn_pool(x, *p["fc"], *p["upw"])          # (P*S, D)
    out = bigru(first[None], p["gru"])                 # (1, P*S, D)
    return attn_pool(out, *p["fc1"], *p["ups"])        # (1, D)


def para_encoder(X, p):
    P, S, W, D = X.shape
    x = X.reshape(P * S, W, D)
    first = attn_pool(x, *p["fc1a"], *p["fc1b"]).reshape(P, S, D)  # word attn per (P,S)
    first = bigru(first, p["gru_sent"])                # (P, S, D)
    second = attn_pool(first, *p["fc2a"], *p["fc2b"])  # (P, D)
    second = bigru(second[None], p["gru_para"])        # (1, P, D)
    return attn_pool(second, *p["fc3a"], *p["fc3b"])   # (1, D)


@jax.jit
def mash_rnn(X, params):
    x1 = word_encoder(X, params["word"])               # (1, D)
    x2 = sent_encoder(X, params["sent"])               # (1, D)
    x3 = para_encoder(X, params["para"])               # (1, D)
    # TODO(synk): torch.cat([X1(1,1,D), X2(1,D), X3(1,D)], dim=1) in the reference
    # is a rank mismatch; we squeeze WordEncoder's keepdim axis and concatenate
    # along the feature axis -> (1, 3*D).
    return jnp.concatenate([x1, x2, x3], axis=1)


# ---------------------------------- driver ------------------------------------

if __name__ == "__main__":
    key = jax.random.PRNGKey(0)
    kx, kp = jax.random.split(key)

    # Small shapes consistent with the module: 2 paragraphs, 3 sentences,
    # 4 words, embed/hidden dim 32 (hidden_dim == input_dim, GRU hidden 16/dir).
    P, S, W, D = 2, 3, 4, 32
    X = jax.random.normal(kx, (P, S, W, D), dtype=jnp.float32)
    params = init_mash_rnn_params(kp, D, num_layers=2)

    out = mash_rnn(X, params)
    out = jax.block_until_ready(out)

    assert out.shape == (1, 3 * D), out.shape
    assert bool(jnp.all(jnp.isfinite(out)))
    print("KERNEL_OK")
</pallas_src>

<mosaic_0001>
module attributes {stable_mosaic.version = 11 : i64} {
  func.func @_attn_pool_kernel(%arg0: memref<6x4x32xf32, #tpu.memory_space<vmem>>, %arg1: memref<32x32xf32, #tpu.memory_space<vmem>>, %arg2: memref<1x32xf32, #tpu.memory_space<vmem>>, %arg3: memref<1x32xf32, #tpu.memory_space<vmem>>, %arg4: memref<1x1xf32, #tpu.memory_space<vmem>>, %arg5: memref<6x1x32xf32, #tpu.memory_space<vmem>>) attributes {dimension_semantics = [], scalar_prefetch = 0 : i64, scratch_operands = 0 : i64, tpu.core_type = #tpu.core_type<tc>} {
    %c0 = arith.constant 0 : index
    %c0_0 = arith.constant 0 : index
    %c0_1 = arith.constant 0 : index
    %0 = vector.load %arg0[%c0, %c0_0, %c0_1] : memref<6x4x32xf32, #tpu.memory_space<vmem>>, vector<6x4x32xf32>
    %c0_2 = arith.constant 0 : index
    %c0_3 = arith.constant 0 : index
    %1 = vector.load %arg1[%c0_2, %c0_3] : memref<32x32xf32, #tpu.memory_space<vmem>>, vector<32x32xf32>
    %2 = vector.shape_cast %1 : vector<32x32xf32> to vector<1x32x32xf32>
    %3 = vector.broadcast %2 : vector<1x32x32xf32> to vector<6x32x32xf32>
    "tpu.trace_start"() <{level = 10 : i32, message = "bsd,bhd->bsh"}> : () -> ()
    %cst = arith.constant dense<0.000000e+00> : vector<6x4x32xf32>
    %4 = tpu.matmul %0, %3, %cst {dimension_numbers = #tpu.dot_dimension_numbers<[2], [2], [1], [1], [0, 0, 0, 1, 1, 1], [0], [0]>} : vector<6x4x32xf32>, vector<6x32x32xf32>, vector<6x4x32xf32> -> vector<6x4x32xf32>
    "tpu.trace_stop"() : () -> ()
    %c0_4 = arith.constant 0 : index
    %c0_5 = arith.constant 0 : index
    %5 = vector.load %arg2[%c0_4, %c0_5] : memref<1x32xf32, #tpu.memory_space<vmem>>, vector<1x32xf32>
    %6 = vector.shape_cast %5 : vector<1x32xf32> to vector<1x1x32xf32>
    %7 = vector.broadcast %6 : vector<1x1x32xf32> to vector<6x4x32xf32>
    %8 = arith.addf %4, %7 : vector<6x4x32xf32>
    %9 = math.tanh %8 : vector<6x4x32xf32>
    %c0_6 = arith.constant 0 : index
    %c0_7 = arith.constant 0 : index
    %10 = vector.load %arg3[%c0_6, %c0_7] : memref<1x32xf32, #tpu.memory_space<vmem>>, vector<1x32xf32>
    %11 = vector.shape_cast %10 : vector<1x32xf32> to vector<1x1x32xf32>
    %12 = vector.broadcast %11 : vector<1x1x32xf32> to vector<6x4x32xf32>
    %13 = arith.mulf %9, %12 : vector<6x4x32xf32>
    %cst_8 = arith.constant dense<0.000000e+00> : vector<6x4xf32>
    %14 = vector.multi_reduction <add>, %13, %cst_8 [2] : vector<6x4x32xf32> to vector<6x4xf32>
    %15 = vector.shape_cast %14 : vector<6x4xf32> to vector<6x4x1xf32>
    %c0_9 = arith.constant 0 : index
    %c0_10 = arith.constant 0 : index
    %16 = vector.load %arg4[%c0_9, %c0_10] : memref<1x1xf32, #tpu.memory_space<vmem>>, vector<1x1xf32>
    %17 = vector.shape_cast %16 : vector<1x1xf32> to vector<1x1x1xf32>
    %18 = vector.broadcast %17 : vector<1x1x1xf32> to vector<6x4x1xf32>
    %19 = arith.addf %15, %18 : vector<6x4x1xf32>
    %cst_11 = arith.constant dense<0xFF800000> : vector<6x1xf32>
    %20 = vector.multi_reduction <maximumf>, %19, %cst_11 [1] : vector<6x4x1xf32> to vector<6x1xf32>
    %21 = vector.shape_cast %20 : vector<6x1xf32> to vector<6x1x1xf32>
    %22 = vector.broadcast %21 : vector<6x1x1xf32> to vector<6x4x1xf32>
    %23 = arith.subf %19, %22 : vector<6x4x1xf32>
    %24 = math.exp %23 : vector<6x4x1xf32>
    %cst_12 = arith.constant dense<0.000000e+00> : vector<6x1xf32>
    %25 = vector.multi_reduction <add>, %24, %cst_12 [1] : vector<6x4x1xf32> to vector<6x1xf32>
    %26 = vector.shape_cast %25 : vector<6x1xf32> to vector<6x1x1xf32>
    %27 = tpu.reciprocal %26 {approx = true} : vector<6x1x1xf32> -> vector<6x1x1xf32>
    %28 = vector.broadcast %27 : vector<6x1x1xf32> to vector<6x4x1xf32>
    %29 = arith.mulf %24, %28 : vector<6x4x1xf32>
    %30 = vector.broadcast %29 : vector<6x4x1xf32> to vector<6x4x32xf32>
    %31 = arith.mulf %30, %0 : vector<6x4x32xf32>
    %cst_13 = arith.constant dense<0.000000e+00> : vector<6x32xf32>
    %32 = vector.multi_reduction <add>, %31, %cst_13 [1] : vector<6x4x32xf32> to vector<6x32xf32>
    %33 = vector.shape_cast %32 : vector<6x32xf32> to vector<6x1x32xf32>
    %c0_14 = arith.constant 0 : index
    %c0_15 = arith.constant 0 : index
    %c0_16 = arith.constant 0 : index
    %34 = vector.load %arg5[%c0_14, %c0_15, %c0_16] : memref<6x1x32xf32, #tpu.memory_space<vmem>>, vector<6x1x32xf32>
    tpu.vector_store %arg5[%c0_14, %c0_15, %c0_16], %33 {strides = array<i32>} : memref<6x1x32xf32, #tpu.memory_space<vmem>>, vector<6x1x32xf32>,
    return
  }
}

module attributes {stable_mosaic.version = 11 : i64} {
  func.func @_attn_pool_kernel(%arg0: memref<2x3x32xf32, #tpu.memory_space<vmem>>, %arg1: memref<32x32xf32, #tpu.memory_space<vmem>>, %arg2: memref<1x32xf32, #tpu.memory_space<vmem>>, %arg3: memref<1x32xf32, #tpu.memory_space<vmem>>, %arg4: memref<1x1xf32, #tpu.memory_space<vmem>>, %arg5: memref<2x1x32xf32, #tpu.memory_space<vmem>>) attributes {dimension_semantics = [], scalar_prefetch = 0 : i64, scratch_operands = 0 : i64, tpu.core_type = #tpu.core_type<tc>} {
    %c0 = arith.constant 0 : index
    %c0_0 = arith.constant 0 : index
    %c0_1 = arith.constant 0 : index
    %0 = vector.load %arg0[%c0, %c0_0, %c0_1] : memref<2x3x32xf32, #tpu.memory_space<vmem>>, vector<2x3x32xf32>
    %c0_2 = arith.constant 0 : index
    %c0_3 = arith.constant 0 : index
    %1 = vector.load %arg1[%c0_2, %c0_3] : memref<32x32xf32, #tpu.memory_space<vmem>>, vector<32x32xf32>
    %2 = vector.shape_cast %1 : vector<32x32xf32> to vector<1x32x32xf32>
    %3 = vector.broadcast %2 : vector<1x32x32xf32> to vector<2x32x32xf32>
    "tpu.trace_start"() <{level = 10 : i32, message = "bsd,bhd->bsh"}> : () -> ()
    %cst = arith.constant dense<0.000000e+00> : vector<2x3x32xf32>
    %4 = tpu.matmul %0, %3, %cst {dimension_numbers = #tpu.dot_dimension_numbers<[2], [2], [1], [1], [0, 0, 0, 1, 1, 1], [0], [0]>} : vector<2x3x32xf32>, vector<2x32x32xf32>, vector<2x3x32xf32> -> vector<2x3x32xf32>
    "tpu.trace_stop"() : () -> ()
    %c0_4 = arith.constant 0 : index
    %c0_5 = arith.constant 0 : index
    %5 = vector.load %arg2[%c0_4, %c0_5] : memref<1x32xf32, #tpu.memory_space<vmem>>, vector<1x32xf32>
    %6 = vector.shape_cast %5 : vector<1x32xf32> to vector<1x1x32xf32>
    %7 = vector.broadcast %6 : vector<1x1x32xf32> to vector<2x3x32xf32>
    %8 = arith.addf %4, %7 : vector<2x3x32xf32>
    %9 = math.tanh %8 : vector<2x3x32xf32>
    %c0_6 = arith.constant 0 : index
    %c0_7 = arith.constant 0 : index
    %10 = vector.load %arg3[%c0_6, %c0_7] : memref<1x32xf32, #tpu.memory_space<vmem>>, vector<1x32xf32>
    %11 = vector.shape_cast %10 : vector<1x32xf32> to vector<1x1x32xf32>
    %12 = vector.broadcast %11 : vector<1x1x32xf32> to vector<2x3x32xf32>
    %13 = arith.mulf %9, %12 : vector<2x3x32xf32>
    %cst_8 = arith.constant dense<0.000000e+00> : vector<2x3xf32>
    %14 = vector.multi_reduction <add>, %13, %cst_8 [2] : vector<2x3x32xf32> to vector<2x3xf32>
    %15 = vector.shape_cast %14 : vector<2x3xf32> to vector<2x3x1xf32>
    %c0_9 = arith.constant 0 : index
    %c0_10 = arith.constant 0 : index
    %16 = vector.load %arg4[%c0_9, %c0_10] : memref<1x1xf32, #tpu.memory_space<vmem>>, vector<1x1xf32>
    %17 = vector.shape_cast %16 : vector<1x1xf32> to vector<1x1x1xf32>
    %18 = vector.broadcast %17 : vector<1x1x1xf32> to vector<2x3x1xf32>
    %19 = arith.addf %15, %18 : vector<2x3x1xf32>
    %cst_11 = arith.constant dense<0xFF800000> : vector<2x1xf32>
    %20 = vector.multi_reduction <maximumf>, %19, %cst_11 [1] : vector<2x3x1xf32> to vector<2x1xf32>
    %21 = vector.shape_cast %20 : vector<2x1xf32> to vector<2x1x1xf32>
    %22 = vector.broadcast %21 : vector<2x1x1xf32> to vector<2x3x1xf32>
    %23 = arith.subf %19, %22 : vector<2x3x1xf32>
    %24 = math.exp %23 : vector<2x3x1xf32>
    %cst_12 = arith.constant dense<0.000000e+00> : vector<2x1xf32>
    %25 = vector.multi_reduction <add>, %24, %cst_12 [1] : vector<2x3x1xf32> to vector<2x1xf32>
    %26 = vector.shape_cast %25 : vector<2x1xf32> to vector<2x1x1xf32>
    %27 = tpu.reciprocal %26 {approx = true} : vector<2x1x1xf32> -> vector<2x1x1xf32>
    %28 = vector.broadcast %27 : vector<2x1x1xf32> to vector<2x3x1xf32>
    %29 = arith.mulf %24, %28 : vector<2x3x1xf32>
    %30 = vector.broadcast %29 : vector<2x3x1xf32> to vector<2x3x32xf32>
    %31 = arith.mulf %30, %0 : vector<2x3x32xf32>
    %cst_13 = arith.constant dense<0.000000e+00> : vector<2x32xf32>
    %32 = vector.multi_reduction <add>, %31, %cst_13 [1] : vector<2x3x32xf32> to vector<2x32xf32>
    %33 = vector.shape_cast %32 : vector<2x32xf32> to vector<2x1x32xf32>
    %c0_14 = arith.constant 0 : index
    %c0_15 = arith.constant 0 : index
    %c0_16 = arith.constant 0 : index
    %34 = vector.load %arg5[%c0_14, %c0_15, %c0_16] : memref<2x1x32xf32, #tpu.memory_space<vmem>>, vector<2x1x32xf32>
    tpu.vector_store %arg5[%c0_14, %c0_15, %c0_16], %33 {strides = array<i32>} : memref<2x1x32xf32, #tpu.memory_space<vmem>>, vector<2x1x32xf32>,
    return
  }
}

module attributes {stable_mosaic.version = 11 : i64} {
  func.func @kernel(%arg0: memref<6x32xf32, #tpu.memory_space<vmem>>, %arg1: memref<12x32x16xf32, #tpu.memory_space<vmem>>, %arg2: memref<12x16x16xf32, #tpu.memory_space<vmem>>, %arg3: memref<12x1x16xf32, #tpu.memory_space<vmem>>, %arg4: memref<4x1x16xf32, #tpu.memory_space<vmem>>, %arg5: memref<6x32xf32, #tpu.memory_space<vmem>>, %arg6: memref<6x16xf32, #tpu.memory_space<vmem>>, %arg7: memref<6x16xf32, #tpu.memory_space<vmem>>) attributes {dimension_semantics = [], scalar_prefetch = 0 : i64, scratch_operands = 2 : i64, tpu.core_type = #tpu.core_type<tc>} {
    %c0 = arith.constant 0 : index
    %c0_0 = arith.constant 0 : index
    %0 = vector.load %arg0[%c0, %c0_0] : memref<6x32xf32, #tpu.memory_space<vmem>>, vector<6x32xf32>
    %c0_1 = arith.constant 0 : index
    %c0_2 = arith.constant 0 : index
    %c0_3 = arith.constant 0 : index
    %1 = vector.load %arg1[%c0_1, %c0_2, %c0_3] : memref<12x32x16xf32, #tpu.memory_space<vmem>>, vector<1x32x16xf32>
    %2 = vector.shape_cast %1 : vector<1x32x16xf32> to vector<32x16xf32>
    %cst = arith.constant dense<0.000000e+00> : vector<6x16xf32>
    %3 = tpu.matmul %0, %2, %cst {dimension_numbers = #tpu.dot_dimension_numbers<[1], [0], [0], [1], [0, 0, 1, 1], [], []>} : vector<6x32xf32>, vector<32x16xf32>, vector<6x16xf32> -> vector<6x16xf32>
    %c0_4 = arith.constant 0 : index
    %c0_5 = arith.constant 0 : index
    %c0_6 = arith.constant 0 : index
    %4 = vector.load %arg3[%c0_4, %c0_5, %c0_6] : memref<12x1x16xf32, #tpu.memory_space<vmem>>, vector<1x1x16xf32>
    %5 = vector.shape_cast %4 : vector<1x1x16xf32> to vector<1x16xf32>
    %6 = vector.broadcast %5 : vector<1x16xf32> to vector<6x16xf32>
    %7 = arith.addf %3, %6 : vector<6x16xf32>
    %c1 = arith.constant 1 : index
    %c0_7 = arith.constant 0 : index
    %c0_8 = arith.constant 0 : index
    %8 = vector.load %arg1[%c1, %c0_7, %c0_8] : memref<12x32x16xf32, #tpu.memory_space<vmem>>, vector<1x32x16xf32>
    %9 = vector.shape_cast %8 : vector<1x32x16xf32> to vector<32x16xf32>
    %cst_9 = arith.constant dense<0.000000e+00> : vector<6x16xf32>
    %10 = tpu.matmul %0, %9, %cst_9 {dimension_numbers = #tpu.dot_dimension_numbers<[1], [0], [0], [1], [0, 0, 1, 1], [], []>} : vector<6x32xf32>, vector<32x16xf32>, vector<6x16xf32> -> vector<6x16xf32>
    %c1_10 = arith.constant 1 : index
    %c0_11 = arith.constant 0 : index
    %c0_12 = arith.constant 0 : index
    %11 = vector.load %arg3[%c1_10, %c0_11, %c0_12] : memref<12x1x16xf32, #tpu.memory_space<vmem>>, vector<1x1x16xf32>
    %12 = vector.shape_cast %11 : vector<1x1x16xf32> to vector<1x16xf32>
    %13 = vector.broadcast %12 : vector<1x16xf32> to vector<6x16xf32>
    %14 = arith.addf %10, %13 : vector<6x16xf32>
    %c2 = arith.constant 2 : index
    %c0_13 = arith.constant 0 : index
    %c0_14 = arith.constant 0 : index
    %15 = vector.load %arg1[%c2, %c0_13, %c0_14] : memref<12x32x16xf32, #tpu.memory_space<vmem>>, vector<1x32x16xf32>
    %16 = vector.shape_cast %15 : vector<1x32x16xf32> to vector<32x16xf32>
    %cst_15 = arith.constant dense<0.000000e+00> : vector<6x16xf32>
    %17 = tpu.matmul %0, %16, %cst_15 {dimension_numbers = #tpu.dot_dimension_numbers<[1], [0], [0], [1], [0, 0, 1, 1], [], []>} : vector<6x32xf32>, vector<32x16xf32>, vector<6x16xf32> -> vector<6x16xf32>
    %c2_16 = arith.constant 2 : index
    %c0_17 = arith.constant 0 : index
    %c0_18 = arith.constant 0 : index
    %18 = vector.load %arg3[%c2_16, %c0_17, %c0_18] : memref<12x1x16xf32, #tpu.memory_space<vmem>>, vector<1x1x16xf32>
    %19 = vector.shape_cast %18 : vector<1x1x16xf32> to vector<1x16xf32>
    %20 = vector.broadcast %19 : vector<1x16xf32> to vector<6x16xf32>
    %21 = arith.addf %17, %20 : vector<6x16xf32>
    %c3 = arith.constant 3 : index
    %c0_19 = arith.constant 0 : index
    %c0_20 = arith.constant 0 : index
    %22 = vector.load %arg1[%c3, %c0_19, %c0_20] : memref<12x32x16xf32, #tpu.memory_space<vmem>>, vector<1x32x16xf32>
    %23 = vector.shape_cast %22 : vector<1x32x16xf32> to vector<32x16xf32>
    %cst_21 = arith.constant dense<0.000000e+00> : vector<6x16xf32>
    %24 = tpu.matmul %0, %23, %cst_21 {dimension_numbers = #tpu.dot_dimension_numbers<[1], [0], [0], [1], [0, 0, 1, 1], [], []>} : vector<6x32xf32>, vector<32x16xf32>, vector<6x16xf32> -> vector<6x16xf32>
    %c3_22 = arith.constant 3 : index
    %c0_23 = arith.constant 0 : index
    %c0_24 = arith.constant 0 : index
    %25 = vector.load %arg3[%c3_22, %c0_23, %c0_24] : memref<12x1x16xf32, #tpu.memory_space<vmem>>, vector<1x1x16xf32>
    %26 = vector.shape_cast %25 : vector<1x1x16xf32> to vector<1x16xf32>
    %27 = vector.broadcast %26 : vector<1x16xf32> to vector<6x16xf32>
    %28 = arith.addf %24, %27 : vector<6x16xf32>
    %c4 = arith.constant 4 : index
    %c0_25 = arith.constant 0 : index
    %c0_26 = arith.constant 0 : index
    %29 = vector.load %arg1[%c4, %c0_25, %c0_26] : memref<12x32x16xf32, #tpu.memory_space<vmem>>, vector<1x32x16xf32>
    %30 = vector.shape_cast %29 : vector<1x32x16xf32> to vector<32x16xf32>
    %cst_27 = arith.constant dense<0.000000e+00> : vector<6x16xf32>
    %31 = tpu.matmul %0, %30, %cst_27 {dimension_numbers = #tpu.dot_dimension_numbers<[1], [0], [0], [1], [0, 0, 1, 1], [], []>} : vector<6x32xf32>, vector<32x16xf32>, vector<6x16xf32> -> vector<6x16xf32>
    %c4_28 = arith.constant 4 : index
    %c0_29 = arith.constant 0 : index
    %c0_30 = arith.constant 0 : index
    %32 = vector.load %arg3[%c4_28, %c0_29, %c0_30] : memref<12x1x16xf32, #tpu.memory_space<vmem>>, vector<1x1x16xf32>
    %33 = vector.shape_cast %32 : vector<1x1x16xf32> to vector<1x16xf32>
    %34 = vector.broadcast %33 : vector<1x16xf32> to vector<6x16xf32>
    %35 = arith.addf %31, %34 : vector<6x16xf32>
    %c5 = arith.constant 5 : index
    %c0_31 = arith.constant 0 : index
    %c0_32 = arith.constant 0 : index
    %36 = vector.load %arg1[%c5, %c0_31, %c0_32] : memref<12x32x16xf32, #tpu.memory_space<vmem>>, vector<1x32x16xf32>
    %37 = vector.shape_cast %36 : vector<1x32x16xf32> to vector<32x16xf32>
    %cst_33 = arith.constant dense<0.000000e+00> : vector<6x16xf32>
    %38 = tpu.matmul %0, %37, %cst_33 {dimension_numbers = #tpu.dot_dimension_numbers<[1], [0], [0], [1], [0, 0, 1, 1], [], []>} : vector<6x32xf32>, vector<32x16xf32>, vector<6x16xf32> -> vector<6x16xf32>
    %c5_34 = arith.constant 5 : index
    %c0_35 = arith.constant 0 : index
    %c0_36 = arith.constant 0 : index
    %39 = vector.load %arg3[%c5_34, %c0_35, %c0_36] : memref<12x1x16xf32, #tpu.memory_space<vmem>>, vector<1x1x16xf32>
    %40 = vector.shape_cast %39 : vector<1x1x16xf32> to vector<1x16xf32>
    %41 = vector.broadcast %40 : vector<1x16xf32> to vector<6x16xf32>
    %42 = arith.addf %38, %41 : vector<6x16xf32>
    %cst_37 = arith.constant 0.000000e+00 : f32
    %43 = vector.broadcast %cst_37 : f32 to vector<2x16xf32>
    %cst_38 = arith.constant 0.000000e+00 : f32
    %44 = vector.broadcast %cst_38 : f32 to vector<2x16xf32>
    %c0_39 = arith.constant 0 : index
    %c0_40 = arith.constant 0 : index
    %c0_41 = arith.constant 0 : index
    %45 = vector.load %arg2[%c0_39, %c0_40, %c0_41] : memref<12x16x16xf32, #tpu.memory_space<vmem>>, vector<1x16x16xf32>
    %46 = vector.shape_cast %45 : vector<1x16x16xf32> to vector<16x16xf32>
    %cst_42 = arith.constant dense<0.000000e+00> : vector<2x16xf32>
    %47 = tpu.matmul %43, %46, %cst_42 {dimension_numbers = #tpu.dot_dimension_numbers<[1], [0], [0], [1], [0, 0, 1, 1], [], []>} : vector<2x16xf32>, vector<16x16xf32>, vector<2x16xf32> -> vector<2x16xf32>
    %c1_43 = arith.constant 1 : index
    %c0_44 = arith.constant 0 : index
    %c0_45 = arith.constant 0 : index
    %48 = vector.load %arg2[%c1_43, %c0_44, %c0_45] : memref<12x16x16xf32, #tpu.memory_space<vmem>>, vector<1x16x16xf32>
    %49 = vector.shape_cast %48 : vector<1x16x16xf32> to vector<16x16xf32>
    %cst_46 = arith.constant dense<0.000000e+00> : vector<2x16xf32>
    %50 = tpu.matmul %43, %49, %cst_46 {dimension_numbers = #tpu.dot_dimension_numbers<[1], [0], [0], [1], [0, 0, 1, 1], [], []>} : vector<2x16xf32>, vector<16x16xf32>, vector<2x16xf32> -> vector<2x16xf32>
    %c2_47 = arith.constant 2 : index
    %c0_48 = arith.constant 0 : index
    %c0_49 = arith.constant 0 : index
    %51 = vector.load %arg2[%c2_47, %c0_48, %c0_49] : memref<12x16x16xf32, #tpu.memory_space<vmem>>, vector<1x16x16xf32>
    %52 = vector.shape_cast %51 : vector<1x16x16xf32> to vector<16x16xf32>
    %cst_50 = arith.constant dense<0.000000e+00> : vector<2x16xf32>
    %53 = tpu.matmul %43, %52, %cst_50 {dimension_numbers = #tpu.dot_dimension_numbers<[1], [0], [0], [1], [0, 0, 1, 1], [], []>} : vector<2x16xf32>, vector<16x16xf32>, vector<2x16xf32> -> vector<2x16xf32>
    %c0_51 = arith.constant 0 : index
    %c0_52 = arith.constant 0 : index
    %c0_53 = arith.constant 0 : index
    %54 = vector.load %arg4[%c0_51, %c0_52, %c0_53] : memref<4x1x16xf32, #tpu.memory_space<vmem>>, vector<1x1x16xf32>
    %55 = vector.shape_cast %54 : vector<1x1x16xf32> to vector<1x16xf32>
    %56 = vector.broadcast %55 : vector<1x16xf32> to vector<2x16xf32>
    %57 = arith.addf %53, %56 : vector<2x16xf32>
    %58 = vector.extract_strided_slice %7 {offsets = [0, 0], sizes = [2, 16], strides = [1, 1]} : vector<6x16xf32> to vector<2x16xf32>
    %59 = arith.addf %58, %47 : vector<2x16xf32>
    %60 = arith.negf %59 : vector<2x16xf32>
    %61 = math.exp %60 : vector<2x16xf32>
    %cst_54 = arith.constant 1.000000e+00 : f32
    %62 = vector.broadcast %cst_54 : f32 to vector<2x16xf32>
    %63 = arith.addf %62, %61 : vector<2x16xf32>
    %64 = arith.divf %62, %63 : vector<2x16xf32>
    %65 = vector.extract_strided_slice %14 {offsets = [0, 0], sizes = [2, 16], strides = [1, 1]} : vector<6x16xf32> to vector<2x16xf32>
    %66 = arith.addf %65, %50 : vector<2x16xf32>
    %67 = arith.negf %66 : vector<2x16xf32>
    %68 = math.exp %67 : vector<2x16xf32>
    %cst_55 = arith.constant 1.000000e+00 : f32
    %69 = vector.broadcast %cst_55 : f32 to vector<2x16xf32>
    %70 = arith.addf %69, %68 : vector<2x16xf32>
    %71 = arith.divf %69, %70 : vector<2x16xf32>
    %72 = vector.extract_strided_slice %21 {offsets = [0, 0], sizes = [2, 16], strides = [1, 1]} : vector<6x16xf32> to vector<2x16xf32>
    %73 = arith.mulf %64, %57 : vector<2x16xf32>
    %74 = arith.addf %72, %73 : vector<2x16xf32>
    %75 = math.tanh %74 : vector<2x16xf32>
    %cst_56 = arith.constant 1.000000e+00 : f32
    %76 = vector.broadcast %cst_56 : f32 to vector<2x16xf32>
    %77 = arith.subf %76, %71 : vector<2x16xf32>
    %78 = arith.mulf %77, %75 : vector<2x16xf32>
    %79 = arith.mulf %71, %43 : vector<2x16xf32>
    %80 = arith.addf %78, %79 : vector<2x16xf32>
    %c0_57 = arith.constant 0 : index
    %c0_58 = arith.constant 0 : index
    %81 = vector.load %arg6[%c0_57, %c0_58] : memref<6x16xf32, #tpu.memory_space<vmem>>, vector<2x16xf32>
    tpu.vector_store %arg6[%c0_57, %c0_58], %80 {strides = array<i32>} : memref<6x16xf32, #tpu.memory_space<vmem>>, vector<2x16xf32>,
    %c3_59 = arith.constant 3 : index
    %c0_60 = arith.constant 0 : index
    %c0_61 = arith.constant 0 : index
    %82 = vector.load %arg2[%c3_59, %c0_60, %c0_61] : memref<12x16x16xf32, #tpu.memory_space<vmem>>, vector<1x16x16xf32>
    %83 = vector.shape_cast %82 : vector<1x16x16xf32> to vector<16x16xf32>
    %cst_62 = arith.constant dense<0.000000e+00> : vector<2x16xf32>
    %84 = tpu.matmul %44, %83, %cst_62 {dimension_numbers = #tpu.dot_dimension_numbers<[1], [0], [0], [1], [0, 0, 1, 1], [], []>} : vector<2x16xf32>, vector<16x16xf32>, vector<2x16xf32> -> vector<2x16xf32>
    %c4_63 = arith.constant 4 : index
    %c0_64 = arith.constant 0 : index
    %c0_65 = arith.constant 0 : index
    %85 = vector.load %arg2[%c4_63, %c0_64, %c0_65] : memref<12x16x16xf32, #tpu.memory_space<vmem>>, vector<1x16x16xf32>
    %86 = vector.shape_cast %85 : vector<1x16x16xf32> to vector<16x16xf32>
    %cst_66 = arith.constant dense<0.000000e+00> : vector<2x16xf32>
    %87 = tpu.matmul %44, %86, %cst_66 {dimension_numbers = #tpu.dot_dimension_numbers<[1], [0], [0], [1], [0, 0, 1, 1], [], []>} : vector<2x16xf32>, vector<16x16xf32>, vector<2x16xf32> -> vector<2x16xf32>
    %c5_67 = arith.constant 5 : index
    %c0_68 = arith.constant 0 : index
    %c0_69 = arith.constant 0 : index
    %88 = vector.load %arg2[%c5_67, %c0_68, %c0_69] : memref<12x16x16xf32, #tpu.memory_space<vmem>>, vector<1x16x16xf32>
    %89 = vector.shape_cast %88 : vector<1x16x16xf32> to vector<16x16xf32>
    %cst_70 = arith.constant dense<0.000000e+00> : vector<2x16xf32>
    %90 = tpu.matmul %44, %89, %cst_70 {dimension_numbers = #tpu.dot_dimension_numbers<[1], [0], [0], [1], [0, 0, 1, 1], [], []>} : vector<2x16xf32>, vector<16x16xf32>, vector<2x16xf32> -> vector<2x16xf32>
    %c1_71 = arith.constant 1 : index
    %c0_72 = arith.constant 0 : index
    %c0_73 = arith.constant 0 : index
    %91 = vector.load %arg4[%c1_71, %c0_72, %c0_73] : memref<4x1x16xf32, #tpu.memory_space<vmem>>, vector<1x1x16xf32>
    %92 = vector.shape_cast %91 : vector<1x1x16xf32> to vector<1x16xf32>
    %93 = vector.broadcast %92 : vector<1x16xf32> to vector<2x16xf32>
    %94 = arith.addf %90, %93 : vector<2x16xf32>
    %95 = vector.extract_strided_slice %28 {offsets = [4, 0], sizes = [2, 16], strides = [1, 1]} : vector<6x16xf32> to vector<2x16xf32>
    %96 = arith.addf %95, %84 : vector<2x16xf32>
    %97 = arith.negf %96 : vector<2x16xf32>
    %98 = math.exp %97 : vector<2x16xf32>
    %cst_74 = arith.constant 1.000000e+00 : f32
    %99 = vector.broadcast %cst_74 : f32 to vector<2x16xf32>
    %100 = arith.addf %99, %98 : vector<2x16xf32>
    %101 = arith.divf %99, %100 : vector<2x16xf32>
    %102 = vector.extract_strided_slice %35 {offsets = [4, 0], sizes = [2, 16], strides = [1, 1]} : vector<6x16xf32> to vector<2x16xf32>
    %103 = arith.addf %102, %87 : vector<2x16xf32>
    %104 = arith.negf %103 : vector<2x16xf32>
    %105 = math.exp %104 : vector<2x16xf32>
    %cst_75 = arith.constant 1.000000e+00 : f32
    %106 = vector.broadcast %cst_75 : f32 to vector<2x16xf32>
    %107 = arith.addf %106, %105 : vector<2x16xf32>
    %108 = arith.divf %106, %107 : vector<2x16xf32>
    %109 = vector.extract_strided_slice %42 {offsets = [4, 0], sizes = [2, 16], strides = [1, 1]} : vector<6x16xf32> to vector<2x16xf32>
    %110 = arith.mulf %101, %94 : vector<2x16xf32>
    %111 = arith.addf %109, %110 : vector<2x16xf32>
    %112 = math.tanh %111 : vector<2x16xf32>
    %cst_76 = arith.constant 1.000000e+00 : f32
    %113 = vector.broadcast %cst_76 : f32 to vector<2x16xf32>
    %114 = arith.subf %113, %108 : vector<2x16xf32>
    %115 = arith.mulf %114, %112 : vector<2x16xf32>
    %116 = arith.mulf %108, %44 : vector<2x16xf32>
    %117 = arith.addf %115, %116 : vector<2x16xf32>
    %c4_77 = arith.constant 4 : index
    %c0_78 = arith.constant 0 : index
    %118 = vector.load %arg7[%c4_77, %c0_78] : memref<6x16xf32, #tpu.memory_space<vmem>>, vector<2x16xf32>
    tpu.vector_store %arg7[%c4_77, %c0_78], %117 {strides = array<i32>} : memref<6x16xf32, #tpu.memory_space<vmem>>, vector<2x16xf32>,
    %c0_79 = arith.constant 0 : index
    %c0_80 = arith.constant 0 : index
    %c0_81 = arith.constant 0 : index
    %119 = vector.load %arg2[%c0_79, %c0_80, %c0_81] : memref<12x16x16xf32, #tpu.memory_space<vmem>>, vector<1x16x16xf32>
    %120 = vector.shape_cast %119 : vector<1x16x16xf32> to vector<16x16xf32>
    %cst_82 = arith.constant dense<0.000000e+00> : vector<2x16xf32>
    %121 = tpu.matmul %80, %120, %cst_82 {dimension_numbers = #tpu.dot_dimension_numbers<[1], [0], [0], [1], [0, 0, 1, 1], [], []>} : vector<2x16xf32>, vector<16x16xf32>, vector<2x16xf32> -> vector<2x16xf32>
    %c1_83 = arith.constant 1 : index
    %c0_84 = arith.constant 0 : index
    %c0_85 = arith.constant 0 : index
    %122 = vector.load %arg2[%c1_83, %c0_84, %c0_85] : memref<12x16x16xf32, #tpu.memory_space<vmem>>, vector<1x16x16xf32>
    %123 = vector.shape_cast %122 : vector<1x16x16xf32> to vector<16x16xf32>
    %cst_86 = arith.constant dense<0.000000e+00> : vector<2x16xf32>
    %124 = tpu.matmul %80, %123, %cst_86 {dimension_numbers = #tpu.dot_dimension_numbers<[1], [0], [0], [1], [0, 0, 1, 1], [], []>} : vector<2x16xf32>, vector<16x16xf32>, vector<2x16xf32> -> vector<2x16xf32>
    %c2_87 = arith.constant 2 : index
    %c0_88 = arith.constant 0 : index
    %c0_89 = arith.constant 0 : index
    %125 = vector.load %arg2[%c2_87, %c0_88, %c0_89] : memref<12x16x16xf32, #tpu.memory_space<vmem>>, vector<1x16x16xf32>
    %126 = vector.shape_cast %125 : vector<1x16x16xf32> to vector<16x16xf32>
    %cst_90 = arith.constant dense<0.000000e+00> : vector<2x16xf32>
    %127 = tpu.matmul %80, %126, %cst_90 {dimension_numbers = #tpu.dot_dimension_numbers<[1], [0], [0], [1], [0, 0, 1, 1], [], []>} : vector<2x16xf32>, vector<16x16xf32>, vector<2x16xf32> -> vector<2x16xf32>
    %c0_91 = arith.constant 0 : index
    %c0_92 = arith.constant 0 : index
    %c0_93 = arith.constant 0 : index
    %128 = vector.load %arg4[%c0_91, %c0_92, %c0_93] : memref<4x1x16xf32, #tpu.memory_space<vmem>>, vector<1x1x16xf32>
    %129 = vector.shape_cast %128 : vector<1x1x16xf32> to vector<1x16xf32>
    %130 = vector.broadcast %129 : vector<1x16xf32> to vector<2x16xf32>
    %131 = arith.addf %127, %130 : vector<2x16xf32>
    %132 = vector.extract_strided_slice %7 {offsets = [2, 0], sizes = [2, 16], strides = [1, 1]} : vector<6x16xf32> to vector<2x16xf32>
    %133 = arith.addf %132, %121 : vector<2x16xf32>
    %134 = arith.negf %133 : vector<2x16xf32>
    %135 = math.exp %134 : vector<2x16xf32>
    %cst_94 = arith.constant 1.000000e+00 : f32
    %136 = vector.broadcast %cst_94 : f32 to vector<2x16xf32>
    %137 = arith.addf %136, %135 : vector<2x16xf32>
    %138 = arith.divf %136, %137 : vector<2x16xf32>
    %139 = vector.extract_strided_slice %14 {offsets = [2, 0], sizes = [2, 16], strides = [1, 1]} : vector<6x16xf32> to vector<2x16xf32>
    %140 = arith.addf %139, %124 : vector<2x16xf32>
    %141 = arith.negf %140 : vector<2x16xf32>
    %142 = math.exp %141 : vector<2x16xf32>
    %cst_95 = arith.constant 1.000000e+00 : f32
    %143 = vector.broadcast %cst_95 : f32 to vector<2x16xf32>
    %144 = arith.addf %143, %142 : vector<2x16xf32>
    %145 = arith.divf %143, %144 : vector<2x16xf32>
    %146 = vector.extract_strided_slice %21 {offsets = [2, 0], sizes = [2, 16], strides = [1, 1]} : vector<6x16xf32> to vector<2x16xf32>
    %147 = arith.mulf %138, %131 : vector<2x16xf32>
    %148 = arith.addf %146, %147 : vector<2x16xf32>
    %149 = math.tanh %148 : vector<2x16xf32>
    %cst_96 = arith.constant 1.000000e+00 : f32
    %150 = vector.broadcast %cst_96 : f32 to vector<2x16xf32>
    %151 = arith.subf %150, %145 : vector<2x16xf32>
    %152 = arith.mulf %151, %149 : vector<2x16xf32>
    %153 = arith.mulf %145, %80 : vector<2x16xf32>
    %154 = arith.addf %152, %153 : vector<2x16xf32>
    %c2_97 = arith.constant 2 : index
    %c0_98 = arith.constant 0 : index
    %155 = vector.load %arg6[%c2_97, %c0_98] : memref<6x16xf32, #tpu.memory_space<vmem>>, vector<2x16xf32>
    tpu.vector_store %arg6[%c2_97, %c0_98], %154 {strides = array<i32>} : memref<6x16xf32, #tpu.memory_space<vmem>>, vector<2x16xf32>,
    %c3_99 = arith.constant 3 : index
    %c0_100 = arith.constant 0 : index
    %c0_101 = arith.constant 0 : index
    %156 = vector.load %arg2[%c3_99, %c0_100, %c0_101] : memref<12x16x16xf32, #tpu.memory_space<vmem>>, vector<1x16x16xf32>
    %157 = vector.shape_cast %156 : vector<1x16x16xf32> to vector<16x16xf32>
    %cst_102 = arith.constant dense<0.000000e+00> : vector<2x16xf32>
    %158 = tpu.matmul %117, %157, %cst_102 {dimension_numbers = #tpu.dot_dimension_numbers<[1], [0], [0], [1], [0, 0, 1, 1], [], []>} : vector<2x16xf32>, vector<16x16xf32>, vector<2x16xf32> -> vector<2x16xf32>
    %c4_103 = arith.constant 4 : index
    %c0_104 = arith.constant 0 : index
    %c0_105 = arith.constant 0 : index
    %159 = vector.load %arg2[%c4_103, %c0_104, %c0_105] : memref<12x16x16xf32, #tpu.memory_space<vmem>>, vector<1x16x16xf32>
    %160 = vector.shape_cast %159 : vector<1x16x16xf32> to vector<16x16xf32>
    %cst_106 = arith.constant dense<0.000000e+00> : vector<2x16xf32>
    %161 = tpu.matmul %117, %160, %cst_106 {dimension_numbers = #tpu.dot_dimension_numbers<[1], [0], [0], [1], [0, 0, 1, 1], [], []>} : vector<2x16xf32>, vector<16x16xf32>, vector<2x16xf32> -> vector<2x16xf32>
    %c5_107 = arith.constant 5 : index
    %c0_108 = arith.constant 0 : index
    %c0_109 = arith.constant 0 : index
    %162 = vector.load %arg2[%c5_107, %c0_108, %c0_109] : memref<12x16x16xf32, #tpu.memory_space<vmem>>, vector<1x16x16xf32>
    %163 = vector.shape_cast %162 : vector<1x16x16xf32> to vector<16x16xf32>
    %cst_110 = arith.constant dense<0.000000e+00> : vector<2x16xf32>
    %164 = tpu.matmul %117, %163, %cst_110 {dimension_numbers = #tpu.dot_dimension_numbers<[1], [0], [0], [1], [0, 0, 1, 1], [], []>} : vector<2x16xf32>, vector<16x16xf32>, vector<2x16xf32> -> vector<2x16xf32>
    %c1_111 = arith.constant 1 : index
    %c0_112 = arith.constant 0 : index
    %c0_113 = arith.constant 0 : index
    %165 = vector.load %arg4[%c1_111, %c0_112, %c0_113] : memref<4x1x16xf32, #tpu.memory_space<vmem>>, vector<1x1x16xf32>
    %166 = vector.shape_cast %165 : vector<1x1x16xf32> to vector<1x16xf32>
    %167 = vector.broadcast %166 : vector<1x16xf32> to vector<2x16xf32>
    %168 = arith.addf %164, %167 : vector<2x16xf32>
    %169 = vector.extract_strided_slice %28 {offsets = [2, 0], sizes = [2, 16], strides = [1, 1]} : vector<6x16xf32> to vector<2x16xf32>
    %170 = arith.addf %169, %158 : vector<2x16xf32>
    %171 = arith.negf %170 : vector<2x16xf32>
    %172 = math.exp %171 : vector<2x16xf32>
    %cst_114 = arith.constant 1.000000e+00 : f32
    %173 = vector.broadcast %cst_114 : f32 to vector<2x16xf32>
    %174 = arith.addf %173, %172 : vector<2x16xf32>
    %175 = arith.divf %173, %174 : vector<2x16xf32>
    %176 = vector.extract_strided_slice %35 {offsets = [2, 0], sizes = [2, 16], strides = [1, 1]} : vector<6x16xf32> to vector<2x16xf32>
    %177 = arith.addf %176, %161 : vector<2x16xf32>
    %178 = arith.negf %177 : vector<2x16xf32>
    %179 = math.exp %178 : vector<2x16xf32>
    %cst_115 = arith.constant 1.000000e+00 : f32
    %180 = vector.broadcast %cst_115 : f32 to vector<2x16xf32>
    %181 = arith.addf %180, %179 : vector<2x16xf32>
    %182 = arith.divf %180, %181 : vector<2x16xf32>
    %183 = vector.extract_strided_slice %42 {offsets = [2, 0], sizes = [2, 16], strides = [1, 1]} : vector<6x16xf32> to vector<2x16xf32>
    %184 = arith.mulf %175, %168 : vector<2x16xf32>
    %185 = arith.addf %183, %184 : vector<2x16xf32>
    %186 = math.tanh %185 : vector<2x16xf32>
    %cst_116 = arith.constant 1.000000e+00 : f32
    %187 = vector.broadcast %cst_116 : f32 to vector<2x16xf32>
    %188 = arith.subf %187, %182 : vector<2x16xf32>
    %189 = arith.mulf %188, %186 : vector<2x16xf32>
    %190 = arith.mulf %182, %117 : vector<2x16xf32>
    %191 = arith.addf %189, %190 : vector<2x16xf32>
    %c2_117 = arith.constant 2 : index
    %c0_118 = arith.constant 0 : index
    %192 = vector.load %arg7[%c2_117, %c0_118] : memref<6x16xf32, #tpu.memory_space<vmem>>, vector<2x16xf32>
    tpu.vector_store %arg7[%c2_117, %c0_118], %191 {strides = array<i32>} : memref<6x16xf32, #tpu.memory_space<vmem>>, vector<2x16xf32>,
    %c0_119 = arith.constant 0 : index
    %c0_120 = arith.constant 0 : index
    %c0_121 = arith.constant 0 : index
    %193 = vector.load %arg2[%c0_119, %c0_120, %c0_121] : memref<12x16x16xf32, #tpu.memory_space<vmem>>, vector<1x16x16xf32>
    %194 = vector.shape_cast %193 : vector<1x16x16xf32> to vector<16x16xf32>
    %cst_122 = arith.constant dense<0.000000e+00> : vector<2x16xf32>
    %195 = tpu.matmul %154, %194, %cst_122 {dimension_numbers = #tpu.dot_dimension_numbers<[1], [0], [0], [1], [0, 0, 1, 1], [], []>} : vector<2x16xf32>, vector<16x16xf32>, vector<2x16xf32> -> vector<2x16xf32>
    %c1_123 = arith.constant 1 : index
    %c0_124 = arith.constant 0 : index
    %c0_125 = arith.constant 0 : index
    %196 = vector.load %arg2[%c1_123, %c0_124, %c0_125] : memref<12x16x16xf32, #tpu.memory_space<vmem>>, vector<1x16x16xf32>
    %197 = vector.shape_cast %196 : vector<1x16x16xf32> to vector<16x16xf32>
    %cst_126 = arith.constant dense<0.000000e+00> : vector<2x16xf32>
    %198 = tpu.matmul %154, %197, %cst_126 {dimension_numbers = #tpu.dot_dimension_numbers<[1], [0], [0], [1], [0, 0, 1, 1], [], []>} : vector<2x16xf32>, vector<16x16xf32>, vector<2x16xf32> -> vector<2x16xf32>
    %c2_127 = arith.constant 2 : index
    %c0_128 = arith.constant 0 : index
    %c0_129 = arith.constant 0 : index
    %199 = vector.load %arg2[%c2_127, %c0_128, %c0_129] : memref<12x16x16xf32, #tpu.memory_space<vmem>>, vector<1x16x16xf32>
    %200 = vector.shape_cast %199 : vector<1x16x16xf32> to vector<16x16xf32>
    %cst_130 = arith.constant dense<0.000000e+00> : vector<2x16xf32>
    %201 = tpu.matmul %154, %200, %cst_130 {dimension_numbers = #tpu.dot_dimension_numbers<[1], [0], [0], [1], [0, 0, 1, 1], [], []>} : vector<2x16xf32>, vector<16x16xf32>, vector<2x16xf32> -> vector<2x16xf32>
    %c0_131 = arith.constant 0 : index
    %c0_132 = arith.constant 0 : index
    %c0_133 = arith.constant 0 : index
    %202 = vector.load %arg4[%c0_131, %c0_132, %c0_133] : memref<4x1x16xf32, #tpu.memory_space<vmem>>, vector<1x1x16xf32>
    %203 = vector.shape_cast %202 : vector<1x1x16xf32> to vector<1x16xf32>
    %204 = vector.broadcast %203 : vector<1x16xf32> to vector<2x16xf32>
    %205 = arith.addf %201, %204 : vector<2x16xf32>
    %206 = vector.extract_strided_slice %7 {offsets = [4, 0], sizes = [2, 16], strides = [1, 1]} : vector<6x16xf32> to vector<2x16xf32>
    %207 = arith.addf %206, %195 : vector<2x16xf32>
    %208 = arith.negf %207 : vector<2x16xf32>
    %209 = math.exp %208 : vector<2x16xf32>
    %cst_134 = arith.constant 1.000000e+00 : f32
    %210 = vector.broadcast %cst_134 : f32 to vector<2x16xf32>
    %211 = arith.addf %210, %209 : vector<2x16xf32>
    %212 = arith.divf %210, %211 : vector<2x16xf32>
    %213 = vector.extract_strided_slice %14 {offsets = [4, 0], sizes = [2, 16], strides = [1, 1]} : vector<6x16xf32> to vector<2x16xf32>
    %214 = arith.addf %213, %198 : vector<2x16xf32>
    %215 = arith.negf %214 : vector<2x16xf32>
    %216 = math.exp %215 : vector<2x16xf32>
    %cst_135 = arith.constant 1.000000e+00 : f32
    %217 = vector.broadcast %cst_135 : f32 to vector<2x16xf32>
    %218 = arith.addf %217, %216 : vector<2x16xf32>
    %219 = arith.divf %217, %218 : vector<2x16xf32>
    %220 = vector.extract_strided_slice %21 {offsets = [4, 0], sizes = [2, 16], strides = [1, 1]} : vector<6x16xf32> to vector<2x16xf32>
    %221 = arith.mulf %212, %205 : vector<2x16xf32>
    %222 = arith.addf %220, %221 : vector<2x16xf32>
    %223 = math.tanh %222 : vector<2x16xf32>
    %cst_136 = arith.constant 1.000000e+00 : f32
    %224 = vector.broadcast %cst_136 : f32 to vector<2x16xf32>
    %225 = arith.subf %224, %219 : vector<2x16xf32>
    %226 = arith.mulf %225, %223 : vector<2x16xf32>
    %227 = arith.mulf %219, %154 : vector<2x16xf32>
    %228 = arith.addf %226, %227 : vector<2x16xf32>
    %c4_137 = arith.constant 4 : index
    %c0_138 = arith.constant 0 : index
    %229 = vector.load %arg6[%c4_137, %c0_138] : memref<6x16xf32, #tpu.memory_space<vmem>>, vector<2x16xf32>
    tpu.vector_store %arg6[%c4_137, %c0_138], %228 {strides = array<i32>} : memref<6x16xf32, #tpu.memory_space<vmem>>, vector<2x16xf32>,
    %c3_139 = arith.constant 3 : index
    %c0_140 = arith.constant 0 : index
    %c0_141 = arith.constant 0 : index
    %230 = vector.load %arg2[%c3_139, %c0_140, %c0_141] : memref<12x16x16xf32, #tpu.memory_space<vmem>>, vector<1x16x16xf32>
    %231 = vector.shape_cast %230 : vector<1x16x16xf32> to vector<16x16xf32>
    %cst_142 = arith.constant dense<0.000000e+00> : vector<2x16xf32>
    %232 = tpu.matmul %191, %231, %cst_142 {dimension_numbers = #tpu.dot_dimension_numbers<[1], [0], [0], [1], [0, 0, 1, 1], [], []>} : vector<2x16xf32>, vector<16x16xf32>, vector<2x16xf32> -> vector<2x16xf32>
    %c4_143 = arith.constant 4 : index
    %c0_144 = arith.constant 0 : index
    %c0_145 = arith.constant 0 : index
    %233 = vector.load %arg2[%c4_143, %c0_144, %c0_145] : memref<12x16x16xf32, #tpu.memory_space<vmem>>, vector<1x16x16xf32>
    %234 = vector.shape_cast %233 : vector<1x16x16xf32> to vector<16x16xf32>
    %cst_146 = arith.constant dense<0.000000e+00> : vector<2x16xf32>
    %235 = tpu.matmul %191, %234, %cst_146 {dimension_numbers = #tpu.dot_dimension_numbers<[1], [0], [0], [1], [0, 0, 1, 1], [], []>} : vector<2x16xf32>, vector<16x16xf32>, vector<2x16xf32> -> vector<2x16xf32>
    %c5_147 = arith.constant 5 : index
    %c0_148 = arith.constant 0 : index
    %c0_149 = arith.constant 0 : index
    %236 = vector.load %arg2[%c5_147, %c0_148, %c0_149] : memref<12x16x16xf32, #tpu.memory_space<vmem>>, vector<1x16x16xf32>
    %237 = vector.shape_cast %236 : vector<1x16x16xf32> to vector<16x16xf32>
    %cst_150 = arith.constant dense<0.000000e+00> : vector<2x16xf32>
    %238 = tpu.matmul %191, %237, %cst_150 {dimension_numbers = #tpu.dot_dimension_numbers<[1], [0], [0], [1], [0, 0, 1, 1], [], []>} : vector<2x16xf32>, vector<16x16xf32>, vector<2x16xf32> -> vector<2x16xf32>
    %c1_151 = arith.constant 1 : index
    %c0_152 = arith.constant 0 : index
    %c0_153 = arith.constant 0 : index
    %239 = vector.load %arg4[%c1_151, %c0_152, %c0_153] : memref<4x1x16xf32, #tpu.memory_space<vmem>>, vector<1x1x16xf32>
    %240 = vector.shape_cast %239 : vector<1x1x16xf32> to vector<1x16xf32>
    %241 = vector.broadcast %240 : vector<1x16xf32> to vector<2x16xf32>
    %242 = arith.addf %238, %241 : vector<2x16xf32>
    %243 = vector.extract_strided_slice %28 {offsets = [0, 0], sizes = [2, 16], strides = [1, 1]} : vector<6x16xf32> to vector<2x16xf32>
    %244 = arith.addf %243, %232 : vector<2x16xf32>
    %245 = arith.negf %244 : vector<2x16xf32>
    %246 = math.exp %245 : vector<2x16xf32>
    %cst_154 = arith.constant 1.000000e+00 : f32
    %247 = vector.broadcast %cst_154 : f32 to vector<2x16xf32>
    %248 = arith.addf %247, %246 : vector<2x16xf32>
    %249 = arith.divf %247, %248 : vector<2x16xf32>
    %250 = vector.extract_strided_slice %35 {offsets = [0, 0], sizes = [2, 16], strides = [1, 1]} : vector<6x16xf32> to vector<2x16xf32>
    %251 = arith.addf %250, %235 : vector<2x16xf32>
    %252 = arith.negf %251 : vector<2x16xf32>
    %253 = math.exp %252 : vector<2x16xf32>
    %cst_155 = arith.constant 1.000000e+00 : f32
    %254 = vector.broadcast %cst_155 : f32 to vector<2x16xf32>
    %255 = arith.addf %254, %253 : vector<2x16xf32>
    %256 = arith.divf %254, %255 : vector<2x16xf32>
    %257 = vector.extract_strided_slice %42 {offsets = [0, 0], sizes = [2, 16], strides = [1, 1]} : vector<6x16xf32> to vector<2x16xf32>
    %258 = arith.mulf %249, %242 : vector<2x16xf32>
    %259 = arith.addf %257, %258 : vector<2x16xf32>
    %260 = math.tanh %259 : vector<2x16xf32>
    %cst_156 = arith.constant 1.000000e+00 : f32
    %261 = vector.broadcast %cst_156 : f32 to vector<2x16xf32>
    %262 = arith.subf %261, %256 : vector<2x16xf32>
    %263 = arith.mulf %262, %260 : vector<2x16xf32>
    %264 = arith.mulf %256, %191 : vector<2x16xf32>
    %265 = arith.addf %263, %264 : vector<2x16xf32>
    %c0_157 = arith.constant 0 : index
    %c0_158 = arith.constant 0 : index
    %266 = vector.load %arg7[%c0_157, %c0_158] : memref<6x16xf32, #tpu.memory_space<vmem>>, vector<2x16xf32>
    tpu.vector_store %arg7[%c0_157, %c0_158], %265 {strides = array<i32>} : memref<6x16xf32, #tpu.memory_space<vmem>>, vector<2x16xf32>,
    %c0_159 = arith.constant 0 : index
    %c0_160 = arith.constant 0 : index
    %267 = vector.load %arg6[%c0_159, %c0_160] : memref<6x16xf32, #tpu.memory_space<vmem>>, vector<6x16xf32>
    %c0_161 = arith.constant 0 : index
    %c0_162 = arith.constant 0 : index
    %268 = vector.load %arg7[%c0_161, %c0_162] : memref<6x16xf32, #tpu.memory_space<vmem>>, vector<6x16xf32>
    %269 = tpu.concatenate %267, %268 in 1 : vector<6x16xf32>, vector<6x16xf32> -> vector<6x32xf32>
    %c6 = arith.constant 6 : index
    %c0_163 = arith.constant 0 : index
    %c0_164 = arith.constant 0 : index
    %270 = vector.load %arg1[%c6, %c0_163, %c0_164] : memref<12x32x16xf32, #tpu.memory_space<vmem>>, vector<1x32x16xf32>
    %271 = vector.shape_cast %270 : vector<1x32x16xf32> to vector<32x16xf32>
    %cst_165 = arith.constant dense<0.000000e+00> : vector<6x16xf32>
    %272 = tpu.matmul %269, %271, %cst_165 {dimension_numbers = #tpu.dot_dimension_numbers<[1], [0], [0], [1], [0, 0, 1, 1], [], []>} : vector<6x32xf32>, vector<32x16xf32>, vector<6x16xf32> -> vector<6x16xf32>
    %c6_166 = arith.constant 6 : index
    %c0_167 = arith.constant 0 : index
    %c0_168 = arith.constant 0 : index
    %273 = vector.load %arg3[%c6_166, %c0_167, %c0_168] : memref<12x1x16xf32, #tpu.memory_space<vmem>>, vector<1x1x16xf32>
    %274 = vector.shape_cast %273 : vector<1x1x16xf32> to vector<1x16xf32>
    %275 = vector.broadcast %274 : vector<1x16xf32> to vector<6x16xf32>
    %276 = arith.addf %272, %275 : vector<6x16xf32>
    %c7 = arith.constant 7 : index
    %c0_169 = arith.constant 0 : index
    %c0_170 = arith.constant 0 : index
    %277 = vector.load %arg1[%c7, %c0_169, %c0_170] : memref<12x32x16xf32, #tpu.memory_space<vmem>>, vector<1x32x16xf32>
    %278 = vector.shape_cast %277 : vector<1x32x16xf32> to vector<32x16xf32>
    %cst_171 = arith.constant dense<0.000000e+00> : vector<6x16xf32>
    %279 = tpu.matmul %269, %278, %cst_171 {dimension_numbers = #tpu.dot_dimension_numbers<[1], [0], [0], [1], [0, 0, 1, 1], [], []>} : vector<6x32xf32>, vector<32x16xf32>, vector<6x16xf32> -> vector<6x16xf32>
    %c7_172 = arith.constant 7 : index
    %c0_173 = arith.constant 0 : index
    %c0_174 = arith.constant 0 : index
    %280 = vector.load %arg3[%c7_172, %c0_173, %c0_174] : memref<12x1x16xf32, #tpu.memory_space<vmem>>, vector<1x1x16xf32>
    %281 = vector.shape_cast %280 : vector<1x1x16xf32> to vector<1x16xf32>
    %282 = vector.broadcast %281 : vector<1x16xf32> to vector<6x16xf32>
    %283 = arith.addf %279, %282 : vector<6x16xf32>
    %c8 = arith.constant 8 : index
    %c0_175 = arith.constant 0 : index
    %c0_176 = arith.constant 0 : index
    %284 = vector.load %arg1[%c8, %c0_175, %c0_176] : memref<12x32x16xf32, #tpu.memory_space<vmem>>, vector<1x32x16xf32>
    %285 = vector.shape_cast %284 : vector<1x32x16xf32> to vector<32x16xf32>
    %cst_177 = arith.constant dense<0.000000e+00> : vector<6x16xf32>
    %286 = tpu.matmul %269, %285, %cst_177 {dimension_numbers = #tpu.dot_dimension_numbers<[1], [0], [0], [1], [0, 0, 1, 1], [], []>} : vector<6x32xf32>, vector<32x16xf32>, vector<6x16xf32> -> vector<6x16xf32>
    %c8_178 = arith.constant 8 : index
    %c0_179 = arith.constant 0 : index
    %c0_180 = arith.constant 0 : index
    %287 = vector.load %arg3[%c8_178, %c0_179, %c0_180] : memref<12x1x16xf32, #tpu.memory_space<vmem>>, vector<1x1x16xf32>
    %288 = vector.shape_cast %287 : vector<1x1x16xf32> to vector<1x16xf32>
    %289 = vector.broadcast %288 : vector<1x16xf32> to vector<6x16xf32>
    %290 = arith.addf %286, %289 : vector<6x16xf32>
    %c9 = arith.constant 9 : index
    %c0_181 = arith.constant 0 : index
    %c0_182 = arith.constant 0 : index
    %291 = vector.load %arg1[%c9, %c0_181, %c0_182] : memref<12x32x16xf32, #tpu.memory_space<vmem>>, vector<1x32x16xf32>
    %292 = vector.shape_cast %291 : vector<1x32x16xf32> to vector<32x16xf32>
    %cst_183 = arith.constant dense<0.000000e+00> : vector<6x16xf32>
    %293 = tpu.matmul %269, %292, %cst_183 {dimension_numbers = #tpu.dot_dimension_numbers<[1], [0], [0], [1], [0, 0, 1, 1], [], []>} : vector<6x32xf32>, vector<32x16xf32>, vector<6x16xf32> -> vector<6x16xf32>
    %c9_184 = arith.constant 9 : index
    %c0_185 = arith.constant 0 : index
    %c0_186 = arith.constant 0 : index
    %294 = vector.load %arg3[%c9_184, %c0_185, %c0_186] : memref<12x1x16xf32, #tpu.memory_space<vmem>>, vector<1x1x16xf32>
    %295 = vector.shape_cast %294 : vector<1x1x16xf32> to vector<1x16xf32>
    %296 = vector.broadcast %295 : vector<1x16xf32> to vector<6x16xf32>
    %297 = arith.addf %293, %296 : vector<6x16xf32>
    %c10 = arith.constant 10 : index
    %c0_187 = arith.constant 0 : index
    %c0_188 = arith.constant 0 : index
    %298 = vector.load %arg1[%c10, %c0_187, %c0_188] : memref<12x32x16xf32, #tpu.memory_space<vmem>>, vector<1x32x16xf32>
    %299 = vector.shape_cast %298 : vector<1x32x16xf32> to vector<32x16xf32>
    %cst_189 = arith.constant dense<0.000000e+00> : vector<6x16xf32>
    %300 = tpu.matmul %269, %299, %cst_189 {dimension_numbers = #tpu.dot_dimension_numbers<[1], [0], [0], [1], [0, 0, 1, 1], [], []>} : vector<6x32xf32>, vector<32x16xf32>, vector<6x16xf32> -> vector<6x16xf32>
    %c10_190 = arith.constant 10 : index
    %c0_191 = arith.constant 0 : index
    %c0_192 = arith.constant 0 : index
    %301 = vector.load %arg3[%c10_190, %c0_191, %c0_192] : memref<12x1x16xf32, #tpu.memory_space<vmem>>, vector<1x1x16xf32>
    %302 = vector.shape_cast %301 : vector<1x1x16xf32> to vector<1x16xf32>
    %303 = vector.broadcast %302 : vector<1x16xf32> to vector<6x16xf32>
    %304 = arith.addf %300, %303 : vector<6x16xf32>
    %c11 = arith.constant 11 : index
    %c0_193 = arith.constant 0 : index
    %c0_194 = arith.constant 0 : index
    %305 = vector.load %arg1[%c11, %c0_193, %c0_194] : memref<12x32x16xf32, #tpu.memory_space<vmem>>, vector<1x32x16xf32>
    %306 = vector.shape_cast %305 : vector<1x32x16xf32> to vector<32x16xf32>
    %cst_195 = arith.constant dense<0.000000e+00> : vector<6x16xf32>
    %307 = tpu.matmul %269, %306, %cst_195 {dimension_numbers = #tpu.dot_dimension_numbers<[1], [0], [0], [1], [0, 0, 1, 1], [], []>} : vector<6x32xf32>, vector<32x16xf32>, vector<6x16xf32> -> vector<6x16xf32>
    %c11_196 = arith.constant 11 : index
    %c0_197 = arith.constant 0 : index
    %c0_198 = arith.constant 0 : index
    %308 = vector.load %arg3[%c11_196, %c0_197, %c0_198] : memref<12x1x16xf32, #tpu.memory_space<vmem>>, vector<1x1x16xf32>
    %309 = vector.shape_cast %308 : vector<1x1x16xf32> to vector<1x16xf32>
    %310 = vector.broadcast %309 : vector<1x16xf32> to vector<6x16xf32>
    %311 = arith.addf %307, %310 : vector<6x16xf32>
    %cst_199 = arith.constant 0.000000e+00 : f32
    %312 = vector.broadcast %cst_199 : f32 to vector<2x16xf32>
    %cst_200 = arith.constant 0.000000e+00 : f32
    %313 = vector.broadcast %cst_200 : f32 to vector<2x16xf32>
    %c6_201 = arith.constant 6 : index
    %c0_202 = arith.constant 0 : index
    %c0_203 = arith.constant 0 : index
    %314 = vector.load %arg2[%c6_201, %c0_202, %c0_203] : memref<12x16x16xf32, #tpu.memory_space<vmem>>, vector<1x16x16xf32>
    %315 = vector.shape_cast %314 : vector<1x16x16xf32> to vector<16x16xf32>
    %cst_204 = arith.constant dense<0.000000e+00> : vector<2x16xf32>
    %316 = tpu.matmul %312, %315, %cst_204 {dimension_numbers = #tpu.dot_dimension_numbers<[1], [0], [0], [1], [0, 0, 1, 1], [], []>} : vector<2x16xf32>, vector<16x16xf32>, vector<2x16xf32> -> vector<2x16xf32>
    %c7_205 = arith.constant 7 : index
    %c0_206 = arith.constant 0 : index
    %c0_207 = arith.constant 0 : index
    %317 = vector.load %arg2[%c7_205, %c0_206, %c0_207] : memref<12x16x16xf32, #tpu.memory_space<vmem>>, vector<1x16x16xf32>
    %318 = vector.shape_cast %317 : vector<1x16x16xf32> to vector<16x16xf32>
    %cst_208 = arith.constant dense<0.000000e+00> : vector<2x16xf32>
    %319 = tpu.matmul %312, %318, %cst_208 {dimension_numbers = #tpu.dot_dimension_numbers<[1], [0], [0], [1], [0, 0, 1, 1], [], []>} : vector<2x16xf32>, vector<16x16xf32>, vector<2x16xf32> -> vector<2x16xf32>
    %c8_209 = arith.constant 8 : index
    %c0_210 = arith.constant 0 : index
    %c0_211 = arith.constant 0 : index
    %320 = vector.load %arg2[%c8_209, %c0_210, %c0_211] : memref<12x16x16xf32, #tpu.memory_space<vmem>>, vector<1x16x16xf32>
    %321 = vector.shape_cast %320 : vector<1x16x16xf32> to vector<16x16xf32>
    %cst_212 = arith.constant dense<0.000000e+00> : vector<2x16xf32>
    %322 = tpu.matmul %312, %321, %cst_212 {dimension_numbers = #tpu.dot_dimension_numbers<[1], [0], [0], [1], [0, 0, 1, 1], [], []>} : vector<2x16xf32>, vector<16x16xf32>, vector<2x16xf32> -> vector<2x16xf32>
    %c2_213 = arith.constant 2 : index
    %c0_214 = arith.constant 0 : index
    %c0_215 = arith.constant 0 : index
    %323 = vector.load %arg4[%c2_213, %c0_214, %c0_215] : memref<4x1x16xf32, #tpu.memory_space<vmem>>, vector<1x1x16xf32>
    %324 = vector.shape_cast %323 : vector<1x1x16xf32> to vector<1x16xf32>
    %325 = vector.broadcast %324 : vector<1x16xf32> to vector<2x16xf32>
    %326 = arith.addf %322, %325 : vector<2x16xf32>
    %327 = vector.extract_strided_slice %276 {offsets = [0, 0], sizes = [2, 16], strides = [1, 1]} : vector<6x16xf32> to vector<2x16xf32>
    %328 = arith.addf %327, %316 : vector<2x16xf32>
    %329 = arith.negf %328 : vector<2x16xf32>
    %330 = math.exp %329 : vector<2x16xf32>
    %cst_216 = arith.constant 1.000000e+00 : f32
    %331 = vector.broadcast %cst_216 : f32 to vector<2x16xf32>
    %332 = arith.addf %331, %330 : vector<2x16xf32>
    %333 = arith.divf %331, %332 : vector<2x16xf32>
    %334 = vector.extract_strided_slice %283 {offsets = [0, 0], sizes = [2, 16], strides = [1, 1]} : vector<6x16xf32> to vector<2x16xf32>
    %335 = arith.addf %334, %319 : vector<2x16xf32>
    %336 = arith.negf %335 : vector<2x16xf32>
    %337 = math.exp %336 : vector<2x16xf32>
    %cst_217 = arith.constant 1.000000e+00 : f32
    %338 = vector.broadcast %cst_217 : f32 to vector<2x16xf32>
    %339 = arith.addf %338, %337 : vector<2x16xf32>
    %340 = arith.divf %338, %339 : vector<2x16xf32>
    %341 = vector.extract_strided_slice %290 {offsets = [0, 0], sizes = [2, 16], strides = [1, 1]} : vector<6x16xf32> to vector<2x16xf32>
    %342 = arith.mulf %333, %326 : vector<2x16xf32>
    %343 = arith.addf %341, %342 : vector<2x16xf32>
    %344 = math.tanh %343 : vector<2x16xf32>
    %cst_218 = arith.constant 1.000000e+00 : f32
    %345 = vector.broadcast %cst_218 : f32 to vector<2x16xf32>
    %346 = arith.subf %345, %340 : vector<2x16xf32>
    %347 = arith.mulf %346, %344 : vector<2x16xf32>
    %348 = arith.mulf %340, %312 : vector<2x16xf32>
    %349 = arith.addf %347, %348 : vector<2x16xf32>
    %c0_219 = arith.constant 0 : index
    %c0_220 = arith.constant 0 : index
    %350 = vector.load %arg6[%c0_219, %c0_220] : memref<6x16xf32, #tpu.memory_space<vmem>>, vector<2x16xf32>
    tpu.vector_store %arg6[%c0_219, %c0_220], %349 {strides = array<i32>} : memref<6x16xf32, #tpu.memory_space<vmem>>, vector<2x16xf32>,
    %c9_221 = arith.constant 9 : index
    %c0_222 = arith.constant 0 : index
    %c0_223 = arith.constant 0 : index
    %351 = vector.load %arg2[%c9_221, %c0_222, %c0_223] : memref<12x16x16xf32, #tpu.memory_space<vmem>>, vector<1x16x16xf32>
    %352 = vector.shape_cast %351 : vector<1x16x16xf32> to vector<16x16xf32>
    %cst_224 = arith.constant dense<0.000000e+00> : vector<2x16xf32>
    %353 = tpu.matmul %313, %352, %cst_224 {dimension_numbers = #tpu.dot_dimension_numbers<[1], [0], [0], [1], [0, 0, 1, 1], [], []>} : vector<2x16xf32>, vector<16x16xf32>, vector<2x16xf32> -> vector<2x16xf32>
    %c10_225 = arith.constant 10 : index
    %c0_226 = arith.constant 0 : index
    %c0_227 = arith.constant 0 : index
    %354 = vector.load %arg2[%c10_225, %c0_226, %c0_227] : memref<12x16x16xf32, #tpu.memory_space<vmem>>, vector<1x16x16xf32>
    %355 = vector.shape_cast %354 : vector<1x16x16xf32> to vector<16x16xf32>
    %cst_228 = arith.constant dense<0.000000e+00> : vector<2x16xf32>
    %356 = tpu.matmul %313, %355, %cst_228 {dimension_numbers = #tpu.dot_dimension_numbers<[1], [0], [0], [1], [0, 0, 1, 1], [], []>} : vector<2x16xf32>, vector<16x16xf32>, vector<2x16xf32> -> vector<2x16xf32>
    %c11_229 = arith.constant 11 : index
    %c0_230 = arith.constant 0 : index
    %c0_231 = arith.constant 0 : index
    %357 = vector.load %arg2[%c11_229, %c0_230, %c0_231] : memref<12x16x16xf32, #tpu.memory_space<vmem>>, vector<1x16x16xf32>
    %358 = vector.shape_cast %357 : vector<1x16x16xf32> to vector<16x16xf32>
    %cst_232 = arith.constant dense<0.000000e+00> : vector<2x16xf32>
    %359 = tpu.matmul %313, %358, %cst_232 {dimension_numbers = #tpu.dot_dimension_numbers<[1], [0], [0], [1], [0, 0, 1, 1], [], []>} : vector<2x16xf32>, vector<16x16xf32>, vector<2x16xf32> -> vector<2x16xf32>
    %c3_233 = arith.constant 3 : index
    %c0_234 = arith.constant 0 : index
    %c0_235 = arith.constant 0 : index
    %360 = vector.load %arg4[%c3_233, %c0_234, %c0_235] : memref<4x1x16xf32, #tpu.memory_space<vmem>>, vector<1x1x16xf32>
    %361 = vector.shape_cast %360 : vector<1x1x16xf32> to vector<1x16xf32>
    %362 = vector.broadcast %361 : vector<1x16xf32> to vector<2x16xf32>
    %363 = arith.addf %359, %362 : vector<2x16xf32>
    %364 = vector.extract_strided_slice %297 {offsets = [4, 0], sizes = [2, 16], strides = [1, 1]} : vector<6x16xf32> to vector<2x16xf32>
    %365 = arith.addf %364, %353 : vector<2x16xf32>
    %366 = arith.negf %365 : vector<2x16xf32>
    %367 = math.exp %366 : vector<2x16xf32>
    %cst_236 = arith.constant 1.000000e+00 : f32
    %368 = vector.broadcast %cst_236 : f32 to vector<2x16xf32>
    %369 = arith.addf %368, %367 : vector<2x16xf32>
    %370 = arith.divf %368, %369 : vector<2x16xf32>
    %371 = vector.extract_strided_slice %304 {offsets = [4, 0], sizes = [2, 16], strides = [1, 1]} : vector<6x16xf32> to vector<2x16xf32>
    %372 = arith.addf %371, %356 : vector<2x16xf32>
    %373 = arith.negf %372 : vector<2x16xf32>
    %374 = math.exp %373 : vector<2x16xf32>
    %cst_237 = arith.constant 1.000000e+00 : f32
    %375 = vector.broadcast %cst_237 : f32 to vector<2x16xf32>
    %376 = arith.addf %375, %374 : vector<2x16xf32>
    %377 = arith.divf %375, %376 : vector<2x16xf32>
    %378 = vector.extract_strided_slice %311 {offsets = [4, 0], sizes = [2, 16], strides = [1, 1]} : vector<6x16xf32> to vector<2x16xf32>
    %379 = arith.mulf %370, %363 : vector<2x16xf32>
    %380 = arith.addf %378, %379 : vector<2x16xf32>
    %381 = math.tanh %380 : vector<2x16xf32>
    %cst_238 = arith.constant 1.000000e+00 : f32
    %382 = vector.broadcast %cst_238 : f32 to vector<2x16xf32>
    %383 = arith.subf %382, %377 : vector<2x16xf32>
    %384 = arith.mulf %383, %381 : vector<2x16xf32>
    %385 = arith.mulf %377, %313 : vector<2x16xf32>
    %386 = arith.addf %384, %385 : vector<2x16xf32>
    %c4_239 = arith.constant 4 : index
    %c0_240 = arith.constant 0 : index
    %387 = vector.load %arg7[%c4_239, %c0_240] : memref<6x16xf32, #tpu.memory_space<vmem>>, vector<2x16xf32>
    tpu.vector_store %arg7[%c4_239, %c0_240], %386 {strides = array<i32>} : memref<6x16xf32, #tpu.memory_space<vmem>>, vector<2x16xf32>,
    %c6_241 = arith.constant 6 : index
    %c0_242 = arith.constant 0 : index
    %c0_243 = arith.constant 0 : index
    %388 = vector.load %arg2[%c6_241, %c0_242, %c0_243] : memref<12x16x16xf32, #tpu.memory_space<vmem>>, vector<1x16x16xf32>
    %389 = vector.shape_cast %388 : vector<1x16x16xf32> to vector<16x16xf32>
    %cst_244 = arith.constant dense<0.000000e+00> : vector<2x16xf32>
    %390 = tpu.matmul %349, %389, %cst_244 {dimension_numbers = #tpu.dot_dimension_numbers<[1], [0], [0], [1], [0, 0, 1, 1], [], []>} : vector<2x16xf32>, vector<16x16xf32>, vector<2x16xf32> -> vector<2x16xf32>
    %c7_245 = arith.constant 7 : index
    %c0_246 = arith.constant 0 : index
    %c0_247 = arith.constant 0 : index
    %391 = vector.load %arg2[%c7_245, %c0_246, %c0_247] : memref<12x16x16xf32, #tpu.memory_space<vmem>>, vector<1x16x16xf32>
    %392 = vector.shape_cast %391 : vector<1x16x16xf32> to vector<16x16xf32>
    %cst_248 = arith.constant dense<0.000000e+00> : vector<2x16xf32>
    %393 = tpu.matmul %349, %392, %cst_248 {dimension_numbers = #tpu.dot_dimension_numbers<[1], [0], [0], [1], [0, 0, 1, 1], [], []>} : vector<2x16xf32>, vector<16x16xf32>, vector<2x16xf32> -> vector<2x16xf32>
    %c8_249 = arith.constant 8 : index
    %c0_250 = arith.constant 0 : index
    %c0_251 = arith.constant 0 : index
    %394 = vector.load %arg2[%c8_249, %c0_250, %c0_251] : memref<12x16x16xf32, #tpu.memory_space<vmem>>, vector<1x16x16xf32>
    %395 = vector.shape_cast %394 : vector<1x16x16xf32> to vector<16x16xf32>
    %cst_252 = arith.constant dense<0.000000e+00> : vector<2x16xf32>
    %396 = tpu.matmul %349, %395, %cst_252 {dimension_numbers = #tpu.dot_dimension_numbers<[1], [0], [0], [1], [0, 0, 1, 1], [], []>} : vector<2x16xf32>, vector<16x16xf32>, vector<2x16xf32> -> vector<2x16xf32>
    %c2_253 = arith.constant 2 : index
    %c0_254 = arith.constant 0 : index
    %c0_255 = arith.constant 0 : index
    %397 = vector.load %arg4[%c2_253, %c0_254, %c0_255] : memref<4x1x16xf32, #tpu.memory_space<vmem>>, vector<1x1x16xf32>
    %398 = vector.shape_cast %397 : vector<1x1x16xf32> to vector<1x16xf32>
    %399 = vector.broadcast %398 : vector<1x16xf32> to vector<2x16xf32>
    %400 = arith.addf %396, %399 : vector<2x16xf32>
    %401 = vector.extract_strided_slice %276 {offsets = [2, 0], sizes = [2, 16], strides = [1, 1]} : vector<6x16xf32> to vector<2x16xf32>
    %402 = arith.addf %401, %390 : vector<2x16xf32>
    %403 = arith.negf %402 : vector<2x16xf32>
    %404 = math.exp %403 : vector<2x16xf32>
    %cst_256 = arith.constant 1.000000e+00 : f32
    %405 = vector.broadcast %cst_256 : f32 to vector<2x16xf32>
    %406 = arith.addf %405, %404 : vector<2x16xf32>
    %407 = arith.divf %405, %406 : vector<2x16xf32>
    %408 = vector.extract_strided_slice %283 {offsets = [2, 0], sizes = [2, 16], strides = [1, 1]} : vector<6x16xf32> to vector<2x16xf32>
    %409 = arith.addf %408, %393 : vector<2x16xf32>
    %410 = arith.negf %409 : vector<2x16xf32>
    %411 = math.exp %410 : vector<2x16xf32>
    %cst_257 = arith.constant 1.000000e+00 : f32
    %412 = vector.broadcast %cst_257 : f32 to vector<2x16xf32>
    %413 = arith.addf %412, %411 : vector<2x16xf32>
    %414 = arith.divf %412, %413 : vector<2x16xf32>
    %415 = vector.extract_strided_slice %290 {offsets = [2, 0], sizes = [2, 16], strides = [1, 1]} : vector<6x16xf32> to vector<2x16xf32>
    %416 = arith.mulf %407, %400 : vector<2x16xf32>
    %417 = arith.addf %415, %416 : vector<2x16xf32>
    %418 = math.tanh %417 : vector<2x16xf32>
    %cst_258 = arith.constant 1.000000e+00 : f32
    %419 = vector.broadcast %cst_258 : f32 to vector<2x16xf32>
    %420 = arith.subf %419, %414 : vector<2x16xf32>
    %421 = arith.mulf %420, %418 : vector<2x16xf32>
    %422 = arith.mulf %414, %349 : vector<2x16xf32>
    %423 = arith.addf %421, %422 : vector<2x16xf32>
    %c2_259 = arith.constant 2 : index
    %c0_260 = arith.constant 0 : index
    %424 = vector.load %arg6[%c2_259, %c0_260] : memref<6x16xf32, #tpu.memory_space<vmem>>, vector<2x16xf32>
    tpu.vector_store %arg6[%c2_259, %c0_260], %423 {strides = array<i32>} : memref<6x16xf32, #tpu.memory_space<vmem>>, vector<2x16xf32>,
    %c9_261 = arith.constant 9 : index
    %c0_262 = arith.constant 0 : index
    %c0_263 = arith.constant 0 : index
    %425 = vector.load %arg2[%c9_261, %c0_262, %c0_263] : memref<12x16x16xf32, #tpu.memory_space<vmem>>, vector<1x16x16xf32>
    %426 = vector.shape_cast %425 : vector<1x16x16xf32> to vector<16x16xf32>
    %cst_264 = arith.constant dense<0.000000e+00> : vector<2x16xf32>
    %427 = tpu.matmul %386, %426, %cst_264 {dimension_numbers = #tpu.dot_dimension_numbers<[1], [0], [0], [1], [0, 0, 1, 1], [], []>} : vector<2x16xf32>, vector<16x16xf32>, vector<2x16xf32> -> vector<2x16xf32>
    %c10_265 = arith.constant 10 : index
    %c0_266 = arith.constant 0 : index
    %c0_267 = arith.constant 0 : index
    %428 = vector.load %arg2[%c10_265, %c0_266, %c0_267] : memref<12x16x16xf32, #tpu.memory_space<vmem>>, vector<1x16x16xf32>
    %429 = vector.shape_cast %428 : vector<1x16x16xf32> to vector<16x16xf32>
    %cst_268 = arith.constant dense<0.000000e+00> : vector<2x16xf32>
    %430 = tpu.matmul %386, %429, %cst_268 {dimension_numbers = #tpu.dot_dimension_numbers<[1], [0], [0], [1], [0, 0, 1, 1], [], []>} : vector<2x16xf32>, vector<16x16xf32>, vector<2x16xf32> -> vector<2x16xf32>
    %c11_269 = arith.constant 11 : index
    %c0_270 = arith.constant 0 : index
    %c0_271 = arith.constant 0 : index
    %431 = vector.load %arg2[%c11_269, %c0_270, %c0_271] : memref<12x16x16xf32, #tpu.memory_space<vmem>>, vector<1x16x16xf32>
    %432 = vector.shape_cast %431 : vector<1x16x16xf32> to vector<16x16xf32>
    %cst_272 = arith.constant dense<0.000000e+00> : vector<2x16xf32>
    %433 = tpu.matmul %386, %432, %cst_272 {dimension_numbers = #tpu.dot_dimension_numbers<[1], [0], [0], [1], [0, 0, 1, 1], [], []>} : vector<2x16xf32>, vector<16x16xf32>, vector<2x16xf32> -> vector<2x16xf32>
    %c3_273 = arith.constant 3 : index
    %c0_274 = arith.constant 0 : index
    %c0_275 = arith.constant 0 : index
    %434 = vector.load %arg4[%c3_273, %c0_274, %c0_275] : memref<4x1x16xf32, #tpu.memory_space<vmem>>, vector<1x1x16xf32>
    %435 = vector.shape_cast %434 : vector<1x1x16xf32> to vector<1x16xf32>
    %436 = vector.broadcast %435 : vector<1x16xf32> to vector<2x16xf32>
    %437 = arith.addf %433, %436 : vector<2x16xf32>
    %438 = vector.extract_strided_slice %297 {offsets = [2, 0], sizes = [2, 16], strides = [1, 1]} : vector<6x16xf32> to vector<2x16xf32>
    %439 = arith.addf %438, %427 : vector<2x16xf32>
    %440 = arith.negf %439 : vector<2x16xf32>
    %441 = math.exp %440 : vector<2x16xf32>
    %cst_276 = arith.constant 1.000000e+00 : f32
    %442 = vector.broadcast %cst_276 : f32 to vector<2x16xf32>
    %443 = arith.addf %442, %441 : vector<2x16xf32>
    %444 = arith.divf %442, %443 : vector<2x16xf32>
    %445 = vector.extract_strided_slice %304 {offsets = [2, 0], sizes = [2, 16], strides = [1, 1]} : vector<6x16xf32> to vector<2x16xf32>
    %446 = arith.addf %445, %430 : vector<2x16xf32>
    %447 = arith.negf %446 : vector<2x16xf32>
    %448 = math.exp %447 : vector<2x16xf32>
    %cst_277 = arith.constant 1.000000e+00 : f32
    %449 = vector.broadcast %cst_277 : f32 to vector<2x16xf32>
    %450 = arith.addf %449, %448 : vector<2x16xf32>
    %451 = arith.divf %449, %450 : vector<2x16xf32>
    %452 = vector.extract_strided_slice %311 {offsets = [2, 0], sizes = [2, 16], strides = [1, 1]} : vector<6x16xf32> to vector<2x16xf32>
    %453 = arith.mulf %444, %437 : vector<2x16xf32>
    %454 = arith.addf %452, %453 : vector<2x16xf32>
    %455 = math.tanh %454 : vector<2x16xf32>
    %cst_278 = arith.constant 1.000000e+00 : f32
    %456 = vector.broadcast %cst_278 : f32 to vector<2x16xf32>
    %457 = arith.subf %456, %451 : vector<2x16xf32>
    %458 = arith.mulf %457, %455 : vector<2x16xf32>
    %459 = arith.mulf %451, %386 : vector<2x16xf32>
    %460 = arith.addf %458, %459 : vector<2x16xf32>
    %c2_279 = arith.constant 2 : index
    %c0_280 = arith.constant 0 : index
    %461 = vector.load %arg7[%c2_279, %c0_280] : memref<6x16xf32, #tpu.memory_space<vmem>>, vector<2x16xf32>
    tpu.vector_store %arg7[%c2_279, %c0_280], %460 {strides = array<i32>} : memref<6x16xf32, #tpu.memory_space<vmem>>, vector<2x16xf32>,
    %c6_281 = arith.constant 6 : index
    %c0_282 = arith.constant 0 : index
    %c0_283 = arith.constant 0 : index
    %462 = vector.load %arg2[%c6_281, %c0_282, %c0_283] : memref<12x16x16xf32, #tpu.memory_space<vmem>>, vector<1x16x16xf32>
    %463 = vector.shape_cast %462 : vector<1x16x16xf32> to vector<16x16xf32>
    %cst_284 = arith.constant dense<0.000000e+00> : vector<2x16xf32>
    %464 = tpu.matmul %423, %463, %cst_284 {dimension_numbers = #tpu.dot_dimension_numbers<[1], [0], [0], [1], [0, 0, 1, 1], [], []>} : vector<2x16xf32>, vector<16x16xf32>, vector<2x16xf32> -> vector<2x16xf32>
    %c7_285 = arith.constant 7 : index
    %c0_286 = arith.constant 0 : index
    %c0_287 = arith.constant 0 : index
    %465 = vector.load %arg2[%c7_285, %c0_286, %c0_287] : memref<12x16x16xf32, #tpu.memory_space<vmem>>, vector<1x16x16xf32>
    %466 = vector.shape_cast %465 : vector<1x16x16xf32> to vector<16x16xf32>
    %cst_288 = arith.constant dense<0.000000e+00> : vector<2x16xf32>
    %467 = tpu.matmul %423, %466, %cst_288 {dimension_numbers = #tpu.dot_dimension_numbers<[1], [0], [0], [1], [0, 0, 1, 1], [], []>} : vector<2x16xf32>, vector<16x16xf32>, vector<2x16xf32> -> vector<2x16xf32>
    %c8_289 = arith.constant 8 : index
    %c0_290 = arith.constant 0 : index
    %c0_291 = arith.constant 0 : index
    %468 = vector.load %arg2[%c8_289, %c0_290, %c0_291] : memref<12x16x16xf32, #tpu.memory_space<vmem>>, vector<1x16x16xf32>
    %469 = vector.shape_cast %468 : vector<1x16x16xf32> to vector<16x16xf32>
    %cst_292 = arith.constant dense<0.000000e+00> : vector<2x16xf32>
    %470 = tpu.matmul %423, %469, %cst_292 {dimension_numbers = #tpu.dot_dimension_numbers<[1], [0], [0], [1], [0, 0, 1, 1], [], []>} : vector<2x16xf32>, vector<16x16xf32>, vector<2x16xf32> -> vector<2x16xf32>
    %c2_293 = arith.constant 2 : index
    %c0_294 = arith.constant 0 : index
    %c0_295 = arith.constant 0 : index
    %471 = vector.load %arg4[%c2_293, %c0_294, %c0_295] : memref<4x1x16xf32, #tpu.memory_space<vmem>>, vector<1x1x16xf32>
    %472 = vector.shape_cast %471 : vector<1x1x16xf32> to vector<1x16xf32>
    %473 = vector.broadcast %472 : vector<1x16xf32> to vector<2x16xf32>
    %474 = arith.addf %470, %473 : vector<2x16xf32>
    %475 = vector.extract_strided_slice %276 {offsets = [4, 0], sizes = [2, 16], strides = [1, 1]} : vector<6x16xf32> to vector<2x16xf32>
    %476 = arith.addf %475, %464 : vector<2x16xf32>
    %477 = arith.negf %476 : vector<2x16xf32>
    %478 = math.exp %477 : vector<2x16xf32>
    %cst_296 = arith.constant 1.000000e+00 : f32
    %479 = vector.broadcast %cst_296 : f32 to vector<2x16xf32>
    %480 = arith.addf %479, %478 : vector<2x16xf32>
    %481 = arith.divf %479, %480 : vector<2x16xf32>
    %482 = vector.extract_strided_slice %283 {offsets = [4, 0], sizes = [2, 16], strides = [1, 1]} : vector<6x16xf32> to vector<2x16xf32>
    %483 = arith.addf %482, %467 : vector<2x16xf32>
    %484 = arith.negf %483 : vector<2x16xf32>
    %485 = math.exp %484 : vector<2x16xf32>
    %cst_297 = arith.constant 1.000000e+00 : f32
    %486 = vector.broadcast %cst_297 : f32 to vector<2x16xf32>
    %487 = arith.addf %486, %485 : vector<2x16xf32>
    %488 = arith.divf %486, %487 : vector<2x16xf32>
    %489 = vector.extract_strided_slice %290 {offsets = [4, 0], sizes = [2, 16], strides = [1, 1]} : vector<6x16xf32> to vector<2x16xf32>
    %490 = arith.mulf %481, %474 : vector<2x16xf32>
    %491 = arith.addf %489, %490 : vector<2x16xf32>
    %492 = math.tanh %491 : vector<2x16xf32>
    %cst_298 = arith.constant 1.000000e+00 : f32
    %493 = vector.broadcast %cst_298 : f32 to vector<2x16xf32>
    %494 = arith.subf %493, %488 : vector<2x16xf32>
    %495 = arith.mulf %494, %492 : vector<2x16xf32>
    %496 = arith.mulf %488, %423 : vector<2x16xf32>
    %497 = arith.addf %495, %496 : vector<2x16xf32>
    %c4_299 = arith.constant 4 : index
    %c0_300 = arith.constant 0 : index
    %498 = vector.load %arg6[%c4_299, %c0_300] : memref<6x16xf32, #tpu.memory_space<vmem>>, vector<2x16xf32>
    tpu.vector_store %arg6[%c4_299, %c0_300], %497 {strides = array<i32>} : memref<6x16xf32, #tpu.memory_space<vmem>>, vector<2x16xf32>,
    %c9_301 = arith.constant 9 : index
    %c0_302 = arith.constant 0 : index
    %c0_303 = arith.constant 0 : index
    %499 = vector.load %arg2[%c9_301, %c0_302, %c0_303] : memref<12x16x16xf32, #tpu.memory_space<vmem>>, vector<1x16x16xf32>
    %500 = vector.shape_cast %499 : vector<1x16x16xf32> to vector<16x16xf32>
    %cst_304 = arith.constant dense<0.000000e+00> : vector<2x16xf32>
    %501 = tpu.matmul %460, %500, %cst_304 {dimension_numbers = #tpu.dot_dimension_numbers<[1], [0], [0], [1], [0, 0, 1, 1], [], []>} : vector<2x16xf32>, vector<16x16xf32>, vector<2x16xf32> -> vector<2x16xf32>
    %c10_305 = arith.constant 10 : index
    %c0_306 = arith.constant 0 : index
    %c0_307 = arith.constant 0 : index
    %502 = vector.load %arg2[%c10_305, %c0_306, %c0_307] : memref<12x16x16xf32, #tpu.memory_space<vmem>>, vector<1x16x16xf32>
    %503 = vector.shape_cast %502 : vector<1x16x16xf32> to vector<16x16xf32>
    %cst_308 = arith.constant dense<0.000000e+00> : vector<2x16xf32>
    %504 = tpu.matmul %460, %503, %cst_308 {dimension_numbers = #tpu.dot_dimension_numbers<[1], [0], [0], [1], [0, 0, 1, 1], [], []>} : vector<2x16xf32>, vector<16x16xf32>, vector<2x16xf32> -> vector<2x16xf32>
    %c11_309 = arith.constant 11 : index
    %c0_310 = arith.constant 0 : index
    %c0_311 = arith.constant 0 : index
    %505 = vector.load %arg2[%c11_309, %c0_310, %c0_311] : memref<12x16x16xf32, #tpu.memory_space<vmem>>, vector<1x16x16xf32>
    %506 = vector.shape_cast %505 : vector<1x16x16xf32> to vector<16x16xf32>
    %cst_312 = arith.constant dense<0.000000e+00> : vector<2x16xf32>
    %507 = tpu.matmul %460, %506, %cst_312 {dimension_numbers = #tpu.dot_dimension_numbers<[1], [0], [0], [1], [0, 0, 1, 1], [], []>} : vector<2x16xf32>, vector<16x16xf32>, vector<2x16xf32> -> vector<2x16xf32>
    %c3_313 = arith.constant 3 : index
    %c0_314 = arith.constant 0 : index
    %c0_315 = arith.constant 0 : index
    %508 = vector.load %arg4[%c3_313, %c0_314, %c0_315] : memref<4x1x16xf32, #tpu.memory_space<vmem>>, vector<1x1x16xf32>
    %509 = vector.shape_cast %508 : vector<1x1x16xf32> to vector<1x16xf32>
    %510 = vector.broadcast %509 : vector<1x16xf32> to vector<2x16xf32>
    %511 = arith.addf %507, %510 : vector<2x16xf32>
    %512 = vector.extract_strided_slice %297 {offsets = [0, 0], sizes = [2, 16], strides = [1, 1]} : vector<6x16xf32> to vector<2x16xf32>
    %513 = arith.addf %512, %501 : vector<2x16xf32>
    %514 = arith.negf %513 : vector<2x16xf32>
    %515 = math.exp %514 : vector<2x16xf32>
    %cst_316 = arith.constant 1.000000e+00 : f32
    %516 = vector.broadcast %cst_316 : f32 to vector<2x16xf32>
    %517 = arith.addf %516, %515 : vector<2x16xf32>
    %518 = arith.divf %516, %517 : vector<2x16xf32>
    %519 = vector.extract_strided_slice %304 {offsets = [0, 0], sizes = [2, 16], strides = [1, 1]} : vector<6x16xf32> to vector<2x16xf32>
    %520 = arith.addf %519, %504 : vector<2x16xf32>
    %521 = arith.negf %520 : vector<2x16xf32>
    %522 = math.exp %521 : vector<2x16xf32>
    %cst_317 = arith.constant 1.000000e+00 : f32
    %523 = vector.broadcast %cst_317 : f32 to vector<2x16xf32>
    %524 = arith.addf %523, %522 : vector<2x16xf32>
    %525 = arith.divf %523, %524 : vector<2x16xf32>
    %526 = vector.extract_strided_slice %311 {offsets = [0, 0], sizes = [2, 16], strides = [1, 1]} : vector<6x16xf32> to vector<2x16xf32>
    %527 = arith.mulf %518, %511 : vector<2x16xf32>
    %528 = arith.addf %526, %527 : vector<2x16xf32>
    %529 = math.tanh %528 : vector<2x16xf32>
    %cst_318 = arith.constant 1.000000e+00 : f32
    %530 = vector.broadcast %cst_318 : f32 to vector<2x16xf32>
    %531 = arith.subf %530, %525 : vector<2x16xf32>
    %532 = arith.mulf %531, %529 : vector<2x16xf32>
    %533 = arith.mulf %525, %460 : vector<2x16xf32>
    %534 = arith.addf %532, %533 : vector<2x16xf32>
    %c0_319 = arith.constant 0 : index
    %c0_320 = arith.constant 0 : index
    %535 = vector.load %arg7[%c0_319, %c0_320] : memref<6x16xf32, #tpu.memory_space<vmem>>, vector<2x16xf32>
    tpu.vector_store %arg7[%c0_319, %c0_320], %534 {strides = array<i32>} : memref<6x16xf32, #tpu.memory_space<vmem>>, vector<2x16xf32>,
    %c0_321 = arith.constant 0 : index
    %c0_322 = arith.constant 0 : index
    %536 = vector.load %arg6[%c0_321, %c0_322] : memref<6x16xf32, #tpu.memory_space<vmem>>, vector<6x16xf32>
    %c0_323 = arith.constant 0 : index
    %c0_324 = arith.constant 0 : index
    %537 = vector.load %arg7[%c0_323, %c0_324] : memref<6x16xf32, #tpu.memory_space<vmem>>, vector<6x16xf32>
    %538 = tpu.concatenate %536, %537 in 1 : vector<6x16xf32>, vector<6x16xf32> -> vector<6x32xf32>
    %c0_325 = arith.constant 0 : index
    %c0_326 = arith.constant 0 : index
    %539 = vector.load %arg5[%c0_325, %c0_326] : memref<6x32xf32, #tpu.memory_space<vmem>>, vector<6x32xf32>
    tpu.vector_store %arg5[%c0_325, %c0_326], %538 {strides = array<i32>} : memref<6x32xf32, #tpu.memory_space<vmem>>, vector<6x32xf32>,
    return
  }
}

module attributes {stable_mosaic.version = 11 : i64} {
  func.func @kernel(%arg0: memref<2x32xf32, #tpu.memory_space<vmem>>, %arg1: memref<12x32x16xf32, #tpu.memory_space<vmem>>, %arg2: memref<12x16x16xf32, #tpu.memory_space<vmem>>, %arg3: memref<12x1x16xf32, #tpu.memory_space<vmem>>, %arg4: memref<4x1x16xf32, #tpu.memory_space<vmem>>, %arg5: memref<2x32xf32, #tpu.memory_space<vmem>>, %arg6: memref<2x16xf32, #tpu.memory_space<vmem>>, %arg7: memref<2x16xf32, #tpu.memory_space<vmem>>) attributes {dimension_semantics = [], scalar_prefetch = 0 : i64, scratch_operands = 2 : i64, tpu.core_type = #tpu.core_type<tc>} {
    %c0 = arith.constant 0 : index
    %c0_0 = arith.constant 0 : index
    %0 = vector.load %arg0[%c0, %c0_0] : memref<2x32xf32, #tpu.memory_space<vmem>>, vector<2x32xf32>
    %c0_1 = arith.constant 0 : index
    %c0_2 = arith.constant 0 : index
    %c0_3 = arith.constant 0 : index
    %1 = vector.load %arg1[%c0_1, %c0_2, %c0_3] : memref<12x32x16xf32, #tpu.memory_space<vmem>>, vector<1x32x16xf32>
    %2 = vector.shape_cast %1 : vector<1x32x16xf32> to vector<32x16xf32>
    %cst = arith.constant dense<0.000000e+00> : vector<2x16xf32>
    %3 = tpu.matmul %0, %2, %cst {dimension_numbers = #tpu.dot_dimension_numbers<[1], [0], [0], [1], [0, 0, 1, 1], [], []>} : vector<2x32xf32>, vector<32x16xf32>, vector<2x16xf32> -> vector<2x16xf32>
    %c0_4 = arith.constant 0 : index
    %c0_5 = arith.constant 0 : index
    %c0_6 = arith.constant 0 : index
    %4 = vector.load %arg3[%c0_4, %c0_5, %c0_6] : memref<12x1x16xf32, #tpu.memory_space<vmem>>, vector<1x1x16xf32>
    %5 = vector.shape_cast %4 : vector<1x1x16xf32> to vector<1x16xf32>
    %6 = vector.broadcast %5 : vector<1x16xf32> to vector<2x16xf32>
    %7 = arith.addf %3, %6 : vector<2x16xf32>
    %c1 = arith.constant 1 : index
    %c0_7 = arith.constant 0 : index
    %c0_8 = arith.constant 0 : index
    %8 = vector.load %arg1[%c1, %c0_7, %c0_8] : memref<12x32x16xf32, #tpu.memory_space<vmem>>, vector<1x32x16xf32>
    %9 = vector.shape_cast %8 : vector<1x32x16xf32> to vector<32x16xf32>
    %cst_9 = arith.constant dense<0.000000e+00> : vector<2x16xf32>
    %10 = tpu.matmul %0, %9, %cst_9 {dimension_numbers = #tpu.dot_dimension_numbers<[1], [0], [0], [1], [0, 0, 1, 1], [], []>} : vector<2x32xf32>, vector<32x16xf32>, vector<2x16xf32> -> vector<2x16xf32>
    %c1_10 = arith.constant 1 : index
    %c0_11 = arith.constant 0 : index
    %c0_12 = arith.constant 0 : index
    %11 = vector.load %arg3[%c1_10, %c0_11, %c0_12] : memref<12x1x16xf32, #tpu.memory_space<vmem>>, vector<1x1x16xf32>
    %12 = vector.shape_cast %11 : vector<1x1x16xf32> to vector<1x16xf32>
    %13 = vector.broadcast %12 : vector<1x16xf32> to vector<2x16xf32>
    %14 = arith.addf %10, %13 : vector<2x16xf32>
    %c2 = arith.constant 2 : index
    %c0_13 = arith.constant 0 : index
    %c0_14 = arith.constant 0 : index
    %15 = vector.load %arg1[%c2, %c0_13, %c0_14] : memref<12x32x16xf32, #tpu.memory_space<vmem>>, vector<1x32x16xf32>
    %16 = vector.shape_cast %15 : vector<1x32x16xf32> to vector<32x16xf32>
    %cst_15 = arith.constant dense<0.000000e+00> : vector<2x16xf32>
    %17 = tpu.matmul %0, %16, %cst_15 {dimension_numbers = #tpu.dot_dimension_numbers<[1], [0], [0], [1], [0, 0, 1, 1], [], []>} : vector<2x32xf32>, vector<32x16xf32>, vector<2x16xf32> -> vector<2x16xf32>
    %c2_16 = arith.constant 2 : index
    %c0_17 = arith.constant 0 : index
    %c0_18 = arith.constant 0 : index
    %18 = vector.load %arg3[%c2_16, %c0_17, %c0_18] : memref<12x1x16xf32, #tpu.memory_space<vmem>>, vector<1x1x16xf32>
    %19 = vector.shape_cast %18 : vector<1x1x16xf32> to vector<1x16xf32>
    %20 = vector.broadcast %19 : vector<1x16xf32> to vector<2x16xf32>
    %21 = arith.addf %17, %20 : vector<2x16xf32>
    %c3 = arith.constant 3 : index
    %c0_19 = arith.constant 0 : index
    %c0_20 = arith.constant 0 : index
    %22 = vector.load %arg1[%c3, %c0_19, %c0_20] : memref<12x32x16xf32, #tpu.memory_space<vmem>>, vector<1x32x16xf32>
    %23 = vector.shape_cast %22 : vector<1x32x16xf32> to vector<32x16xf32>
    %cst_21 = arith.constant dense<0.000000e+00> : vector<2x16xf32>
    %24 = tpu.matmul %0, %23, %cst_21 {dimension_numbers = #tpu.dot_dimension_numbers<[1], [0], [0], [1], [0, 0, 1, 1], [], []>} : vector<2x32xf32>, vector<32x16xf32>, vector<2x16xf32> -> vector<2x16xf32>
    %c3_22 = arith.constant 3 : index
    %c0_23 = arith.constant 0 : index
    %c0_24 = arith.constant 0 : index
    %25 = vector.load %arg3[%c3_22, %c0_23, %c0_24] : memref<12x1x16xf32, #tpu.memory_space<vmem>>, vector<1x1x16xf32>
    %26 = vector.shape_cast %25 : vector<1x1x16xf32> to vector<1x16xf32>
    %27 = vector.broadcast %26 : vector<1x16xf32> to vector<2x16xf32>
    %28 = arith.addf %24, %27 : vector<2x16xf32>
    %c4 = arith.constant 4 : index
    %c0_25 = arith.constant 0 : index
    %c0_26 = arith.constant 0 : index
    %29 = vector.load %arg1[%c4, %c0_25, %c0_26] : memref<12x32x16xf32, #tpu.memory_space<vmem>>, vector<1x32x16xf32>
    %30 = vector.shape_cast %29 : vector<1x32x16xf32> to vector<32x16xf32>
    %cst_27 = arith.constant dense<0.000000e+00> : vector<2x16xf32>
    %31 = tpu.matmul %0, %30, %cst_27 {dimension_numbers = #tpu.dot_dimension_numbers<[1], [0], [0], [1], [0, 0, 1, 1], [], []>} : vector<2x32xf32>, vector<32x16xf32>, vector<2x16xf32> -> vector<2x16xf32>
    %c4_28 = arith.constant 4 : index
    %c0_29 = arith.constant 0 : index
    %c0_30 = arith.constant 0 : index
    %32 = vector.load %arg3[%c4_28, %c0_29, %c0_30] : memref<12x1x16xf32, #tpu.memory_space<vmem>>, vector<1x1x16xf32>
    %33 = vector.shape_cast %32 : vector<1x1x16xf32> to vector<1x16xf32>
    %34 = vector.broadcast %33 : vector<1x16xf32> to vector<2x16xf32>
    %35 = arith.addf %31, %34 : vector<2x16xf32>
    %c5 = arith.constant 5 : index
    %c0_31 = arith.constant 0 : index
    %c0_32 = arith.constant 0 : index
    %36 = vector.load %arg1[%c5, %c0_31, %c0_32] : memref<12x32x16xf32, #tpu.memory_space<vmem>>, vector<1x32x16xf32>
    %37 = vector.shape_cast %36 : vector<1x32x16xf32> to vector<32x16xf32>
    %cst_33 = arith.constant dense<0.000000e+00> : vector<2x16xf32>
    %38 = tpu.matmul %0, %37, %cst_33 {dimension_numbers = #tpu.dot_dimension_numbers<[1], [0], [0], [1], [0, 0, 1, 1], [], []>} : vector<2x32xf32>, vector<32x16xf32>, vector<2x16xf32> -> vector<2x16xf32>
    %c5_34 = arith.constant 5 : index
    %c0_35 = arith.constant 0 : index
    %c0_36 = arith.constant 0 : index
    %39 = vector.load %arg3[%c5_34, %c0_35, %c0_36] : memref<12x1x16xf32, #tpu.memory_space<vmem>>, vector<1x1x16xf32>
    %40 = vector.shape_cast %39 : vector<1x1x16xf32> to vector<1x16xf32>
    %41 = vector.broadcast %40 : vector<1x16xf32> to vector<2x16xf32>
    %42 = arith.addf %38, %41 : vector<2x16xf32>
    %cst_37 = arith.constant 0.000000e+00 : f32
    %43 = vector.broadcast %cst_37 : f32 to vector<1x16xf32>
    %cst_38 = arith.constant 0.000000e+00 : f32
    %44 = vector.broadcast %cst_38 : f32 to vector<1x16xf32>
    %c0_39 = arith.constant 0 : index
    %c0_40 = arith.constant 0 : index
    %c0_41 = arith.constant 0 : index
    %45 = vector.load %arg2[%c0_39, %c0_40, %c0_41] : memref<12x16x16xf32, #tpu.memory_space<vmem>>, vector<1x16x16xf32>
    %46 = vector.shape_cast %45 : vector<1x16x16xf32> to vector<16x16xf32>
    %cst_42 = arith.constant dense<0.000000e+00> : vector<1x16xf32>
    %47 = tpu.matmul %43, %46, %cst_42 {dimension_numbers = #tpu.dot_dimension_numbers<[1], [0], [0], [1], [0, 0, 1, 1], [], []>} : vector<1x16xf32>, vector<16x16xf32>, vector<1x16xf32> -> vector<1x16xf32>
    %c1_43 = arith.constant 1 : index
    %c0_44 = arith.constant 0 : index
    %c0_45 = arith.constant 0 : index
    %48 = vector.load %arg2[%c1_43, %c0_44, %c0_45] : memref<12x16x16xf32, #tpu.memory_space<vmem>>, vector<1x16x16xf32>
    %49 = vector.shape_cast %48 : vector<1x16x16xf32> to vector<16x16xf32>
    %cst_46 = arith.constant dense<0.000000e+00> : vector<1x16xf32>
    %50 = tpu.matmul %43, %49, %cst_46 {dimension_numbers = #tpu.dot_dimension_numbers<[1], [0], [0], [1], [0, 0, 1, 1], [], []>} : vector<1x16xf32>, vector<16x16xf32>, vector<1x16xf32> -> vector<1x16xf32>
    %c2_47 = arith.constant 2 : index
    %c0_48 = arith.constant 0 : index
    %c0_49 = arith.constant 0 : index
    %51 = vector.load %arg2[%c2_47, %c0_48, %c0_49] : memref<12x16x16xf32, #tpu.memory_space<vmem>>, vector<1x16x16xf32>
    %52 = vector.shape_cast %51 : vector<1x16x16xf32> to vector<16x16xf32>
    %cst_50 = arith.constant dense<0.000000e+00> : vector<1x16xf32>
    %53 = tpu.matmul %43, %52, %cst_50 {dimension_numbers = #tpu.dot_dimension_numbers<[1], [0], [0], [1], [0, 0, 1, 1], [], []>} : vector<1x16xf32>, vector<16x16xf32>, vector<1x16xf32> -> vector<1x16xf32>
    %c0_51 = arith.constant 0 : index
    %c0_52 = arith.constant 0 : index
    %c0_53 = arith.constant 0 : index
    %54 = vector.load %arg4[%c0_51, %c0_52, %c0_53] : memref<4x1x16xf32, #tpu.memory_space<vmem>>, vector<1x1x16xf32>
    %55 = vector.shape_cast %54 : vector<1x1x16xf32> to vector<1x16xf32>
    %56 = arith.addf %53, %55 : vector<1x16xf32>
    %57 = vector.extract_strided_slice %7 {offsets = [0, 0], sizes = [1, 16], strides = [1, 1]} : vector<2x16xf32> to vector<1x16xf32>
    %58 = arith.addf %57, %47 : vector<1x16xf32>
    %59 = arith.negf %58 : vector<1x16xf32>
    %60 = math.exp %59 : vector<1x16xf32>
    %cst_54 = arith.constant 1.000000e+00 : f32
    %61 = vector.broadcast %cst_54 : f32 to vector<1x16xf32>
    %62 = arith.addf %61, %60 : vector<1x16xf32>
    %63 = arith.divf %61, %62 : vector<1x16xf32>
    %64 = vector.extract_strided_slice %14 {offsets = [0, 0], sizes = [1, 16], strides = [1, 1]} : vector<2x16xf32> to vector<1x16xf32>
    %65 = arith.addf %64, %50 : vector<1x16xf32>
    %66 = arith.negf %65 : vector<1x16xf32>
    %67 = math.exp %66 : vector<1x16xf32>
    %cst_55 = arith.constant 1.000000e+00 : f32
    %68 = vector.broadcast %cst_55 : f32 to vector<1x16xf32>
    %69 = arith.addf %68, %67 : vector<1x16xf32>
    %70 = arith.divf %68, %69 : vector<1x16xf32>
    %71 = vector.extract_strided_slice %21 {offsets = [0, 0], sizes = [1, 16], strides = [1, 1]} : vector<2x16xf32> to vector<1x16xf32>
    %72 = arith.mulf %63, %56 : vector<1x16xf32>
    %73 = arith.addf %71, %72 : vector<1x16xf32>
    %74 = math.tanh %73 : vector<1x16xf32>
    %cst_56 = arith.constant 1.000000e+00 : f32
    %75 = vector.broadcast %cst_56 : f32 to vector<1x16xf32>
    %76 = arith.subf %75, %70 : vector<1x16xf32>
    %77 = arith.mulf %76, %74 : vector<1x16xf32>
    %78 = arith.mulf %70, %43 : vector<1x16xf32>
    %79 = arith.addf %77, %78 : vector<1x16xf32>
    %c0_57 = arith.constant 0 : index
    %c0_58 = arith.constant 0 : index
    %80 = vector.load %arg6[%c0_57, %c0_58] : memref<2x16xf32, #tpu.memory_space<vmem>>, vector<1x16xf32>
    tpu.vector_store %arg6[%c0_57, %c0_58], %79 {strides = array<i32>} : memref<2x16xf32, #tpu.memory_space<vmem>>, vector<1x16xf32>,
    %c3_59 = arith.constant 3 : index
    %c0_60 = arith.constant 0 : index
    %c0_61 = arith.constant 0 : index
    %81 = vector.load %arg2[%c3_59, %c0_60, %c0_61] : memref<12x16x16xf32, #tpu.memory_space<vmem>>, vector<1x16x16xf32>
    %82 = vector.shape_cast %81 : vector<1x16x16xf32> to vector<16x16xf32>
    %cst_62 = arith.constant dense<0.000000e+00> : vector<1x16xf32>
    %83 = tpu.matmul %44, %82, %cst_62 {dimension_numbers = #tpu.dot_dimension_numbers<[1], [0], [0], [1], [0, 0, 1, 1], [], []>} : vector<1x16xf32>, vector<16x16xf32>, vector<1x16xf32> -> vector<1x16xf32>
    %c4_63 = arith.constant 4 : index
    %c0_64 = arith.constant 0 : index
    %c0_65 = arith.constant 0 : index
    %84 = vector.load %arg2[%c4_63, %c0_64, %c0_65] : memref<12x16x16xf32, #tpu.memory_space<vmem>>, vector<1x16x16xf32>
    %85 = vector.shape_cast %84 : vector<1x16x16xf32> to vector<16x16xf32>
    %cst_66 = arith.constant dense<0.000000e+00> : vector<1x16xf32>
    %86 = tpu.matmul %44, %85, %cst_66 {dimension_numbers = #tpu.dot_dimension_numbers<[1], [0], [0], [1], [0, 0, 1, 1], [], []>} : vector<1x16xf32>, vector<16x16xf32>, vector<1x16xf32> -> vector<1x16xf32>
    %c5_67 = arith.constant 5 : index
    %c0_68 = arith.constant 0 : index
    %c0_69 = arith.constant 0 : index
    %87 = vector.load %arg2[%c5_67, %c0_68, %c0_69] : memref<12x16x16xf32, #tpu.memory_space<vmem>>, vector<1x16x16xf32>
    %88 = vector.shape_cast %87 : vector<1x16x16xf32> to vector<16x16xf32>
    %cst_70 = arith.constant dense<0.000000e+00> : vector<1x16xf32>
    %89 = tpu.matmul %44, %88, %cst_70 {dimension_numbers = #tpu.dot_dimension_numbers<[1], [0], [0], [1], [0, 0, 1, 1], [], []>} : vector<1x16xf32>, vector<16x16xf32>, vector<1x16xf32> -> vector<1x16xf32>
    %c1_71 = arith.constant 1 : index
    %c0_72 = arith.constant 0 : index
    %c0_73 = arith.constant 0 : index
    %90 = vector.load %arg4[%c1_71, %c0_72, %c0_73] : memref<4x1x16xf32, #tpu.memory_space<vmem>>, vector<1x1x16xf32>
    %91 = vector.shape_cast %90 : vector<1x1x16xf32> to vector<1x16xf32>
    %92 = arith.addf %89, %91 : vector<1x16xf32>
    %93 = vector.extract_strided_slice %28 {offsets = [1, 0], sizes = [1, 16], strides = [1, 1]} : vector<2x16xf32> to vector<1x16xf32>
    %94 = arith.addf %93, %83 : vector<1x16xf32>
    %95 = arith.negf %94 : vector<1x16xf32>
    %96 = math.exp %95 : vector<1x16xf32>
    %cst_74 = arith.constant 1.000000e+00 : f32
    %97 = vector.broadcast %cst_74 : f32 to vector<1x16xf32>
    %98 = arith.addf %97, %96 : vector<1x16xf32>
    %99 = arith.divf %97, %98 : vector<1x16xf32>
    %100 = vector.extract_strided_slice %35 {offsets = [1, 0], sizes = [1, 16], strides = [1, 1]} : vector<2x16xf32> to vector<1x16xf32>
    %101 = arith.addf %100, %86 : vector<1x16xf32>
    %102 = arith.negf %101 : vector<1x16xf32>
    %103 = math.exp %102 : vector<1x16xf32>
    %cst_75 = arith.constant 1.000000e+00 : f32
    %104 = vector.broadcast %cst_75 : f32 to vector<1x16xf32>
    %105 = arith.addf %104, %103 : vector<1x16xf32>
    %106 = arith.divf %104, %105 : vector<1x16xf32>
    %107 = vector.extract_strided_slice %42 {offsets = [1, 0], sizes = [1, 16], strides = [1, 1]} : vector<2x16xf32> to vector<1x16xf32>
    %108 = arith.mulf %99, %92 : vector<1x16xf32>
    %109 = arith.addf %107, %108 : vector<1x16xf32>
    %110 = math.tanh %109 : vector<1x16xf32>
    %cst_76 = arith.constant 1.000000e+00 : f32
    %111 = vector.broadcast %cst_76 : f32 to vector<1x16xf32>
    %112 = arith.subf %111, %106 : vector<1x16xf32>
    %113 = arith.mulf %112, %110 : vector<1x16xf32>
    %114 = arith.mulf %106, %44 : vector<1x16xf32>
    %115 = arith.addf %113, %114 : vector<1x16xf32>
    %c1_77 = arith.constant 1 : index
    %c0_78 = arith.constant 0 : index
    %116 = vector.load %arg7[%c1_77, %c0_78] : memref<2x16xf32, #tpu.memory_space<vmem>>, vector<1x16xf32>
    tpu.vector_store %arg7[%c1_77, %c0_78], %115 {strides = array<i32>} : memref<2x16xf32, #tpu.memory_space<vmem>>, vector<1x16xf32>,
    %c0_79 = arith.constant 0 : index
    %c0_80 = arith.constant 0 : index
    %c0_81 = arith.constant 0 : index
    %117 = vector.load %arg2[%c0_79, %c0_80, %c0_81] : memref<12x16x16xf32, #tpu.memory_space<vmem>>, vector<1x16x16xf32>
    %118 = vector.shape_cast %117 : vector<1x16x16xf32> to vector<16x16xf32>
    %cst_82 = arith.constant dense<0.000000e+00> : vector<1x16xf32>
    %119 = tpu.matmul %79, %118, %cst_82 {dimension_numbers = #tpu.dot_dimension_numbers<[1], [0], [0], [1], [0, 0, 1, 1], [], []>} : vector<1x16xf32>, vector<16x16xf32>, vector<1x16xf32> -> vector<1x16xf32>
    %c1_83 = arith.constant 1 : index
    %c0_84 = arith.constant 0 : index
    %c0_85 = arith.constant 0 : index
    %120 = vector.load %arg2[%c1_83, %c0_84, %c0_85] : memref<12x16x16xf32, #tpu.memory_space<vmem>>, vector<1x16x16xf32>
    %121 = vector.shape_cast %120 : vector<1x16x16xf32> to vector<16x16xf32>
    %cst_86 = arith.constant dense<0.000000e+00> : vector<1x16xf32>
    %122 = tpu.matmul %79, %121, %cst_86 {dimension_numbers = #tpu.dot_dimension_numbers<[1], [0], [0], [1], [0, 0, 1, 1], [], []>} : vector<1x16xf32>, vector<16x16xf32>, vector<1x16xf32> -> vector<1x16xf32>
    %c2_87 = arith.constant 2 : index
    %c0_88 = arith.constant 0 : index
    %c0_89 = arith.constant 0 : index
    %123 = vector.load %arg2[%c2_87, %c0_88, %c0_89] : memref<12x16x16xf32, #tpu.memory_space<vmem>>, vector<1x16x16xf32>
    %124 = vector.shape_cast %123 : vector<1x16x16xf32> to vector<16x16xf32>
    %cst_90 = arith.constant dense<0.000000e+00> : vector<1x16xf32>
    %125 = tpu.matmul %79, %124, %cst_90 {dimension_numbers = #tpu.dot_dimension_numbers<[1], [0], [0], [1], [0, 0, 1, 1], [], []>} : vector<1x16xf32>, vector<16x16xf32>, vector<1x16xf32> -> vector<1x16xf32>
    %c0_91 = arith.constant 0 : index
    %c0_92 = arith.constant 0 : index
    %c0_93 = arith.constant 0 : index
    %126 = vector.load %arg4[%c0_91, %c0_92, %c0_93] : memref<4x1x16xf32, #tpu.memory_space<vmem>>, vector<1x1x16xf32>
    %127 = vector.shape_cast %126 : vector<1x1x16xf32> to vector<1x16xf32>
    %128 = arith.addf %125, %127 : vector<1x16xf32>
    %129 = vector.extract_strided_slice %7 {offsets = [1, 0], sizes = [1, 16], strides = [1, 1]} : vector<2x16xf32> to vector<1x16xf32>
    %130 = arith.addf %129, %119 : vector<1x16xf32>
    %131 = arith.negf %130 : vector<1x16xf32>
    %132 = math.exp %131 : vector<1x16xf32>
    %cst_94 = arith.constant 1.000000e+00 : f32
    %133 = vector.broadcast %cst_94 : f32 to vector<1x16xf32>
    %134 = arith.addf %133, %132 : vector<1x16xf32>
    %135 = arith.divf %133, %134 : vector<1x16xf32>
    %136 = vector.extract_strided_slice %14 {offsets = [1, 0], sizes = [1, 16], strides = [1, 1]} : vector<2x16xf32> to vector<1x16xf32>
    %137 = arith.addf %136, %122 : vector<1x16xf32>
    %138 = arith.negf %137 : vector<1x16xf32>
    %139 = math.exp %138 : vector<1x16xf32>
    %cst_95 = arith.constant 1.000000e+00 : f32
    %140 = vector.broadcast %cst_95 : f32 to vector<1x16xf32>
    %141 = arith.addf %140, %139 : vector<1x16xf32>
    %142 = arith.divf %140, %141 : vector<1x16xf32>
    %143 = vector.extract_strided_slice %21 {offsets = [1, 0], sizes = [1, 16], strides = [1, 1]} : vector<2x16xf32> to vector<1x16xf32>
    %144 = arith.mulf %135, %128 : vector<1x16xf32>
    %145 = arith.addf %143, %144 : vector<1x16xf32>
    %146 = math.tanh %145 : vector<1x16xf32>
    %cst_96 = arith.constant 1.000000e+00 : f32
    %147 = vector.broadcast %cst_96 : f32 to vector<1x16xf32>
    %148 = arith.subf %147, %142 : vector<1x16xf32>
    %149 = arith.mulf %148, %146 : vector<1x16xf32>
    %150 = arith.mulf %142, %79 : vector<1x16xf32>
    %151 = arith.addf %149, %150 : vector<1x16xf32>
    %c1_97 = arith.constant 1 : index
    %c0_98 = arith.constant 0 : index
    %152 = vector.load %arg6[%c1_97, %c0_98] : memref<2x16xf32, #tpu.memory_space<vmem>>, vector<1x16xf32>
    tpu.vector_store %arg6[%c1_97, %c0_98], %151 {strides = array<i32>} : memref<2x16xf32, #tpu.memory_space<vmem>>, vector<1x16xf32>,
    %c3_99 = arith.constant 3 : index
    %c0_100 = arith.constant 0 : index
    %c0_101 = arith.constant 0 : index
    %153 = vector.load %arg2[%c3_99, %c0_100, %c0_101] : memref<12x16x16xf32, #tpu.memory_space<vmem>>, vector<1x16x16xf32>
    %154 = vector.shape_cast %153 : vector<1x16x16xf32> to vector<16x16xf32>
    %cst_102 = arith.constant dense<0.000000e+00> : vector<1x16xf32>
    %155 = tpu.matmul %115, %154, %cst_102 {dimension_numbers = #tpu.dot_dimension_numbers<[1], [0], [0], [1], [0, 0, 1, 1], [], []>} : vector<1x16xf32>, vector<16x16xf32>, vector<1x16xf32> -> vector<1x16xf32>
    %c4_103 = arith.constant 4 : index
    %c0_104 = arith.constant 0 : index
    %c0_105 = arith.constant 0 : index
    %156 = vector.load %arg2[%c4_103, %c0_104, %c0_105] : memref<12x16x16xf32, #tpu.memory_space<vmem>>, vector<1x16x16xf32>
    %157 = vector.shape_cast %156 : vector<1x16x16xf32> to vector<16x16xf32>
    %cst_106 = arith.constant dense<0.000000e+00> : vector<1x16xf32>
    %158 = tpu.matmul %115, %157, %cst_106 {dimension_numbers = #tpu.dot_dimension_numbers<[1], [0], [0], [1], [0, 0, 1, 1], [], []>} : vector<1x16xf32>, vector<16x16xf32>, vector<1x16xf32> -> vector<1x16xf32>
    %c5_107 = arith.constant 5 : index
    %c0_108 = arith.constant 0 : index
    %c0_109 = arith.constant 0 : index
    %159 = vector.load %arg2[%c5_107, %c0_108, %c0_109] : memref<12x16x16xf32, #tpu.memory_space<vmem>>, vector<1x16x16xf32>
    %160 = vector.shape_cast %159 : vector<1x16x16xf32> to vector<16x16xf32>
    %cst_110 = arith.constant dense<0.000000e+00> : vector<1x16xf32>
    %161 = tpu.matmul %115, %160, %cst_110 {dimension_numbers = #tpu.dot_dimension_numbers<[1], [0], [0], [1], [0, 0, 1, 1], [], []>} : vector<1x16xf32>, vector<16x16xf32>, vector<1x16xf32> -> vector<1x16xf32>
    %c1_111 = arith.constant 1 : index
    %c0_112 = arith.constant 0 : index
    %c0_113 = arith.constant 0 : index
    %162 = vector.load %arg4[%c1_111, %c0_112, %c0_113] : memref<4x1x16xf32, #tpu.memory_space<vmem>>, vector<1x1x16xf32>
    %163 = vector.shape_cast %162 : vector<1x1x16xf32> to vector<1x16xf32>
    %164 = arith.addf %161, %163 : vector<1x16xf32>
    %165 = vector.extract_strided_slice %28 {offsets = [0, 0], sizes = [1, 16], strides = [1, 1]} : vector<2x16xf32> to vector<1x16xf32>
    %166 = arith.addf %165, %155 : vector<1x16xf32>
    %167 = arith.negf %166 : vector<1x16xf32>
    %168 = math.exp %167 : vector<1x16xf32>
    %cst_114 = arith.constant 1.000000e+00 : f32
    %169 = vector.broadcast %cst_114 : f32 to vector<1x16xf32>
    %170 = arith.addf %169, %168 : vector<1x16xf32>
    %171 = arith.divf %169, %170 : vector<1x16xf32>
    %172 = vector.extract_strided_slice %35 {offsets = [0, 0], sizes = [1, 16], strides = [1, 1]} : vector<2x16xf32> to vector<1x16xf32>
    %173 = arith.addf %172, %158 : vector<1x16xf32>
    %174 = arith.negf %173 : vector<1x16xf32>
    %175 = math.exp %174 : vector<1x16xf32>
    %cst_115 = arith.constant 1.000000e+00 : f32
    %176 = vector.broadcast %cst_115 : f32 to vector<1x16xf32>
    %177 = arith.addf %176, %175 : vector<1x16xf32>
    %178 = arith.divf %176, %177 : vector<1x16xf32>
    %179 = vector.extract_strided_slice %42 {offsets = [0, 0], sizes = [1, 16], strides = [1, 1]} : vector<2x16xf32> to vector<1x16xf32>
    %180 = arith.mulf %171, %164 : vector<1x16xf32>
    %181 = arith.addf %179, %180 : vector<1x16xf32>
    %182 = math.tanh %181 : vector<1x16xf32>
    %cst_116 = arith.constant 1.000000e+00 : f32
    %183 = vector.broadcast %cst_116 : f32 to vector<1x16xf32>
    %184 = arith.subf %183, %178 : vector<1x16xf32>
    %185 = arith.mulf %184, %182 : vector<1x16xf32>
    %186 = arith.mulf %178, %115 : vector<1x16xf32>
    %187 = arith.addf %185, %186 : vector<1x16xf32>
    %c0_117 = arith.constant 0 : index
    %c0_118 = arith.constant 0 : index
    %188 = vector.load %arg7[%c0_117, %c0_118] : memref<2x16xf32, #tpu.memory_space<vmem>>, vector<1x16xf32>
    tpu.vector_store %arg7[%c0_117, %c0_118], %187 {strides = array<i32>} : memref<2x16xf32, #tpu.memory_space<vmem>>, vector<1x16xf32>,
    %c0_119 = arith.constant 0 : index
    %c0_120 = arith.constant 0 : index
    %189 = vector.load %arg6[%c0_119, %c0_120] : memref<2x16xf32, #tpu.memory_space<vmem>>, vector<2x16xf32>
    %c0_121 = arith.constant 0 : index
    %c0_122 = arith.constant 0 : index
    %190 = vector.load %arg7[%c0_121, %c0_122] : memref<2x16xf32, #tpu.memory_space<vmem>>, vector<2x16xf32>
    %191 = tpu.concatenate %189, %190 in 1 : vector<2x16xf32>, vector<2x16xf32> -> vector<2x32xf32>
    %c6 = arith.constant 6 : index
    %c0_123 = arith.constant 0 : index
    %c0_124 = arith.constant 0 : index
    %192 = vector.load %arg1[%c6, %c0_123, %c0_124] : memref<12x32x16xf32, #tpu.memory_space<vmem>>, vector<1x32x16xf32>
    %193 = vector.shape_cast %192 : vector<1x32x16xf32> to vector<32x16xf32>
    %cst_125 = arith.constant dense<0.000000e+00> : vector<2x16xf32>
    %194 = tpu.matmul %191, %193, %cst_125 {dimension_numbers = #tpu.dot_dimension_numbers<[1], [0], [0], [1], [0, 0, 1, 1], [], []>} : vector<2x32xf32>, vector<32x16xf32>, vector<2x16xf32> -> vector<2x16xf32>
    %c6_126 = arith.constant 6 : index
    %c0_127 = arith.constant 0 : index
    %c0_128 = arith.constant 0 : index
    %195 = vector.load %arg3[%c6_126, %c0_127, %c0_128] : memref<12x1x16xf32, #tpu.memory_space<vmem>>, vector<1x1x16xf32>
    %196 = vector.shape_cast %195 : vector<1x1x16xf32> to vector<1x16xf32>
    %197 = vector.broadcast %196 : vector<1x16xf32> to vector<2x16xf32>
    %198 = arith.addf %194, %197 : vector<2x16xf32>
    %c7 = arith.constant 7 : index
    %c0_129 = arith.constant 0 : index
    %c0_130 = arith.constant 0 : index
    %199 = vector.load %arg1[%c7, %c0_129, %c0_130] : memref<12x32x16xf32, #tpu.memory_space<vmem>>, vector<1x32x16xf32>
    %200 = vector.shape_cast %199 : vector<1x32x16xf32> to vector<32x16xf32>
    %cst_131 = arith.constant dense<0.000000e+00> : vector<2x16xf32>
    %201 = tpu.matmul %191, %200, %cst_131 {dimension_numbers = #tpu.dot_dimension_numbers<[1], [0], [0], [1], [0, 0, 1, 1], [], []>} : vector<2x32xf32>, vector<32x16xf32>, vector<2x16xf32> -> vector<2x16xf32>
    %c7_132 = arith.constant 7 : index
    %c0_133 = arith.constant 0 : index
    %c0_134 = arith.constant 0 : index
    %202 = vector.load %arg3[%c7_132, %c0_133, %c0_134] : memref<12x1x16xf32, #tpu.memory_space<vmem>>, vector<1x1x16xf32>
    %203 = vector.shape_cast %202 : vector<1x1x16xf32> to vector<1x16xf32>
    %204 = vector.broadcast %203 : vector<1x16xf32> to vector<2x16xf32>
    %205 = arith.addf %201, %204 : vector<2x16xf32>
    %c8 = arith.constant 8 : index
    %c0_135 = arith.constant 0 : index
    %c0_136 = arith.constant 0 : index
    %206 = vector.load %arg1[%c8, %c0_135, %c0_136] : memref<12x32x16xf32, #tpu.memory_space<vmem>>, vector<1x32x16xf32>
    %207 = vector.shape_cast %206 : vector<1x32x16xf32> to vector<32x16xf32>
    %cst_137 = arith.constant dense<0.000000e+00> : vector<2x16xf32>
    %208 = tpu.matmul %191, %207, %cst_137 {dimension_numbers = #tpu.dot_dimension_numbers<[1], [0], [0], [1], [0, 0, 1, 1], [], []>} : vector<2x32xf32>, vector<32x16xf32>, vector<2x16xf32> -> vector<2x16xf32>
    %c8_138 = arith.constant 8 : index
    %c0_139 = arith.constant 0 : index
    %c0_140 = arith.constant 0 : index
    %209 = vector.load %arg3[%c8_138, %c0_139, %c0_140] : memref<12x1x16xf32, #tpu.memory_space<vmem>>, vector<1x1x16xf32>
    %210 = vector.shape_cast %209 : vector<1x1x16xf32> to vector<1x16xf32>
    %211 = vector.broadcast %210 : vector<1x16xf32> to vector<2x16xf32>
    %212 = arith.addf %208, %211 : vector<2x16xf32>
    %c9 = arith.constant 9 : index
    %c0_141 = arith.constant 0 : index
    %c0_142 = arith.constant 0 : index
    %213 = vector.load %arg1[%c9, %c0_141, %c0_142] : memref<12x32x16xf32, #tpu.memory_space<vmem>>, vector<1x32x16xf32>
    %214 = vector.shape_cast %213 : vector<1x32x16xf32> to vector<32x16xf32>
    %cst_143 = arith.constant dense<0.000000e+00> : vector<2x16xf32>
    %215 = tpu.matmul %191, %214, %cst_143 {dimension_numbers = #tpu.dot_dimension_numbers<[1], [0], [0], [1], [0, 0, 1, 1], [], []>} : vector<2x32xf32>, vector<32x16xf32>, vector<2x16xf32> -> vector<2x16xf32>
    %c9_144 = arith.constant 9 : index
    %c0_145 = arith.constant 0 : index
    %c0_146 = arith.constant 0 : index
    %216 = vector.load %arg3[%c9_144, %c0_145, %c0_146] : memref<12x1x16xf32, #tpu.memory_space<vmem>>, vector<1x1x16xf32>
    %217 = vector.shape_cast %216 : vector<1x1x16xf32> to vector<1x16xf32>
    %218 = vector.broadcast %217 : vector<1x16xf32> to vector<2x16xf32>
    %219 = arith.addf %215, %218 : vector<2x16xf32>
    %c10 = arith.constant 10 : index
    %c0_147 = arith.constant 0 : index
    %c0_148 = arith.constant 0 : index
    %220 = vector.load %arg1[%c10, %c0_147, %c0_148] : memref<12x32x16xf32, #tpu.memory_space<vmem>>, vector<1x32x16xf32>
    %221 = vector.shape_cast %220 : vector<1x32x16xf32> to vector<32x16xf32>
    %cst_149 = arith.constant dense<0.000000e+00> : vector<2x16xf32>
    %222 = tpu.matmul %191, %221, %cst_149 {dimension_numbers = #tpu.dot_dimension_numbers<[1], [0], [0], [1], [0, 0, 1, 1], [], []>} : vector<2x32xf32>, vector<32x16xf32>, vector<2x16xf32> -> vector<2x16xf32>
    %c10_150 = arith.constant 10 : index
    %c0_151 = arith.constant 0 : index
    %c0_152 = arith.constant 0 : index
    %223 = vector.load %arg3[%c10_150, %c0_151, %c0_152] : memref<12x1x16xf32, #tpu.memory_space<vmem>>, vector<1x1x16xf32>
    %224 = vector.shape_cast %223 : vector<1x1x16xf32> to vector<1x16xf32>
    %225 = vector.broadcast %224 : vector<1x16xf32> to vector<2x16xf32>
    %226 = arith.addf %222, %225 : vector<2x16xf32>
    %c11 = arith.constant 11 : index
    %c0_153 = arith.constant 0 : index
    %c0_154 = arith.constant 0 : index
    %227 = vector.load %arg1[%c11, %c0_153, %c0_154] : memref<12x32x16xf32, #tpu.memory_space<vmem>>, vector<1x32x16xf32>
    %228 = vector.shape_cast %227 : vector<1x32x16xf32> to vector<32x16xf32>
    %cst_155 = arith.constant dense<0.000000e+00> : vector<2x16xf32>
    %229 = tpu.matmul %191, %228, %cst_155 {dimension_numbers = #tpu.dot_dimension_numbers<[1], [0], [0], [1], [0, 0, 1, 1], [], []>} : vector<2x32xf32>, vector<32x16xf32>, vector<2x16xf32> -> vector<2x16xf32>
    %c11_156 = arith.constant 11 : index
    %c0_157 = arith.constant 0 : index
    %c0_158 = arith.constant 0 : index
    %230 = vector.load %arg3[%c11_156, %c0_157, %c0_158] : memref<12x1x16xf32, #tpu.memory_space<vmem>>, vector<1x1x16xf32>
    %231 = vector.shape_cast %230 : vector<1x1x16xf32> to vector<1x16xf32>
    %232 = vector.broadcast %231 : vector<1x16xf32> to vector<2x16xf32>
    %233 = arith.addf %229, %232 : vector<2x16xf32>
    %cst_159 = arith.constant 0.000000e+00 : f32
    %234 = vector.broadcast %cst_159 : f32 to vector<1x16xf32>
    %cst_160 = arith.constant 0.000000e+00 : f32
    %235 = vector.broadcast %cst_160 : f32 to vector<1x16xf32>
    %c6_161 = arith.constant 6 : index
    %c0_162 = arith.constant 0 : index
    %c0_163 = arith.constant 0 : index
    %236 = vector.load %arg2[%c6_161, %c0_162, %c0_163] : memref<12x16x16xf32, #tpu.memory_space<vmem>>, vector<1x16x16xf32>
    %237 = vector.shape_cast %236 : vector<1x16x16xf32> to vector<16x16xf32>
    %cst_164 = arith.constant dense<0.000000e+00> : vector<1x16xf32>
    %238 = tpu.matmul %234, %237, %cst_164 {dimension_numbers = #tpu.dot_dimension_numbers<[1], [0], [0], [1], [0, 0, 1, 1], [], []>} : vector<1x16xf32>, vector<16x16xf32>, vector<1x16xf32> -> vector<1x16xf32>
    %c7_165 = arith.constant 7 : index
    %c0_166 = arith.constant 0 : index
    %c0_167 = arith.constant 0 : index
    %239 = vector.load %arg2[%c7_165, %c0_166, %c0_167] : memref<12x16x16xf32, #tpu.memory_space<vmem>>, vector<1x16x16xf32>
    %240 = vector.shape_cast %239 : vector<1x16x16xf32> to vector<16x16xf32>
    %cst_168 = arith.constant dense<0.000000e+00> : vector<1x16xf32>
    %241 = tpu.matmul %234, %240, %cst_168 {dimension_numbers = #tpu.dot_dimension_numbers<[1], [0], [0], [1], [0, 0, 1, 1], [], []>} : vector<1x16xf32>, vector<16x16xf32>, vector<1x16xf32> -> vector<1x16xf32>
    %c8_169 = arith.constant 8 : index
    %c0_170 = arith.constant 0 : index
    %c0_171 = arith.constant 0 : index
    %242 = vector.load %arg2[%c8_169, %c0_170, %c0_171] : memref<12x16x16xf32, #tpu.memory_space<vmem>>, vector<1x16x16xf32>
    %243 = vector.shape_cast %242 : vector<1x16x16xf32> to vector<16x16xf32>
    %cst_172 = arith.constant dense<0.000000e+00> : vector<1x16xf32>
    %244 = tpu.matmul %234, %243, %cst_172 {dimension_numbers = #tpu.dot_dimension_numbers<[1], [0], [0], [1], [0, 0, 1, 1], [], []>} : vector<1x16xf32>, vector<16x16xf32>, vector<1x16xf32> -> vector<1x16xf32>
    %c2_173 = arith.constant 2 : index
    %c0_174 = arith.constant 0 : index
    %c0_175 = arith.constant 0 : index
    %245 = vector.load %arg4[%c2_173, %c0_174, %c0_175] : memref<4x1x16xf32, #tpu.memory_space<vmem>>, vector<1x1x16xf32>
    %246 = vector.shape_cast %245 : vector<1x1x16xf32> to vector<1x16xf32>
    %247 = arith.addf %244, %246 : vector<1x16xf32>
    %248 = vector.extract_strided_slice %198 {offsets = [0, 0], sizes = [1, 16], strides = [1, 1]} : vector<2x16xf32> to vector<1x16xf32>
    %249 = arith.addf %248, %238 : vector<1x16xf32>
    %250 = arith.negf %249 : vector<1x16xf32>
    %251 = math.exp %250 : vector<1x16xf32>
    %cst_176 = arith.constant 1.000000e+00 : f32
    %252 = vector.broadcast %cst_176 : f32 to vector<1x16xf32>
    %253 = arith.addf %252, %251 : vector<1x16xf32>
    %254 = arith.divf %252, %253 : vector<1x16xf32>
    %255 = vector.extract_strided_slice %205 {offsets = [0, 0], sizes = [1, 16], strides = [1, 1]} : vector<2x16xf32> to vector<1x16xf32>
    %256 = arith.addf %255, %241 : vector<1x16xf32>
    %257 = arith.negf %256 : vector<1x16xf32>
    %258 = math.exp %257 : vector<1x16xf32>
    %cst_177 = arith.constant 1.000000e+00 : f32
    %259 = vector.broadcast %cst_177 : f32 to vector<1x16xf32>
    %260 = arith.addf %259, %258 : vector<1x16xf32>
    %261 = arith.divf %259, %260 : vector<1x16xf32>
    %262 = vector.extract_strided_slice %212 {offsets = [0, 0], sizes = [1, 16], strides = [1, 1]} : vector<2x16xf32> to vector<1x16xf32>
    %263 = arith.mulf %254, %247 : vector<1x16xf32>
    %264 = arith.addf %262, %263 : vector<1x16xf32>
    %265 = math.tanh %264 : vector<1x16xf32>
    %cst_178 = arith.constant 1.000000e+00 : f32
    %266 = vector.broadcast %cst_178 : f32 to vector<1x16xf32>
    %267 = arith.subf %266, %261 : vector<1x16xf32>
    %268 = arith.mulf %267, %265 : vector<1x16xf32>
    %269 = arith.mulf %261, %234 : vector<1x16xf32>
    %270 = arith.addf %268, %269 : vector<1x16xf32>
    %c0_179 = arith.constant 0 : index
    %c0_180 = arith.constant 0 : index
    %271 = vector.load %arg6[%c0_179, %c0_180] : memref<2x16xf32, #tpu.memory_space<vmem>>, vector<1x16xf32>
    tpu.vector_store %arg6[%c0_179, %c0_180], %270 {strides = array<i32>} : memref<2x16xf32, #tpu.memory_space<vmem>>, vector<1x16xf32>,
    %c9_181 = arith.constant 9 : index
    %c0_182 = arith.constant 0 : index
    %c0_183 = arith.constant 0 : index
    %272 = vector.load %arg2[%c9_181, %c0_182, %c0_183] : memref<12x16x16xf32, #tpu.memory_space<vmem>>, vector<1x16x16xf32>
    %273 = vector.shape_cast %272 : vector<1x16x16xf32> to vector<16x16xf32>
    %cst_184 = arith.constant dense<0.000000e+00> : vector<1x16xf32>
    %274 = tpu.matmul %235, %273, %cst_184 {dimension_numbers = #tpu.dot_dimension_numbers<[1], [0], [0], [1], [0, 0, 1, 1], [], []>} : vector<1x16xf32>, vector<16x16xf32>, vector<1x16xf32> -> vector<1x16xf32>
    %c10_185 = arith.constant 10 : index
    %c0_186 = arith.constant 0 : index
    %c0_187 = arith.constant 0 : index
    %275 = vector.load %arg2[%c10_185, %c0_186, %c0_187] : memref<12x16x16xf32, #tpu.memory_space<vmem>>, vector<1x16x16xf32>
    %276 = vector.shape_cast %275 : vector<1x16x16xf32> to vector<16x16xf32>
    %cst_188 = arith.constant dense<0.000000e+00> : vector<1x16xf32>
    %277 = tpu.matmul %235, %276, %cst_188 {dimension_numbers = #tpu.dot_dimension_numbers<[1], [0], [0], [1], [0, 0, 1, 1], [], []>} : vector<1x16xf32>, vector<16x16xf32>, vector<1x16xf32> -> vector<1x16xf32>
    %c11_189 = arith.constant 11 : index
    %c0_190 = arith.constant 0 : index
    %c0_191 = arith.constant 0 : index
    %278 = vector.load %arg2[%c11_189, %c0_190, %c0_191] : memref<12x16x16xf32, #tpu.memory_space<vmem>>, vector<1x16x16xf32>
    %279 = vector.shape_cast %278 : vector<1x16x16xf32> to vector<16x16xf32>
    %cst_192 = arith.constant dense<0.000000e+00> : vector<1x16xf32>
    %280 = tpu.matmul %235, %279, %cst_192 {dimension_numbers = #tpu.dot_dimension_numbers<[1], [0], [0], [1], [0, 0, 1, 1], [], []>} : vector<1x16xf32>, vector<16x16xf32>, vector<1x16xf32> -> vector<1x16xf32>
    %c3_193 = arith.constant 3 : index
    %c0_194 = arith.constant 0 : index
    %c0_195 = arith.constant 0 : index
    %281 = vector.load %arg4[%c3_193, %c0_194, %c0_195] : memref<4x1x16xf32, #tpu.memory_space<vmem>>, vector<1x1x16xf32>
    %282 = vector.shape_cast %281 : vector<1x1x16xf32> to vector<1x16xf32>
    %283 = arith.addf %280, %282 : vector<1x16xf32>
    %284 = vector.extract_strided_slice %219 {offsets = [1, 0], sizes = [1, 16], strides = [1, 1]} : vector<2x16xf32> to vector<1x16xf32>
    %285 = arith.addf %284, %274 : vector<1x16xf32>
    %286 = arith.negf %285 : vector<1x16xf32>
    %287 = math.exp %286 : vector<1x16xf32>
    %cst_196 = arith.constant 1.000000e+00 : f32
    %288 = vector.broadcast %cst_196 : f32 to vector<1x16xf32>
    %289 = arith.addf %288, %287 : vector<1x16xf32>
    %290 = arith.divf %288, %289 : vector<1x16xf32>
    %291 = vector.extract_strided_slice %226 {offsets = [1, 0], sizes = [1, 16], strides = [1, 1]} : vector<2x16xf32> to vector<1x16xf32>
    %292 = arith.addf %291, %277 : vector<1x16xf32>
    %293 = arith.negf %292 : vector<1x16xf32>
    %294 = math.exp %293 : vector<1x16xf32>
    %cst_197 = arith.constant 1.000000e+00 : f32
    %295 = vector.broadcast %cst_197 : f32 to vector<1x16xf32>
    %296 = arith.addf %295, %294 : vector<1x16xf32>
    %297 = arith.divf %295, %296 : vector<1x16xf32>
    %298 = vector.extract_strided_slice %233 {offsets = [1, 0], sizes = [1, 16], strides = [1, 1]} : vector<2x16xf32> to vector<1x16xf32>
    %299 = arith.mulf %290, %283 : vector<1x16xf32>
    %300 = arith.addf %298, %299 : vector<1x16xf32>
    %301 = math.tanh %300 : vector<1x16xf32>
    %cst_198 = arith.constant 1.000000e+00 : f32
    %302 = vector.broadcast %cst_198 : f32 to vector<1x16xf32>
    %303 = arith.subf %302, %297 : vector<1x16xf32>
    %304 = arith.mulf %303, %301 : vector<1x16xf32>
    %305 = arith.mulf %297, %235 : vector<1x16xf32>
    %306 = arith.addf %304, %305 : vector<1x16xf32>
    %c1_199 = arith.constant 1 : index
    %c0_200 = arith.constant 0 : index
    %307 = vector.load %arg7[%c1_199, %c0_200] : memref<2x16xf32, #tpu.memory_space<vmem>>, vector<1x16xf32>
    tpu.vector_store %arg7[%c1_199, %c0_200], %306 {strides = array<i32>} : memref<2x16xf32, #tpu.memory_space<vmem>>, vector<1x16xf32>,
    %c6_201 = arith.constant 6 : index
    %c0_202 = arith.constant 0 : index
    %c0_203 = arith.constant 0 : index
    %308 = vector.load %arg2[%c6_201, %c0_202, %c0_203] : memref<12x16x16xf32, #tpu.memory_space<vmem>>, vector<1x16x16xf32>
    %309 = vector.shape_cast %308 : vector<1x16x16xf32> to vector<16x16xf32>
    %cst_204 = arith.constant dense<0.000000e+00> : vector<1x16xf32>
    %310 = tpu.matmul %270, %309, %cst_204 {dimension_numbers = #tpu.dot_dimension_numbers<[1], [0], [0], [1], [0, 0, 1, 1], [], []>} : vector<1x16xf32>, vector<16x16xf32>, vector<1x16xf32> -> vector<1x16xf32>
    %c7_205 = arith.constant 7 : index
    %c0_206 = arith.constant 0 : index
    %c0_207 = arith.constant 0 : index
    %311 = vector.load %arg2[%c7_205, %c0_206, %c0_207] : memref<12x16x16xf32, #tpu.memory_space<vmem>>, vector<1x16x16xf32>
    %312 = vector.shape_cast %311 : vector<1x16x16xf32> to vector<16x16xf32>
    %cst_208 = arith.constant dense<0.000000e+00> : vector<1x16xf32>
    %313 = tpu.matmul %270, %312, %cst_208 {dimension_numbers = #tpu.dot_dimension_numbers<[1], [0], [0], [1], [0, 0, 1, 1], [], []>} : vector<1x16xf32>, vector<16x16xf32>, vector<1x16xf32> -> vector<1x16xf32>
    %c8_209 = arith.constant 8 : index
    %c0_210 = arith.constant 0 : index
    %c0_211 = arith.constant 0 : index
    %314 = vector.load %arg2[%c8_209, %c0_210, %c0_211] : memref<12x16x16xf32, #tpu.memory_space<vmem>>, vector<1x16x16xf32>
    %315 = vector.shape_cast %314 : vector<1x16x16xf32> to vector<16x16xf32>
    %cst_212 = arith.constant dense<0.000000e+00> : vector<1x16xf32>
    %316 = tpu.matmul %270, %315, %cst_212 {dimension_numbers = #tpu.dot_dimension_numbers<[1], [0], [0], [1], [0, 0, 1, 1], [], []>} : vector<1x16xf32>, vector<16x16xf32>, vector<1x16xf32> -> vector<1x16xf32>
    %c2_213 = arith.constant 2 : index
    %c0_214 = arith.constant 0 : index
    %c0_215 = arith.constant 0 : index
    %317 = vector.load %arg4[%c2_213, %c0_214, %c0_215] : memref<4x1x16xf32, #tpu.memory_space<vmem>>, vector<1x1x16xf32>
    %318 = vector.shape_cast %317 : vector<1x1x16xf32> to vector<1x16xf32>
    %319 = arith.addf %316, %318 : vector<1x16xf32>
    %320 = vector.extract_strided_slice %198 {offsets = [1, 0], sizes = [1, 16], strides = [1, 1]} : vector<2x16xf32> to vector<1x16xf32>
    %321 = arith.addf %320, %310 : vector<1x16xf32>
    %322 = arith.negf %321 : vector<1x16xf32>
    %323 = math.exp %322 : vector<1x16xf32>
    %cst_216 = arith.constant 1.000000e+00 : f32
    %324 = vector.broadcast %cst_216 : f32 to vector<1x16xf32>
    %325 = arith.addf %324, %323 : vector<1x16xf32>
    %326 = arith.divf %324, %325 : vector<1x16xf32>
    %327 = vector.extract_strided_slice %205 {offsets = [1, 0], sizes = [1, 16], strides = [1, 1]} : vector<2x16xf32> to vector<1x16xf32>
    %328 = arith.addf %327, %313 : vector<1x16xf32>
    %329 = arith.negf %328 : vector<1x16xf32>
    %330 = math.exp %329 : vector<1x16xf32>
    %cst_217 = arith.constant 1.000000e+00 : f32
    %331 = vector.broadcast %cst_217 : f32 to vector<1x16xf32>
    %332 = arith.addf %331, %330 : vector<1x16xf32>
    %333 = arith.divf %331, %332 : vector<1x16xf32>
    %334 = vector.extract_strided_slice %212 {offsets = [1, 0], sizes = [1, 16], strides = [1, 1]} : vector<2x16xf32> to vector<1x16xf32>
    %335 = arith.mulf %326, %319 : vector<1x16xf32>
    %336 = arith.addf %334, %335 : vector<1x16xf32>
    %337 = math.tanh %336 : vector<1x16xf32>
    %cst_218 = arith.constant 1.000000e+00 : f32
    %338 = vector.broadcast %cst_218 : f32 to vector<1x16xf32>
    %339 = arith.subf %338, %333 : vector<1x16xf32>
    %340 = arith.mulf %339, %337 : vector<1x16xf32>
    %341 = arith.mulf %333, %270 : vector<1x16xf32>
    %342 = arith.addf %340, %341 : vector<1x16xf32>
    %c1_219 = arith.constant 1 : index
    %c0_220 = arith.constant 0 : index
    %343 = vector.load %arg6[%c1_219, %c0_220] : memref<2x16xf32, #tpu.memory_space<vmem>>, vector<1x16xf32>
    tpu.vector_store %arg6[%c1_219, %c0_220], %342 {strides = array<i32>} : memref<2x16xf32, #tpu.memory_space<vmem>>, vector<1x16xf32>,
    %c9_221 = arith.constant 9 : index
    %c0_222 = arith.constant 0 : index
    %c0_223 = arith.constant 0 : index
    %344 = vector.load %arg2[%c9_221, %c0_222, %c0_223] : memref<12x16x16xf32, #tpu.memory_space<vmem>>, vector<1x16x16xf32>
    %345 = vector.shape_cast %344 : vector<1x16x16xf32> to vector<16x16xf32>
    %cst_224 = arith.constant dense<0.000000e+00> : vector<1x16xf32>
    %346 = tpu.matmul %306, %345, %cst_224 {dimension_numbers = #tpu.dot_dimension_numbers<[1], [0], [0], [1], [0, 0, 1, 1], [], []>} : vector<1x16xf32>, vector<16x16xf32>, vector<1x16xf32> -> vector<1x16xf32>
    %c10_225 = arith.constant 10 : index
    %c0_226 = arith.constant 0 : index
    %c0_227 = arith.constant 0 : index
    %347 = vector.load %arg2[%c10_225, %c0_226, %c0_227] : memref<12x16x16xf32, #tpu.memory_space<vmem>>, vector<1x16x16xf32>
    %348 = vector.shape_cast %347 : vector<1x16x16xf32> to vector<16x16xf32>
    %cst_228 = arith.constant dense<0.000000e+00> : vector<1x16xf32>
    %349 = tpu.matmul %306, %348, %cst_228 {dimension_numbers = #tpu.dot_dimension_numbers<[1], [0], [0], [1], [0, 0, 1, 1], [], []>} : vector<1x16xf32>, vector<16x16xf32>, vector<1x16xf32> -> vector<1x16xf32>
    %c11_229 = arith.constant 11 : index
    %c0_230 = arith.constant 0 : index
    %c0_231 = arith.constant 0 : index
    %350 = vector.load %arg2[%c11_229, %c0_230, %c0_231] : memref<12x16x16xf32, #tpu.memory_space<vmem>>, vector<1x16x16xf32>
    %351 = vector.shape_cast %350 : vector<1x16x16xf32> to vector<16x16xf32>
    %cst_232 = arith.constant dense<0.000000e+00> : vector<1x16xf32>
    %352 = tpu.matmul %306, %351, %cst_232 {dimension_numbers = #tpu.dot_dimension_numbers<[1], [0], [0], [1], [0, 0, 1, 1], [], []>} : vector<1x16xf32>, vector<16x16xf32>, vector<1x16xf32> -> vector<1x16xf32>
    %c3_233 = arith.constant 3 : index
    %c0_234 = arith.constant 0 : index
    %c0_235 = arith.constant 0 : index
    %353 = vector.load %arg4[%c3_233, %c0_234, %c0_235] : memref<4x1x16xf32, #tpu.memory_space<vmem>>, vector<1x1x16xf32>
    %354 = vector.shape_cast %353 : vector<1x1x16xf32> to vector<1x16xf32>
    %355 = arith.addf %352, %354 : vector<1x16xf32>
    %356 = vector.extract_strided_slice %219 {offsets = [0, 0], sizes = [1, 16], strides = [1, 1]} : vector<2x16xf32> to vector<1x16xf32>
    %357 = arith.addf %356, %346 : vector<1x16xf32>
    %358 = arith.negf %357 : vector<1x16xf32>
    %359 = math.exp %358 : vector<1x16xf32>
    %cst_236 = arith.constant 1.000000e+00 : f32
    %360 = vector.broadcast %cst_236 : f32 to vector<1x16xf32>
    %361 = arith.addf %360, %359 : vector<1x16xf32>
    %362 = arith.divf %360, %361 : vector<1x16xf32>
    %363 = vector.extract_strided_slice %226 {offsets = [0, 0], sizes = [1, 16], strides = [1, 1]} : vector<2x16xf32> to vector<1x16xf32>
    %364 = arith.addf %363, %349 : vector<1x16xf32>
    %365 = arith.negf %364 : vector<1x16xf32>
    %366 = math.exp %365 : vector<1x16xf32>
    %cst_237 = arith.constant 1.000000e+00 : f32
    %367 = vector.broadcast %cst_237 : f32 to vector<1x16xf32>
    %368 = arith.addf %367, %366 : vector<1x16xf32>
    %369 = arith.divf %367, %368 : vector<1x16xf32>
    %370 = vector.extract_strided_slice %233 {offsets = [0, 0], sizes = [1, 16], strides = [1, 1]} : vector<2x16xf32> to vector<1x16xf32>
    %371 = arith.mulf %362, %355 : vector<1x16xf32>
    %372 = arith.addf %370, %371 : vector<1x16xf32>
    %373 = math.tanh %372 : vector<1x16xf32>
    %cst_238 = arith.constant 1.000000e+00 : f32
    %374 = vector.broadcast %cst_238 : f32 to vector<1x16xf32>
    %375 = arith.subf %374, %369 : vector<1x16xf32>
    %376 = arith.mulf %375, %373 : vector<1x16xf32>
    %377 = arith.mulf %369, %306 : vector<1x16xf32>
    %378 = arith.addf %376, %377 : vector<1x16xf32>
    %c0_239 = arith.constant 0 : index
    %c0_240 = arith.constant 0 : index
    %379 = vector.load %arg7[%c0_239, %c0_240] : memref<2x16xf32, #tpu.memory_space<vmem>>, vector<1x16xf32>
    tpu.vector_store %arg7[%c0_239, %c0_240], %378 {strides = array<i32>} : memref<2x16xf32, #tpu.memory_space<vmem>>, vector<1x16xf32>,
    %c0_241 = arith.constant 0 : index
    %c0_242 = arith.constant 0 : index
    %380 = vector.load %arg6[%c0_241, %c0_242] : memref<2x16xf32, #tpu.memory_space<vmem>>, vector<2x16xf32>
    %c0_243 = arith.constant 0 : index
    %c0_244 = arith.constant 0 : index
    %381 = vector.load %arg7[%c0_243, %c0_244] : memref<2x16xf32, #tpu.memory_space<vmem>>, vector<2x16xf32>
    %382 = tpu.concatenate %380, %381 in 1 : vector<2x16xf32>, vector<2x16xf32> -> vector<2x32xf32>
    %c0_245 = arith.constant 0 : index
    %c0_246 = arith.constant 0 : index
    %383 = vector.load %arg5[%c0_245, %c0_246] : memref<2x32xf32, #tpu.memory_space<vmem>>, vector<2x32xf32>
    tpu.vector_store %arg5[%c0_245, %c0_246], %382 {strides = array<i32>} : memref<2x32xf32, #tpu.memory_space<vmem>>, vector<2x32xf32>,
    return
  }
}

module attributes {stable_mosaic.version = 11 : i64} {
  func.func @_attn_pool_kernel(%arg0: memref<1x2x32xf32, #tpu.memory_space<vmem>>, %arg1: memref<32x32xf32, #tpu.memory_space<vmem>>, %arg2: memref<1x32xf32, #tpu.memory_space<vmem>>, %arg3: memref<1x32xf32, #tpu.memory_space<vmem>>, %arg4: memref<1x1xf32, #tpu.memory_space<vmem>>, %arg5: memref<1x1x32xf32, #tpu.memory_space<vmem>>) attributes {dimension_semantics = [], scalar_prefetch = 0 : i64, scratch_operands = 0 : i64, tpu.core_type = #tpu.core_type<tc>} {
    %c0 = arith.constant 0 : index
    %c0_0 = arith.constant 0 : index
    %c0_1 = arith.constant 0 : index
    %0 = vector.load %arg0[%c0, %c0_0, %c0_1] : memref<1x2x32xf32, #tpu.memory_space<vmem>>, vector<1x2x32xf32>
    %c0_2 = arith.constant 0 : index
    %c0_3 = arith.constant 0 : index
    %1 = vector.load %arg1[%c0_2, %c0_3] : memref<32x32xf32, #tpu.memory_space<vmem>>, vector<32x32xf32>
    %2 = vector.shape_cast %1 : vector<32x32xf32> to vector<1x32x32xf32>
    "tpu.trace_start"() <{level = 10 : i32, message = "bsd,bhd->bsh"}> : () -> ()
    %cst = arith.constant dense<0.000000e+00> : vector<1x2x32xf32>
    %3 = tpu.matmul %0, %2, %cst {dimension_numbers = #tpu.dot_dimension_numbers<[2], [2], [1], [1], [0, 0, 0, 1, 1, 1], [0], [0]>} : vector<1x2x32xf32>, vector<1x32x32xf32>, vector<1x2x32xf32> -> vector<1x2x32xf32>
    "tpu.trace_stop"() : () -> ()
    %c0_4 = arith.constant 0 : index
    %c0_5 = arith.constant 0 : index
    %4 = vector.load %arg2[%c0_4, %c0_5] : memref<1x32xf32, #tpu.memory_space<vmem>>, vector<1x32xf32>
    %5 = vector.shape_cast %4 : vector<1x32xf32> to vector<1x1x32xf32>
    %6 = vector.broadcast %5 : vector<1x1x32xf32> to vector<1x2x32xf32>
    %7 = arith.addf %3, %6 : vector<1x2x32xf32>
    %8 = math.tanh %7 : vector<1x2x32xf32>
    %c0_6 = arith.constant 0 : index
    %c0_7 = arith.constant 0 : index
    %9 = vector.load %arg3[%c0_6, %c0_7] : memref<1x32xf32, #tpu.memory_space<vmem>>, vector<1x32xf32>
    %10 = vector.shape_cast %9 : vector<1x32xf32> to vector<1x1x32xf32>
    %11 = vector.broadcast %10 : vector<1x1x32xf32> to vector<1x2x32xf32>
    %12 = arith.mulf %8, %11 : vector<1x2x32xf32>
    %cst_8 = arith.constant dense<0.000000e+00> : vector<1x2xf32>
    %13 = vector.multi_reduction <add>, %12, %cst_8 [2] : vector<1x2x32xf32> to vector<1x2xf32>
    %14 = vector.shape_cast %13 : vector<1x2xf32> to vector<1x2x1xf32>
    %c0_9 = arith.constant 0 : index
    %c0_10 = arith.constant 0 : index
    %15 = vector.load %arg4[%c0_9, %c0_10] : memref<1x1xf32, #tpu.memory_space<vmem>>, vector<1x1xf32>
    %16 = vector.shape_cast %15 : vector<1x1xf32> to vector<1x1x1xf32>
    %17 = vector.broadcast %16 : vector<1x1x1xf32> to vector<1x2x1xf32>
    %18 = arith.addf %14, %17 : vector<1x2x1xf32>
    %cst_11 = arith.constant dense<0xFF800000> : vector<1x1xf32>
    %19 = vector.multi_reduction <maximumf>, %18, %cst_11 [1] : vector<1x2x1xf32> to vector<1x1xf32>
    %20 = vector.shape_cast %19 : vector<1x1xf32> to vector<1x1x1xf32>
    %21 = vector.broadcast %20 : vector<1x1x1xf32> to vector<1x2x1xf32>
    %22 = arith.subf %18, %21 : vector<1x2x1xf32>
    %23 = math.exp %22 : vector<1x2x1xf32>
    %cst_12 = arith.constant dense<0.000000e+00> : vector<1x1xf32>
    %24 = vector.multi_reduction <add>, %23, %cst_12 [1] : vector<1x2x1xf32> to vector<1x1xf32>
    %25 = vector.shape_cast %24 : vector<1x1xf32> to vector<1x1x1xf32>
    %26 = tpu.reciprocal %25 {approx = true} : vector<1x1x1xf32> -> vector<1x1x1xf32>
    %27 = vector.broadcast %26 : vector<1x1x1xf32> to vector<1x2x1xf32>
    %28 = arith.mulf %23, %27 : vector<1x2x1xf32>
    %29 = vector.broadcast %28 : vector<1x2x1xf32> to vector<1x2x32xf32>
    %30 = arith.mulf %29, %0 : vector<1x2x32xf32>
    %cst_13 = arith.constant dense<0.000000e+00> : vector<1x32xf32>
    %31 = vector.multi_reduction <add>, %30, %cst_13 [1] : vector<1x2x32xf32> to vector<1x32xf32>
    %32 = vector.shape_cast %31 : vector<1x32xf32> to vector<1x1x32xf32>
    %c0_14 = arith.constant 0 : index
    %c0_15 = arith.constant 0 : index
    %c0_16 = arith.constant 0 : index
    %33 = vector.load %arg5[%c0_14, %c0_15, %c0_16] : memref<1x1x32xf32, #tpu.memory_space<vmem>>, vector<1x1x32xf32>
    tpu.vector_store %arg5[%c0_14, %c0_15, %c0_16], %32 {strides = array<i32>} : memref<1x1x32xf32, #tpu.memory_space<vmem>>, vector<1x1x32xf32>,
    return
  }
}

module attributes {stable_mosaic.version = 11 : i64} {
  func.func @kernel(%arg0: memref<6x32xf32, #tpu.memory_space<vmem>>, %arg1: memref<12x32x16xf32, #tpu.memory_space<vmem>>, %arg2: memref<12x16x16xf32, #tpu.memory_space<vmem>>, %arg3: memref<12x1x16xf32, #tpu.memory_space<vmem>>, %arg4: memref<4x1x16xf32, #tpu.memory_space<vmem>>, %arg5: memref<6x32xf32, #tpu.memory_space<vmem>>, %arg6: memref<6x16xf32, #tpu.memory_space<vmem>>, %arg7: memref<6x16xf32, #tpu.memory_space<vmem>>) attributes {dimension_semantics = [], scalar_prefetch = 0 : i64, scratch_operands = 2 : i64, tpu.core_type = #tpu.core_type<tc>} {
    %c0 = arith.constant 0 : index
    %c0_0 = arith.constant 0 : index
    %0 = vector.load %arg0[%c0, %c0_0] : memref<6x32xf32, #tpu.memory_space<vmem>>, vector<6x32xf32>
    %c0_1 = arith.constant 0 : index
    %c0_2 = arith.constant 0 : index
    %c0_3 = arith.constant 0 : index
    %1 = vector.load %arg1[%c0_1, %c0_2, %c0_3] : memref<12x32x16xf32, #tpu.memory_space<vmem>>, vector<1x32x16xf32>
    %2 = vector.shape_cast %1 : vector<1x32x16xf32> to vector<32x16xf32>
    %cst = arith.constant dense<0.000000e+00> : vector<6x16xf32>
    %3 = tpu.matmul %0, %2, %cst {dimension_numbers = #tpu.dot_dimension_numbers<[1], [0], [0], [1], [0, 0, 1, 1], [], []>} : vector<6x32xf32>, vector<32x16xf32>, vector<6x16xf32> -> vector<6x16xf32>
    %c0_4 = arith.constant 0 : index
    %c0_5 = arith.constant 0 : index
    %c0_6 = arith.constant 0 : index
    %4 = vector.load %arg3[%c0_4, %c0_5, %c0_6] : memref<12x1x16xf32, #tpu.memory_space<vmem>>, vector<1x1x16xf32>
    %5 = vector.shape_cast %4 : vector<1x1x16xf32> to vector<1x16xf32>
    %6 = vector.broadcast %5 : vector<1x16xf32> to vector<6x16xf32>
    %7 = arith.addf %3, %6 : vector<6x16xf32>
    %c1 = arith.constant 1 : index
    %c0_7 = arith.constant 0 : index
    %c0_8 = arith.constant 0 : index
    %8 = vector.load %arg1[%c1, %c0_7, %c0_8] : memref<12x32x16xf32, #tpu.memory_space<vmem>>, vector<1x32x16xf32>
    %9 = vector.shape_cast %8 : vector<1x32x16xf32> to vector<32x16xf32>
    %cst_9 = arith.constant dense<0.000000e+00> : vector<6x16xf32>
    %10 = tpu.matmul %0, %9, %cst_9 {dimension_numbers = #tpu.dot_dimension_numbers<[1], [0], [0], [1], [0, 0, 1, 1], [], []>} : vector<6x32xf32>, vector<32x16xf32>, vector<6x16xf32> -> vector<6x16xf32>
    %c1_10 = arith.constant 1 : index
    %c0_11 = arith.constant 0 : index
    %c0_12 = arith.constant 0 : index
    %11 = vector.load %arg3[%c1_10, %c0_11, %c0_12] : memref<12x1x16xf32, #tpu.memory_space<vmem>>, vector<1x1x16xf32>
    %12 = vector.shape_cast %11 : vector<1x1x16xf32> to vector<1x16xf32>
    %13 = vector.broadcast %12 : vector<1x16xf32> to vector<6x16xf32>
    %14 = arith.addf %10, %13 : vector<6x16xf32>
    %c2 = arith.constant 2 : index
    %c0_13 = arith.constant 0 : index
    %c0_14 = arith.constant 0 : index
    %15 = vector.load %arg1[%c2, %c0_13, %c0_14] : memref<12x32x16xf32, #tpu.memory_space<vmem>>, vector<1x32x16xf32>
    %16 = vector.shape_cast %15 : vector<1x32x16xf32> to vector<32x16xf32>
    %cst_15 = arith.constant dense<0.000000e+00> : vector<6x16xf32>
    %17 = tpu.matmul %0, %16, %cst_15 {dimension_numbers = #tpu.dot_dimension_numbers<[1], [0], [0], [1], [0, 0, 1, 1], [], []>} : vector<6x32xf32>, vector<32x16xf32>, vector<6x16xf32> -> vector<6x16xf32>
    %c2_16 = arith.constant 2 : index
    %c0_17 = arith.constant 0 : index
    %c0_18 = arith.constant 0 : index
    %18 = vector.load %arg3[%c2_16, %c0_17, %c0_18] : memref<12x1x16xf32, #tpu.memory_space<vmem>>, vector<1x1x16xf32>
    %19 = vector.shape_cast %18 : vector<1x1x16xf32> to vector<1x16xf32>
    %20 = vector.broadcast %19 : vector<1x16xf32> to vector<6x16xf32>
    %21 = arith.addf %17, %20 : vector<6x16xf32>
    %c3 = arith.constant 3 : index
    %c0_19 = arith.constant 0 : index
    %c0_20 = arith.constant 0 : index
    %22 = vector.load %arg1[%c3, %c0_19, %c0_20] : memref<12x32x16xf32, #tpu.memory_space<vmem>>, vector<1x32x16xf32>
    %23 = vector.shape_cast %22 : vector<1x32x16xf32> to vector<32x16xf32>
    %cst_21 = arith.constant dense<0.000000e+00> : vector<6x16xf32>
    %24 = tpu.matmul %0, %23, %cst_21 {dimension_numbers = #tpu.dot_dimension_numbers<[1], [0], [0], [1], [0, 0, 1, 1], [], []>} : vector<6x32xf32>, vector<32x16xf32>, vector<6x16xf32> -> vector<6x16xf32>
    %c3_22 = arith.constant 3 : index
    %c0_23 = arith.constant 0 : index
    %c0_24 = arith.constant 0 : index
    %25 = vector.load %arg3[%c3_22, %c0_23, %c0_24] : memref<12x1x16xf32, #tpu.memory_space<vmem>>, vector<1x1x16xf32>
    %26 = vector.shape_cast %25 : vector<1x1x16xf32> to vector<1x16xf32>
    %27 = vector.broadcast %26 : vector<1x16xf32> to vector<6x16xf32>
    %28 = arith.addf %24, %27 : vector<6x16xf32>
    %c4 = arith.constant 4 : index
    %c0_25 = arith.constant 0 : index
    %c0_26 = arith.constant 0 : index
    %29 = vector.load %arg1[%c4, %c0_25, %c0_26] : memref<12x32x16xf32, #tpu.memory_space<vmem>>, vector<1x32x16xf32>
    %30 = vector.shape_cast %29 : vector<1x32x16xf32> to vector<32x16xf32>
    %cst_27 = arith.constant dense<0.000000e+00> : vector<6x16xf32>
    %31 = tpu.matmul %0, %30, %cst_27 {dimension_numbers = #tpu.dot_dimension_numbers<[1], [0], [0], [1], [0, 0, 1, 1], [], []>} : vector<6x32xf32>, vector<32x16xf32>, vector<6x16xf32> -> vector<6x16xf32>
    %c4_28 = arith.constant 4 : index
    %c0_29 = arith.constant 0 : index
    %c0_30 = arith.constant 0 : index
    %32 = vector.load %arg3[%c4_28, %c0_29, %c0_30] : memref<12x1x16xf32, #tpu.memory_space<vmem>>, vector<1x1x16xf32>
    %33 = vector.shape_cast %32 : vector<1x1x16xf32> to vector<1x16xf32>
    %34 = vector.broadcast %33 : vector<1x16xf32> to vector<6x16xf32>
    %35 = arith.addf %31, %34 : vector<6x16xf32>
    %c5 = arith.constant 5 : index
    %c0_31 = arith.constant 0 : index
    %c0_32 = arith.constant 0 : index
    %36 = vector.load %arg1[%c5, %c0_31, %c0_32] : memref<12x32x16xf32, #tpu.memory_space<vmem>>, vector<1x32x16xf32>
    %37 = vector.shape_cast %36 : vector<1x32x16xf32> to vector<32x16xf32>
    %cst_33 = arith.constant dense<0.000000e+00> : vector<6x16xf32>
    %38 = tpu.matmul %0, %37, %cst_33 {dimension_numbers = #tpu.dot_dimension_numbers<[1], [0], [0], [1], [0, 0, 1, 1], [], []>} : vector<6x32xf32>, vector<32x16xf32>, vector<6x16xf32> -> vector<6x16xf32>
    %c5_34 = arith.constant 5 : index
    %c0_35 = arith.constant 0 : index
    %c0_36 = arith.constant 0 : index
    %39 = vector.load %arg3[%c5_34, %c0_35, %c0_36] : memref<12x1x16xf32, #tpu.memory_space<vmem>>, vector<1x1x16xf32>
    %40 = vector.shape_cast %39 : vector<1x1x16xf32> to vector<1x16xf32>
    %41 = vector.broadcast %40 : vector<1x16xf32> to vector<6x16xf32>
    %42 = arith.addf %38, %41 : vector<6x16xf32>
    %cst_37 = arith.constant 0.000000e+00 : f32
    %43 = vector.broadcast %cst_37 : f32 to vector<1x16xf32>
    %cst_38 = arith.constant 0.000000e+00 : f32
    %44 = vector.broadcast %cst_38 : f32 to vector<1x16xf32>
    %c0_39 = arith.constant 0 : index
    %c0_40 = arith.constant 0 : index
    %c0_41 = arith.constant 0 : index
    %45 = vector.load %arg2[%c0_39, %c0_40, %c0_41] : memref<12x16x16xf32, #tpu.memory_space<vmem>>, vector<1x16x16xf32>
    %46 = vector.shape_cast %45 : vector<1x16x16xf32> to vector<16x16xf32>
    %cst_42 = arith.constant dense<0.000000e+00> : vector<1x16xf32>
    %47 = tpu.matmul %43, %46, %cst_42 {dimension_numbers = #tpu.dot_dimension_numbers<[1], [0], [0], [1], [0, 0, 1, 1], [], []>} : vector<1x16xf32>, vector<16x16xf32>, vector<1x16xf32> -> vector<1x16xf32>
    %c1_43 = arith.constant 1 : index
    %c0_44 = arith.constant 0 : index
    %c0_45 = arith.constant 0 : index
    %48 = vector.load %arg2[%c1_43, %c0_44, %c0_45] : memref<12x16x16xf32, #tpu.memory_space<vmem>>, vector<1x16x16xf32>
    %49 = vector.shape_cast %48 : vector<1x16x16xf32> to vector<16x16xf32>
    %cst_46 = arith.constant dense<0.000000e+00> : vector<1x16xf32>
    %50 = tpu.matmul %43, %49, %cst_46 {dimension_numbers = #tpu.dot_dimension_numbers<[1], [0], [0], [1], [0, 0, 1, 1], [], []>} : vector<1x16xf32>, vector<16x16xf32>, vector<1x16xf32> -> vector<1x16xf32>
    %c2_47 = arith.constant 2 : index
    %c0_48 = arith.constant 0 : index
    %c0_49 = arith.constant 0 : index
    %51 = vector.load %arg2[%c2_47, %c0_48, %c0_49] : memref<12x16x16xf32, #tpu.memory_space<vmem>>, vector<1x16x16xf32>
    %52 = vector.shape_cast %51 : vector<1x16x16xf32> to vector<16x16xf32>
    %cst_50 = arith.constant dense<0.000000e+00> : vector<1x16xf32>
    %53 = tpu.matmul %43, %52, %cst_50 {dimension_numbers = #tpu.dot_dimension_numbers<[1], [0], [0], [1], [0, 0, 1, 1], [], []>} : vector<1x16xf32>, vector<16x16xf32>, vector<1x16xf32> -> vector<1x16xf32>
    %c0_51 = arith.constant 0 : index
    %c0_52 = arith.constant 0 : index
    %c0_53 = arith.constant 0 : index
    %54 = vector.load %arg4[%c0_51, %c0_52, %c0_53] : memref<4x1x16xf32, #tpu.memory_space<vmem>>, vector<1x1x16xf32>
    %55 = vector.shape_cast %54 : vector<1x1x16xf32> to vector<1x16xf32>
    %56 = arith.addf %53, %55 : vector<1x16xf32>
    %57 = vector.extract_strided_slice %7 {offsets = [0, 0], sizes = [1, 16], strides = [1, 1]} : vector<6x16xf32> to vector<1x16xf32>
    %58 = arith.addf %57, %47 : vector<1x16xf32>
    %59 = arith.negf %58 : vector<1x16xf32>
    %60 = math.exp %59 : vector<1x16xf32>
    %cst_54 = arith.constant 1.000000e+00 : f32
    %61 = vector.broadcast %cst_54 : f32 to vector<1x16xf32>
    %62 = arith.addf %61, %60 : vector<1x16xf32>
    %63 = arith.divf %61, %62 : vector<1x16xf32>
    %64 = vector.extract_strided_slice %14 {offsets = [0, 0], sizes = [1, 16], strides = [1, 1]} : vector<6x16xf32> to vector<1x16xf32>
    %65 = arith.addf %64, %50 : vector<1x16xf32>
    %66 = arith.negf %65 : vector<1x16xf32>
    %67 = math.exp %66 : vector<1x16xf32>
    %cst_55 = arith.constant 1.000000e+00 : f32
    %68 = vector.broadcast %cst_55 : f32 to vector<1x16xf32>
    %69 = arith.addf %68, %67 : vector<1x16xf32>
    %70 = arith.divf %68, %69 : vector<1x16xf32>
    %71 = vector.extract_strided_slice %21 {offsets = [0, 0], sizes = [1, 16], strides = [1, 1]} : vector<6x16xf32> to vector<1x16xf32>
    %72 = arith.mulf %63, %56 : vector<1x16xf32>
    %73 = arith.addf %71, %72 : vector<1x16xf32>
    %74 = math.tanh %73 : vector<1x16xf32>
    %cst_56 = arith.constant 1.000000e+00 : f32
    %75 = vector.broadcast %cst_56 : f32 to vector<1x16xf32>
    %76 = arith.subf %75, %70 : vector<1x16xf32>
    %77 = arith.mulf %76, %74 : vector<1x16xf32>
    %78 = arith.mulf %70, %43 : vector<1x16xf32>
    %79 = arith.addf %77, %78 : vector<1x16xf32>
    %c0_57 = arith.constant 0 : index
    %c0_58 = arith.constant 0 : index
    %80 = vector.load %arg6[%c0_57, %c0_58] : memref<6x16xf32, #tpu.memory_space<vmem>>, vector<1x16xf32>
    tpu.vector_store %arg6[%c0_57, %c0_58], %79 {strides = array<i32>} : memref<6x16xf32, #tpu.memory_space<vmem>>, vector<1x16xf32>,
    %c3_59 = arith.constant 3 : index
    %c0_60 = arith.constant 0 : index
    %c0_61 = arith.constant 0 : index
    %81 = vector.load %arg2[%c3_59, %c0_60, %c0_61] : memref<12x16x16xf32, #tpu.memory_space<vmem>>, vector<1x16x16xf32>
    %82 = vector.shape_cast %81 : vector<1x16x16xf32> to vector<16x16xf32>
    %cst_62 = arith.constant dense<0.000000e+00> : vector<1x16xf32>
    %83 = tpu.matmul %44, %82, %cst_62 {dimension_numbers = #tpu.dot_dimension_numbers<[1], [0], [0], [1], [0, 0, 1, 1], [], []>} : vector<1x16xf32>, vector<16x16xf32>, vector<1x16xf32> -> vector<1x16xf32>
    %c4_63 = arith.constant 4 : index
    %c0_64 = arith.constant 0 : index
    %c0_65 = arith.constant 0 : index
    %84 = vector.load %arg2[%c4_63, %c0_64, %c0_65] : memref<12x16x16xf32, #tpu.memory_space<vmem>>, vector<1x16x16xf32>
    %85 = vector.shape_cast %84 : vector<1x16x16xf32> to vector<16x16xf32>
    %cst_66 = arith.constant dense<0.000000e+00> : vector<1x16xf32>
    %86 = tpu.matmul %44, %85, %cst_66 {dimension_numbers = #tpu.dot_dimension_numbers<[1], [0], [0], [1], [0, 0, 1, 1], [], []>} : vector<1x16xf32>, vector<16x16xf32>, vector<1x16xf32> -> vector<1x16xf32>
    %c5_67 = arith.constant 5 : index
    %c0_68 = arith.constant 0 : index
    %c0_69 = arith.constant 0 : index
    %87 = vector.load %arg2[%c5_67, %c0_68, %c0_69] : memref<12x16x16xf32, #tpu.memory_space<vmem>>, vector<1x16x16xf32>
    %88 = vector.shape_cast %87 : vector<1x16x16xf32> to vector<16x16xf32>
    %cst_70 = arith.constant dense<0.000000e+00> : vector<1x16xf32>
    %89 = tpu.matmul %44, %88, %cst_70 {dimension_numbers = #tpu.dot_dimension_numbers<[1], [0], [0], [1], [0, 0, 1, 1], [], []>} : vector<1x16xf32>, vector<16x16xf32>, vector<1x16xf32> -> vector<1x16xf32>
    %c1_71 = arith.constant 1 : index
    %c0_72 = arith.constant 0 : index
    %c0_73 = arith.constant 0 : index
    %90 = vector.load %arg4[%c1_71, %c0_72, %c0_73] : memref<4x1x16xf32, #tpu.memory_space<vmem>>, vector<1x1x16xf32>
    %91 = vector.shape_cast %90 : vector<1x1x16xf32> to vector<1x16xf32>
    %92 = arith.addf %89, %91 : vector<1x16xf32>
    %93 = vector.extract_strided_slice %28 {offsets = [5, 0], sizes = [1, 16], strides = [1, 1]} : vector<6x16xf32> to vector<1x16xf32>
    %94 = arith.addf %93, %83 : vector<1x16xf32>
    %95 = arith.negf %94 : vector<1x16xf32>
    %96 = math.exp %95 : vector<1x16xf32>
    %cst_74 = arith.constant 1.000000e+00 : f32
    %97 = vector.broadcast %cst_74 : f32 to vector<1x16xf32>
    %98 = arith.addf %97, %96 : vector<1x16xf32>
    %99 = arith.divf %97, %98 : vector<1x16xf32>
    %100 = vector.extract_strided_slice %35 {offsets = [5, 0], sizes = [1, 16], strides = [1, 1]} : vector<6x16xf32> to vector<1x16xf32>
    %101 = arith.addf %100, %86 : vector<1x16xf32>
    %102 = arith.negf %101 : vector<1x16xf32>
    %103 = math.exp %102 : vector<1x16xf32>
    %cst_75 = arith.constant 1.000000e+00 : f32
    %104 = vector.broadcast %cst_75 : f32 to vector<1x16xf32>
    %105 = arith.addf %104, %103 : vector<1x16xf32>
    %106 = arith.divf %104, %105 : vector<1x16xf32>
    %107 = vector.extract_strided_slice %42 {offsets = [5, 0], sizes = [1, 16], strides = [1, 1]} : vector<6x16xf32> to vector<1x16xf32>
    %108 = arith.mulf %99, %92 : vector<1x16xf32>
    %109 = arith.addf %107, %108 : vector<1x16xf32>
    %110 = math.tanh %109 : vector<1x16xf32>
    %cst_76 = arith.constant 1.000000e+00 : f32
    %111 = vector.broadcast %cst_76 : f32 to vector<1x16xf32>
    %112 = arith.subf %111, %106 : vector<1x16xf32>
    %113 = arith.mulf %112, %110 : vector<1x16xf32>
    %114 = arith.mulf %106, %44 : vector<1x16xf32>
    %115 = arith.addf %113, %114 : vector<1x16xf32>
    %c5_77 = arith.constant 5 : index
    %c0_78 = arith.constant 0 : index
    %116 = vector.load %arg7[%c5_77, %c0_78] : memref<6x16xf32, #tpu.memory_space<vmem>>, vector<1x16xf32>
    tpu.vector_store %arg7[%c5_77, %c0_78], %115 {strides = array<i32>} : memref<6x16xf32, #tpu.memory_space<vmem>>, vector<1x16xf32>,
    %c0_79 = arith.constant 0 : index
    %c0_80 = arith.constant 0 : index
    %c0_81 = arith.constant 0 : index
    %117 = vector.load %arg2[%c0_79, %c0_80, %c0_81] : memref<12x16x16xf32, #tpu.memory_space<vmem>>, vector<1x16x16xf32>
    %118 = vector.shape_cast %117 : vector<1x16x16xf32> to vector<16x16xf32>
    %cst_82 = arith.constant dense<0.000000e+00> : vector<1x16xf32>
    %119 = tpu.matmul %79, %118, %cst_82 {dimension_numbers = #tpu.dot_dimension_numbers<[1], [0], [0], [1], [0, 0, 1, 1], [], []>} : vector<1x16xf32>, vector<16x16xf32>, vector<1x16xf32> -> vector<1x16xf32>
    %c1_83 = arith.constant 1 : index
    %c0_84 = arith.constant 0 : index
    %c0_85 = arith.constant 0 : index
    %120 = vector.load %arg2[%c1_83, %c0_84, %c0_85] : memref<12x16x16xf32, #tpu.memory_space<vmem>>, vector<1x16x16xf32>
    %121 = vector.shape_cast %120 : vector<1x16x16xf32> to vector<16x16xf32>
    %cst_86 = arith.constant dense<0.000000e+00> : vector<1x16xf32>
    %122 = tpu.matmul %79, %121, %cst_86 {dimension_numbers = #tpu.dot_dimension_numbers<[1], [0], [0], [1], [0, 0, 1, 1], [], []>} : vector<1x16xf32>, vector<16x16xf32>, vector<1x16xf32> -> vector<1x16xf32>
    %c2_87 = arith.constant 2 : index
    %c0_88 = arith.constant 0 : index
    %c0_89 = arith.constant 0 : index
    %123 = vector.load %arg2[%c2_87, %c0_88, %c0_89] : memref<12x16x16xf32, #tpu.memory_space<vmem>>, vector<1x16x16xf32>
    %124 = vector.shape_cast %123 : vector<1x16x16xf32> to vector<16x16xf32>
    %cst_90 = arith.constant dense<0.000000e+00> : vector<1x16xf32>
    %125 = tpu.matmul %79, %124, %cst_90 {dimension_numbers = #tpu.dot_dimension_numbers<[1], [0], [0], [1], [0, 0, 1, 1], [], []>} : vector<1x16xf32>, vector<16x16xf32>, vector<1x16xf32> -> vector<1x16xf32>
    %c0_91 = arith.constant 0 : index
    %c0_92 = arith.constant 0 : index
    %c0_93 = arith.constant 0 : index
    %126 = vector.load %arg4[%c0_91, %c0_92, %c0_93] : memref<4x1x16xf32, #tpu.memory_space<vmem>>, vector<1x1x16xf32>
    %127 = vector.shape_cast %126 : vector<1x1x16xf32> to vector<1x16xf32>
    %128 = arith.addf %125, %127 : vector<1x16xf32>
    %129 = vector.extract_strided_slice %7 {offsets = [1, 0], sizes = [1, 16], strides = [1, 1]} : vector<6x16xf32> to vector<1x16xf32>
    %130 = arith.addf %129, %119 : vector<1x16xf32>
    %131 = arith.negf %130 : vector<1x16xf32>
    %132 = math.exp %131 : vector<1x16xf32>
    %cst_94 = arith.constant 1.000000e+00 : f32
    %133 = vector.broadcast %cst_94 : f32 to vector<1x16xf32>
    %134 = arith.addf %133, %132 : vector<1x16xf32>
    %135 = arith.divf %133, %134 : vector<1x16xf32>
    %136 = vector.extract_strided_slice %14 {offsets = [1, 0], sizes = [1, 16], strides = [1, 1]} : vector<6x16xf32> to vector<1x16xf32>
    %137 = arith.addf %136, %122 : vector<1x16xf32>
    %138 = arith.negf %137 : vector<1x16xf32>
    %139 = math.exp %138 : vector<1x16xf32>
    %cst_95 = arith.constant 1.000000e+00 : f32
    %140 = vector.broadcast %cst_95 : f32 to vector<1x16xf32>
    %141 = arith.addf %140, %139 : vector<1x16xf32>
    %142 = arith.divf %140, %141 : vector<1x16xf32>
    %143 = vector.extract_strided_slice %21 {offsets = [1, 0], sizes = [1, 16], strides = [1, 1]} : vector<6x16xf32> to vector<1x16xf32>
    %144 = arith.mulf %135, %128 : vector<1x16xf32>
    %145 = arith.addf %143, %144 : vector<1x16xf32>
    %146 = math.tanh %145 : vector<1x16xf32>
    %cst_96 = arith.constant 1.000000e+00 : f32
    %147 = vector.broadcast %cst_96 : f32 to vector<1x16xf32>
    %148 = arith.subf %147, %142 : vector<1x16xf32>
    %149 = arith.mulf %148, %146 : vector<1x16xf32>
    %150 = arith.mulf %142, %79 : vector<1x16xf32>
    %151 = arith.addf %149, %150 : vector<1x16xf32>
    %c1_97 = arith.constant 1 : index
    %c0_98 = arith.constant 0 : index
    %152 = vector.load %arg6[%c1_97, %c0_98] : memref<6x16xf32, #tpu.memory_space<vmem>>, vector<1x16xf32>
    tpu.vector_store %arg6[%c1_97, %c0_98], %151 {strides = array<i32>} : memref<6x16xf32, #tpu.memory_space<vmem>>, vector<1x16xf32>,
    %c3_99 = arith.constant 3 : index
    %c0_100 = arith.constant 0 : index
    %c0_101 = arith.constant 0 : index
    %153 = vector.load %arg2[%c3_99, %c0_100, %c0_101] : memref<12x16x16xf32, #tpu.memory_space<vmem>>, vector<1x16x16xf32>
    %154 = vector.shape_cast %153 : vector<1x16x16xf32> to vector<16x16xf32>
    %cst_102 = arith.constant dense<0.000000e+00> : vector<1x16xf32>
    %155 = tpu.matmul %115, %154, %cst_102 {dimension_numbers = #tpu.dot_dimension_numbers<[1], [0], [0], [1], [0, 0, 1, 1], [], []>} : vector<1x16xf32>, vector<16x16xf32>, vector<1x16xf32> -> vector<1x16xf32>
    %c4_103 = arith.constant 4 : index
    %c0_104 = arith.constant 0 : index
    %c0_105 = arith.constant 0 : index
    %156 = vector.load %arg2[%c4_103, %c0_104, %c0_105] : memref<12x16x16xf32, #tpu.memory_space<vmem>>, vector<1x16x16xf32>
    %157 = vector.shape_cast %156 : vector<1x16x16xf32> to vector<16x16xf32>
    %cst_106 = arith.constant dense<0.000000e+00> : vector<1x16xf32>
    %158 = tpu.matmul %115, %157, %cst_106 {dimension_numbers = #tpu.dot_dimension_numbers<[1], [0], [0], [1], [0, 0, 1, 1], [], []>} : vector<1x16xf32>, vector<16x16xf32>, vector<1x16xf32> -> vector<1x16xf32>
    %c5_107 = arith.constant 5 : index
    %c0_108 = arith.constant 0 : index
    %c0_109 = arith.constant 0 : index
    %159 = vector.load %arg2[%c5_107, %c0_108, %c0_109] : memref<12x16x16xf32, #tpu.memory_space<vmem>>, vector<1x16x16xf32>
    %160 = vector.shape_cast %159 : vector<1x16x16xf32> to vector<16x16xf32>
    %cst_110 = arith.constant dense<0.000000e+00> : vector<1x16xf32>
    %161 = tpu.matmul %115, %160, %cst_110 {dimension_numbers = #tpu.dot_dimension_numbers<[1], [0], [0], [1], [0, 0, 1, 1], [], []>} : vector<1x16xf32>, vector<16x16xf32>, vector<1x16xf32> -> vector<1x16xf32>
    %c1_111 = arith.constant 1 : index
    %c0_112 = arith.constant 0 : index
    %c0_113 = arith.constant 0 : index
    %162 = vector.load %arg4[%c1_111, %c0_112, %c0_113] : memref<4x1x16xf32, #tpu.memory_space<vmem>>, vector<1x1x16xf32>
    %163 = vector.shape_cast %162 : vector<1x1x16xf32> to vector<1x16xf32>
    %164 = arith.addf %161, %163 : vector<1x16xf32>
    %165 = vector.extract_strided_slice %28 {offsets = [4, 0], sizes = [1, 16], strides = [1, 1]} : vector<6x16xf32> to vector<1x16xf32>
    %166 = arith.addf %165, %155 : vector<1x16xf32>
    %167 = arith.negf %166 : vector<1x16xf32>
    %168 = math.exp %167 : vector<1x16xf32>
    %cst_114 = arith.constant 1.000000e+00 : f32
    %169 = vector.broadcast %cst_114 : f32 to vector<1x16xf32>
    %170 = arith.addf %169, %168 : vector<1x16xf32>
    %171 = arith.divf %169, %170 : vector<1x16xf32>
    %172 = vector.extract_strided_slice %35 {offsets = [4, 0], sizes = [1, 16], strides = [1, 1]} : vector<6x16xf32> to vector<1x16xf32>
    %173 = arith.addf %172, %158 : vector<1x16xf32>
    %174 = arith.negf %173 : vector<1x16xf32>
    %175 = math.exp %174 : vector<1x16xf32>
    %cst_115 = arith.constant 1.000000e+00 : f32
    %176 = vector.broadcast %cst_115 : f32 to vector<1x16xf32>
    %177 = arith.addf %176, %175 : vector<1x16xf32>
    %178 = arith.divf %176, %177 : vector<1x16xf32>
    %179 = vector.extract_strided_slice %42 {offsets = [4, 0], sizes = [1, 16], strides = [1, 1]} : vector<6x16xf32> to vector<1x16xf32>
    %180 = arith.mulf %171, %164 : vector<1x16xf32>
    %181 = arith.addf %179, %180 : vector<1x16xf32>
    %182 = math.tanh %181 : vector<1x16xf32>
    %cst_116 = arith.constant 1.000000e+00 : f32
    %183 = vector.broadcast %cst_116 : f32 to vector<1x16xf32>
    %184 = arith.subf %183, %178 : vector<1x16xf32>
    %185 = arith.mulf %184, %182 : vector<1x16xf32>
    %186 = arith.mulf %178, %115 : vector<1x16xf32>
    %187 = arith.addf %185, %186 : vector<1x16xf32>
    %c4_117 = arith.constant 4 : index
    %c0_118 = arith.constant 0 : index
    %188 = vector.load %arg7[%c4_117, %c0_118] : memref<6x16xf32, #tpu.memory_space<vmem>>, vector<1x16xf32>
    tpu.vector_store %arg7[%c4_117, %c0_118], %187 {strides = array<i32>} : memref<6x16xf32, #tpu.memory_space<vmem>>, vector<1x16xf32>,
    %c0_119 = arith.constant 0 : index
    %c0_120 = arith.constant 0 : index
    %c0_121 = arith.constant 0 : index
    %189 = vector.load %arg2[%c0_119, %c0_120, %c0_121] : memref<12x16x16xf32, #tpu.memory_space<vmem>>, vector<1x16x16xf32>
    %190 = vector.shape_cast %189 : vector<1x16x16xf32> to vector<16x16xf32>
    %cst_122 = arith.constant dense<0.000000e+00> : vector<1x16xf32>
    %191 = tpu.matmul %151, %190, %cst_122 {dimension_numbers = #tpu.dot_dimension_numbers<[1], [0], [0], [1], [0, 0, 1, 1], [], []>} : vector<1x16xf32>, vector<16x16xf32>, vector<1x16xf32> -> vector<1x16xf32>
    %c1_123 = arith.constant 1 : index
    %c0_124 = arith.constant 0 : index
    %c0_125 = arith.constant 0 : index
    %192 = vector.load %arg2[%c1_123, %c0_124, %c0_125] : memref<12x16x16xf32, #tpu.memory_space<vmem>>, vector<1x16x16xf32>
    %193 = vector.shape_cast %192 : vector<1x16x16xf32> to vector<16x16xf32>
    %cst_126 = arith.constant dense<0.000000e+00> : vector<1x16xf32>
    %194 = tpu.matmul %151, %193, %cst_126 {dimension_numbers = #tpu.dot_dimension_numbers<[1], [0], [0], [1], [0, 0, 1, 1], [], []>} : vector<1x16xf32>, vector<16x16xf32>, vector<1x16xf32> -> vector<1x16xf32>
    %c2_127 = arith.constant 2 : index
    %c0_128 = arith.constant 0 : index
    %c0_129 = arith.constant 0 : index
    %195 = vector.load %arg2[%c2_127, %c0_128, %c0_129] : memref<12x16x16xf32, #tpu.memory_space<vmem>>, vector<1x16x16xf32>
    %196 = vector.shape_cast %195 : vector<1x16x16xf32> to vector<16x16xf32>
    %cst_130 = arith.constant dense<0.000000e+00> : vector<1x16xf32>
    %197 = tpu.matmul %151, %196, %cst_130 {dimension_numbers = #tpu.dot_dimension_numbers<[1], [0], [0], [1], [0, 0, 1, 1], [], []>} : vector<1x16xf32>, vector<16x16xf32>, vector<1x16xf32> -> vector<1x16xf32>
    %c0_131 = arith.constant 0 : index
    %c0_132 = arith.constant 0 : index
    %c0_133 = arith.constant 0 : index
    %198 = vector.load %arg4[%c0_131, %c0_132, %c0_133] : memref<4x1x16xf32, #tpu.memory_space<vmem>>, vector<1x1x16xf32>
    %199 = vector.shape_cast %198 : vector<1x1x16xf32> to vector<1x16xf32>
    %200 = arith.addf %197, %199 : vector<1x16xf32>
    %201 = vector.extract_strided_slice %7 {offsets = [2, 0], sizes = [1, 16], strides = [1, 1]} : vector<6x16xf32> to vector<1x16xf32>
    %202 = arith.addf %201, %191 : vector<1x16xf32>
    %203 = arith.negf %202 : vector<1x16xf32>
    %204 = math.exp %203 : vector<1x16xf32>
    %cst_134 = arith.constant 1.000000e+00 : f32
    %205 = vector.broadcast %cst_134 : f32 to vector<1x16xf32>
    %206 = arith.addf %205, %204 : vector<1x16xf32>
    %207 = arith.divf %205, %206 : vector<1x16xf32>
    %208 = vector.extract_strided_slice %14 {offsets = [2, 0], sizes = [1, 16], strides = [1, 1]} : vector<6x16xf32> to vector<1x16xf32>
    %209 = arith.addf %208, %194 : vector<1x16xf32>
    %210 = arith.negf %209 : vector<1x16xf32>
    %211 = math.exp %210 : vector<1x16xf32>
    %cst_135 = arith.constant 1.000000e+00 : f32
    %212 = vector.broadcast %cst_135 : f32 to vector<1x16xf32>
    %213 = arith.addf %212, %211 : vector<1x16xf32>
    %214 = arith.divf %212, %213 : vector<1x16xf32>
    %215 = vector.extract_strided_slice %21 {offsets = [2, 0], sizes = [1, 16], strides = [1, 1]} : vector<6x16xf32> to vector<1x16xf32>
    %216 = arith.mulf %207, %200 : vector<1x16xf32>
    %217 = arith.addf %215, %216 : vector<1x16xf32>
    %218 = math.tanh %217 : vector<1x16xf32>
    %cst_136 = arith.constant 1.000000e+00 : f32
    %219 = vector.broadcast %cst_136 : f32 to vector<1x16xf32>
    %220 = arith.subf %219, %214 : vector<1x16xf32>
    %221 = arith.mulf %220, %218 : vector<1x16xf32>
    %222 = arith.mulf %214, %151 : vector<1x16xf32>
    %223 = arith.addf %221, %222 : vector<1x16xf32>
    %c2_137 = arith.constant 2 : index
    %c0_138 = arith.constant 0 : index
    %224 = vector.load %arg6[%c2_137, %c0_138] : memref<6x16xf32, #tpu.memory_space<vmem>>, vector<1x16xf32>
    tpu.vector_store %arg6[%c2_137, %c0_138], %223 {strides = array<i32>} : memref<6x16xf32, #tpu.memory_space<vmem>>, vector<1x16xf32>,
    %c3_139 = arith.constant 3 : index
    %c0_140 = arith.constant 0 : index
    %c0_141 = arith.constant 0 : index
    %225 = vector.load %arg2[%c3_139, %c0_140, %c0_141] : memref<12x16x16xf32, #tpu.memory_space<vmem>>, vector<1x16x16xf32>
    %226 = vector.shape_cast %225 : vector<1x16x16xf32> to vector<16x16xf32>
    %cst_142 = arith.constant dense<0.000000e+00> : vector<1x16xf32>
    %227 = tpu.matmul %187, %226, %cst_142 {dimension_numbers = #tpu.dot_dimension_numbers<[1], [0], [0], [1], [0, 0, 1, 1], [], []>} : vector<1x16xf32>, vector<16x16xf32>, vector<1x16xf32> -> vector<1x16xf32>
    %c4_143 = arith.constant 4 : index
    %c0_144 = arith.constant 0 : index
    %c0_145 = arith.constant 0 : index
    %228 = vector.load %arg2[%c4_143, %c0_144, %c0_145] : memref<12x16x16xf32, #tpu.memory_space<vmem>>, vector<1x16x16xf32>
    %229 = vector.shape_cast %228 : vector<1x16x16xf32> to vector<16x16xf32>
    %cst_146 = arith.constant dense<0.000000e+00> : vector<1x16xf32>
    %230 = tpu.matmul %187, %229, %cst_146 {dimension_numbers = #tpu.dot_dimension_numbers<[1], [0], [0], [1], [0, 0, 1, 1], [], []>} : vector<1x16xf32>, vector<16x16xf32>, vector<1x16xf32> -> vector<1x16xf32>
    %c5_147 = arith.constant 5 : index
    %c0_148 = arith.constant 0 : index
    %c0_149 = arith.constant 0 : index
    %231 = vector.load %arg2[%c5_147, %c0_148, %c0_149] : memref<12x16x16xf32, #tpu.memory_space<vmem>>, vector<1x16x16xf32>
    %232 = vector.shape_cast %231 : vector<1x16x16xf32> to vector<16x16xf32>
    %cst_150 = arith.constant dense<0.000000e+00> : vector<1x16xf32>
    %233 = tpu.matmul %187, %232, %cst_150 {dimension_numbers = #tpu.dot_dimension_numbers<[1], [0], [0], [1], [0, 0, 1, 1], [], []>} : vector<1x16xf32>, vector<16x16xf32>, vector<1x16xf32> -> vector<1x16xf32>
    %c1_151 = arith.constant 1 : index
    %c0_152 = arith.constant 0 : index
    %c0_153 = arith.constant 0 : index
    %234 = vector.load %arg4[%c1_151, %c0_152, %c0_153] : memref<4x1x16xf32, #tpu.memory_space<vmem>>, vector<1x1x16xf32>
    %235 = vector.shape_cast %234 : vector<1x1x16xf32> to vector<1x16xf32>
    %236 = arith.addf %233, %235 : vector<1x16xf32>
    %237 = vector.extract_strided_slice %28 {offsets = [3, 0], sizes = [1, 16], strides = [1, 1]} : vector<6x16xf32> to vector<1x16xf32>
    %238 = arith.addf %237, %227 : vector<1x16xf32>
    %239 = arith.negf %238 : vector<1x16xf32>
    %240 = math.exp %239 : vector<1x16xf32>
    %cst_154 = arith.constant 1.000000e+00 : f32
    %241 = vector.broadcast %cst_154 : f32 to vector<1x16xf32>
    %242 = arith.addf %241, %240 : vector<1x16xf32>
    %243 = arith.divf %241, %242 : vector<1x16xf32>
    %244 = vector.extract_strided_slice %35 {offsets = [3, 0], sizes = [1, 16], strides = [1, 1]} : vector<6x16xf32> to vector<1x16xf32>
    %245 = arith.addf %244, %230 : vector<1x16xf32>
    %246 = arith.negf %245 : vector<1x16xf32>
    %247 = math.exp %246 : vector<1x16xf32>
    %cst_155 = arith.constant 1.000000e+00 : f32
    %248 = vector.broadcast %cst_155 : f32 to vector<1x16xf32>
    %249 = arith.addf %248, %247 : vector<1x16xf32>
    %250 = arith.divf %248, %249 : vector<1x16xf32>
    %251 = vector.extract_strided_slice %42 {offsets = [3, 0], sizes = [1, 16], strides = [1, 1]} : vector<6x16xf32> to vector<1x16xf32>
    %252 = arith.mulf %243, %236 : vector<1x16xf32>
    %253 = arith.addf %251, %252 : vector<1x16xf32>
    %254 = math.tanh %253 : vector<1x16xf32>
    %cst_156 = arith.constant 1.000000e+00 : f32
    %255 = vector.broadcast %cst_156 : f32 to vector<1x16xf32>
    %256 = arith.subf %255, %250 : vector<1x16xf32>
    %257 = arith.mulf %256, %254 : vector<1x16xf32>
    %258 = arith.mulf %250, %187 : vector<1x16xf32>
    %259 = arith.addf %257, %258 : vector<1x16xf32>
    %c3_157 = arith.constant 3 : index
    %c0_158 = arith.constant 0 : index
    %260 = vector.load %arg7[%c3_157, %c0_158] : memref<6x16xf32, #tpu.memory_space<vmem>>, vector<1x16xf32>
    tpu.vector_store %arg7[%c3_157, %c0_158], %259 {strides = array<i32>} : memref<6x16xf32, #tpu.memory_space<vmem>>, vector<1x16xf32>,
    %c0_159 = arith.constant 0 : index
    %c0_160 = arith.constant 0 : index
    %c0_161 = arith.constant 0 : index
    %261 = vector.load %arg2[%c0_159, %c0_160, %c0_161] : memref<12x16x16xf32, #tpu.memory_space<vmem>>, vector<1x16x16xf32>
    %262 = vector.shape_cast %261 : vector<1x16x16xf32> to vector<16x16xf32>
    %cst_162 = arith.constant dense<0.000000e+00> : vector<1x16xf32>
    %263 = tpu.matmul %223, %262, %cst_162 {dimension_numbers = #tpu.dot_dimension_numbers<[1], [0], [0], [1], [0, 0, 1, 1], [], []>} : vector<1x16xf32>, vector<16x16xf32>, vector<1x16xf32> -> vector<1x16xf32>
    %c1_163 = arith.constant 1 : index
    %c0_164 = arith.constant 0 : index
    %c0_165 = arith.constant 0 : index
    %264 = vector.load %arg2[%c1_163, %c0_164, %c0_165] : memref<12x16x16xf32, #tpu.memory_space<vmem>>, vector<1x16x16xf32>
    %265 = vector.shape_cast %264 : vector<1x16x16xf32> to vector<16x16xf32>
    %cst_166 = arith.constant dense<0.000000e+00> : vector<1x16xf32>
    %266 = tpu.matmul %223, %265, %cst_166 {dimension_numbers = #tpu.dot_dimension_numbers<[1], [0], [0], [1], [0, 0, 1, 1], [], []>} : vector<1x16xf32>, vector<16x16xf32>, vector<1x16xf32> -> vector<1x16xf32>
    %c2_167 = arith.constant 2 : index
    %c0_168 = arith.constant 0 : index
    %c0_169 = arith.constant 0 : index
    %267 = vector.load %arg2[%c2_167, %c0_168, %c0_169] : memref<12x16x16xf32, #tpu.memory_space<vmem>>, vector<1x16x16xf32>
    %268 = vector.shape_cast %267 : vector<1x16x16xf32> to vector<16x16xf32>
    %cst_170 = arith.constant dense<0.000000e+00> : vector<1x16xf32>
    %269 = tpu.matmul %223, %268, %cst_170 {dimension_numbers = #tpu.dot_dimension_numbers<[1], [0], [0], [1], [0, 0, 1, 1], [], []>} : vector<1x16xf32>, vector<16x16xf32>, vector<1x16xf32> -> vector<1x16xf32>
    %c0_171 = arith.constant 0 : index
    %c0_172 = arith.constant 0 : index
    %c0_173 = arith.constant 0 : index
    %270 = vector.load %arg4[%c0_171, %c0_172, %c0_173] : memref<4x1x16xf32, #tpu.memory_space<vmem>>, vector<1x1x16xf32>
    %271 = vector.shape_cast %270 : vector<1x1x16xf32> to vector<1x16xf32>
    %272 = arith.addf %269, %271 : vector<1x16xf32>
    %273 = vector.extract_strided_slice %7 {offsets = [3, 0], sizes = [1, 16], strides = [1, 1]} : vector<6x16xf32> to vector<1x16xf32>
    %274 = arith.addf %273, %263 : vector<1x16xf32>
    %275 = arith.negf %274 : vector<1x16xf32>
    %276 = math.exp %275 : vector<1x16xf32>
    %cst_174 = arith.constant 1.000000e+00 : f32
    %277 = vector.broadcast %cst_174 : f32 to vector<1x16xf32>
    %278 = arith.addf %277, %276 : vector<1x16xf32>
    %279 = arith.divf %277, %278 : vector<1x16xf32>
    %280 = vector.extract_strided_slice %14 {offsets = [3, 0], sizes = [1, 16], strides = [1, 1]} : vector<6x16xf32> to vector<1x16xf32>
    %281 = arith.addf %280, %266 : vector<1x16xf32>
    %282 = arith.negf %281 : vector<1x16xf32>
    %283 = math.exp %282 : vector<1x16xf32>
    %cst_175 = arith.constant 1.000000e+00 : f32
    %284 = vector.broadcast %cst_175 : f32 to vector<1x16xf32>
    %285 = arith.addf %284, %283 : vector<1x16xf32>
    %286 = arith.divf %284, %285 : vector<1x16xf32>
    %287 = vector.extract_strided_slice %21 {offsets = [3, 0], sizes = [1, 16], strides = [1, 1]} : vector<6x16xf32> to vector<1x16xf32>
    %288 = arith.mulf %279, %272 : vector<1x16xf32>
    %289 = arith.addf %287, %288 : vector<1x16xf32>
    %290 = math.tanh %289 : vector<1x16xf32>
    %cst_176 = arith.constant 1.000000e+00 : f32
    %291 = vector.broadcast %cst_176 : f32 to vector<1x16xf32>
    %292 = arith.subf %291, %286 : vector<1x16xf32>
    %293 = arith.mulf %292, %290 : vector<1x16xf32>
    %294 = arith.mulf %286, %223 : vector<1x16xf32>
    %295 = arith.addf %293, %294 : vector<1x16xf32>
    %c3_177 = arith.constant 3 : index
    %c0_178 = arith.constant 0 : index
    %296 = vector.load %arg6[%c3_177, %c0_178] : memref<6x16xf32, #tpu.memory_space<vmem>>, vector<1x16xf32>
    tpu.vector_store %arg6[%c3_177, %c0_178], %295 {strides = array<i32>} : memref<6x16xf32, #tpu.memory_space<vmem>>, vector<1x16xf32>,
    %c3_179 = arith.constant 3 : index
    %c0_180 = arith.constant 0 : index
    %c0_181 = arith.constant 0 : index
    %297 = vector.load %arg2[%c3_179, %c0_180, %c0_181] : memref<12x16x16xf32, #tpu.memory_space<vmem>>, vector<1x16x16xf32>
    %298 = vector.shape_cast %297 : vector<1x16x16xf32> to vector<16x16xf32>
    %cst_182 = arith.constant dense<0.000000e+00> : vector<1x16xf32>
    %299 = tpu.matmul %259, %298, %cst_182 {dimension_numbers = #tpu.dot_dimension_numbers<[1], [0], [0], [1], [0, 0, 1, 1], [], []>} : vector<1x16xf32>, vector<16x16xf32>, vector<1x16xf32> -> vector<1x16xf32>
    %c4_183 = arith.constant 4 : index
    %c0_184 = arith.constant 0 : index
    %c0_185 = arith.constant 0 : index
    %300 = vector.load %arg2[%c4_183, %c0_184, %c0_185] : memref<12x16x16xf32, #tpu.memory_space<vmem>>, vector<1x16x16xf32>
    %301 = vector.shape_cast %300 : vector<1x16x16xf32> to vector<16x16xf32>
    %cst_186 = arith.constant dense<0.000000e+00> : vector<1x16xf32>
    %302 = tpu.matmul %259, %301, %cst_186 {dimension_numbers = #tpu.dot_dimension_numbers<[1], [0], [0], [1], [0, 0, 1, 1], [], []>} : vector<1x16xf32>, vector<16x16xf32>, vector<1x16xf32> -> vector<1x16xf32>
    %c5_187 = arith.constant 5 : index
    %c0_188 = arith.constant 0 : index
    %c0_189 = arith.constant 0 : index
    %303 = vector.load %arg2[%c5_187, %c0_188, %c0_189] : memref<12x16x16xf32, #tpu.memory_space<vmem>>, vector<1x16x16xf32>
    %304 = vector.shape_cast %303 : vector<1x16x16xf32> to vector<16x16xf32>
    %cst_190 = arith.constant dense<0.000000e+00> : vector<1x16xf32>
    %305 = tpu.matmul %259, %304, %cst_190 {dimension_numbers = #tpu.dot_dimension_numbers<[1], [0], [0], [1], [0, 0, 1, 1], [], []>} : vector<1x16xf32>, vector<16x16xf32>, vector<1x16xf32> -> vector<1x16xf32>
    %c1_191 = arith.constant 1 : index
    %c0_192 = arith.constant 0 : index
    %c0_193 = arith.constant 0 : index
    %306 = vector.load %arg4[%c1_191, %c0_192, %c0_193] : memref<4x1x16xf32, #tpu.memory_space<vmem>>, vector<1x1x16xf32>
    %307 = vector.shape_cast %306 : vector<1x1x16xf32> to vector<1x16xf32>
    %308 = arith.addf %305, %307 : vector<1x16xf32>
    %309 = vector.extract_strided_slice %28 {offsets = [2, 0], sizes = [1, 16], strides = [1, 1]} : vector<6x16xf32> to vector<1x16xf32>
    %310 = arith.addf %309, %299 : vector<1x16xf32>
    %311 = arith.negf %310 : vector<1x16xf32>
    %312 = math.exp %311 : vector<1x16xf32>
    %cst_194 = arith.constant 1.000000e+00 : f32
    %313 = vector.broadcast %cst_194 : f32 to vector<1x16xf32>
    %314 = arith.addf %313, %312 : vector<1x16xf32>
    %315 = arith.divf %313, %314 : vector<1x16xf32>
    %316 = vector.extract_strided_slice %35 {offsets = [2, 0], sizes = [1, 16], strides = [1, 1]} : vector<6x16xf32> to vector<1x16xf32>
    %317 = arith.addf %316, %302 : vector<1x16xf32>
    %318 = arith.negf %317 : vector<1x16xf32>
    %319 = math.exp %318 : vector<1x16xf32>
    %cst_195 = arith.constant 1.000000e+00 : f32
    %320 = vector.broadcast %cst_195 : f32 to vector<1x16xf32>
    %321 = arith.addf %320, %319 : vector<1x16xf32>
    %322 = arith.divf %320, %321 : vector<1x16xf32>
    %323 = vector.extract_strided_slice %42 {offsets = [2, 0], sizes = [1, 16], strides = [1, 1]} : vector<6x16xf32> to vector<1x16xf32>
    %324 = arith.mulf %315, %308 : vector<1x16xf32>
    %325 = arith.addf %323, %324 : vector<1x16xf32>
    %326 = math.tanh %325 : vector<1x16xf32>
    %cst_196 = arith.constant 1.000000e+00 : f32
    %327 = vector.broadcast %cst_196 : f32 to vector<1x16xf32>
    %328 = arith.subf %327, %322 : vector<1x16xf32>
    %329 = arith.mulf %328, %326 : vector<1x16xf32>
    %330 = arith.mulf %322, %259 : vector<1x16xf32>
    %331 = arith.addf %329, %330 : vector<1x16xf32>
    %c2_197 = arith.constant 2 : index
    %c0_198 = arith.constant 0 : index
    %332 = vector.load %arg7[%c2_197, %c0_198] : memref<6x16xf32, #tpu.memory_space<vmem>>, vector<1x16xf32>
    tpu.vector_store %arg7[%c2_197, %c0_198], %331 {strides = array<i32>} : memref<6x16xf32, #tpu.memory_space<vmem>>, vector<1x16xf32>,
    %c0_199 = arith.constant 0 : index
    %c0_200 = arith.constant 0 : index
    %c0_201 = arith.constant 0 : index
    %333 = vector.load %arg2[%c0_199, %c0_200, %c0_201] : memref<12x16x16xf32, #tpu.memory_space<vmem>>, vector<1x16x16xf32>
    %334 = vector.shape_cast %333 : vector<1x16x16xf32> to vector<16x16xf32>
    %cst_202 = arith.constant dense<0.000000e+00> : vector<1x16xf32>
    %335 = tpu.matmul %295, %334, %cst_202 {dimension_numbers = #tpu.dot_dimension_numbers<[1], [0], [0], [1], [0, 0, 1, 1], [], []>} : vector<1x16xf32>, vector<16x16xf32>, vector<1x16xf32> -> vector<1x16xf32>
    %c1_203 = arith.constant 1 : index
    %c0_204 = arith.constant 0 : index
    %c0_205 = arith.constant 0 : index
    %336 = vector.load %arg2[%c1_203, %c0_204, %c0_205] : memref<12x16x16xf32, #tpu.memory_space<vmem>>, vector<1x16x16xf32>
    %337 = vector.shape_cast %336 : vector<1x16x16xf32> to vector<16x16xf32>
    %cst_206 = arith.constant dense<0.000000e+00> : vector<1x16xf32>
    %338 = tpu.matmul %295, %337, %cst_206 {dimension_numbers = #tpu.dot_dimension_numbers<[1], [0], [0], [1], [0, 0, 1, 1], [], []>} : vector<1x16xf32>, vector<16x16xf32>, vector<1x16xf32> -> vector<1x16xf32>
    %c2_207 = arith.constant 2 : index
    %c0_208 = arith.constant 0 : index
    %c0_209 = arith.constant 0 : index
    %339 = vector.load %arg2[%c2_207, %c0_208, %c0_209] : memref<12x16x16xf32, #tpu.memory_space<vmem>>, vector<1x16x16xf32>
    %340 = vector.shape_cast %339 : vector<1x16x16xf32> to vector<16x16xf32>
    %cst_210 = arith.constant dense<0.000000e+00> : vector<1x16xf32>
    %341 = tpu.matmul %295, %340, %cst_210 {dimension_numbers = #tpu.dot_dimension_numbers<[1], [0], [0], [1], [0, 0, 1, 1], [], []>} : vector<1x16xf32>, vector<16x16xf32>, vector<1x16xf32> -> vector<1x16xf32>
    %c0_211 = arith.constant 0 : index
    %c0_212 = arith.constant 0 : index
    %c0_213 = arith.constant 0 : index
    %342 = vector.load %arg4[%c0_211, %c0_212, %c0_213] : memref<4x1x16xf32, #tpu.memory_space<vmem>>, vector<1x1x16xf32>
    %343 = vector.shape_cast %342 : vector<1x1x16xf32> to vector<1x16xf32>
    %344 = arith.addf %341, %343 : vector<1x16xf32>
    %345 = vector.extract_strided_slice %7 {offsets = [4, 0], sizes = [1, 16], strides = [1, 1]} : vector<6x16xf32> to vector<1x16xf32>
    %346 = arith.addf %345, %335 : vector<1x16xf32>
    %347 = arith.negf %346 : vector<1x16xf32>
    %348 = math.exp %347 : vector<1x16xf32>
    %cst_214 = arith.constant 1.000000e+00 : f32
    %349 = vector.broadcast %cst_214 : f32 to vector<1x16xf32>
    %350 = arith.addf %349, %348 : vector<1x16xf32>
    %351 = arith.divf %349, %350 : vector<1x16xf32>
    %352 = vector.extract_strided_slice %14 {offsets = [4, 0], sizes = [1, 16], strides = [1, 1]} : vector<6x16xf32> to vector<1x16xf32>
    %353 = arith.addf %352, %338 : vector<1x16xf32>
    %354 = arith.negf %353 : vector<1x16xf32>
    %355 = math.exp %354 : vector<1x16xf32>
    %cst_215 = arith.constant 1.000000e+00 : f32
    %356 = vector.broadcast %cst_215 : f32 to vector<1x16xf32>
    %357 = arith.addf %356, %355 : vector<1x16xf32>
    %358 = arith.divf %356, %357 : vector<1x16xf32>
    %359 = vector.extract_strided_slice %21 {offsets = [4, 0], sizes = [1, 16], strides = [1, 1]} : vector<6x16xf32> to vector<1x16xf32>
    %360 = arith.mulf %351, %344 : vector<1x16xf32>
    %361 = arith.addf %359, %360 : vector<1x16xf32>
    %362 = math.tanh %361 : vector<1x16xf32>
    %cst_216 = arith.constant 1.000000e+00 : f32
    %363 = vector.broadcast %cst_216 : f32 to vector<1x16xf32>
    %364 = arith.subf %363, %358 : vector<1x16xf32>
    %365 = arith.mulf %364, %362 : vector<1x16xf32>
    %366 = arith.mulf %358, %295 : vector<1x16xf32>
    %367 = arith.addf %365, %366 : vector<1x16xf32>
    %c4_217 = arith.constant 4 : index
    %c0_218 = arith.constant 0 : index
    %368 = vector.load %arg6[%c4_217, %c0_218] : memref<6x16xf32, #tpu.memory_space<vmem>>, vector<1x16xf32>
    tpu.vector_store %arg6[%c4_217, %c0_218], %367 {strides = array<i32>} : memref<6x16xf32, #tpu.memory_space<vmem>>, vector<1x16xf32>,
    %c3_219 = arith.constant 3 : index
    %c0_220 = arith.constant 0 : index
    %c0_221 = arith.constant 0 : index
    %369 = vector.load %arg2[%c3_219, %c0_220, %c0_221] : memref<12x16x16xf32, #tpu.memory_space<vmem>>, vector<1x16x16xf32>
    %370 = vector.shape_cast %369 : vector<1x16x16xf32> to vector<16x16xf32>
    %cst_222 = arith.constant dense<0.000000e+00> : vector<1x16xf32>
    %371 = tpu.matmul %331, %370, %cst_222 {dimension_numbers = #tpu.dot_dimension_numbers<[1], [0], [0], [1], [0, 0, 1, 1], [], []>} : vector<1x16xf32>, vector<16x16xf32>, vector<1x16xf32> -> vector<1x16xf32>
    %c4_223 = arith.constant 4 : index
    %c0_224 = arith.constant 0 : index
    %c0_225 = arith.constant 0 : index
    %372 = vector.load %arg2[%c4_223, %c0_224, %c0_225] : memref<12x16x16xf32, #tpu.memory_space<vmem>>, vector<1x16x16xf32>
    %373 = vector.shape_cast %372 : vector<1x16x16xf32> to vector<16x16xf32>
    %cst_226 = arith.constant dense<0.000000e+00> : vector<1x16xf32>
    %374 = tpu.matmul %331, %373, %cst_226 {dimension_numbers = #tpu.dot_dimension_numbers<[1], [0], [0], [1], [0, 0, 1, 1], [], []>} : vector<1x16xf32>, vector<16x16xf32>, vector<1x16xf32> -> vector<1x16xf32>
    %c5_227 = arith.constant 5 : index
    %c0_228 = arith.constant 0 : index
    %c0_229 = arith.constant 0 : index
    %375 = vector.load %arg2[%c5_227, %c0_228, %c0_229] : memref<12x16x16xf32, #tpu.memory_space<vmem>>, vector<1x16x16xf32>
    %376 = vector.shape_cast %375 : vector<1x16x16xf32> to vector<16x16xf32>
    %cst_230 = arith.constant dense<0.000000e+00> : vector<1x16xf32>
    %377 = tpu.matmul %331, %376, %cst_230 {dimension_numbers = #tpu.dot_dimension_numbers<[1], [0], [0], [1], [0, 0, 1, 1], [], []>} : vector<1x16xf32>, vector<16x16xf32>, vector<1x16xf32> -> vector<1x16xf32>
    %c1_231 = arith.constant 1 : index
    %c0_232 = arith.constant 0 : index
    %c0_233 = arith.constant 0 : index
    %378 = vector.load %arg4[%c1_231, %c0_232, %c0_233] : memref<4x1x16xf32, #tpu.memory_space<vmem>>, vector<1x1x16xf32>
    %379 = vector.shape_cast %378 : vector<1x1x16xf32> to vector<1x16xf32>
    %380 = arith.addf %377, %379 : vector<1x16xf32>
    %381 = vector.extract_strided_slice %28 {offsets = [1, 0], sizes = [1, 16], strides = [1, 1]} : vector<6x16xf32> to vector<1x16xf32>
    %382 = arith.addf %381, %371 : vector<1x16xf32>
    %383 = arith.negf %382 : vector<1x16xf32>
    %384 = math.exp %383 : vector<1x16xf32>
    %cst_234 = arith.constant 1.000000e+00 : f32
    %385 = vector.broadcast %cst_234 : f32 to vector<1x16xf32>
    %386 = arith.addf %385, %384 : vector<1x16xf32>
    %387 = arith.divf %385, %386 : vector<1x16xf32>
    %388 = vector.extract_strided_slice %35 {offsets = [1, 0], sizes = [1, 16], strides = [1, 1]} : vector<6x16xf32> to vector<1x16xf32>
    %389 = arith.addf %388, %374 : vector<1x16xf32>
    %390 = arith.negf %389 : vector<1x16xf32>
    %391 = math.exp %390 : vector<1x16xf32>
    %cst_235 = arith.constant 1.000000e+00 : f32
    %392 = vector.broadcast %cst_235 : f32 to vector<1x16xf32>
    %393 = arith.addf %392, %391 : vector<1x16xf32>
    %394 = arith.divf %392, %393 : vector<1x16xf32>
    %395 = vector.extract_strided_slice %42 {offsets = [1, 0], sizes = [1, 16], strides = [1, 1]} : vector<6x16xf32> to vector<1x16xf32>
    %396 = arith.mulf %387, %380 : vector<1x16xf32>
    %397 = arith.addf %395, %396 : vector<1x16xf32>
    %398 = math.tanh %397 : vector<1x16xf32>
    %cst_236 = arith.constant 1.000000e+00 : f32
    %399 = vector.broadcast %cst_236 : f32 to vector<1x16xf32>
    %400 = arith.subf %399, %394 : vector<1x16xf32>
    %401 = arith.mulf %400, %398 : vector<1x16xf32>
    %402 = arith.mulf %394, %331 : vector<1x16xf32>
    %403 = arith.addf %401, %402 : vector<1x16xf32>
    %c1_237 = arith.constant 1 : index
    %c0_238 = arith.constant 0 : index
    %404 = vector.load %arg7[%c1_237, %c0_238] : memref<6x16xf32, #tpu.memory_space<vmem>>, vector<1x16xf32>
    tpu.vector_store %arg7[%c1_237, %c0_238], %403 {strides = array<i32>} : memref<6x16xf32, #tpu.memory_space<vmem>>, vector<1x16xf32>,
    %c0_239 = arith.constant 0 : index
    %c0_240 = arith.constant 0 : index
    %c0_241 = arith.constant 0 : index
    %405 = vector.load %arg2[%c0_239, %c0_240, %c0_241] : memref<12x16x16xf32, #tpu.memory_space<vmem>>, vector<1x16x16xf32>
    %406 = vector.shape_cast %405 : vector<1x16x16xf32> to vector<16x16xf32>
    %cst_242 = arith.constant dense<0.000000e+00> : vector<1x16xf32>
    %407 = tpu.matmul %367, %406, %cst_242 {dimension_numbers = #tpu.dot_dimension_numbers<[1], [0], [0], [1], [0, 0, 1, 1], [], []>} : vector<1x16xf32>, vector<16x16xf32>, vector<1x16xf32> -> vector<1x16xf32>
    %c1_243 = arith.constant 1 : index
    %c0_244 = arith.constant 0 : index
    %c0_245 = arith.constant 0 : index
    %408 = vector.load %arg2[%c1_243, %c0_244, %c0_245] : memref<12x16x16xf32, #tpu.memory_space<vmem>>, vector<1x16x16xf32>
    %409 = vector.shape_cast %408 : vector<1x16x16xf32> to vector<16x16xf32>
    %cst_246 = arith.constant dense<0.000000e+00> : vector<1x16xf32>
    %410 = tpu.matmul %367, %409, %cst_246 {dimension_numbers = #tpu.dot_dimension_numbers<[1], [0], [0], [1], [0, 0, 1, 1], [], []>} : vector<1x16xf32>, vector<16x16xf32>, vector<1x16xf32> -> vector<1x16xf32>
    %c2_247 = arith.constant 2 : index
    %c0_248 = arith.constant 0 : index
    %c0_249 = arith.constant 0 : index
    %411 = vector.load %arg2[%c2_247, %c0_248, %c0_249] : memref<12x16x16xf32, #tpu.memory_space<vmem>>, vector<1x16x16xf32>
    %412 = vector.shape_cast %411 : vector<1x16x16xf32> to vector<16x16xf32>
    %cst_250 = arith.constant dense<0.000000e+00> : vector<1x16xf32>
    %413 = tpu.matmul %367, %412, %cst_250 {dimension_numbers = #tpu.dot_dimension_numbers<[1], [0], [0], [1], [0, 0, 1, 1], [], []>} : vector<1x16xf32>, vector<16x16xf32>, vector<1x16xf32> -> vector<1x16xf32>
    %c0_251 = arith.constant 0 : index
    %c0_252 = arith.constant 0 : index
    %c0_253 = arith.constant 0 : index
    %414 = vector.load %arg4[%c0_251, %c0_252, %c0_253] : memref<4x1x16xf32, #tpu.memory_space<vmem>>, vector<1x1x16xf32>
    %415 = vector.shape_cast %414 : vector<1x1x16xf32> to vector<1x16xf32>
    %416 = arith.addf %413, %415 : vector<1x16xf32>
    %417 = vector.extract_strided_slice %7 {offsets = [5, 0], sizes = [1, 16], strides = [1, 1]} : vector<6x16xf32> to vector<1x16xf32>
    %418 = arith.addf %417, %407 : vector<1x16xf32>
    %419 = arith.negf %418 : vector<1x16xf32>
    %420 = math.exp %419 : vector<1x16xf32>
    %cst_254 = arith.constant 1.000000e+00 : f32
    %421 = vector.broadcast %cst_254 : f32 to vector<1x16xf32>
    %422 = arith.addf %421, %420 : vector<1x16xf32>
    %423 = arith.divf %421, %422 : vector<1x16xf32>
    %424 = vector.extract_strided_slice %14 {offsets = [5, 0], sizes = [1, 16], strides = [1, 1]} : vector<6x16xf32> to vector<1x16xf32>
    %425 = arith.addf %424, %410 : vector<1x16xf32>
    %426 = arith.negf %425 : vector<1x16xf32>
    %427 = math.exp %426 : vector<1x16xf32>
    %cst_255 = arith.constant 1.000000e+00 : f32
    %428 = vector.broadcast %cst_255 : f32 to vector<1x16xf32>
    %429 = arith.addf %428, %427 : vector<1x16xf32>
    %430 = arith.divf %428, %429 : vector<1x16xf32>
    %431 = vector.extract_strided_slice %21 {offsets = [5, 0], sizes = [1, 16], strides = [1, 1]} : vector<6x16xf32> to vector<1x16xf32>
    %432 = arith.mulf %423, %416 : vector<1x16xf32>
    %433 = arith.addf %431, %432 : vector<1x16xf32>
    %434 = math.tanh %433 : vector<1x16xf32>
    %cst_256 = arith.constant 1.000000e+00 : f32
    %435 = vector.broadcast %cst_256 : f32 to vector<1x16xf32>
    %436 = arith.subf %435, %430 : vector<1x16xf32>
    %437 = arith.mulf %436, %434 : vector<1x16xf32>
    %438 = arith.mulf %430, %367 : vector<1x16xf32>
    %439 = arith.addf %437, %438 : vector<1x16xf32>
    %c5_257 = arith.constant 5 : index
    %c0_258 = arith.constant 0 : index
    %440 = vector.load %arg6[%c5_257, %c0_258] : memref<6x16xf32, #tpu.memory_space<vmem>>, vector<1x16xf32>
    tpu.vector_store %arg6[%c5_257, %c0_258], %439 {strides = array<i32>} : memref<6x16xf32, #tpu.memory_space<vmem>>, vector<1x16xf32>,
    %c3_259 = arith.constant 3 : index
    %c0_260 = arith.constant 0 : index
    %c0_261 = arith.constant 0 : index
    %441 = vector.load %arg2[%c3_259, %c0_260, %c0_261] : memref<12x16x16xf32, #tpu.memory_space<vmem>>, vector<1x16x16xf32>
    %442 = vector.shape_cast %441 : vector<1x16x16xf32> to vector<16x16xf32>
    %cst_262 = arith.constant dense<0.000000e+00> : vector<1x16xf32>
    %443 = tpu.matmul %403, %442, %cst_262 {dimension_numbers = #tpu.dot_dimension_numbers<[1], [0], [0], [1], [0, 0, 1, 1], [], []>} : vector<1x16xf32>, vector<16x16xf32>, vector<1x16xf32> -> vector<1x16xf32>
    %c4_263 = arith.constant 4 : index
    %c0_264 = arith.constant 0 : index
    %c0_265 = arith.constant 0 : index
    %444 = vector.load %arg2[%c4_263, %c0_264, %c0_265] : memref<12x16x16xf32, #tpu.memory_space<vmem>>, vector<1x16x16xf32>
    %445 = vector.shape_cast %444 : vector<1x16x16xf32> to vector<16x16xf32>
    %cst_266 = arith.constant dense<0.000000e+00> : vector<1x16xf32>
    %446 = tpu.matmul %403, %445, %cst_266 {dimension_numbers = #tpu.dot_dimension_numbers<[1], [0], [0], [1], [0, 0, 1, 1], [], []>} : vector<1x16xf32>, vector<16x16xf32>, vector<1x16xf32> -> vector<1x16xf32>
    %c5_267 = arith.constant 5 : index
    %c0_268 = arith.constant 0 : index
    %c0_269 = arith.constant 0 : index
    %447 = vector.load %arg2[%c5_267, %c0_268, %c0_269] : memref<12x16x16xf32, #tpu.memory_space<vmem>>, vector<1x16x16xf32>
    %448 = vector.shape_cast %447 : vector<1x16x16xf32> to vector<16x16xf32>
    %cst_270 = arith.constant dense<0.000000e+00> : vector<1x16xf32>
    %449 = tpu.matmul %403, %448, %cst_270 {dimension_numbers = #tpu.dot_dimension_numbers<[1], [0], [0], [1], [0, 0, 1, 1], [], []>} : vector<1x16xf32>, vector<16x16xf32>, vector<1x16xf32> -> vector<1x16xf32>
    %c1_271 = arith.constant 1 : index
    %c0_272 = arith.constant 0 : index
    %c0_273 = arith.constant 0 : index
    %450 = vector.load %arg4[%c1_271, %c0_272, %c0_273] : memref<4x1x16xf32, #tpu.memory_space<vmem>>, vector<1x1x16xf32>
    %451 = vector.shape_cast %450 : vector<1x1x16xf32> to vector<1x16xf32>
    %452 = arith.addf %449, %451 : vector<1x16xf32>
    %453 = vector.extract_strided_slice %28 {offsets = [0, 0], sizes = [1, 16], strides = [1, 1]} : vector<6x16xf32> to vector<1x16xf32>
    %454 = arith.addf %453, %443 : vector<1x16xf32>
    %455 = arith.negf %454 : vector<1x16xf32>
    %456 = math.exp %455 : vector<1x16xf32>
    %cst_274 = arith.constant 1.000000e+00 : f32
    %457 = vector.broadcast %cst_274 : f32 to vector<1x16xf32>
    %458 = arith.addf %457, %456 : vector<1x16xf32>
    %459 = arith.divf %457, %458 : vector<1x16xf32>
    %460 = vector.extract_strided_slice %35 {offsets = [0, 0], sizes = [1, 16], strides = [1, 1]} : vector<6x16xf32> to vector<1x16xf32>
    %461 = arith.addf %460, %446 : vector<1x16xf32>
    %462 = arith.negf %461 : vector<1x16xf32>
    %463 = math.exp %462 : vector<1x16xf32>
    %cst_275 = arith.constant 1.000000e+00 : f32
    %464 = vector.broadcast %cst_275 : f32 to vector<1x16xf32>
    %465 = arith.addf %464, %463 : vector<1x16xf32>
    %466 = arith.divf %464, %465 : vector<1x16xf32>
    %467 = vector.extract_strided_slice %42 {offsets = [0, 0], sizes = [1, 16], strides = [1, 1]} : vector<6x16xf32> to vector<1x16xf32>
    %468 = arith.mulf %459, %452 : vector<1x16xf32>
    %469 = arith.addf %467, %468 : vector<1x16xf32>
    %470 = math.tanh %469 : vector<1x16xf32>
    %cst_276 = arith.constant 1.000000e+00 : f32
    %471 = vector.broadcast %cst_276 : f32 to vector<1x16xf32>
    %472 = arith.subf %471, %466 : vector<1x16xf32>
    %473 = arith.mulf %472, %470 : vector<1x16xf32>
    %474 = arith.mulf %466, %403 : vector<1x16xf32>
    %475 = arith.addf %473, %474 : vector<1x16xf32>
    %c0_277 = arith.constant 0 : index
    %c0_278 = arith.constant 0 : index
    %476 = vector.load %arg7[%c0_277, %c0_278] : memref<6x16xf32, #tpu.memory_space<vmem>>, vector<1x16xf32>
    tpu.vector_store %arg7[%c0_277, %c0_278], %475 {strides = array<i32>} : memref<6x16xf32, #tpu.memory_space<vmem>>, vector<1x16xf32>,
    %c0_279 = arith.constant 0 : index
    %c0_280 = arith.constant 0 : index
    %477 = vector.load %arg6[%c0_279, %c0_280] : memref<6x16xf32, #tpu.memory_space<vmem>>, vector<6x16xf32>
    %c0_281 = arith.constant 0 : index
    %c0_282 = arith.constant 0 : index
    %478 = vector.load %arg7[%c0_281, %c0_282] : memref<6x16xf32, #tpu.memory_space<vmem>>, vector<6x16xf32>
    %479 = tpu.concatenate %477, %478 in 1 : vector<6x16xf32>, vector<6x16xf32> -> vector<6x32xf32>
    %c6 = arith.constant 6 : index
    %c0_283 = arith.constant 0 : index
    %c0_284 = arith.constant 0 : index
    %480 = vector.load %arg1[%c6, %c0_283, %c0_284] : memref<12x32x16xf32, #tpu.memory_space<vmem>>, vector<1x32x16xf32>
    %481 = vector.shape_cast %480 : vector<1x32x16xf32> to vector<32x16xf32>
    %cst_285 = arith.constant dense<0.000000e+00> : vector<6x16xf32>
    %482 = tpu.matmul %479, %481, %cst_285 {dimension_numbers = #tpu.dot_dimension_numbers<[1], [0], [0], [1], [0, 0, 1, 1], [], []>} : vector<6x32xf32>, vector<32x16xf32>, vector<6x16xf32> -> vector<6x16xf32>
    %c6_286 = arith.constant 6 : index
    %c0_287 = arith.constant 0 : index
    %c0_288 = arith.constant 0 : index
    %483 = vector.load %arg3[%c6_286, %c0_287, %c0_288] : memref<12x1x16xf32, #tpu.memory_space<vmem>>, vector<1x1x16xf32>
    %484 = vector.shape_cast %483 : vector<1x1x16xf32> to vector<1x16xf32>
    %485 = vector.broadcast %484 : vector<1x16xf32> to vector<6x16xf32>
    %486 = arith.addf %482, %485 : vector<6x16xf32>
    %c7 = arith.constant 7 : index
    %c0_289 = arith.constant 0 : index
    %c0_290 = arith.constant 0 : index
    %487 = vector.load %arg1[%c7, %c0_289, %c0_290] : memref<12x32x16xf32, #tpu.memory_space<vmem>>, vector<1x32x16xf32>
    %488 = vector.shape_cast %487 : vector<1x32x16xf32> to vector<32x16xf32>
    %cst_291 = arith.constant dense<0.000000e+00> : vector<6x16xf32>
    %489 = tpu.matmul %479, %488, %cst_291 {dimension_numbers = #tpu.dot_dimension_numbers<[1], [0], [0], [1], [0, 0, 1, 1], [], []>} : vector<6x32xf32>, vector<32x16xf32>, vector<6x16xf32> -> vector<6x16xf32>
    %c7_292 = arith.constant 7 : index
    %c0_293 = arith.constant 0 : index
    %c0_294 = arith.constant 0 : index
    %490 = vector.load %arg3[%c7_292, %c0_293, %c0_294] : memref<12x1x16xf32, #tpu.memory_space<vmem>>, vector<1x1x16xf32>
    %491 = vector.shape_cast %490 : vector<1x1x16xf32> to vector<1x16xf32>
    %492 = vector.broadcast %491 : vector<1x16xf32> to vector<6x16xf32>
    %493 = arith.addf %489, %492 : vector<6x16xf32>
    %c8 = arith.constant 8 : index
    %c0_295 = arith.constant 0 : index
    %c0_296 = arith.constant 0 : index
    %494 = vector.load %arg1[%c8, %c0_295, %c0_296] : memref<12x32x16xf32, #tpu.memory_space<vmem>>, vector<1x32x16xf32>
    %495 = vector.shape_cast %494 : vector<1x32x16xf32> to vector<32x16xf32>
    %cst_297 = arith.constant dense<0.000000e+00> : vector<6x16xf32>
    %496 = tpu.matmul %479, %495, %cst_297 {dimension_numbers = #tpu.dot_dimension_numbers<[1], [0], [0], [1], [0, 0, 1, 1], [], []>} : vector<6x32xf32>, vector<32x16xf32>, vector<6x16xf32> -> vector<6x16xf32>
    %c8_298 = arith.constant 8 : index
    %c0_299 = arith.constant 0 : index
    %c0_300 = arith.constant 0 : index
    %497 = vector.load %arg3[%c8_298, %c0_299, %c0_300] : memref<12x1x16xf32, #tpu.memory_space<vmem>>, vector<1x1x16xf32>
    %498 = vector.shape_cast %497 : vector<1x1x16xf32> to vector<1x16xf32>
    %499 = vector.broadcast %498 : vector<1x16xf32> to vector<6x16xf32>
    %500 = arith.addf %496, %499 : vector<6x16xf32>
    %c9 = arith.constant 9 : index
    %c0_301 = arith.constant 0 : index
    %c0_302 = arith.constant 0 : index
    %501 = vector.load %arg1[%c9, %c0_301, %c0_302] : memref<12x32x16xf32, #tpu.memory_space<vmem>>, vector<1x32x16xf32>
    %502 = vector.shape_cast %501 : vector<1x32x16xf32> to vector<32x16xf32>
    %cst_303 = arith.constant dense<0.000000e+00> : vector<6x16xf32>
    %503 = tpu.matmul %479, %502, %cst_303 {dimension_numbers = #tpu.dot_dimension_numbers<[1], [0], [0], [1], [0, 0, 1, 1], [], []>} : vector<6x32xf32>, vector<32x16xf32>, vector<6x16xf32> -> vector<6x16xf32>
    %c9_304 = arith.constant 9 : index
    %c0_305 = arith.constant 0 : index
    %c0_306 = arith.constant 0 : index
    %504 = vector.load %arg3[%c9_304, %c0_305, %c0_306] : memref<12x1x16xf32, #tpu.memory_space<vmem>>, vector<1x1x16xf32>
    %505 = vector.shape_cast %504 : vector<1x1x16xf32> to vector<1x16xf32>
    %506 = vector.broadcast %505 : vector<1x16xf32> to vector<6x16xf32>
    %507 = arith.addf %503, %506 : vector<6x16xf32>
    %c10 = arith.constant 10 : index
    %c0_307 = arith.constant 0 : index
    %c0_308 = arith.constant 0 : index
    %508 = vector.load %arg1[%c10, %c0_307, %c0_308] : memref<12x32x16xf32, #tpu.memory_space<vmem>>, vector<1x32x16xf32>
    %509 = vector.shape_cast %508 : vector<1x32x16xf32> to vector<32x16xf32>
    %cst_309 = arith.constant dense<0.000000e+00> : vector<6x16xf32>
    %510 = tpu.matmul %479, %509, %cst_309 {dimension_numbers = #tpu.dot_dimension_numbers<[1], [0], [0], [1], [0, 0, 1, 1], [], []>} : vector<6x32xf32>, vector<32x16xf32>, vector<6x16xf32> -> vector<6x16xf32>
    %c10_310 = arith.constant 10 : index
    %c0_311 = arith.constant 0 : index
    %c0_312 = arith.constant 0 : index
    %511 = vector.load %arg3[%c10_310, %c0_311, %c0_312] : memref<12x1x16xf32, #tpu.memory_space<vmem>>, vector<1x1x16xf32>
    %512 = vector.shape_cast %511 : vector<1x1x16xf32> to vector<1x16xf32>
    %513 = vector.broadcast %512 : vector<1x16xf32> to vector<6x16xf32>
    %514 = arith.addf %510, %513 : vector<6x16xf32>
    %c11 = arith.constant 11 : index
    %c0_313 = arith.constant 0 : index
    %c0_314 = arith.constant 0 : index
    %515 = vector.load %arg1[%c11, %c0_313, %c0_314] : memref<12x32x16xf32, #tpu.memory_space<vmem>>, vector<1x32x16xf32>
    %516 = vector.shape_cast %515 : vector<1x32x16xf32> to vector<32x16xf32>
    %cst_315 = arith.constant dense<0.000000e+00> : vector<6x16xf32>
    %517 = tpu.matmul %479, %516, %cst_315 {dimension_numbers = #tpu.dot_dimension_numbers<[1], [0], [0], [1], [0, 0, 1, 1], [], []>} : vector<6x32xf32>, vector<32x16xf32>, vector<6x16xf32> -> vector<6x16xf32>
    %c11_316 = arith.constant 11 : index
    %c0_317 = arith.constant 0 : index
    %c0_318 = arith.constant 0 : index
    %518 = vector.load %arg3[%c11_316, %c0_317, %c0_318] : memref<12x1x16xf32, #tpu.memory_space<vmem>>, vector<1x1x16xf32>
    %519 = vector.shape_cast %518 : vector<1x1x16xf32> to vector<1x16xf32>
    %520 = vector.broadcast %519 : vector<1x16xf32> to vector<6x16xf32>
    %521 = arith.addf %517, %520 : vector<6x16xf32>
    %cst_319 = arith.constant 0.000000e+00 : f32
    %522 = vector.broadcast %cst_319 : f32 to vector<1x16xf32>
    %cst_320 = arith.constant 0.000000e+00 : f32
    %523 = vector.broadcast %cst_320 : f32 to vector<1x16xf32>
    %c6_321 = arith.constant 6 : index
    %c0_322 = arith.constant 0 : index
    %c0_323 = arith.constant 0 : index
    %524 = vector.load %arg2[%c6_321, %c0_322, %c0_323] : memref<12x16x16xf32, #tpu.memory_space<vmem>>, vector<1x16x16xf32>
    %525 = vector.shape_cast %524 : vector<1x16x16xf32> to vector<16x16xf32>
    %cst_324 = arith.constant dense<0.000000e+00> : vector<1x16xf32>
    %526 = tpu.matmul %522, %525, %cst_324 {dimension_numbers = #tpu.dot_dimension_numbers<[1], [0], [0], [1], [0, 0, 1, 1], [], []>} : vector<1x16xf32>, vector<16x16xf32>, vector<1x16xf32> -> vector<1x16xf32>
    %c7_325 = arith.constant 7 : index
    %c0_326 = arith.constant 0 : index
    %c0_327 = arith.constant 0 : index
    %527 = vector.load %arg2[%c7_325, %c0_326, %c0_327] : memref<12x16x16xf32, #tpu.memory_space<vmem>>, vector<1x16x16xf32>
    %528 = vector.shape_cast %527 : vector<1x16x16xf32> to vector<16x16xf32>
    %cst_328 = arith.constant dense<0.000000e+00> : vector<1x16xf32>
    %529 = tpu.matmul %522, %528, %cst_328 {dimension_numbers = #tpu.dot_dimension_numbers<[1], [0], [0], [1], [0, 0, 1, 1], [], []>} : vector<1x16xf32>, vector<16x16xf32>, vector<1x16xf32> -> vector<1x16xf32>
    %c8_329 = arith.constant 8 : index
    %c0_330 = arith.constant 0 : index
    %c0_331 = arith.constant 0 : index
    %530 = vector.load %arg2[%c8_329, %c0_330, %c0_331] : memref<12x16x16xf32, #tpu.memory_space<vmem>>, vector<1x16x16xf32>
    %531 = vector.shape_cast %530 : vector<1x16x16xf32> to vector<16x16xf32>
    %cst_332 = arith.constant dense<0.000000e+00> : vector<1x16xf32>
    %532 = tpu.matmul %522, %531, %cst_332 {dimension_numbers = #tpu.dot_dimension_numbers<[1], [0], [0], [1], [0, 0, 1, 1], [], []>} : vector<1x16xf32>, vector<16x16xf32>, vector<1x16xf32> -> vector<1x16xf32>
    %c2_333 = arith.constant 2 : index
    %c0_334 = arith.constant 0 : index
    %c0_335 = arith.constant 0 : index
    %533 = vector.load %arg4[%c2_333, %c0_334, %c0_335] : memref<4x1x16xf32, #tpu.memory_space<vmem>>, vector<1x1x16xf32>
    %534 = vector.shape_cast %533 : vector<1x1x16xf32> to vector<1x16xf32>
    %535 = arith.addf %532, %534 : vector<1x16xf32>
    %536 = vector.extract_strided_slice %486 {offsets = [0, 0], sizes = [1, 16], strides = [1, 1]} : vector<6x16xf32> to vector<1x16xf32>
    %537 = arith.addf %536, %526 : vector<1x16xf32>
    %538 = arith.negf %537 : vector<1x16xf32>
    %539 = math.exp %538 : vector<1x16xf32>
    %cst_336 = arith.constant 1.000000e+00 : f32
    %540 = vector.broadcast %cst_336 : f32 to vector<1x16xf32>
    %541 = arith.addf %540, %539 : vector<1x16xf32>
    %542 = arith.divf %540, %541 : vector<1x16xf32>
    %543 = vector.extract_strided_slice %493 {offsets = [0, 0], sizes = [1, 16], strides = [1, 1]} : vector<6x16xf32> to vector<1x16xf32>
    %544 = arith.addf %543, %529 : vector<1x16xf32>
    %545 = arith.negf %544 : vector<1x16xf32>
    %546 = math.exp %545 : vector<1x16xf32>
    %cst_337 = arith.constant 1.000000e+00 : f32
    %547 = vector.broadcast %cst_337 : f32 to vector<1x16xf32>
    %548 = arith.addf %547, %546 : vector<1x16xf32>
    %549 = arith.divf %547, %548 : vector<1x16xf32>
    %550 = vector.extract_strided_slice %500 {offsets = [0, 0], sizes = [1, 16], strides = [1, 1]} : vector<6x16xf32> to vector<1x16xf32>
    %551 = arith.mulf %542, %535 : vector<1x16xf32>
    %552 = arith.addf %550, %551 : vector<1x16xf32>
    %553 = math.tanh %552 : vector<1x16xf32>
    %cst_338 = arith.constant 1.000000e+00 : f32
    %554 = vector.broadcast %cst_338 : f32 to vector<1x16xf32>
    %555 = arith.subf %554, %549 : vector<1x16xf32>
    %556 = arith.mulf %555, %553 : vector<1x16xf32>
    %557 = arith.mulf %549, %522 : vector<1x16xf32>
    %558 = arith.addf %556, %557 : vector<1x16xf32>
    %c0_339 = arith.constant 0 : index
    %c0_340 = arith.constant 0 : index
    %559 = vector.load %arg6[%c0_339, %c0_340] : memref<6x16xf32, #tpu.memory_space<vmem>>, vector<1x16xf32>
    tpu.vector_store %arg6[%c0_339, %c0_340], %558 {strides = array<i32>} : memref<6x16xf32, #tpu.memory_space<vmem>>, vector<1x16xf32>,
    %c9_341 = arith.constant 9 : index
    %c0_342 = arith.constant 0 : index
    %c0_343 = arith.constant 0 : index
    %560 = vector.load %arg2[%c9_341, %c0_342, %c0_343] : memref<12x16x16xf32, #tpu.memory_space<vmem>>, vector<1x16x16xf32>
    %561 = vector.shape_cast %560 : vector<1x16x16xf32> to vector<16x16xf32>
    %cst_344 = arith.constant dense<0.000000e+00> : vector<1x16xf32>
    %562 = tpu.matmul %523, %561, %cst_344 {dimension_numbers = #tpu.dot_dimension_numbers<[1], [0], [0], [1], [0, 0, 1, 1], [], []>} : vector<1x16xf32>, vector<16x16xf32>, vector<1x16xf32> -> vector<1x16xf32>
    %c10_345 = arith.constant 10 : index
    %c0_346 = arith.constant 0 : index
    %c0_347 = arith.constant 0 : index
    %563 = vector.load %arg2[%c10_345, %c0_346, %c0_347] : memref<12x16x16xf32, #tpu.memory_space<vmem>>, vector<1x16x16xf32>
    %564 = vector.shape_cast %563 : vector<1x16x16xf32> to vector<16x16xf32>
    %cst_348 = arith.constant dense<0.000000e+00> : vector<1x16xf32>
    %565 = tpu.matmul %523, %564, %cst_348 {dimension_numbers = #tpu.dot_dimension_numbers<[1], [0], [0], [1], [0, 0, 1, 1], [], []>} : vector<1x16xf32>, vector<16x16xf32>, vector<1x16xf32> -> vector<1x16xf32>
    %c11_349 = arith.constant 11 : index
    %c0_350 = arith.constant 0 : index
    %c0_351 = arith.constant 0 : index
    %566 = vector.load %arg2[%c11_349, %c0_350, %c0_351] : memref<12x16x16xf32, #tpu.memory_space<vmem>>, vector<1x16x16xf32>
    %567 = vector.shape_cast %566 : vector<1x16x16xf32> to vector<16x16xf32>
    %cst_352 = arith.constant dense<0.000000e+00> : vector<1x16xf32>
    %568 = tpu.matmul %523, %567, %cst_352 {dimension_numbers = #tpu.dot_dimension_numbers<[1], [0], [0], [1], [0, 0, 1, 1], [], []>} : vector<1x16xf32>, vector<16x16xf32>, vector<1x16xf32> -> vector<1x16xf32>
    %c3_353 = arith.constant 3 : index
    %c0_354 = arith.constant 0 : index
    %c0_355 = arith.constant 0 : index
    %569 = vector.load %arg4[%c3_353, %c0_354, %c0_355] : memref<4x1x16xf32, #tpu.memory_space<vmem>>, vector<1x1x16xf32>
    %570 = vector.shape_cast %569 : vector<1x1x16xf32> to vector<1x16xf32>
    %571 = arith.addf %568, %570 : vector<1x16xf32>
    %572 = vector.extract_strided_slice %507 {offsets = [5, 0], sizes = [1, 16], strides = [1, 1]} : vector<6x16xf32> to vector<1x16xf32>
    %573 = arith.addf %572, %562 : vector<1x16xf32>
    %574 = arith.negf %573 : vector<1x16xf32>
    %575 = math.exp %574 : vector<1x16xf32>
    %cst_356 = arith.constant 1.000000e+00 : f32
    %576 = vector.broadcast %cst_356 : f32 to vector<1x16xf32>
    %577 = arith.addf %576, %575 : vector<1x16xf32>
    %578 = arith.divf %576, %577 : vector<1x16xf32>
    %579 = vector.extract_strided_slice %514 {offsets = [5, 0], sizes = [1, 16], strides = [1, 1]} : vector<6x16xf32> to vector<1x16xf32>
    %580 = arith.addf %579, %565 : vector<1x16xf32>
    %581 = arith.negf %580 : vector<1x16xf32>
    %582 = math.exp %581 : vector<1x16xf32>
    %cst_357 = arith.constant 1.000000e+00 : f32
    %583 = vector.broadcast %cst_357 : f32 to vector<1x16xf32>
    %584 = arith.addf %583, %582 : vector<1x16xf32>
    %585 = arith.divf %583, %584 : vector<1x16xf32>
    %586 = vector.extract_strided_slice %521 {offsets = [5, 0], sizes = [1, 16], strides = [1, 1]} : vector<6x16xf32> to vector<1x16xf32>
    %587 = arith.mulf %578, %571 : vector<1x16xf32>
    %588 = arith.addf %586, %587 : vector<1x16xf32>
    %589 = math.tanh %588 : vector<1x16xf32>
    %cst_358 = arith.constant 1.000000e+00 : f32
    %590 = vector.broadcast %cst_358 : f32 to vector<1x16xf32>
    %591 = arith.subf %590, %585 : vector<1x16xf32>
    %592 = arith.mulf %591, %589 : vector<1x16xf32>
    %593 = arith.mulf %585, %523 : vector<1x16xf32>
    %594 = arith.addf %592, %593 : vector<1x16xf32>
    %c5_359 = arith.constant 5 : index
    %c0_360 = arith.constant 0 : index
    %595 = vector.load %arg7[%c5_359, %c0_360] : memref<6x16xf32, #tpu.memory_space<vmem>>, vector<1x16xf32>
    tpu.vector_store %arg7[%c5_359, %c0_360], %594 {strides = array<i32>} : memref<6x16xf32, #tpu.memory_space<vmem>>, vector<1x16xf32>,
    %c6_361 = arith.constant 6 : index
    %c0_362 = arith.constant 0 : index
    %c0_363 = arith.constant 0 : index
    %596 = vector.load %arg2[%c6_361, %c0_362, %c0_363] : memref<12x16x16xf32, #tpu.memory_space<vmem>>, vector<1x16x16xf32>
    %597 = vector.shape_cast %596 : vector<1x16x16xf32> to vector<16x16xf32>
    %cst_364 = arith.constant dense<0.000000e+00> : vector<1x16xf32>
    %598 = tpu.matmul %558, %597, %cst_364 {dimension_numbers = #tpu.dot_dimension_numbers<[1], [0], [0], [1], [0, 0, 1, 1], [], []>} : vector<1x16xf32>, vector<16x16xf32>, vector<1x16xf32> -> vector<1x16xf32>
    %c7_365 = arith.constant 7 : index
    %c0_366 = arith.constant 0 : index
    %c0_367 = arith.constant 0 : index
    %599 = vector.load %arg2[%c7_365, %c0_366, %c0_367] : memref<12x16x16xf32, #tpu.memory_space<vmem>>, vector<1x16x16xf32>
    %600 = vector.shape_cast %599 : vector<1x16x16xf32> to vector<16x16xf32>
    %cst_368 = arith.constant dense<0.000000e+00> : vector<1x16xf32>
    %601 = tpu.matmul %558, %600, %cst_368 {dimension_numbers = #tpu.dot_dimension_numbers<[1], [0], [0], [1], [0, 0, 1, 1], [], []>} : vector<1x16xf32>, vector<16x16xf32>, vector<1x16xf32> -> vector<1x16xf32>
    %c8_369 = arith.constant 8 : index
    %c0_370 = arith.constant 0 : index
    %c0_371 = arith.constant 0 : index
    %602 = vector.load %arg2[%c8_369, %c0_370, %c0_371] : memref<12x16x16xf32, #tpu.memory_space<vmem>>, vector<1x16x16xf32>
    %603 = vector.shape_cast %602 : vector<1x16x16xf32> to vector<16x16xf32>
    %cst_372 = arith.constant dense<0.000000e+00> : vector<1x16xf32>
    %604 = tpu.matmul %558, %603, %cst_372 {dimension_numbers = #tpu.dot_dimension_numbers<[1], [0], [0], [1], [0, 0, 1, 1], [], []>} : vector<1x16xf32>, vector<16x16xf32>, vector<1x16xf32> -> vector<1x16xf32>
    %c2_373 = arith.constant 2 : index
    %c0_374 = arith.constant 0 : index
    %c0_375 = arith.constant 0 : index
    %605 = vector.load %arg4[%c2_373, %c0_374, %c0_375] : memref<4x1x16xf32, #tpu.memory_space<vmem>>, vector<1x1x16xf32>
    %606 = vector.shape_cast %605 : vector<1x1x16xf32> to vector<1x16xf32>
    %607 = arith.addf %604, %606 : vector<1x16xf32>
    %608 = vector.extract_strided_slice %486 {offsets = [1, 0], sizes = [1, 16], strides = [1, 1]} : vector<6x16xf32> to vector<1x16xf32>
    %609 = arith.addf %608, %598 : vector<1x16xf32>
    %610 = arith.negf %609 : vector<1x16xf32>
    %611 = math.exp %610 : vector<1x16xf32>
    %cst_376 = arith.constant 1.000000e+00 : f32
    %612 = vector.broadcast %cst_376 : f32 to vector<1x16xf32>
    %613 = arith.addf %612, %611 : vector<1x16xf32>
    %614 = arith.divf %612, %613 : vector<1x16xf32>
    %615 = vector.extract_strided_slice %493 {offsets = [1, 0], sizes = [1, 16], strides = [1, 1]} : vector<6x16xf32> to vector<1x16xf32>
    %616 = arith.addf %615, %601 : vector<1x16xf32>
    %617 = arith.negf %616 : vector<1x16xf32>
    %618 = math.exp %617 : vector<1x16xf32>
    %cst_377 = arith.constant 1.000000e+00 : f32
    %619 = vector.broadcast %cst_377 : f32 to vector<1x16xf32>
    %620 = arith.addf %619, %618 : vector<1x16xf32>
    %621 = arith.divf %619, %620 : vector<1x16xf32>
    %622 = vector.extract_strided_slice %500 {offsets = [1, 0], sizes = [1, 16], strides = [1, 1]} : vector<6x16xf32> to vector<1x16xf32>
    %623 = arith.mulf %614, %607 : vector<1x16xf32>
    %624 = arith.addf %622, %623 : vector<1x16xf32>
    %625 = math.tanh %624 : vector<1x16xf32>
    %cst_378 = arith.constant 1.000000e+00 : f32
    %626 = vector.broadcast %cst_378 : f32 to vector<1x16xf32>
    %627 = arith.subf %626, %621 : vector<1x16xf32>
    %628 = arith.mulf %627, %625 : vector<1x16xf32>
    %629 = arith.mulf %621, %558 : vector<1x16xf32>
    %630 = arith.addf %628, %629 : vector<1x16xf32>
    %c1_379 = arith.constant 1 : index
    %c0_380 = arith.constant 0 : index
    %631 = vector.load %arg6[%c1_379, %c0_380] : memref<6x16xf32, #tpu.memory_space<vmem>>, vector<1x16xf32>
    tpu.vector_store %arg6[%c1_379, %c0_380], %630 {strides = array<i32>} : memref<6x16xf32, #tpu.memory_space<vmem>>, vector<1x16xf32>,
    %c9_381 = arith.constant 9 : index
    %c0_382 = arith.constant 0 : index
    %c0_383 = arith.constant 0 : index
    %632 = vector.load %arg2[%c9_381, %c0_382, %c0_383] : memref<12x16x16xf32, #tpu.memory_space<vmem>>, vector<1x16x16xf32>
    %633 = vector.shape_cast %632 : vector<1x16x16xf32> to vector<16x16xf32>
    %cst_384 = arith.constant dense<0.000000e+00> : vector<1x16xf32>
    %634 = tpu.matmul %594, %633, %cst_384 {dimension_numbers = #tpu.dot_dimension_numbers<[1], [0], [0], [1], [0, 0, 1, 1], [], []>} : vector<1x16xf32>, vector<16x16xf32>, vector<1x16xf32> -> vector<1x16xf32>
    %c10_385 = arith.constant 10 : index
    %c0_386 = arith.constant 0 : index
    %c0_387 = arith.constant 0 : index
    %635 = vector.load %arg2[%c10_385, %c0_386, %c0_387] : memref<12x16x16xf32, #tpu.memory_space<vmem>>, vector<1x16x16xf32>
    %636 = vector.shape_cast %635 : vector<1x16x16xf32> to vector<16x16xf32>
    %cst_388 = arith.constant dense<0.000000e+00> : vector<1x16xf32>
    %637 = tpu.matmul %594, %636, %cst_388 {dimension_numbers = #tpu.dot_dimension_numbers<[1], [0], [0], [1], [0, 0, 1, 1], [], []>} : vector<1x16xf32>, vector<16x16xf32>, vector<1x16xf32> -> vector<1x16xf32>
    %c11_389 = arith.constant 11 : index
    %c0_390 = arith.constant 0 : index
    %c0_391 = arith.constant 0 : index
    %638 = vector.load %arg2[%c11_389, %c0_390, %c0_391] : memref<12x16x16xf32, #tpu.memory_space<vmem>>, vector<1x16x16xf32>
    %639 = vector.shape_cast %638 : vector<1x16x16xf32> to vector<16x16xf32>
    %cst_392 = arith.constant dense<0.000000e+00> : vector<1x16xf32>
    %640 = tpu.matmul %594, %639, %cst_392 {dimension_numbers = #tpu.dot_dimension_numbers<[1], [0], [0], [1], [0, 0, 1, 1], [], []>} : vector<1x16xf32>, vector<16x16xf32>, vector<1x16xf32> -> vector<1x16xf32>
    %c3_393 = arith.constant 3 : index
    %c0_394 = arith.constant 0 : index
    %c0_395 = arith.constant 0 : index
    %641 = vector.load %arg4[%c3_393, %c0_394, %c0_395] : memref<4x1x16xf32, #tpu.memory_space<vmem>>, vector<1x1x16xf32>
    %642 = vector.shape_cast %641 : vector<1x1x16xf32> to vector<1x16xf32>
    %643 = arith.addf %640, %642 : vector<1x16xf32>
    %644 = vector.extract_strided_slice %507 {offsets = [4, 0], sizes = [1, 16], strides = [1, 1]} : vector<6x16xf32> to vector<1x16xf32>
    %645 = arith.addf %644, %634 : vector<1x16xf32>
    %646 = arith.negf %645 : vector<1x16xf32>
    %647 = math.exp %646 : vector<1x16xf32>
    %cst_396 = arith.constant 1.000000e+00 : f32
    %648 = vector.broadcast %cst_396 : f32 to vector<1x16xf32>
    %649 = arith.addf %648, %647 : vector<1x16xf32>
    %650 = arith.divf %648, %649 : vector<1x16xf32>
    %651 = vector.extract_strided_slice %514 {offsets = [4, 0], sizes = [1, 16], strides = [1, 1]} : vector<6x16xf32> to vector<1x16xf32>
    %652 = arith.addf %651, %637 : vector<1x16xf32>
    %653 = arith.negf %652 : vector<1x16xf32>
    %654 = math.exp %653 : vector<1x16xf32>
    %cst_397 = arith.constant 1.000000e+00 : f32
    %655 = vector.broadcast %cst_397 : f32 to vector<1x16xf32>
    %656 = arith.addf %655, %654 : vector<1x16xf32>
    %657 = arith.divf %655, %656 : vector<1x16xf32>
    %658 = vector.extract_strided_slice %521 {offsets = [4, 0], sizes = [1, 16], strides = [1, 1]} : vector<6x16xf32> to vector<1x16xf32>
    %659 = arith.mulf %650, %643 : vector<1x16xf32>
    %660 = arith.addf %658, %659 : vector<1x16xf32>
    %661 = math.tanh %660 : vector<1x16xf32>
    %cst_398 = arith.constant 1.000000e+00 : f32
    %662 = vector.broadcast %cst_398 : f32 to vector<1x16xf32>
    %663 = arith.subf %662, %657 : vector<1x16xf32>
    %664 = arith.mulf %663, %661 : vector<1x16xf32>
    %665 = arith.mulf %657, %594 : vector<1x16xf32>
    %666 = arith.addf %664, %665 : vector<1x16xf32>
    %c4_399 = arith.constant 4 : index
    %c0_400 = arith.constant 0 : index
    %667 = vector.load %arg7[%c4_399, %c0_400] : memref<6x16xf32, #tpu.memory_space<vmem>>, vector<1x16xf32>
    tpu.vector_store %arg7[%c4_399, %c0_400], %666 {strides = array<i32>} : memref<6x16xf32, #tpu.memory_space<vmem>>, vector<1x16xf32>,
    %c6_401 = arith.constant 6 : index
    %c0_402 = arith.constant 0 : index
    %c0_403 = arith.constant 0 : index
    %668 = vector.load %arg2[%c6_401, %c0_402, %c0_403] : memref<12x16x16xf32, #tpu.memory_space<vmem>>, vector<1x16x16xf32>
    %669 = vector.shape_cast %668 : vector<1x16x16xf32> to vector<16x16xf32>
    %cst_404 = arith.constant dense<0.000000e+00> : vector<1x16xf32>
    %670 = tpu.matmul %630, %669, %cst_404 {dimension_numbers = #tpu.dot_dimension_numbers<[1], [0], [0], [1], [0, 0, 1, 1], [], []>} : vector<1x16xf32>, vector<16x16xf32>, vector<1x16xf32> -> vector<1x16xf32>
    %c7_405 = arith.constant 7 : index
    %c0_406 = arith.constant 0 : index
    %c0_407 = arith.constant 0 : index
    %671 = vector.load %arg2[%c7_405, %c0_406, %c0_407] : memref<12x16x16xf32, #tpu.memory_space<vmem>>, vector<1x16x16xf32>
    %672 = vector.shape_cast %671 : vector<1x16x16xf32> to vector<16x16xf32>
    %cst_408 = arith.constant dense<0.000000e+00> : vector<1x16xf32>
    %673 = tpu.matmul %630, %672, %cst_408 {dimension_numbers = #tpu.dot_dimension_numbers<[1], [0], [0], [1], [0, 0, 1, 1], [], []>} : vector<1x16xf32>, vector<16x16xf32>, vector<1x16xf32> -> vector<1x16xf32>
    %c8_409 = arith.constant 8 : index
    %c0_410 = arith.constant 0 : index
    %c0_411 = arith.constant 0 : index
    %674 = vector.load %arg2[%c8_409, %c0_410, %c0_411] : memref<12x16x16xf32, #tpu.memory_space<vmem>>, vector<1x16x16xf32>
    %675 = vector.shape_cast %674 : vector<1x16x16xf32> to vector<16x16xf32>
    %cst_412 = arith.constant dense<0.000000e+00> : vector<1x16xf32>
    %676 = tpu.matmul %630, %675, %cst_412 {dimension_numbers = #tpu.dot_dimension_numbers<[1], [0], [0], [1], [0, 0, 1, 1], [], []>} : vector<1x16xf32>, vector<16x16xf32>, vector<1x16xf32> -> vector<1x16xf32>
    %c2_413 = arith.constant 2 : index
    %c0_414 = arith.constant 0 : index
    %c0_415 = arith.constant 0 : index
    %677 = vector.load %arg4[%c2_413, %c0_414, %c0_415] : memref<4x1x16xf32, #tpu.memory_space<vmem>>, vector<1x1x16xf32>
    %678 = vector.shape_cast %677 : vector<1x1x16xf32> to vector<1x16xf32>
    %679 = arith.addf %676, %678 : vector<1x16xf32>
    %680 = vector.extract_strided_slice %486 {offsets = [2, 0], sizes = [1, 16], strides = [1, 1]} : vector<6x16xf32> to vector<1x16xf32>
    %681 = arith.addf %680, %670 : vector<1x16xf32>
    %682 = arith.negf %681 : vector<1x16xf32>
    %683 = math.exp %682 : vector<1x16xf32>
    %cst_416 = arith.constant 1.000000e+00 : f32
    %684 = vector.broadcast %cst_416 : f32 to vector<1x16xf32>
    %685 = arith.addf %684, %683 : vector<1x16xf32>
    %686 = arith.divf %684, %685 : vector<1x16xf32>
    %687 = vector.extract_strided_slice %493 {offsets = [2, 0], sizes = [1, 16], strides = [1, 1]} : vector<6x16xf32> to vector<1x16xf32>
    %688 = arith.addf %687, %673 : vector<1x16xf32>
    %689 = arith.negf %688 : vector<1x16xf32>
    %690 = math.exp %689 : vector<1x16xf32>
    %cst_417 = arith.constant 1.000000e+00 : f32
    %691 = vector.broadcast %cst_417 : f32 to vector<1x16xf32>
    %692 = arith.addf %691, %690 : vector<1x16xf32>
    %693 = arith.divf %691, %692 : vector<1x16xf32>
    %694 = vector.extract_strided_slice %500 {offsets = [2, 0], sizes = [1, 16], strides = [1, 1]} : vector<6x16xf32> to vector<1x16xf32>
    %695 = arith.mulf %686, %679 : vector<1x16xf32>
    %696 = arith.addf %694, %695 : vector<1x16xf32>
    %697 = math.tanh %696 : vector<1x16xf32>
    %cst_418 = arith.constant 1.000000e+00 : f32
    %698 = vector.broadcast %cst_418 : f32 to vector<1x16xf32>
    %699 = arith.subf %698, %693 : vector<1x16xf32>
    %700 = arith.mulf %699, %697 : vector<1x16xf32>
    %701 = arith.mulf %693, %630 : vector<1x16xf32>
    %702 = arith.addf %700, %701 : vector<1x16xf32>
    %c2_419 = arith.constant 2 : index
    %c0_420 = arith.constant 0 : index
    %703 = vector.load %arg6[%c2_419, %c0_420] : memref<6x16xf32, #tpu.memory_space<vmem>>, vector<1x16xf32>
    tpu.vector_store %arg6[%c2_419, %c0_420], %702 {strides = array<i32>} : memref<6x16xf32, #tpu.memory_space<vmem>>, vector<1x16xf32>,
    %c9_421 = arith.constant 9 : index
    %c0_422 = arith.constant 0 : index
    %c0_423 = arith.constant 0 : index
    %704 = vector.load %arg2[%c9_421, %c0_422, %c0_423] : memref<12x16x16xf32, #tpu.memory_space<vmem>>, vector<1x16x16xf32>
    %705 = vector.shape_cast %704 : vector<1x16x16xf32> to vector<16x16xf32>
    %cst_424 = arith.constant dense<0.000000e+00> : vector<1x16xf32>
    %706 = tpu.matmul %666, %705, %cst_424 {dimension_numbers = #tpu.dot_dimension_numbers<[1], [0], [0], [1], [0, 0, 1, 1], [], []>} : vector<1x16xf32>, vector<16x16xf32>, vector<1x16xf32> -> vector<1x16xf32>
    %c10_425 = arith.constant 10 : index
    %c0_426 = arith.constant 0 : index
    %c0_427 = arith.constant 0 : index
    %707 = vector.load %arg2[%c10_425, %c0_426, %c0_427] : memref<12x16x16xf32, #tpu.memory_space<vmem>>, vector<1x16x16xf32>
    %708 = vector.shape_cast %707 : vector<1x16x16xf32> to vector<16x16xf32>
    %cst_428 = arith.constant dense<0.000000e+00> : vector<1x16xf32>
    %709 = tpu.matmul %666, %708, %cst_428 {dimension_numbers = #tpu.dot_dimension_numbers<[1], [0], [0], [1], [0, 0, 1, 1], [], []>} : vector<1x16xf32>, vector<16x16xf32>, vector<1x16xf32> -> vector<1x16xf32>
    %c11_429 = arith.constant 11 : index
    %c0_430 = arith.constant 0 : index
    %c0_431 = arith.constant 0 : index
    %710 = vector.load %arg2[%c11_429, %c0_430, %c0_431] : memref<12x16x16xf32, #tpu.memory_space<vmem>>, vector<1x16x16xf32>
    %711 = vector.shape_cast %710 : vector<1x16x16xf32> to vector<16x16xf32>
    %cst_432 = arith.constant dense<0.000000e+00> : vector<1x16xf32>
    %712 = tpu.matmul %666, %711, %cst_432 {dimension_numbers = #tpu.dot_dimension_numbers<[1], [0], [0], [1], [0, 0, 1, 1], [], []>} : vector<1x16xf32>, vector<16x16xf32>, vector<1x16xf32> -> vector<1x16xf32>
    %c3_433 = arith.constant 3 : index
    %c0_434 = arith.constant 0 : index
    %c0_435 = arith.constant 0 : index
    %713 = vector.load %arg4[%c3_433, %c0_434, %c0_435] : memref<4x1x16xf32, #tpu.memory_space<vmem>>, vector<1x1x16xf32>
    %714 = vector.shape_cast %713 : vector<1x1x16xf32> to vector<1x16xf32>
    %715 = arith.addf %712, %714 : vector<1x16xf32>
    %716 = vector.extract_strided_slice %507 {offsets = [3, 0], sizes = [1, 16], strides = [1, 1]} : vector<6x16xf32> to vector<1x16xf32>
    %717 = arith.addf %716, %706 : vector<1x16xf32>
    %718 = arith.negf %717 : vector<1x16xf32>
    %719 = math.exp %718 : vector<1x16xf32>
    %cst_436 = arith.constant 1.000000e+00 : f32
    %720 = vector.broadcast %cst_436 : f32 to vector<1x16xf32>
    %721 = arith.addf %720, %719 : vector<1x16xf32>
    %722 = arith.divf %720, %721 : vector<1x16xf32>
    %723 = vector.extract_strided_slice %514 {offsets = [3, 0], sizes = [1, 16], strides = [1, 1]} : vector<6x16xf32> to vector<1x16xf32>
    %724 = arith.addf %723, %709 : vector<1x16xf32>
    %725 = arith.negf %724 : vector<1x16xf32>
    %726 = math.exp %725 : vector<1x16xf32>
    %cst_437 = arith.constant 1.000000e+00 : f32
    %727 = vector.broadcast %cst_437 : f32 to vector<1x16xf32>
    %728 = arith.addf %727, %726 : vector<1x16xf32>
    %729 = arith.divf %727, %728 : vector<1x16xf32>
    %730 = vector.extract_strided_slice %521 {offsets = [3, 0], sizes = [1, 16], strides = [1, 1]} : vector<6x16xf32> to vector<1x16xf32>
    %731 = arith.mulf %722, %715 : vector<1x16xf32>
    %732 = arith.addf %730, %731 : vector<1x16xf32>
    %733 = math.tanh %732 : vector<1x16xf32>
    %cst_438 = arith.constant 1.000000e+00 : f32
    %734 = vector.broadcast %cst_438 : f32 to vector<1x16xf32>
    %735 = arith.subf %734, %729 : vector<1x16xf32>
    %736 = arith.mulf %735, %733 : vector<1x16xf32>
    %737 = arith.mulf %729, %666 : vector<1x16xf32>
    %738 = arith.addf %736, %737 : vector<1x16xf32>
    %c3_439 = arith.constant 3 : index
    %c0_440 = arith.constant 0 : index
    %739 = vector.load %arg7[%c3_439, %c0_440] : memref<6x16xf32, #tpu.memory_space<vmem>>, vector<1x16xf32>
    tpu.vector_store %arg7[%c3_439, %c0_440], %738 {strides = array<i32>} : memref<6x16xf32, #tpu.memory_space<vmem>>, vector<1x16xf32>,
    %c6_441 = arith.constant 6 : index
    %c0_442 = arith.constant 0 : index
    %c0_443 = arith.constant 0 : index
    %740 = vector.load %arg2[%c6_441, %c0_442, %c0_443] : memref<12x16x16xf32, #tpu.memory_space<vmem>>, vector<1x16x16xf32>
    %741 = vector.shape_cast %740 : vector<1x16x16xf32> to vector<16x16xf32>
    %cst_444 = arith.constant dense<0.000000e+00> : vector<1x16xf32>
    %742 = tpu.matmul %702, %741, %cst_444 {dimension_numbers = #tpu.dot_dimension_numbers<[1], [0], [0], [1], [0, 0, 1, 1], [], []>} : vector<1x16xf32>, vector<16x16xf32>, vector<1x16xf32> -> vector<1x16xf32>
    %c7_445 = arith.constant 7 : index
    %c0_446 = arith.constant 0 : index
    %c0_447 = arith.constant 0 : index
    %743 = vector.load %arg2[%c7_445, %c0_446, %c0_447] : memref<12x16x16xf32, #tpu.memory_space<vmem>>, vector<1x16x16xf32>
    %744 = vector.shape_cast %743 : vector<1x16x16xf32> to vector<16x16xf32>
    %cst_448 = arith.constant dense<0.000000e+00> : vector<1x16xf32>
    %745 = tpu.matmul %702, %744, %cst_448 {dimension_numbers = #tpu.dot_dimension_numbers<[1], [0], [0], [1], [0, 0, 1, 1], [], []>} : vector<1x16xf32>, vector<16x16xf32>, vector<1x16xf32> -> vector<1x16xf32>
    %c8_449 = arith.constant 8 : index
    %c0_450 = arith.constant 0 : index
    %c0_451 = arith.constant 0 : index
    %746 = vector.load %arg2[%c8_449, %c0_450, %c0_451] : memref<12x16x16xf32, #tpu.memory_space<vmem>>, vector<1x16x16xf32>
    %747 = vector.shape_cast %746 : vector<1x16x16xf32> to vector<16x16xf32>
    %cst_452 = arith.constant dense<0.000000e+00> : vector<1x16xf32>
    %748 = tpu.matmul %702, %747, %cst_452 {dimension_numbers = #tpu.dot_dimension_numbers<[1], [0], [0], [1], [0, 0, 1, 1], [], []>} : vector<1x16xf32>, vector<16x16xf32>, vector<1x16xf32> -> vector<1x16xf32>
    %c2_453 = arith.constant 2 : index
    %c0_454 = arith.constant 0 : index
    %c0_455 = arith.constant 0 : index
    %749 = vector.load %arg4[%c2_453, %c0_454, %c0_455] : memref<4x1x16xf32, #tpu.memory_space<vmem>>, vector<1x1x16xf32>
    %750 = vector.shape_cast %749 : vector<1x1x16xf32> to vector<1x16xf32>
    %751 = arith.addf %748, %750 : vector<1x16xf32>
    %752 = vector.extract_strided_slice %486 {offsets = [3, 0], sizes = [1, 16], strides = [1, 1]} : vector<6x16xf32> to vector<1x16xf32>
    %753 = arith.addf %752, %742 : vector<1x16xf32>
    %754 = arith.negf %753 : vector<1x16xf32>
    %755 = math.exp %754 : vector<1x16xf32>
    %cst_456 = arith.constant 1.000000e+00 : f32
    %756 = vector.broadcast %cst_456 : f32 to vector<1x16xf32>
    %757 = arith.addf %756, %755 : vector<1x16xf32>
    %758 = arith.divf %756, %757 : vector<1x16xf32>
    %759 = vector.extract_strided_slice %493 {offsets = [3, 0], sizes = [1, 16], strides = [1, 1]} : vector<6x16xf32> to vector<1x16xf32>
    %760 = arith.addf %759, %745 : vector<1x16xf32>
    %761 = arith.negf %760 : vector<1x16xf32>
    %762 = math.exp %761 : vector<1x16xf32>
    %cst_457 = arith.constant 1.000000e+00 : f32
    %763 = vector.broadcast %cst_457 : f32 to vector<1x16xf32>
    %764 = arith.addf %763, %762 : vector<1x16xf32>
    %765 = arith.divf %763, %764 : vector<1x16xf32>
    %766 = vector.extract_strided_slice %500 {offsets = [3, 0], sizes = [1, 16], strides = [1, 1]} : vector<6x16xf32> to vector<1x16xf32>
    %767 = arith.mulf %758, %751 : vector<1x16xf32>
    %768 = arith.addf %766, %767 : vector<1x16xf32>
    %769 = math.tanh %768 : vector<1x16xf32>
    %cst_458 = arith.constant 1.000000e+00 : f32
    %770 = vector.broadcast %cst_458 : f32 to vector<1x16xf32>
    %771 = arith.subf %770, %765 : vector<1x16xf32>
    %772 = arith.mulf %771, %769 : vector<1x16xf32>
    %773 = arith.mulf %765, %702 : vector<1x16xf32>
    %774 = arith.addf %772, %773 : vector<1x16xf32>
    %c3_459 = arith.constant 3 : index
    %c0_460 = arith.constant 0 : index
    %775 = vector.load %arg6[%c3_459, %c0_460] : memref<6x16xf32, #tpu.memory_space<vmem>>, vector<1x16xf32>
    tpu.vector_store %arg6[%c3_459, %c0_460], %774 {strides = array<i32>} : memref<6x16xf32, #tpu.memory_space<vmem>>, vector<1x16xf32>,
    %c9_461 = arith.constant 9 : index
    %c0_462 = arith.constant 0 : index
    %c0_463 = arith.constant 0 : index
    %776 = vector.load %arg2[%c9_461, %c0_462, %c0_463] : memref<12x16x16xf32, #tpu.memory_space<vmem>>, vector<1x16x16xf32>
    %777 = vector.shape_cast %776 : vector<1x16x16xf32> to vector<16x16xf32>
    %cst_464 = arith.constant dense<0.000000e+00> : vector<1x16xf32>
    %778 = tpu.matmul %738, %777, %cst_464 {dimension_numbers = #tpu.dot_dimension_numbers<[1], [0], [0], [1], [0, 0, 1, 1], [], []>} : vector<1x16xf32>, vector<16x16xf32>, vector<1x16xf32> -> vector<1x16xf32>
    %c10_465 = arith.constant 10 : index
    %c0_466 = arith.constant 0 : index
    %c0_467 = arith.constant 0 : index
    %779 = vector.load %arg2[%c10_465, %c0_466, %c0_467] : memref<12x16x16xf32, #tpu.memory_space<vmem>>, vector<1x16x16xf32>
    %780 = vector.shape_cast %779 : vector<1x16x16xf32> to vector<16x16xf32>
    %cst_468 = arith.constant dense<0.000000e+00> : vector<1x16xf32>
    %781 = tpu.matmul %738, %780, %cst_468 {dimension_numbers = #tpu.dot_dimension_numbers<[1], [0], [0], [1], [0, 0, 1, 1], [], []>} : vector<1x16xf32>, vector<16x16xf32>, vector<1x16xf32> -> vector<1x16xf32>
    %c11_469 = arith.constant 11 : index
    %c0_470 = arith.constant 0 : index
    %c0_471 = arith.constant 0 : index
    %782 = vector.load %arg2[%c11_469, %c0_470, %c0_471] : memref<12x16x16xf32, #tpu.memory_space<vmem>>, vector<1x16x16xf32>
    %783 = vector.shape_cast %782 : vector<1x16x16xf32> to vector<16x16xf32>
    %cst_472 = arith.constant dense<0.000000e+00> : vector<1x16xf32>
    %784 = tpu.matmul %738, %783, %cst_472 {dimension_numbers = #tpu.dot_dimension_numbers<[1], [0], [0], [1], [0, 0, 1, 1], [], []>} : vector<1x16xf32>, vector<16x16xf32>, vector<1x16xf32> -> vector<1x16xf32>
    %c3_473 = arith.constant 3 : index
    %c0_474 = arith.constant 0 : index
    %c0_475 = arith.constant 0 : index
    %785 = vector.load %arg4[%c3_473, %c0_474, %c0_475] : memref<4x1x16xf32, #tpu.memory_space<vmem>>, vector<1x1x16xf32>
    %786 = vector.shape_cast %785 : vector<1x1x16xf32> to vector<1x16xf32>
    %787 = arith.addf %784, %786 : vector<1x16xf32>
    %788 = vector.extract_strided_slice %507 {offsets = [2, 0], sizes = [1, 16], strides = [1, 1]} : vector<6x16xf32> to vector<1x16xf32>
    %789 = arith.addf %788, %778 : vector<1x16xf32>
    %790 = arith.negf %789 : vector<1x16xf32>
    %791 = math.exp %790 : vector<1x16xf32>
    %cst_476 = arith.constant 1.000000e+00 : f32
    %792 = vector.broadcast %cst_476 : f32 to vector<1x16xf32>
    %793 = arith.addf %792, %791 : vector<1x16xf32>
    %794 = arith.divf %792, %793 : vector<1x16xf32>
    %795 = vector.extract_strided_slice %514 {offsets = [2, 0], sizes = [1, 16], strides = [1, 1]} : vector<6x16xf32> to vector<1x16xf32>
    %796 = arith.addf %795, %781 : vector<1x16xf32>
    %797 = arith.negf %796 : vector<1x16xf32>
    %798 = math.exp %797 : vector<1x16xf32>
    %cst_477 = arith.constant 1.000000e+00 : f32
    %799 = vector.broadcast %cst_477 : f32 to vector<1x16xf32>
    %800 = arith.addf %799, %798 : vector<1x16xf32>
    %801 = arith.divf %799, %800 : vector<1x16xf32>
    %802 = vector.extract_strided_slice %521 {offsets = [2, 0], sizes = [1, 16], strides = [1, 1]} : vector<6x16xf32> to vector<1x16xf32>
    %803 = arith.mulf %794, %787 : vector<1x16xf32>
    %804 = arith.addf %802, %803 : vector<1x16xf32>
    %805 = math.tanh %804 : vector<1x16xf32>
    %cst_478 = arith.constant 1.000000e+00 : f32
    %806 = vector.broadcast %cst_478 : f32 to vector<1x16xf32>
    %807 = arith.subf %806, %801 : vector<1x16xf32>
    %808 = arith.mulf %807, %805 : vector<1x16xf32>
    %809 = arith.mulf %801, %738 : vector<1x16xf32>
    %810 = arith.addf %808, %809 : vector<1x16xf32>
    %c2_479 = arith.constant 2 : index
    %c0_480 = arith.constant 0 : index
    %811 = vector.load %arg7[%c2_479, %c0_480] : memref<6x16xf32, #tpu.memory_space<vmem>>, vector<1x16xf32>
    tpu.vector_store %arg7[%c2_479, %c0_480], %810 {strides = array<i32>} : memref<6x16xf32, #tpu.memory_space<vmem>>, vector<1x16xf32>,
    %c6_481 = arith.constant 6 : index
    %c0_482 = arith.constant 0 : index
    %c0_483 = arith.constant 0 : index
    %812 = vector.load %arg2[%c6_481, %c0_482, %c0_483] : memref<12x16x16xf32, #tpu.memory_space<vmem>>, vector<1x16x16xf32>
    %813 = vector.shape_cast %812 : vector<1x16x16xf32> to vector<16x16xf32>
    %cst_484 = arith.constant dense<0.000000e+00> : vector<1x16xf32>
    %814 = tpu.matmul %774, %813, %cst_484 {dimension_numbers = #tpu.dot_dimension_numbers<[1], [0], [0], [1], [0, 0, 1, 1], [], []>} : vector<1x16xf32>, vector<16x16xf32>, vector<1x16xf32> -> vector<1x16xf32>
    %c7_485 = arith.constant 7 : index
    %c0_486 = arith.constant 0 : index
    %c0_487 = arith.constant 0 : index
    %815 = vector.load %arg2[%c7_485, %c0_486, %c0_487] : memref<12x16x16xf32, #tpu.memory_space<vmem>>, vector<1x16x16xf32>
    %816 = vector.shape_cast %815 : vector<1x16x16xf32> to vector<16x16xf32>
    %cst_488 = arith.constant dense<0.000000e+00> : vector<1x16xf32>
    %817 = tpu.matmul %774, %816, %cst_488 {dimension_numbers = #tpu.dot_dimension_numbers<[1], [0], [0], [1], [0, 0, 1, 1], [], []>} : vector<1x16xf32>, vector<16x16xf32>, vector<1x16xf32> -> vector<1x16xf32>
    %c8_489 = arith.constant 8 : index
    %c0_490 = arith.constant 0 : index
    %c0_491 = arith.constant 0 : index
    %818 = vector.load %arg2[%c8_489, %c0_490, %c0_491] : memref<12x16x16xf32, #tpu.memory_space<vmem>>, vector<1x16x16xf32>
    %819 = vector.shape_cast %818 : vector<1x16x16xf32> to vector<16x16xf32>
    %cst_492 = arith.constant dense<0.000000e+00> : vector<1x16xf32>
    %820 = tpu.matmul %774, %819, %cst_492 {dimension_numbers = #tpu.dot_dimension_numbers<[1], [0], [0], [1], [0, 0, 1, 1], [], []>} : vector<1x16xf32>, vector<16x16xf32>, vector<1x16xf32> -> vector<1x16xf32>
    %c2_493 = arith.constant 2 : index
    %c0_494 = arith.constant 0 : index
    %c0_495 = arith.constant 0 : index
    %821 = vector.load %arg4[%c2_493, %c0_494, %c0_495] : memref<4x1x16xf32, #tpu.memory_space<vmem>>, vector<1x1x16xf32>
    %822 = vector.shape_cast %821 : vector<1x1x16xf32> to vector<1x16xf32>
    %823 = arith.addf %820, %822 : vector<1x16xf32>
    %824 = vector.extract_strided_slice %486 {offsets = [4, 0], sizes = [1, 16], strides = [1, 1]} : vector<6x16xf32> to vector<1x16xf32>
    %825 = arith.addf %824, %814 : vector<1x16xf32>
    %826 = arith.negf %825 : vector<1x16xf32>
    %827 = math.exp %826 : vector<1x16xf32>
    %cst_496 = arith.constant 1.000000e+00 : f32
    %828 = vector.broadcast %cst_496 : f32 to vector<1x16xf32>
    %829 = arith.addf %828, %827 : vector<1x16xf32>
    %830 = arith.divf %828, %829 : vector<1x16xf32>
    %831 = vector.extract_strided_slice %493 {offsets = [4, 0], sizes = [1, 16], strides = [1, 1]} : vector<6x16xf32> to vector<1x16xf32>
    %832 = arith.addf %831, %817 : vector<1x16xf32>
    %833 = arith.negf %832 : vector<1x16xf32>
    %834 = math.exp %833 : vector<1x16xf32>
    %cst_497 = arith.constant 1.000000e+00 : f32
    %835 = vector.broadcast %cst_497 : f32 to vector<1x16xf32>
    %836 = arith.addf %835, %834 : vector<1x16xf32>
    %837 = arith.divf %835, %836 : vector<1x16xf32>
    %838 = vector.extract_strided_slice %500 {offsets = [4, 0], sizes = [1, 16], strides = [1, 1]} : vector<6x16xf32> to vector<1x16xf32>
    %839 = arith.mulf %830, %823 : vector<1x16xf32>
    %840 = arith.addf %838, %839 : vector<1x16xf32>
    %841 = math.tanh %840 : vector<1x16xf32>
    %cst_498 = arith.constant 1.000000e+00 : f32
    %842 = vector.broadcast %cst_498 : f32 to vector<1x16xf32>
    %843 = arith.subf %842, %837 : vector<1x16xf32>
    %844 = arith.mulf %843, %841 : vector<1x16xf32>
    %845 = arith.mulf %837, %774 : vector<1x16xf32>
    %846 = arith.addf %844, %845 : vector<1x16xf32>
    %c4_499 = arith.constant 4 : index
    %c0_500 = arith.constant 0 : index
    %847 = vector.load %arg6[%c4_499, %c0_500] : memref<6x16xf32, #tpu.memory_space<vmem>>, vector<1x16xf32>
    tpu.vector_store %arg6[%c4_499, %c0_500], %846 {strides = array<i32>} : memref<6x16xf32, #tpu.memory_space<vmem>>, vector<1x16xf32>,
    %c9_501 = arith.constant 9 : index
    %c0_502 = arith.constant 0 : index
    %c0_503 = arith.constant 0 : index
    %848 = vector.load %arg2[%c9_501, %c0_502, %c0_503] : memref<12x16x16xf32, #tpu.memory_space<vmem>>, vector<1x16x16xf32>
    %849 = vector.shape_cast %848 : vector<1x16x16xf32> to vector<16x16xf32>
    %cst_504 = arith.constant dense<0.000000e+00> : vector<1x16xf32>
    %850 = tpu.matmul %810, %849, %cst_504 {dimension_numbers = #tpu.dot_dimension_numbers<[1], [0], [0], [1], [0, 0, 1, 1], [], []>} : vector<1x16xf32>, vector<16x16xf32>, vector<1x16xf32> -> vector<1x16xf32>
    %c10_505 = arith.constant 10 : index
    %c0_506 = arith.constant 0 : index
    %c0_507 = arith.constant 0 : index
    %851 = vector.load %arg2[%c10_505, %c0_506, %c0_507] : memref<12x16x16xf32, #tpu.memory_space<vmem>>, vector<1x16x16xf32>
    %852 = vector.shape_cast %851 : vector<1x16x16xf32> to vector<16x16xf32>
    %cst_508 = arith.constant dense<0.000000e+00> : vector<1x16xf32>
    %853 = tpu.matmul %810, %852, %cst_508 {dimension_numbers = #tpu.dot_dimension_numbers<[1], [0], [0], [1], [0, 0, 1, 1], [], []>} : vector<1x16xf32>, vector<16x16xf32>, vector<1x16xf32> -> vector<1x16xf32>
    %c11_509 = arith.constant 11 : index
    %c0_510 = arith.constant 0 : index
    %c0_511 = arith.constant 0 : index
    %854 = vector.load %arg2[%c11_509, %c0_510, %c0_511] : memref<12x16x16xf32, #tpu.memory_space<vmem>>, vector<1x16x16xf32>
    %855 = vector.shape_cast %854 : vector<1x16x16xf32> to vector<16x16xf32>
    %cst_512 = arith.constant dense<0.000000e+00> : vector<1x16xf32>
    %856 = tpu.matmul %810, %855, %cst_512 {dimension_numbers = #tpu.dot_dimension_numbers<[1], [0], [0], [1], [0, 0, 1, 1], [], []>} : vector<1x16xf32>, vector<16x16xf32>, vector<1x16xf32> -> vector<1x16xf32>
    %c3_513 = arith.constant 3 : index
    %c0_514 = arith.constant 0 : index
    %c0_515 = arith.constant 0 : index
    %857 = vector.load %arg4[%c3_513, %c0_514, %c0_515] : memref<4x1x16xf32, #tpu.memory_space<vmem>>, vector<1x1x16xf32>
    %858 = vector.shape_cast %857 : vector<1x1x16xf32> to vector<1x16xf32>
    %859 = arith.addf %856, %858 : vector<1x16xf32>
    %860 = vector.extract_strided_slice %507 {offsets = [1, 0], sizes = [1, 16], strides = [1, 1]} : vector<6x16xf32> to vector<1x16xf32>
    %861 = arith.addf %860, %850 : vector<1x16xf32>
    %862 = arith.negf %861 : vector<1x16xf32>
    %863 = math.exp %862 : vector<1x16xf32>
    %cst_516 = arith.constant 1.000000e+00 : f32
    %864 = vector.broadcast %cst_516 : f32 to vector<1x16xf32>
    %865 = arith.addf %864, %863 : vector<1x16xf32>
    %866 = arith.divf %864, %865 : vector<1x16xf32>
    %867 = vector.extract_strided_slice %514 {offsets = [1, 0], sizes = [1, 16], strides = [1, 1]} : vector<6x16xf32> to vector<1x16xf32>
    %868 = arith.addf %867, %853 : vector<1x16xf32>
    %869 = arith.negf %868 : vector<1x16xf32>
    %870 = math.exp %869 : vector<1x16xf32>
    %cst_517 = arith.constant 1.000000e+00 : f32
    %871 = vector.broadcast %cst_517 : f32 to vector<1x16xf32>
    %872 = arith.addf %871, %870 : vector<1x16xf32>
    %873 = arith.divf %871, %872 : vector<1x16xf32>
    %874 = vector.extract_strided_slice %521 {offsets = [1, 0], sizes = [1, 16], strides = [1, 1]} : vector<6x16xf32> to vector<1x16xf32>
    %875 = arith.mulf %866, %859 : vector<1x16xf32>
    %876 = arith.addf %874, %875 : vector<1x16xf32>
    %877 = math.tanh %876 : vector<1x16xf32>
    %cst_518 = arith.constant 1.000000e+00 : f32
    %878 = vector.broadcast %cst_518 : f32 to vector<1x16xf32>
    %879 = arith.subf %878, %873 : vector<1x16xf32>
    %880 = arith.mulf %879, %877 : vector<1x16xf32>
    %881 = arith.mulf %873, %810 : vector<1x16xf32>
    %882 = arith.addf %880, %881 : vector<1x16xf32>
    %c1_519 = arith.constant 1 : index
    %c0_520 = arith.constant 0 : index
    %883 = vector.load %arg7[%c1_519, %c0_520] : memref<6x16xf32, #tpu.memory_space<vmem>>, vector<1x16xf32>
    tpu.vector_store %arg7[%c1_519, %c0_520], %882 {strides = array<i32>} : memref<6x16xf32, #tpu.memory_space<vmem>>, vector<1x16xf32>,
    %c6_521 = arith.constant 6 : index
    %c0_522 = arith.constant 0 : index
    %c0_523 = arith.constant 0 : index
    %884 = vector.load %arg2[%c6_521, %c0_522, %c0_523] : memref<12x16x16xf32, #tpu.memory_space<vmem>>, vector<1x16x16xf32>
    %885 = vector.shape_cast %884 : vector<1x16x16xf32> to vector<16x16xf32>
    %cst_524 = arith.constant dense<0.000000e+00> : vector<1x16xf32>
    %886 = tpu.matmul %846, %885, %cst_524 {dimension_numbers = #tpu.dot_dimension_numbers<[1], [0], [0], [1], [0, 0, 1, 1], [], []>} : vector<1x16xf32>, vector<16x16xf32>, vector<1x16xf32> -> vector<1x16xf32>
    %c7_525 = arith.constant 7 : index
    %c0_526 = arith.constant 0 : index
    %c0_527 = arith.constant 0 : index
    %887 = vector.load %arg2[%c7_525, %c0_526, %c0_527] : memref<12x16x16xf32, #tpu.memory_space<vmem>>, vector<1x16x16xf32>
    %888 = vector.shape_cast %887 : vector<1x16x16xf32> to vector<16x16xf32>
    %cst_528 = arith.constant dense<0.000000e+00> : vector<1x16xf32>
    %889 = tpu.matmul %846, %888, %cst_528 {dimension_numbers = #tpu.dot_dimension_numbers<[1], [0], [0], [1], [0, 0, 1, 1], [], []>} : vector<1x16xf32>, vector<16x16xf32>, vector<1x16xf32> -> vector<1x16xf32>
    %c8_529 = arith.constant 8 : index
    %c0_530 = arith.constant 0 : index
    %c0_531 = arith.constant 0 : index
    %890 = vector.load %arg2[%c8_529, %c0_530, %c0_531] : memref<12x16x16xf32, #tpu.memory_space<vmem>>, vector<1x16x16xf32>
    %891 = vector.shape_cast %890 : vector<1x16x16xf32> to vector<16x16xf32>
    %cst_532 = arith.constant dense<0.000000e+00> : vector<1x16xf32>
    %892 = tpu.matmul %846, %891, %cst_532 {dimension_numbers = #tpu.dot_dimension_numbers<[1], [0], [0], [1], [0, 0, 1, 1], [], []>} : vector<1x16xf32>, vector<16x16xf32>, vector<1x16xf32> -> vector<1x16xf32>
    %c2_533 = arith.constant 2 : index
    %c0_534 = arith.constant 0 : index
    %c0_535 = arith.constant 0 : index
    %893 = vector.load %arg4[%c2_533, %c0_534, %c0_535] : memref<4x1x16xf32, #tpu.memory_space<vmem>>, vector<1x1x16xf32>
    %894 = vector.shape_cast %893 : vector<1x1x16xf32> to vector<1x16xf32>
    %895 = arith.addf %892, %894 : vector<1x16xf32>
    %896 = vector.extract_strided_slice %486 {offsets = [5, 0], sizes = [1, 16], strides = [1, 1]} : vector<6x16xf32> to vector<1x16xf32>
    %897 = arith.addf %896, %886 : vector<1x16xf32>
    %898 = arith.negf %897 : vector<1x16xf32>
    %899 = math.exp %898 : vector<1x16xf32>
    %cst_536 = arith.constant 1.000000e+00 : f32
    %900 = vector.broadcast %cst_536 : f32 to vector<1x16xf32>
    %901 = arith.addf %900, %899 : vector<1x16xf32>
    %902 = arith.divf %900, %901 : vector<1x16xf32>
    %903 = vector.extract_strided_slice %493 {offsets = [5, 0], sizes = [1, 16], strides = [1, 1]} : vector<6x16xf32> to vector<1x16xf32>
    %904 = arith.addf %903, %889 : vector<1x16xf32>
    %905 = arith.negf %904 : vector<1x16xf32>
    %906 = math.exp %905 : vector<1x16xf32>
    %cst_537 = arith.constant 1.000000e+00 : f32
    %907 = vector.broadcast %cst_537 : f32 to vector<1x16xf32>
    %908 = arith.addf %907, %906 : vector<1x16xf32>
    %909 = arith.divf %907, %908 : vector<1x16xf32>
    %910 = vector.extract_strided_slice %500 {offsets = [5, 0], sizes = [1, 16], strides = [1, 1]} : vector<6x16xf32> to vector<1x16xf32>
    %911 = arith.mulf %902, %895 : vector<1x16xf32>
    %912 = arith.addf %910, %911 : vector<1x16xf32>
    %913 = math.tanh %912 : vector<1x16xf32>
    %cst_538 = arith.constant 1.000000e+00 : f32
    %914 = vector.broadcast %cst_538 : f32 to vector<1x16xf32>
    %915 = arith.subf %914, %909 : vector<1x16xf32>
    %916 = arith.mulf %915, %913 : vector<1x16xf32>
    %917 = arith.mulf %909, %846 : vector<1x16xf32>
    %918 = arith.addf %916, %917 : vector<1x16xf32>
    %c5_539 = arith.constant 5 : index
    %c0_540 = arith.constant 0 : index
    %919 = vector.load %arg6[%c5_539, %c0_540] : memref<6x16xf32, #tpu.memory_space<vmem>>, vector<1x16xf32>
    tpu.vector_store %arg6[%c5_539, %c0_540], %918 {strides = array<i32>} : memref<6x16xf32, #tpu.memory_space<vmem>>, vector<1x16xf32>,
    %c9_541 = arith.constant 9 : index
    %c0_542 = arith.constant 0 : index
    %c0_543 = arith.constant 0 : index
    %920 = vector.load %arg2[%c9_541, %c0_542, %c0_543] : memref<12x16x16xf32, #tpu.memory_space<vmem>>, vector<1x16x16xf32>
    %921 = vector.shape_cast %920 : vector<1x16x16xf32> to vector<16x16xf32>
    %cst_544 = arith.constant dense<0.000000e+00> : vector<1x16xf32>
    %922 = tpu.matmul %882, %921, %cst_544 {dimension_numbers = #tpu.dot_dimension_numbers<[1], [0], [0], [1], [0, 0, 1, 1], [], []>} : vector<1x16xf32>, vector<16x16xf32>, vector<1x16xf32> -> vector<1x16xf32>
    %c10_545 = arith.constant 10 : index
    %c0_546 = arith.constant 0 : index
    %c0_547 = arith.constant 0 : index
    %923 = vector.load %arg2[%c10_545, %c0_546, %c0_547] : memref<12x16x16xf32, #tpu.memory_space<vmem>>, vector<1x16x16xf32>
    %924 = vector.shape_cast %923 : vector<1x16x16xf32> to vector<16x16xf32>
    %cst_548 = arith.constant dense<0.000000e+00> : vector<1x16xf32>
    %925 = tpu.matmul %882, %924, %cst_548 {dimension_numbers = #tpu.dot_dimension_numbers<[1], [0], [0], [1], [0, 0, 1, 1], [], []>} : vector<1x16xf32>, vector<16x16xf32>, vector<1x16xf32> -> vector<1x16xf32>
    %c11_549 = arith.constant 11 : index
    %c0_550 = arith.constant 0 : index
    %c0_551 = arith.constant 0 : index
    %926 = vector.load %arg2[%c11_549, %c0_550, %c0_551] : memref<12x16x16xf32, #tpu.memory_space<vmem>>, vector<1x16x16xf32>
    %927 = vector.shape_cast %926 : vector<1x16x16xf32> to vector<16x16xf32>
    %cst_552 = arith.constant dense<0.000000e+00> : vector<1x16xf32>
    %928 = tpu.matmul %882, %927, %cst_552 {dimension_numbers = #tpu.dot_dimension_numbers<[1], [0], [0], [1], [0, 0, 1, 1], [], []>} : vector<1x16xf32>, vector<16x16xf32>, vector<1x16xf32> -> vector<1x16xf32>
    %c3_553 = arith.constant 3 : index
    %c0_554 = arith.constant 0 : index
    %c0_555 = arith.constant 0 : index
    %929 = vector.load %arg4[%c3_553, %c0_554, %c0_555] : memref<4x1x16xf32, #tpu.memory_space<vmem>>, vector<1x1x16xf32>
    %930 = vector.shape_cast %929 : vector<1x1x16xf32> to vector<1x16xf32>
    %931 = arith.addf %928, %930 : vector<1x16xf32>
    %932 = vector.extract_strided_slice %507 {offsets = [0, 0], sizes = [1, 16], strides = [1, 1]} : vector<6x16xf32> to vector<1x16xf32>
    %933 = arith.addf %932, %922 : vector<1x16xf32>
    %934 = arith.negf %933 : vector<1x16xf32>
    %935 = math.exp %934 : vector<1x16xf32>
    %cst_556 = arith.constant 1.000000e+00 : f32
    %936 = vector.broadcast %cst_556 : f32 to vector<1x16xf32>
    %937 = arith.addf %936, %935 : vector<1x16xf32>
    %938 = arith.divf %936, %937 : vector<1x16xf32>
    %939 = vector.extract_strided_slice %514 {offsets = [0, 0], sizes = [1, 16], strides = [1, 1]} : vector<6x16xf32> to vector<1x16xf32>
    %940 = arith.addf %939, %925 : vector<1x16xf32>
    %941 = arith.negf %940 : vector<1x16xf32>
    %942 = math.exp %941 : vector<1x16xf32>
    %cst_557 = arith.constant 1.000000e+00 : f32
    %943 = vector.broadcast %cst_557 : f32 to vector<1x16xf32>
    %944 = arith.addf %943, %942 : vector<1x16xf32>
    %945 = arith.divf %943, %944 : vector<1x16xf32>
    %946 = vector.extract_strided_slice %521 {offsets = [0, 0], sizes = [1, 16], strides = [1, 1]} : vector<6x16xf32> to vector<1x16xf32>
    %947 = arith.mulf %938, %931 : vector<1x16xf32>
    %948 = arith.addf %946, %947 : vector<1x16xf32>
    %949 = math.tanh %948 : vector<1x16xf32>
    %cst_558 = arith.constant 1.000000e+00 : f32
    %950 = vector.broadcast %cst_558 : f32 to vector<1x16xf32>
    %951 = arith.subf %950, %945 : vector<1x16xf32>
    %952 = arith.mulf %951, %949 : vector<1x16xf32>
    %953 = arith.mulf %945, %882 : vector<1x16xf32>
    %954 = arith.addf %952, %953 : vector<1x16xf32>
    %c0_559 = arith.constant 0 : index
    %c0_560 = arith.constant 0 : index
    %955 = vector.load %arg7[%c0_559, %c0_560] : memref<6x16xf32, #tpu.memory_space<vmem>>, vector<1x16xf32>
    tpu.vector_store %arg7[%c0_559, %c0_560], %954 {strides = array<i32>} : memref<6x16xf32, #tpu.memory_space<vmem>>, vector<1x16xf32>,
    %c0_561 = arith.constant 0 : index
    %c0_562 = arith.constant 0 : index
    %956 = vector.load %arg6[%c0_561, %c0_562] : memref<6x16xf32, #tpu.memory_space<vmem>>, vector<6x16xf32>
    %c0_563 = arith.constant 0 : index
    %c0_564 = arith.constant 0 : index
    %957 = vector.load %arg7[%c0_563, %c0_564] : memref<6x16xf32, #tpu.memory_space<vmem>>, vector<6x16xf32>
    %958 = tpu.concatenate %956, %957 in 1 : vector<6x16xf32>, vector<6x16xf32> -> vector<6x32xf32>
    %c0_565 = arith.constant 0 : index
    %c0_566 = arith.constant 0 : index
    %959 = vector.load %arg5[%c0_565, %c0_566] : memref<6x32xf32, #tpu.memory_space<vmem>>, vector<6x32xf32>
    tpu.vector_store %arg5[%c0_565, %c0_566], %958 {strides = array<i32>} : memref<6x32xf32, #tpu.memory_space<vmem>>, vector<6x32xf32>,
    return
  }
}

module attributes {stable_mosaic.version = 11 : i64} {
  func.func @_attn_pool_kernel(%arg0: memref<1x6x32xf32, #tpu.memory_space<vmem>>, %arg1: memref<32x32xf32, #tpu.memory_space<vmem>>, %arg2: memref<1x32xf32, #tpu.memory_space<vmem>>, %arg3: memref<1x32xf32, #tpu.memory_space<vmem>>, %arg4: memref<1x1xf32, #tpu.memory_space<vmem>>, %arg5: memref<1x1x32xf32, #tpu.memory_space<vmem>>) attributes {dimension_semantics = [], scalar_prefetch = 0 : i64, scratch_operands = 0 : i64, tpu.core_type = #tpu.core_type<tc>} {
    %c0 = arith.constant 0 : index
    %c0_0 = arith.constant 0 : index
    %c0_1 = arith.constant 0 : index
    %0 = vector.load %arg0[%c0, %c0_0, %c0_1] : memref<1x6x32xf32, #tpu.memory_space<vmem>>, vector<1x6x32xf32>
    %c0_2 = arith.constant 0 : index
    %c0_3 = arith.constant 0 : index
    %1 = vector.load %arg1[%c0_2, %c0_3] : memref<32x32xf32, #tpu.memory_space<vmem>>, vector<32x32xf32>
    %2 = vector.shape_cast %1 : vector<32x32xf32> to vector<1x32x32xf32>
    "tpu.trace_start"() <{level = 10 : i32, message = "bsd,bhd->bsh"}> : () -> ()
    %cst = arith.constant dense<0.000000e+00> : vector<1x6x32xf32>
    %3 = tpu.matmul %0, %2, %cst {dimension_numbers = #tpu.dot_dimension_numbers<[2], [2], [1], [1], [0, 0, 0, 1, 1, 1], [0], [0]>} : vector<1x6x32xf32>, vector<1x32x32xf32>, vector<1x6x32xf32> -> vector<1x6x32xf32>
    "tpu.trace_stop"() : () -> ()
    %c0_4 = arith.constant 0 : index
    %c0_5 = arith.constant 0 : index
    %4 = vector.load %arg2[%c0_4, %c0_5] : memref<1x32xf32, #tpu.memory_space<vmem>>, vector<1x32xf32>
    %5 = vector.shape_cast %4 : vector<1x32xf32> to vector<1x1x32xf32>
    %6 = vector.broadcast %5 : vector<1x1x32xf32> to vector<1x6x32xf32>
    %7 = arith.addf %3, %6 : vector<1x6x32xf32>
    %8 = math.tanh %7 : vector<1x6x32xf32>
    %c0_6 = arith.constant 0 : index
    %c0_7 = arith.constant 0 : index
    %9 = vector.load %arg3[%c0_6, %c0_7] : memref<1x32xf32, #tpu.memory_space<vmem>>, vector<1x32xf32>
    %10 = vector.shape_cast %9 : vector<1x32xf32> to vector<1x1x32xf32>
    %11 = vector.broadcast %10 : vector<1x1x32xf32> to vector<1x6x32xf32>
    %12 = arith.mulf %8, %11 : vector<1x6x32xf32>
    %cst_8 = arith.constant dense<0.000000e+00> : vector<1x6xf32>
    %13 = vector.multi_reduction <add>, %12, %cst_8 [2] : vector<1x6x32xf32> to vector<1x6xf32>
    %14 = vector.shape_cast %13 : vector<1x6xf32> to vector<1x6x1xf32>
    %c0_9 = arith.constant 0 : index
    %c0_10 = arith.constant 0 : index
    %15 = vector.load %arg4[%c0_9, %c0_10] : memref<1x1xf32, #tpu.memory_space<vmem>>, vector<1x1xf32>
    %16 = vector.shape_cast %15 : vector<1x1xf32> to vector<1x1x1xf32>
    %17 = vector.broadcast %16 : vector<1x1x1xf32> to vector<1x6x1xf32>
    %18 = arith.addf %14, %17 : vector<1x6x1xf32>
    %cst_11 = arith.constant dense<0xFF800000> : vector<1x1xf32>
    %19 = vector.multi_reduction <maximumf>, %18, %cst_11 [1] : vector<1x6x1xf32> to vector<1x1xf32>
    %20 = vector.shape_cast %19 : vector<1x1xf32> to vector<1x1x1xf32>
    %21 = vector.broadcast %20 : vector<1x1x1xf32> to vector<1x6x1xf32>
    %22 = arith.subf %18, %21 : vector<1x6x1xf32>
    %23 = math.exp %22 : vector<1x6x1xf32>
    %cst_12 = arith.constant dense<0.000000e+00> : vector<1x1xf32>
    %24 = vector.multi_reduction <add>, %23, %cst_12 [1] : vector<1x6x1xf32> to vector<1x1xf32>
    %25 = vector.shape_cast %24 : vector<1x1xf32> to vector<1x1x1xf32>
    %26 = tpu.reciprocal %25 {approx = true} : vector<1x1x1xf32> -> vector<1x1x1xf32>
    %27 = vector.broadcast %26 : vector<1x1x1xf32> to vector<1x6x1xf32>
    %28 = arith.mulf %23, %27 : vector<1x6x1xf32>
    %29 = vector.broadcast %28 : vector<1x6x1xf32> to vector<1x6x32xf32>
    %30 = arith.mulf %29, %0 : vector<1x6x32xf32>
    %cst_13 = arith.constant dense<0.000000e+00> : vector<1x32xf32>
    %31 = vector.multi_reduction <add>, %30, %cst_13 [1] : vector<1x6x32xf32> to vector<1x32xf32>
    %32 = vector.shape_cast %31 : vector<1x32xf32> to vector<1x1x32xf32>
    %c0_14 = arith.constant 0 : index
    %c0_15 = arith.constant 0 : index
    %c0_16 = arith.constant 0 : index
    %33 = vector.load %arg5[%c0_14, %c0_15, %c0_16] : memref<1x1x32xf32, #tpu.memory_space<vmem>>, vector<1x1x32xf32>
    tpu.vector_store %arg5[%c0_14, %c0_15, %c0_16], %32 {strides = array<i32>} : memref<1x1x32xf32, #tpu.memory_space<vmem>>, vector<1x1x32xf32>,
    return
  }
}

module attributes {stable_mosaic.version = 11 : i64} {
  func.func @_attn_pool_kernel(%arg0: memref<1x24x32xf32, #tpu.memory_space<vmem>>, %arg1: memref<32x32xf32, #tpu.memory_space<vmem>>, %arg2: memref<1x32xf32, #tpu.memory_space<vmem>>, %arg3: memref<1x32xf32, #tpu.memory_space<vmem>>, %arg4: memref<1x1xf32, #tpu.memory_space<vmem>>, %arg5: memref<1x1x32xf32, #tpu.memory_space<vmem>>) attributes {dimension_semantics = [], scalar_prefetch = 0 : i64, scratch_operands = 0 : i64, tpu.core_type = #tpu.core_type<tc>} {
    %c0 = arith.constant 0 : index
    %c0_0 = arith.constant 0 : index
    %c0_1 = arith.constant 0 : index
    %0 = vector.load %arg0[%c0, %c0_0, %c0_1] : memref<1x24x32xf32, #tpu.memory_space<vmem>>, vector<1x24x32xf32>
    %c0_2 = arith.constant 0 : index
    %c0_3 = arith.constant 0 : index
    %1 = vector.load %arg1[%c0_2, %c0_3] : memref<32x32xf32, #tpu.memory_space<vmem>>, vector<32x32xf32>
    %2 = vector.shape_cast %1 : vector<32x32xf32> to vector<1x32x32xf32>
    "tpu.trace_start"() <{level = 10 : i32, message = "bsd,bhd->bsh"}> : () -> ()
    %cst = arith.constant dense<0.000000e+00> : vector<1x24x32xf32>
    %3 = tpu.matmul %0, %2, %cst {dimension_numbers = #tpu.dot_dimension_numbers<[2], [2], [1], [1], [0, 0, 0, 1, 1, 1], [0], [0]>} : vector<1x24x32xf32>, vector<1x32x32xf32>, vector<1x24x32xf32> -> vector<1x24x32xf32>
    "tpu.trace_stop"() : () -> ()
    %c0_4 = arith.constant 0 : index
    %c0_5 = arith.constant 0 : index
    %4 = vector.load %arg2[%c0_4, %c0_5] : memref<1x32xf32, #tpu.memory_space<vmem>>, vector<1x32xf32>
    %5 = vector.shape_cast %4 : vector<1x32xf32> to vector<1x1x32xf32>
    %6 = vector.broadcast %5 : vector<1x1x32xf32> to vector<1x24x32xf32>
    %7 = arith.addf %3, %6 : vector<1x24x32xf32>
    %8 = math.tanh %7 : vector<1x24x32xf32>
    %c0_6 = arith.constant 0 : index
    %c0_7 = arith.constant 0 : index
    %9 = vector.load %arg3[%c0_6, %c0_7] : memref<1x32xf32, #tpu.memory_space<vmem>>, vector<1x32xf32>
    %10 = vector.shape_cast %9 : vector<1x32xf32> to vector<1x1x32xf32>
    %11 = vector.broadcast %10 : vector<1x1x32xf32> to vector<1x24x32xf32>
    %12 = arith.mulf %8, %11 : vector<1x24x32xf32>
    %cst_8 = arith.constant dense<0.000000e+00> : vector<1x24xf32>
    %13 = vector.multi_reduction <add>, %12, %cst_8 [2] : vector<1x24x32xf32> to vector<1x24xf32>
    %14 = vector.shape_cast %13 : vector<1x24xf32> to vector<1x24x1xf32>
    %c0_9 = arith.constant 0 : index
    %c0_10 = arith.constant 0 : index
    %15 = vector.load %arg4[%c0_9, %c0_10] : memref<1x1xf32, #tpu.memory_space<vmem>>, vector<1x1xf32>
    %16 = vector.shape_cast %15 : vector<1x1xf32> to vector<1x1x1xf32>
    %17 = vector.broadcast %16 : vector<1x1x1xf32> to vector<1x24x1xf32>
    %18 = arith.addf %14, %17 : vector<1x24x1xf32>
    %cst_11 = arith.constant dense<0xFF800000> : vector<1x1xf32>
    %19 = vector.multi_reduction <maximumf>, %18, %cst_11 [1] : vector<1x24x1xf32> to vector<1x1xf32>
    %20 = vector.shape_cast %19 : vector<1x1xf32> to vector<1x1x1xf32>
    %21 = vector.broadcast %20 : vector<1x1x1xf32> to vector<1x24x1xf32>
    %22 = arith.subf %18, %21 : vector<1x24x1xf32>
    %23 = math.exp %22 : vector<1x24x1xf32>
    %cst_12 = arith.constant dense<0.000000e+00> : vector<1x1xf32>
    %24 = vector.multi_reduction <add>, %23, %cst_12 [1] : vector<1x24x1xf32> to vector<1x1xf32>
    %25 = vector.shape_cast %24 : vector<1x1xf32> to vector<1x1x1xf32>
    %26 = tpu.reciprocal %25 {approx = true} : vector<1x1x1xf32> -> vector<1x1x1xf32>
    %27 = vector.broadcast %26 : vector<1x1x1xf32> to vector<1x24x1xf32>
    %28 = arith.mulf %23, %27 : vector<1x24x1xf32>
    %29 = vector.broadcast %28 : vector<1x24x1xf32> to vector<1x24x32xf32>
    %30 = arith.mulf %29, %0 : vector<1x24x32xf32>
    %cst_13 = arith.constant dense<0.000000e+00> : vector<1x32xf32>
    %31 = vector.multi_reduction <add>, %30, %cst_13 [1] : vector<1x24x32xf32> to vector<1x32xf32>
    %32 = vector.shape_cast %31 : vector<1x32xf32> to vector<1x1x32xf32>
    %c0_14 = arith.constant 0 : index
    %c0_15 = arith.constant 0 : index
    %c0_16 = arith.constant 0 : index
    %33 = vector.load %arg5[%c0_14, %c0_15, %c0_16] : memref<1x1x32xf32, #tpu.memory_space<vmem>>, vector<1x1x32xf32>
    tpu.vector_store %arg5[%c0_14, %c0_15, %c0_16], %32 {strides = array<i32>} : memref<1x1x32xf32, #tpu.memory_space<vmem>>, vector<1x1x32xf32>,
    return
  }
}

</mosaic_0001>

<bundles_post_ra>
// kernel: squeeze.9
= control target key start
LH: loop header
LB: loop body
LE: loop exit
PB: predicated region body
PF: predicated region fallthrough
CT: control target
= control target key end

     0   :  { %vm3_vm0 = vcmask 261120   ;;  %s38_s0 = inlined_call_operand.vmem [shape: f32[6,32], index: 0, kind: input, shape index: {}]   ;;  %s39_s1 = inlined_call_operand.vmem [shape: f32[2,3,32], index: 1, kind: output, shape index: {}]  }
   0x1   :  { %v2_v0 = vld [vmem:[%s38_s0] sm:$0x3f]  }
   0x2   :  { %4 = vst.msk [vmem:[#allocation0] sm:$0x7] %vm3_vm0, %v2_v0   ;;  %6 = vst.msk [vmem:[#allocation0 + $0x5] sm:$0x38] %vm3_vm0, %v2_v0  }
   0x9   :  { %v10_v1 = vld [vmem:[#allocation0] sm:$0xf]  ;;  %v14_v2 = vld [vmem:[#allocation0 + $0x8] sm:$0xf] }
   0xa   :  { %12 = vst [vmem:[%s39_s1] sm:$0xf] %v10_v1  ;;  %18 = vst [vmem:[%s39_s1 + $0x4] sm:$0xf] %v14_v2 }

// kernel: mash_rnn.13
= control target key start
LH: loop header
LB: loop body
LE: loop exit
PB: predicated region body
PF: predicated region fallthrough
CT: control target
= control target key end

     0   :  { %vm39_vm0 = vcmask 261120   ;;  %v964_v0 = vmov 0.0|0.0   ;;  %vm965_vm2 = vmmov 0   ;;  %v966_v5 = vmov 0.0   ;;  %s1155_s1 = inlined_call_operand.vmem [shape: f32[32,32], index: 1, kind: input, shape index: {}]   ;;  %s1156_s0 = inlined_call_operand.vmem [shape: f32[6,4,32], index: 0, kind: input, shape index: {}]   ;;  %s1157_s4 = inlined_call_operand.<no memory space> [shape: f32[1,1], index: 4, kind: input, shape index: {}]   ;;  %s1158_s2 = inlined_call_operand.vmem [shape: f32[1,32], index: 2, kind: input, shape index: {}]   ;;  %s1159_s3 = inlined_call_operand.vmem [shape: f32[1,32], index: 3, kind: input, shape index: {}]   ;;  %s1160_s5 = inlined_call_operand.vmem [shape: f32[6,1,32], index: 5, kind: output, shape index: {}]  }
   0x1   :  { %874 = vmatprep.subr.bf16.mxu0 %v964_v0  ;;  %882 = vmatprep.subr.bf16.mxu1 %v964_v0  ;;  %v28_v1 = vld [vmem:[%s1155_s1] sm:$0xff]  ;;  %v29_v2 = vld [vmem:[%s1155_s1 + $0x8] sm:$0xff]  ;;  %vm1006_vm1 = vmpackc.low %vm39_vm0, %vm39_vm0  ;;  %v10_v15 = vstv %s1157_s4  ;;  %vm509_vm3 = vcmask 257024   ;;  %v967_v54 = vmov 0   ;;  %vm541_vm4 = vcmask 3072  }
   0x2   :  { %v875_v4 = vpack.c.bf16 %v29_v2, %v28_v1  ;;  %816 = vmatprep.mubr.msk.f32.mxu0 %vm965_vm2, %v966_v5  ;;  %827 = vmatprep.mubr.msk.f32.mxu1 %vm965_vm2, %v966_v5  ;;  %v30_v6 = vld [vmem:[%s1155_s1 + $0x10] sm:$0xff]  ;;  %v31_v7 = vld [vmem:[%s1155_s1 + $0x18] sm:$0xff]  ;;  %v1029_v9 = vld [vmem:[%s1156_s0] sm:$0xf]  ;;  %11 = vst [vmem:[#allocation2] sm:$0x1] %v10_v15 }
   0x3   :  { %v879_v8 = vpack.c.bf16 %v31_v7, %v30_v6  ;;  %v1034_v10 = vld [vmem:[%s1156_s0 + $0x4] sm:$0xf]  ;;  %v1053_v11 = vld [vmem:[%s1156_s0 + $0x8] sm:$0xf]  ;;  %v1058_v12 = vld [vmem:[%s1156_s0 + $0xc] sm:$0xf]  ;;  %926 = vset.pattern.permute.xlu0 %v967_v54  ;;  %927 = vset.pattern.permute.xlu1 %v967_v54 }
   0x4   :  { %877 = vmatpush3.bf16.xpose.msk.msra.mxu0 %vm1006_vm1, %v875_v4  ;;  %885 = vmatpush3.bf16.xpose.msk.msra.mxu1 %vm1006_vm1, %v875_v4  ;;  %v1077_v13 = vld [vmem:[%s1156_s0 + $0x10] sm:$0xf]  ;;  %v1082_v14 = vld [vmem:[%s1156_s0 + $0x14] sm:$0xf]  ;;  %v745_v16 = vld [vmem:[%s1158_s2] ss:$0 sm:$0xff] }
   0x5   :  { %878 = vmatprep.subr.bf16.mxu0 %v964_v0  ;;  %886 = vmatprep.subr.bf16.mxu1 %v964_v0  ;;  %v776_v23 = vld [vmem:[%s1159_s3] ss:$0 sm:$0xff]  ;;  %vm734_vm5 = vcmask 253952  }
   0x9   :  { %v777_v55 = vld [vmem:[#allocation2] ss:$0 sm:$0xff] }
   0xc   :  { %881 = vmatpush3.bf16.xpose.msk.msra.mxu0 %vm1006_vm1, %v879_v8  ;;  %889 = vmatpush3.bf16.xpose.msk.msra.mxu1 %vm1006_vm1, %v879_v8 }
   0xd   :  { %890 = vmatprep.subr.bf16.mxu0 %v964_v0  ;;  %898 = vmatprep.subr.bf16.mxu1 %v964_v0 }
  0x13   :  { %817 = vmatmul.mubr.msk.f32.vlgmr.msra.gmra.mrb[0].mxu0 %vm39_vm0, %v1029_v9  ;;  %828 = vmatmul.mubr.msk.f32.vlgmr.msra.gmra.mrb[0].mxu1 %vm39_vm0, %v1034_v10 }
  0x14   :  { %893 = vmatpush3.bf16.xpose.msk.msra.mxu0 %vm1006_vm1, %v875_v4  ;;  %901 = vmatpush3.bf16.xpose.msk.msra.mxu1 %vm1006_vm1, %v875_v4 }
  0x15   :  { %894 = vmatprep.subr.bf16.mxu0 %v964_v0  ;;  %902 = vmatprep.subr.bf16.mxu1 %v964_v0 }
  0x16   :  { %838 = vmatprep.mubr.msk.f32.mxu0 %vm965_vm2, %v966_v5  ;;  %849 = vmatprep.mubr.msk.f32.mxu1 %vm965_vm2, %v966_v5 }
  0x1c   :  { %897 = vmatpush3.bf16.xpose.msk.msra.mxu0 %vm1006_vm1, %v879_v8  ;;  %905 = vmatpush3.bf16.xpose.msk.msra.mxu1 %vm1006_vm1, %v879_v8 }
  0x1d   :  { %906 = vmatprep.subr.bf16.mxu0 %v964_v0  ;;  %914 = vmatprep.subr.bf16.mxu1 %v964_v0 }
  0x23   :  { %839 = vmatmul.mubr.msk.f32.vlgmr.msra.gmra.mrb[2].mxu0 %vm39_vm0, %v1053_v11  ;;  %850 = vmatmul.mubr.msk.f32.vlgmr.msra.gmra.mrb[2].mxu1 %vm39_vm0, %v1058_v12 }
  0x24   :  { %909 = vmatpush3.bf16.xpose.msk.msra.mxu0 %vm1006_vm1, %v875_v4  ;;  %917 = vmatpush3.bf16.xpose.msk.msra.mxu1 %vm1006_vm1, %v875_v4 }
  0x25   :  { %910 = vmatprep.subr.bf16.mxu0 %v964_v0  ;;  %918 = vmatprep.subr.bf16.mxu1 %v964_v0 }
  0x26   :  { %860 = vmatprep.mubr.msk.f32.mxu0 %vm965_vm2, %v966_v5  ;;  %871 = vmatprep.mubr.msk.f32.mxu1 %vm965_vm2, %v966_v5 }
  0x2c   :  { %913 = vmatpush3.bf16.xpose.msk.msra.mxu0 %vm1006_vm1, %v879_v8  ;;  %921 = vmatpush3.bf16.xpose.msk.msra.mxu1 %vm1006_vm1, %v879_v8 }
  0x33   :  { %861 = vmatmul.mubr.msk.f32.vlgmr.msra.gmra.mrb[4].mxu0 %vm39_vm0, %v1077_v13  ;;  %872 = vmatmul.mubr.msk.f32.vlgmr.msra.gmra.mrb[4].mxu1 %vm39_vm0, %v1082_v14 }
  0xe6   :  { %v121_v17 = vpop.f32.mrb[0].mxu0  ;;  %v194_v18 = vpop.f32.mrb[0].mxu1 }
  0xe7   :  { %v122_v19 = vadd.f32 %v745_v16, %v121_v17  ;;  %v818_v20 = vpop.f32.mrb[1].mxu0  ;;  %v195_v21 = vadd.f32 %v745_v16, %v194_v18  ;;  %v829_v22 = vpop.f32.mrb[1].mxu1 }
  0xe9   :  { %928 = vtanh.f32 %v122_v19 }
  0xea   :  { %930 = vtanh.f32 %v195_v21 }
  0xf3   :  { %v929_v24 = vpop.eup %928 }
  0xf4   :  { %v931_v25 = vpop.eup %930  ;;  %v503_v26 = vmul.f32 %v929_v24, %v776_v23 }
  0xf5   :  { %v504_v27 = vmul.f32 %v931_v25, %v776_v23 }
  0xf6   :  { %v267_v28 = vpop.f32.mrb[2].mxu0  ;;  %v510_v29 = vsel %vm509_vm3, %v503_v26, 0.0  ;;  %v340_v30 = vpop.f32.mrb[2].mxu1 }
  0xf7   :  { %v268_v31 = vadd.f32 %v745_v16, %v267_v28  ;;  %511 = vadd.xlane.f32.xlu0 %v510_v29  ;;  %v840_v32 = vpop.f32.mrb[3].mxu0  ;;  %v341_v33 = vadd.f32 %v745_v16, %v340_v30  ;;  %v851_v34 = vpop.f32.mrb[3].mxu1  ;;  %v513_v35 = vsel %vm509_vm3, %v504_v27, 0.0 }
  0xf9   :  { %932 = vtanh.f32 %v268_v31 }
  0xfa   :  { %934 = vtanh.f32 %v341_v33 }
  0xfb   :  { %514 = vadd.xlane.f32.xlu0 %v513_v35 }
 0x103   :  { %v933_v36 = vpop.eup %932 }
 0x104   :  { %v935_v37 = vpop.eup %934  ;;  %v505_v38 = vmul.f32 %v933_v36, %v776_v23 }
 0x105   :  { %v506_v39 = vmul.f32 %v935_v37, %v776_v23 }
 0x106   :  { %v413_v40 = vpop.f32.mrb[4].mxu0  ;;  %v486_v41 = vpop.f32.mrb[4].mxu1  ;;  %v516_v42 = vsel %vm509_vm3, %v505_v38, 0.0 }
 0x107   :  { %v414_v43 = vadd.f32 %v745_v16, %v413_v40  ;;  %v487_v44 = vadd.f32 %v745_v16, %v486_v41  ;;  %517 = vadd.xlane.f32.xlu1 %v516_v42  ;;  %v862_v45 = vpop.f32.mrb[5].mxu0  ;;  %v873_v46 = vpop.f32.mrb[5].mxu1  ;;  %v519_v47 = vsel %vm509_vm3, %v506_v39, 0.0 }
 0x109   :  { %936 = vtanh.f32 %v414_v43 }
 0x10a   :  { %938 = vtanh.f32 %v487_v44 }
 0x10b   :  { %520 = vadd.xlane.f32.xlu1 %v519_v47 }
 0x113   :  { %v937_v48 = vpop.eup %936 }
 0x114   :  { %v939_v49 = vpop.eup %938  ;;  %v507_v50 = vmul.f32 %v937_v48, %v776_v23 }
 0x115   :  { %v508_v51 = vmul.f32 %v939_v49, %v776_v23 }
 0x116   :  { %v522_v52 = vsel %vm509_vm3, %v507_v50, 0.0 }
 0x117   :  { %v525_v53 = vsel %vm509_vm3, %v508_v51, 0.0  ;;  %523 = vadd.xlane.f32.xlu0 %v522_v52 }
 0x118   :  { %526 = vadd.xlane.f32.xlu1 %v525_v53 }
 0x184   :  { %v512_v56 = vpop.xlane.xlu0 %511 }
 0x185   :  { %v535_v57 = vadd.f32 %v777_v55, %v512_v56 }
 0x187   :  { %v542_v58 = vsel %vm541_vm4, %v535_v57, -inf }
 0x188   :  { %v543_v59 = vrot.slane %v542_v58, 4  ;;  %v515_v60 = vpop.xlane.xlu0 %514 }
 0x189   :  { %v536_v61 = vadd.f32 %v777_v55, %v515_v60 }
 0x18a   :  { %v544_v62 = vmax.f32 %v542_v58, %v543_v59 }
 0x18b   :  { %v549_v63 = vsel %vm541_vm4, %v536_v61, -inf }
 0x18c   :  { %v545_v0 = vrot.slane %v544_v62, 2  ;;  %v550_v1 = vrot.slane %v549_v63, 4 }
 0x18e   :  { %v546_v2 = vmax.f32 %v544_v62, %v545_v0  ;;  %v551_v3 = vmax.f32 %v549_v63, %v550_v1 }
 0x190   :  { %v547_v4 = vrot.slane %v546_v2, 1  ;;  %v552_v5 = vrot.slane %v551_v3, 2 }
 0x192   :  { %v548_v6 = vmax.f32 %v546_v2, %v547_v4  ;;  %v553_v7 = vmax.f32 %v551_v3, %v552_v5 }
 0x194   :  { %v584_v8 = vsub.f32 %v535_v57, %v548_v6  ;;  %v554_v15 = vrot.slane %v553_v7, 1  ;;  %v518_v16 = vpop.xlane.xlu1 %517 }
 0x195   :  { %v537_v17 = vadd.f32 %v777_v55, %v518_v16 }
 0x196   :  { %v590_v18 = vmul.f32 1.442695, %v584_v8  ;;  %v555_v19 = vmax.f32 %v553_v7, %v554_v15 }
 0x197   :  { %v556_v20 = vsel %vm541_vm4, %v537_v17, -inf }
 0x198   :  { %940 = vpow2.f32 %v590_v18  ;;  %v585_v21 = vsub.f32 %v536_v61, %v555_v19  ;;  %v557_v22 = vrot.slane %v556_v20, 4  ;;  %v521_v23 = vpop.xlane.xlu1 %520 }
 0x199   :  { %v538_v24 = vadd.f32 %v777_v55, %v521_v23 }
 0x19a   :  { %v592_v25 = vmul.f32 1.442695, %v585_v21  ;;  %v558_v26 = vmax.f32 %v556_v20, %v557_v22 }
 0x19b   :  { %v563_v27 = vsel %vm541_vm4, %v538_v24, -inf }
 0x19c   :  { %942 = vpow2.f32 %v592_v25  ;;  %v559_v28 = vrot.slane %v558_v26, 2  ;;  %v564_v29 = vrot.slane %v563_v27, 4 }
 0x19e   :  { %v560_v30 = vmax.f32 %v558_v26, %v559_v28  ;;  %v565_v31 = vmax.f32 %v563_v27, %v564_v29 }
 0x1a0   :  { %v561_v32 = vrot.slane %v560_v30, 1  ;;  %v566_v33 = vrot.slane %v565_v31, 2 }
 0x1a2   :  { %v1107_v34 = vpop.eup %940  ;;  %v562_v35 = vmax.f32 %v560_v30, %v561_v32  ;;  %v567_v36 = vmax.f32 %v565_v31, %v566_v33 }
 0x1a3   :  { %v602_v37 = vsel %vm541_vm4, %v1107_v34, 0.0 }
 0x1a4   :  { %v603_v38 = vrot.slane %v602_v37, 4  ;;  %v586_v39 = vsub.f32 %v537_v17, %v562_v35  ;;  %v568_v40 = vrot.slane %v567_v36, 1  ;;  %v524_v41 = vpop.xlane.xlu0 %523 }
 0x1a5   :  { %v527_v42 = vpop.xlane.xlu1 %526  ;;  %v539_v43 = vadd.f32 %v777_v55, %v524_v41 }
 0x1a6   :  { %v943_v44 = vpop.eup %942  ;;  %v604_v45 = vadd.f32 %v603_v38, %v602_v37  ;;  %v594_v46 = vmul.f32 1.442695, %v586_v39  ;;  %v569_v47 = vmax.f32 %v567_v36, %v568_v40  ;;  %v540_v48 = vadd.f32 %v777_v55, %v527_v42 }
 0x1a7   :  { %v609_v49 = vsel %vm541_vm4, %v943_v44, 0.0  ;;  %v570_v50 = vsel %vm541_vm4, %v539_v43, -inf }
 0x1a8   :  { %v605_v51 = vrot.slane %v604_v45, 2  ;;  %v610_v52 = vrot.slane %v609_v49, 4  ;;  %944 = vpow2.f32 %v594_v46  ;;  %v587_v53 = vsub.f32 %v538_v24, %v569_v47 }
 0x1a9   :  { %v577_v54 = vsel %vm541_vm4, %v540_v48, -inf  ;;  %v571_v56 = vrot.slane %v570_v50, 4 }
 0x1aa   :  { %v611_v57 = vadd.f32 %v610_v52, %v609_v49  ;;  %v596_v58 = vmul.f32 1.442695, %v587_v53  ;;  %v578_v59 = vrot.slane %v577_v54, 4  ;;  %v606_v60 = vadd.f32 %v605_v51, %v604_v45 }
 0x1ab   :  { %v572_v61 = vmax.f32 %v570_v50, %v571_v56 }
 0x1ac   :  { %v612_v62 = vrot.slane %v611_v57, 2  ;;  %946 = vpow2.f32 %v596_v58  ;;  %v579_v63 = vmax.f32 %v577_v54, %v578_v59  ;;  %v607_v55 = vrot.slane %v606_v60, 1 }
 0x1ad   :  { %v573_v0 = vrot.slane %v572_v61, 2 }
 0x1ae   :  { %v580_v1 = vrot.slane %v579_v63, 2  ;;  %v608_v2 = vadd.f32 %v607_v55, %v606_v60  ;;  %v613_v3 = vadd.f32 %v612_v62, %v611_v57 }
 0x1af   :  { %v574_v4 = vmax.f32 %v572_v61, %v573_v0 }
 0x1b0   :  { %v581_v5 = vmax.f32 %v579_v63, %v580_v1  ;;  %948 = vrcp.f32 %v608_v2  ;;  %v614_v6 = vrot.slane %v613_v3, 1 }
 0x1b1   :  { %v575_v7 = vrot.slane %v574_v4, 1 }
 0x1b2   :  { %v945_v8 = vpop.eup %944  ;;  %v582_v15 = vrot.slane %v581_v5, 1  ;;  %v615_v16 = vadd.f32 %v614_v6, %v613_v3 }
 0x1b3   :  { %v616_v17 = vsel %vm541_vm4, %v945_v8, 0.0  ;;  %v576_v18 = vmax.f32 %v574_v4, %v575_v7 }
 0x1b4   :  { %v617_v19 = vrot.slane %v616_v17, 4  ;;  %v583_v20 = vmax.f32 %v581_v5, %v582_v15  ;;  %950 = vrcp.f32 %v615_v16 }
 0x1b5   :  { %v588_v21 = vsub.f32 %v539_v43, %v576_v18 }
 0x1b6   :  { %v947_v22 = vpop.eup %946  ;;  %v618_v23 = vadd.f32 %v617_v19, %v616_v17  ;;  %v589_v24 = vsub.f32 %v540_v48, %v583_v20 }
 0x1b7   :  { %v623_v25 = vsel %vm541_vm4, %v947_v22, 0.0  ;;  %v598_v26 = vmul.f32 1.442695, %v588_v21 }
 0x1b8   :  { %v619_v27 = vrot.slane %v618_v23, 2  ;;  %v624_v28 = vrot.slane %v623_v25, 4  ;;  %v600_v29 = vmul.f32 1.442695, %v589_v24 }
 0x1b9   :  { %952 = vpow2.f32 %v598_v26 }
 0x1ba   :  { %v949_v30 = vpop.eup %948  ;;  %v625_v31 = vadd.f32 %v624_v28, %v623_v25  ;;  %954 = vpow2.f32 %v600_v29  ;;  %v620_v32 = vadd.f32 %v619_v27, %v618_v23 }
 0x1bb   :  { %v650_v33 = vmul.f32 %v949_v30, %v1107_v34 }
 0x1bc   :  { %v626_v35 = vrot.slane %v625_v31, 2  ;;  %v621_v36 = vrot.slane %v620_v32, 1 }
 0x1bd   :  { %658 = vperm.xlu0 %926, %v650_v33  }
 0x1be   :  { %v951_v37 = vpop.eup %950  ;;  %v622_v38 = vadd.f32 %v621_v36, %v620_v32  ;;  %v627_v39 = vadd.f32 %v626_v35, %v625_v31 }
 0x1bf   :  { %v651_v40 = vmul.f32 %v951_v37, %v943_v44 }
 0x1c0   :  { %956 = vrcp.f32 %v622_v38  ;;  %v628_v41 = vrot.slane %v627_v39, 1 }
 0x1c1   :  { %663 = vperm.xlu1 %927, %v651_v40  }
 0x1c2   :  { %v629_v42 = vadd.f32 %v628_v41, %v627_v39 }
 0x1c3   :  { %v953_v43 = vpop.eup %952 }
 0x1c4   :  { %v955_v45 = vpop.eup %954  ;;  %v630_v46 = vsel %vm541_vm4, %v953_v43, 0.0  ;;  %958 = vrcp.f32 %v629_v42 }
 0x1c5   :  { %v637_v47 = vsel %vm541_vm4, %v955_v45, 0.0  ;;  %v631_v48 = vrot.slane %v630_v46, 4 }
 0x1c6   :  { %v638_v34 = vrot.slane %v637_v47, 4 }
 0x1c7   :  { %v632_v49 = vadd.f32 %v631_v48, %v630_v46 }
 0x1c8   :  { %v639_v50 = vadd.f32 %v638_v34, %v637_v47 }
 0x1c9   :  { %v633_v51 = vrot.slane %v632_v49, 2 }
 0x1ca   :  { %v957_v52 = vpop.eup %956  ;;  %v640_v53 = vrot.slane %v639_v50, 2 }
 0x1cb   :  { %v652_v54 = vmul.f32 %v957_v52, %v945_v8  ;;  %v634_v44 = vadd.f32 %v633_v51, %v632_v49 }
 0x1cc   :  { %v641_v56 = vadd.f32 %v640_v53, %v639_v50 }
 0x1cd   :  { %668 = vperm.xlu1 %927, %v652_v54   ;;  %v635_v57 = vrot.slane %v634_v44, 1 }
 0x1ce   :  { %v959_v58 = vpop.eup %958  ;;  %v642_v59 = vrot.slane %v641_v56, 1 }
 0x1cf   :  { %v653_v60 = vmul.f32 %v959_v58, %v947_v22  ;;  %v636_v61 = vadd.f32 %v635_v57, %v634_v44 }
 0x1d0   :  { %v643_v62 = vadd.f32 %v642_v59, %v641_v56 }
 0x1d1   :  { %673 = vperm.xlu1 %927, %v653_v60   ;;  %960 = vrcp.f32 %v636_v61 }
 0x1d2   :  { %962 = vrcp.f32 %v643_v62 }
 0x1db   :  { %v961_v63 = vpop.eup %960 }
 0x1dc   :  { %v654_v55 = vmul.f32 %v961_v63, %v953_v43  ;;  %v963_v0 = vpop.eup %962 }
 0x1dd   :  { %v655_v1 = vmul.f32 %v963_v0, %v955_v45 }
 0x1de   :  { %678 = vperm.xlu1 %927, %v654_v55  }
 0x1e2   :  { %683 = vperm.xlu1 %927, %v655_v1  }
 0x23c   :  { %v659_v2 = vpop.permute.xlu0 %658 }
 0x23d   :  { %v686_v3 = vmul.f32 %v659_v2, %v1029_v9 }
 0x23f   :  { %v692_v4 = vsel %vm509_vm3, %v686_v3, 0.0 }
 0x240   :  { %v693_v5 = vrot.slane %v692_v4, 4  ;;  %v664_v6 = vpop.permute.xlu1 %663 }
 0x241   :  { %v687_v7 = vmul.f32 %v664_v6, %v1034_v10 }
 0x242   :  { %v694_v8 = vadd.f32 %v693_v5, %v692_v4 }
 0x243   :  { %v699_v15 = vsel %vm509_vm3, %v687_v7, 0.0 }
 0x244   :  { %v695_v16 = vrot.slane %v694_v8, 2  ;;  %v700_v17 = vrot.slane %v699_v15, 4 }
 0x246   :  { %v696_v18 = vadd.f32 %v695_v16, %v694_v8  ;;  %v701_v19 = vadd.f32 %v700_v17, %v699_v15 }
 0x248   :  { %v697_v20 = vrot.slane %v696_v18, 1  ;;  %v702_v21 = vrot.slane %v701_v19, 2 }
 0x24a   :  { %v698_v22 = vadd.f32 %v697_v20, %v696_v18  ;;  %v703_v23 = vadd.f32 %v702_v21, %v701_v19 }
 0x24c   :  { %735 = vst.msk [vmem:[%s1160_s5] sm:$0x1] %vm734_vm5, %v698_v22  ;;  %v704_v9 = vrot.slane %v703_v23, 1  ;;  %v669_v24 = vpop.permute.xlu1 %668 }
 0x24d   :  { %v688_v10 = vmul.f32 %v669_v24, %v1053_v11 }
 0x24e   :  { %v705_v25 = vadd.f32 %v704_v9, %v703_v23 }
 0x24f   :  { %v706_v26 = vsel %vm509_vm3, %v688_v10, 0.0 }
 0x250   :  { %736 = vst.msk [vmem:[%s1160_s5 + $0x1] sm:$0x1] %vm734_vm5, %v705_v25  ;;  %v707_v27 = vrot.slane %v706_v26, 4  ;;  %v674_v28 = vpop.permute.xlu1 %673 }
 0x251   :  { %v689_v29 = vmul.f32 %v674_v28, %v1058_v12 }
 0x252   :  { %v708_v30 = vadd.f32 %v707_v27, %v706_v26 }
 0x253   :  { %v713_v31 = vsel %vm509_vm3, %v689_v29, 0.0 }
 0x254   :  { %v709_v32 = vrot.slane %v708_v30, 2  ;;  %v714_v33 = vrot.slane %v713_v31, 4 }
 0x256   :  { %v710_v35 = vadd.f32 %v709_v32, %v708_v30  ;;  %v715_v36 = vadd.f32 %v714_v33, %v713_v31 }
 0x258   :  { %v711_v11 = vrot.slane %v710_v35, 1  ;;  %v716_v37 = vrot.slane %v715_v36, 2 }
 0x25a   :  { %v712_v38 = vadd.f32 %v711_v11, %v710_v35  ;;  %v717_v39 = vadd.f32 %v716_v37, %v715_v36 }
 0x25c   :  { %737 = vst.msk [vmem:[%s1160_s5 + $0x2] sm:$0x1] %vm734_vm5, %v712_v38  ;;  %v718_v40 = vrot.slane %v717_v39, 1 }
 0x25d   :  { %v679_v41 = vpop.permute.xlu1 %678 }
 0x25e   :  { %v719_v42 = vadd.f32 %v718_v40, %v717_v39  ;;  %v690_v12 = vmul.f32 %v679_v41, %v1077_v13 }
 0x260   :  { %738 = vst.msk [vmem:[%s1160_s5 + $0x3] sm:$0x1] %vm734_vm5, %v719_v42  ;;  %v720_v43 = vsel %vm509_vm3, %v690_v12, 0.0 }
 0x261   :  { %v721_v45 = vrot.slane %v720_v43, 4  ;;  %v684_v46 = vpop.permute.xlu1 %683 }
 0x262   :  { %v691_v47 = vmul.f32 %v684_v46, %v1082_v14 }
 0x263   :  { %v722_v48 = vadd.f32 %v721_v45, %v720_v43 }
 0x264   :  { %v727_v34 = vsel %vm509_vm3, %v691_v47, 0.0 }
 0x265   :  { %v723_v49 = vrot.slane %v722_v48, 2  ;;  %v728_v50 = vrot.slane %v727_v34, 4 }
 0x267   :  { %v724_v51 = vadd.f32 %v723_v49, %v722_v48  ;;  %v729_v52 = vadd.f32 %v728_v50, %v727_v34 }
 0x269   :  { %v725_v53 = vrot.slane %v724_v51, 1  ;;  %v730_v13 = vrot.slane %v729_v52, 2 }
 0x26b   :  { %v726_v54 = vadd.f32 %v725_v53, %v724_v51  ;;  %v731_v44 = vadd.f32 %v730_v13, %v729_v52 }
 0x26d   :  { %739 = vst.msk [vmem:[%s1160_s5 + $0x4] sm:$0x1] %vm734_vm5, %v726_v54  ;;  %v732_v56 = vrot.slane %v731_v44, 1 }
 0x26f   :  { %v733_v57 = vadd.f32 %v732_v56, %v731_v44 }
 0x271   :  { %740 = vst.msk [vmem:[%s1160_s5 + $0x5] sm:$0x1] %vm734_vm5, %v733_v57 }

// kernel: mash_rnn.15
= control target key start
LH: loop header
LB: loop body
LE: loop exit
PB: predicated region body
PF: predicated region fallthrough
CT: control target
= control target key end

     0   :  { %vm35_vm0 = vcmask 261120   ;;  %v372_v0 = vmov 0.0|0.0   ;;  %vm373_vm2 = vmmov 0   ;;  %v374_v4 = vmov 0.0   ;;  %s459_s1 = inlined_call_operand.vmem [shape: f32[32,32], index: 1, kind: input, shape index: {}]   ;;  %s460_s0 = inlined_call_operand.vmem [shape: f32[2,3,32], index: 0, kind: input, shape index: {}]   ;;  %s461_s4 = inlined_call_operand.<no memory space> [shape: f32[1,1], index: 4, kind: input, shape index: {}]   ;;  %s462_s2 = inlined_call_operand.vmem [shape: f32[1,32], index: 2, kind: input, shape index: {}]   ;;  %s463_s3 = inlined_call_operand.vmem [shape: f32[1,32], index: 3, kind: input, shape index: {}]   ;;  %s464_s5 = inlined_call_operand.vmem [shape: f32[2,1,32], index: 5, kind: output, shape index: {}]  }
   0x1   :  { %338 = vmatprep.subr.bf16.mxu0 %v372_v0  ;;  %v24_v1 = vld [vmem:[%s459_s1] sm:$0xff]  ;;  %v25_v2 = vld [vmem:[%s459_s1 + $0x8] sm:$0xff]  ;;  %vm340_vm1 = vmpackc.low %vm35_vm0, %vm35_vm0  ;;  %346 = vmatprep.subr.bf16.mxu1 %v372_v0  ;;  %v10_v10 = vstv %s461_s4  ;;  %vm205_vm3 = vcmask 256000   ;;  %v375_v25 = vmov 0   ;;  %vm221_vm4 = vcmask 2048  }
   0x2   :  { %v339_v3 = vpack.c.bf16 %v25_v2, %v24_v1  ;;  %324 = vmatprep.mubr.msk.f32.mxu0 %vm373_vm2, %v374_v4  ;;  %335 = vmatprep.mubr.msk.f32.mxu1 %vm373_vm2, %v374_v4  ;;  %v26_v5 = vld [vmem:[%s459_s1 + $0x10] sm:$0xff]  ;;  %v27_v6 = vld [vmem:[%s459_s1 + $0x18] sm:$0xff]  ;;  %v423_v8 = vld [vmem:[%s460_s0] sm:$0x7]  ;;  %11 = vst [vmem:[#allocation2] sm:$0x1] %v10_v10 }
   0x3   :  { %v343_v7 = vpack.c.bf16 %v27_v6, %v26_v5  ;;  %v428_v9 = vld [vmem:[%s460_s0 + $0x4] sm:$0x7]  ;;  %v293_v11 = vld [vmem:[%s462_s2] ss:$0 sm:$0xff]  ;;  %358 = vset.pattern.permute.xlu1 %v375_v25  ;;  %359 = vset.pattern.permute.xlu0 %v375_v25  ;;  %vm286_vm5 = vcmask 253952  }
   0x4   :  { %341 = vmatpush3.bf16.xpose.msk.msra.mxu0 %vm340_vm1, %v339_v3  ;;  %349 = vmatpush3.bf16.xpose.msk.msra.mxu1 %vm340_vm1, %v339_v3  ;;  %v304_v18 = vld [vmem:[%s463_s3] ss:$0 sm:$0xff] }
   0x5   :  { %342 = vmatprep.subr.bf16.mxu0 %v372_v0  ;;  %350 = vmatprep.subr.bf16.mxu1 %v372_v0 }
   0x9   :  { %v305_v26 = vld [vmem:[#allocation2] ss:$0 sm:$0xff] }
   0xc   :  { %345 = vmatpush3.bf16.xpose.msk.msra.mxu0 %vm340_vm1, %v343_v7  ;;  %353 = vmatpush3.bf16.xpose.msk.msra.mxu1 %vm340_vm1, %v343_v7 }
  0x13   :  { %325 = vmatmul.mubr.msk.f32.vlgmr.msra.gmra.mrb[0].mxu0 %vm35_vm0, %v423_v8  ;;  %336 = vmatmul.mubr.msk.f32.vlgmr.msra.gmra.mrb[0].mxu1 %vm35_vm0, %v428_v9 }
  0xe6   :  { %v117_v12 = vpop.f32.mrb[0].mxu0  ;;  %v190_v13 = vpop.f32.mrb[0].mxu1 }
  0xe7   :  { %v118_v14 = vadd.f32 %v293_v11, %v117_v12  ;;  %v326_v15 = vpop.f32.mrb[1].mxu0  ;;  %v191_v16 = vadd.f32 %v293_v11, %v190_v13  ;;  %v337_v17 = vpop.f32.mrb[1].mxu1 }
  0xe9   :  { %360 = vtanh.f32 %v118_v14 }
  0xea   :  { %362 = vtanh.f32 %v191_v16 }
  0xf3   :  { %v361_v19 = vpop.eup %360 }
  0xf4   :  { %v363_v20 = vpop.eup %362  ;;  %v203_v21 = vmul.f32 %v361_v19, %v304_v18 }
  0xf5   :  { %v204_v22 = vmul.f32 %v363_v20, %v304_v18 }
  0xf6   :  { %v206_v23 = vsel %vm205_vm3, %v203_v21, 0.0 }
  0xf7   :  { %207 = vadd.xlane.f32.xlu0 %v206_v23  ;;  %v209_v24 = vsel %vm205_vm3, %v204_v22, 0.0 }
  0xfb   :  { %210 = vadd.xlane.f32.xlu0 %v209_v24 }
 0x184   :  { %v208_v27 = vpop.xlane.xlu0 %207 }
 0x185   :  { %v219_v28 = vadd.f32 %v305_v26, %v208_v27 }
 0x187   :  { %v222_v29 = vsel %vm221_vm4, %v219_v28, -inf }
 0x188   :  { %v223_v30 = vrot.slane %v222_v29, 4  ;;  %v211_v31 = vpop.xlane.xlu0 %210 }
 0x189   :  { %v220_v32 = vadd.f32 %v305_v26, %v211_v31 }
 0x18a   :  { %v224_v33 = vmax.f32 %v222_v29, %v223_v30 }
 0x18b   :  { %v229_v34 = vsel %vm221_vm4, %v220_v32, -inf }
 0x18c   :  { %v225_v35 = vrot.slane %v224_v33, 2  ;;  %v230_v36 = vrot.slane %v229_v34, 4 }
 0x18e   :  { %v226_v37 = vmax.f32 %v224_v33, %v225_v35  ;;  %v231_v38 = vmax.f32 %v229_v34, %v230_v36 }
 0x190   :  { %v227_v39 = vrot.slane %v226_v37, 1  ;;  %v232_v40 = vrot.slane %v231_v38, 2 }
 0x192   :  { %v228_v41 = vmax.f32 %v226_v37, %v227_v39  ;;  %v233_v42 = vmax.f32 %v231_v38, %v232_v40 }
 0x194   :  { %v236_v43 = vsub.f32 %v219_v28, %v228_v41  ;;  %v234_v44 = vrot.slane %v233_v42, 1 }
 0x196   :  { %v238_v45 = vmul.f32 1.442695, %v236_v43  ;;  %v235_v46 = vmax.f32 %v233_v42, %v234_v44 }
 0x198   :  { %364 = vpow2.f32 %v238_v45  ;;  %v237_v47 = vsub.f32 %v220_v32, %v235_v46 }
 0x19a   :  { %v240_v48 = vmul.f32 1.442695, %v237_v47 }
 0x19c   :  { %366 = vpow2.f32 %v240_v48 }
 0x1a2   :  { %v365_v49 = vpop.eup %364 }
 0x1a3   :  { %v242_v50 = vsel %vm221_vm4, %v365_v49, 0.0 }
 0x1a4   :  { %v243_v51 = vrot.slane %v242_v50, 4 }
 0x1a6   :  { %v367_v52 = vpop.eup %366  ;;  %v244_v53 = vadd.f32 %v243_v51, %v242_v50 }
 0x1a7   :  { %v249_v54 = vsel %vm221_vm4, %v367_v52, 0.0 }
 0x1a8   :  { %v245_v55 = vrot.slane %v244_v53, 2  ;;  %v250_v56 = vrot.slane %v249_v54, 4 }
 0x1aa   :  { %v246_v57 = vadd.f32 %v245_v55, %v244_v53  ;;  %v251_v58 = vadd.f32 %v250_v56, %v249_v54 }
 0x1ac   :  { %v252_v59 = vrot.slane %v251_v58, 2  ;;  %v247_v60 = vrot.slane %v246_v57, 1 }
 0x1ae   :  { %v248_v61 = vadd.f32 %v247_v60, %v246_v57  ;;  %v253_v62 = vadd.f32 %v252_v59, %v251_v58 }
 0x1b0   :  { %368 = vrcp.f32 %v248_v61  ;;  %v254_v63 = vrot.slane %v253_v62, 1 }
 0x1b2   :  { %v255_v0 = vadd.f32 %v254_v63, %v253_v62 }
 0x1b4   :  { %370 = vrcp.f32 %v255_v0 }
 0x1ba   :  { %v369_v1 = vpop.eup %368 }
 0x1bb   :  { %v258_v2 = vmul.f32 %v369_v1, %v365_v49 }
 0x1bd   :  { %262 = vperm.xlu1 %358, %v258_v2  }
 0x1be   :  { %v371_v3 = vpop.eup %370 }
 0x1bf   :  { %v259_v4 = vmul.f32 %v371_v3, %v367_v52 }
 0x1c1   :  { %267 = vperm.xlu1 %358, %v259_v4  }
 0x23c   :  { %v263_v5 = vpop.permute.xlu1 %262 }
 0x23d   :  { %v270_v6 = vmul.f32 %v263_v5, %v423_v8 }
 0x23f   :  { %v272_v7 = vsel %vm205_vm3, %v270_v6, 0.0 }
 0x240   :  { %v273_v10 = vrot.slane %v272_v7, 4  ;;  %v268_v11 = vpop.permute.xlu1 %267 }
 0x241   :  { %v271_v12 = vmul.f32 %v268_v11, %v428_v9 }
 0x242   :  { %v274_v13 = vadd.f32 %v273_v10, %v272_v7 }
 0x243   :  { %v279_v14 = vsel %vm205_vm3, %v271_v12, 0.0 }
 0x244   :  { %v275_v15 = vrot.slane %v274_v13, 2  ;;  %v280_v16 = vrot.slane %v279_v14, 4 }
 0x246   :  { %v276_v17 = vadd.f32 %v275_v15, %v274_v13  ;;  %v281_v18 = vadd.f32 %v280_v16, %v279_v14 }
 0x248   :  { %v277_v19 = vrot.slane %v276_v17, 1  ;;  %v282_v20 = vrot.slane %v281_v18, 2 }
 0x24a   :  { %v278_v21 = vadd.f32 %v277_v19, %v276_v17  ;;  %v283_v22 = vadd.f32 %v282_v20, %v281_v18 }
 0x24c   :  { %287 = vst.msk [vmem:[%s464_s5] sm:$0x1] %vm286_vm5, %v278_v21  ;;  %v284_v8 = vrot.slane %v283_v22, 1 }
 0x24e   :  { %v285_v23 = vadd.f32 %v284_v8, %v283_v22 }
 0x250   :  { %288 = vst.msk [vmem:[%s464_s5 + $0x1] sm:$0x1] %vm286_vm5, %v285_v23 }

// kernel: mash_rnn.17
= control target key start
LH: loop header
LB: loop body
LE: loop exit
PB: predicated region body
PF: predicated region fallthrough
CT: control target
= control target key end

     0   :  { %vm34_vm0 = vcmask 261120   ;;  %v223_v0 = vmov 0.0|0.0   ;;  %vm224_vm2 = vmmov 0   ;;  %v225_v3 = vmov 0.0   ;;  %s289_s1 = inlined_call_operand.vmem [shape: f32[32,32], index: 1, kind: input, shape index: {}]   ;;  %s290_s0 = inlined_call_operand.vmem [shape: f32[1,2,32], index: 0, kind: input, shape index: {}]   ;;  %s291_s4 = inlined_call_operand.<no memory space> [shape: f32[1,1], index: 4, kind: input, shape index: {}]   ;;  %s292_s2 = inlined_call_operand.vmem [shape: f32[1,32], index: 2, kind: input, shape index: {}]   ;;  %s293_s3 = inlined_call_operand.vmem [shape: f32[1,32], index: 3, kind: input, shape index: {}]   ;;  %s294_s5 = inlined_call_operand.vmem [shape: f32[1,1,32], index: 5, kind: output, shape index: {}]  }
   0x1   :  { %204 = vmatprep.subr.bf16.mxu0 %v223_v0  ;;  %v23_v1 = vld [vmem:[%s289_s1] sm:$0xff]  ;;  %v24_v2 = vld [vmem:[%s289_s1 + $0x8] sm:$0xff]  ;;  %vm206_vm1 = vmpackc.low %vm34_vm0, %vm34_vm0  ;;  %201 = vmatprep.mubr.msk.f32.mxu0 %vm224_vm2, %v225_v3  ;;  %v10_v9 = vstv %s291_s4  ;;  %vm129_vm3 = vcmask 254976   ;;  %v226_v18 = vmov 0   ;;  %vm141_vm4 = vcmask 1024  }
   0x2   :  { %v205_v4 = vpack.c.bf16 %v24_v2, %v23_v1  ;;  %v25_v5 = vld [vmem:[%s289_s1 + $0x10] sm:$0xff]  ;;  %v26_v6 = vld [vmem:[%s289_s1 + $0x18] sm:$0xff]  ;;  %v22_v8 = vld [vmem:[%s290_s0] sm:$0x3]  ;;  %11 = vst [vmem:[#allocation2] sm:$0x1] %v10_v9  ;;  %216 = vset.pattern.permute.xlu0 %v226_v18 }
   0x3   :  { %v209_v7 = vpack.c.bf16 %v26_v6, %v25_v5  ;;  %v180_v10 = vld [vmem:[%s292_s2] ss:$0 sm:$0xff]  ;;  %vm174_vm5 = vcmask 253952  }
   0x4   :  { %207 = vmatpush3.bf16.xpose.msk.msra.mxu0 %vm206_vm1, %v205_v4  ;;  %v186_v14 = vld [vmem:[%s293_s3] ss:$0 sm:$0xff] }
   0x5   :  { %208 = vmatprep.subr.bf16.mxu0 %v223_v0 }
   0x9   :  { %v187_v19 = vld [vmem:[#allocation2] ss:$0 sm:$0xff] }
   0xc   :  { %211 = vmatpush3.bf16.xpose.msk.msra.mxu0 %vm206_vm1, %v209_v7 }
  0x13   :  { %202 = vmatmul.mubr.msk.f32.vlgmr.msra.gmra.mrb[0].mxu0 %vm34_vm0, %v22_v8 }
  0xe6   :  { %v116_v11 = vpop.f32.mrb[0].mxu0 }
  0xe7   :  { %v117_v12 = vadd.f32 %v180_v10, %v116_v11  ;;  %v203_v13 = vpop.f32.mrb[1].mxu0 }
  0xe9   :  { %217 = vtanh.f32 %v117_v12 }
  0xf3   :  { %v218_v15 = vpop.eup %217 }
  0xf4   :  { %v128_v16 = vmul.f32 %v218_v15, %v186_v14 }
  0xf6   :  { %v130_v17 = vsel %vm129_vm3, %v128_v16, 0.0 }
  0xf7   :  { %131 = vadd.xlane.f32.xlu0 %v130_v17 }
 0x184   :  { %v132_v20 = vpop.xlane.xlu0 %131 }
 0x185   :  { %v140_v21 = vadd.f32 %v187_v19, %v132_v20 }
 0x187   :  { %v142_v22 = vsel %vm141_vm4, %v140_v21, -inf }
 0x188   :  { %v143_v23 = vrot.slane %v142_v22, 4 }
 0x18a   :  { %v144_v24 = vmax.f32 %v142_v22, %v143_v23 }
 0x18c   :  { %v145_v25 = vrot.slane %v144_v24, 2 }
 0x18e   :  { %v146_v26 = vmax.f32 %v144_v24, %v145_v25 }
 0x190   :  { %v147_v27 = vrot.slane %v146_v26, 1 }
 0x192   :  { %v148_v28 = vmax.f32 %v146_v26, %v147_v27 }
 0x194   :  { %v149_v29 = vsub.f32 %v140_v21, %v148_v28 }
 0x196   :  { %v150_v30 = vmul.f32 1.442695, %v149_v29 }
 0x198   :  { %219 = vpow2.f32 %v150_v30 }
 0x1a2   :  { %v220_v31 = vpop.eup %219 }
 0x1a3   :  { %v152_v32 = vsel %vm141_vm4, %v220_v31, 0.0 }
 0x1a4   :  { %v153_v33 = vrot.slane %v152_v32, 4 }
 0x1a6   :  { %v154_v34 = vadd.f32 %v153_v33, %v152_v32 }
 0x1a8   :  { %v155_v35 = vrot.slane %v154_v34, 2 }
 0x1aa   :  { %v156_v36 = vadd.f32 %v155_v35, %v154_v34 }
 0x1ac   :  { %v157_v37 = vrot.slane %v156_v36, 1 }
 0x1ae   :  { %v158_v38 = vadd.f32 %v157_v37, %v156_v36 }
 0x1b0   :  { %221 = vrcp.f32 %v158_v38 }
 0x1ba   :  { %v222_v39 = vpop.eup %221 }
 0x1bb   :  { %v160_v40 = vmul.f32 %v222_v39, %v220_v31 }
 0x1bd   :  { %163 = vperm.xlu0 %216, %v160_v40  }
 0x23c   :  { %v164_v41 = vpop.permute.xlu0 %163 }
 0x23d   :  { %v166_v42 = vmul.f32 %v164_v41, %v22_v8 }
 0x23f   :  { %v167_v43 = vsel %vm129_vm3, %v166_v42, 0.0 }
 0x240   :  { %v168_v44 = vrot.slane %v167_v43, 4 }
 0x242   :  { %v169_v45 = vadd.f32 %v168_v44, %v167_v43 }
 0x244   :  { %v170_v46 = vrot.slane %v169_v45, 2 }
 0x246   :  { %v171_v47 = vadd.f32 %v170_v46, %v169_v45 }
 0x248   :  { %v172_v48 = vrot.slane %v171_v47, 1 }
 0x24a   :  { %v173_v49 = vadd.f32 %v172_v48, %v171_v47 }
 0x24c   :  { %175 = vst.msk [vmem:[%s294_s5] sm:$0x1] %vm174_vm5, %v173_v49 }

// kernel: mash_rnn.12
= control target key start
LH: loop header
LB: loop body
LE: loop exit
PB: predicated region body
PF: predicated region fallthrough
CT: control target
= control target key end

     0   :  { %vm34_vm0 = vcmask 261120   ;;  %v223_v0 = vmov 0.0|0.0   ;;  %vm224_vm2 = vmmov 0   ;;  %v225_v3 = vmov 0.0   ;;  %s289_s1 = inlined_call_operand.vmem [shape: f32[32,32], index: 1, kind: input, shape index: {}]   ;;  %s290_s0 = inlined_call_operand.vmem [shape: f32[1,6,32], index: 0, kind: input, shape index: {}]   ;;  %s291_s4 = inlined_call_operand.<no memory space> [shape: f32[1,1], index: 4, kind: input, shape index: {}]   ;;  %s292_s2 = inlined_call_operand.vmem [shape: f32[1,32], index: 2, kind: input, shape index: {}]   ;;  %s293_s3 = inlined_call_operand.vmem [shape: f32[1,32], index: 3, kind: input, shape index: {}]   ;;  %s294_s5 = inlined_call_operand.vmem [shape: f32[1,1,32], index: 5, kind: output, shape index: {}]  }
   0x1   :  { %204 = vmatprep.subr.bf16.mxu0 %v223_v0  ;;  %v23_v1 = vld [vmem:[%s289_s1] sm:$0xff]  ;;  %v24_v2 = vld [vmem:[%s289_s1 + $0x8] sm:$0xff]  ;;  %vm206_vm1 = vmpackc.low %vm34_vm0, %vm34_vm0  ;;  %201 = vmatprep.mubr.msk.f32.mxu0 %vm224_vm2, %v225_v3  ;;  %v10_v9 = vstv %s291_s4  ;;  %vm129_vm3 = vcmask 259072   ;;  %v226_v18 = vmov 0   ;;  %vm141_vm4 = vcmask 5120  }
   0x2   :  { %v205_v4 = vpack.c.bf16 %v24_v2, %v23_v1  ;;  %v25_v5 = vld [vmem:[%s289_s1 + $0x10] sm:$0xff]  ;;  %v26_v6 = vld [vmem:[%s289_s1 + $0x18] sm:$0xff]  ;;  %v22_v8 = vld [vmem:[%s290_s0] sm:$0x3f]  ;;  %11 = vst [vmem:[#allocation2] sm:$0x1] %v10_v9  ;;  %216 = vset.pattern.permute.xlu0 %v226_v18 }
   0x3   :  { %v209_v7 = vpack.c.bf16 %v26_v6, %v25_v5  ;;  %v180_v10 = vld [vmem:[%s292_s2] ss:$0 sm:$0xff]  ;;  %vm174_vm5 = vcmask 253952  }
   0x4   :  { %207 = vmatpush3.bf16.xpose.msk.msra.mxu0 %vm206_vm1, %v205_v4  ;;  %v186_v14 = vld [vmem:[%s293_s3] ss:$0 sm:$0xff] }
   0x5   :  { %208 = vmatprep.subr.bf16.mxu0 %v223_v0 }
   0x9   :  { %v187_v19 = vld [vmem:[#allocation2] ss:$0 sm:$0xff] }
   0xc   :  { %211 = vmatpush3.bf16.xpose.msk.msra.mxu0 %vm206_vm1, %v209_v7 }
  0x13   :  { %202 = vmatmul.mubr.msk.f32.vlgmr.msra.gmra.mrb[0].mxu0 %vm34_vm0, %v22_v8 }
  0xe6   :  { %v116_v11 = vpop.f32.mrb[0].mxu0 }
  0xe7   :  { %v117_v12 = vadd.f32 %v180_v10, %v116_v11  ;;  %v203_v13 = vpop.f32.mrb[1].mxu0 }
  0xe9   :  { %217 = vtanh.f32 %v117_v12 }
  0xf3   :  { %v218_v15 = vpop.eup %217 }
  0xf4   :  { %v128_v16 = vmul.f32 %v218_v15, %v186_v14 }
  0xf6   :  { %v130_v17 = vsel %vm129_vm3, %v128_v16, 0.0 }
  0xf7   :  { %131 = vadd.xlane.f32.xlu0 %v130_v17 }
 0x184   :  { %v132_v20 = vpop.xlane.xlu0 %131 }
 0x185   :  { %v140_v21 = vadd.f32 %v187_v19, %v132_v20 }
 0x187   :  { %v142_v22 = vsel %vm141_vm4, %v140_v21, -inf }
 0x188   :  { %v143_v23 = vrot.slane %v142_v22, 4 }
 0x18a   :  { %v144_v24 = vmax.f32 %v142_v22, %v143_v23 }
 0x18c   :  { %v145_v25 = vrot.slane %v144_v24, 2 }
 0x18e   :  { %v146_v26 = vmax.f32 %v144_v24, %v145_v25 }
 0x190   :  { %v147_v27 = vrot.slane %v146_v26, 1 }
 0x192   :  { %v148_v28 = vmax.f32 %v146_v26, %v147_v27 }
 0x194   :  { %v149_v29 = vsub.f32 %v140_v21, %v148_v28 }
 0x196   :  { %v150_v30 = vmul.f32 1.442695, %v149_v29 }
 0x198   :  { %219 = vpow2.f32 %v150_v30 }
 0x1a2   :  { %v220_v31 = vpop.eup %219 }
 0x1a3   :  { %v152_v32 = vsel %vm141_vm4, %v220_v31, 0.0 }
 0x1a4   :  { %v153_v33 = vrot.slane %v152_v32, 4 }
 0x1a6   :  { %v154_v34 = vadd.f32 %v153_v33, %v152_v32 }
 0x1a8   :  { %v155_v35 = vrot.slane %v154_v34, 2 }
 0x1aa   :  { %v156_v36 = vadd.f32 %v155_v35, %v154_v34 }
 0x1ac   :  { %v157_v37 = vrot.slane %v156_v36, 1 }
 0x1ae   :  { %v158_v38 = vadd.f32 %v157_v37, %v156_v36 }
 0x1b0   :  { %221 = vrcp.f32 %v158_v38 }
 0x1ba   :  { %v222_v39 = vpop.eup %221 }
 0x1bb   :  { %v160_v40 = vmul.f32 %v222_v39, %v220_v31 }
 0x1bd   :  { %163 = vperm.xlu0 %216, %v160_v40  }
 0x23c   :  { %v164_v41 = vpop.permute.xlu0 %163 }
 0x23d   :  { %v166_v42 = vmul.f32 %v164_v41, %v22_v8 }
 0x23f   :  { %v167_v43 = vsel %vm129_vm3, %v166_v42, 0.0 }
 0x240   :  { %v168_v44 = vrot.slane %v167_v43, 4 }
 0x242   :  { %v169_v45 = vadd.f32 %v168_v44, %v167_v43 }
 0x244   :  { %v170_v46 = vrot.slane %v169_v45, 2 }
 0x246   :  { %v171_v47 = vadd.f32 %v170_v46, %v169_v45 }
 0x248   :  { %v172_v48 = vrot.slane %v171_v47, 1 }
 0x24a   :  { %v173_v49 = vadd.f32 %v172_v48, %v171_v47 }
 0x24c   :  { %175 = vst.msk [vmem:[%s294_s5] sm:$0x1] %vm174_vm5, %v173_v49 }

// kernel: mash_rnn.16
= control target key start
LH: loop header
LB: loop body
LE: loop exit
PB: predicated region body
PF: predicated region fallthrough
CT: control target
= control target key end

     0   :  { %v3847_v0 = vmov 0.0|0.0   ;;  %vm3848_vm0 = vmmov 0   ;;  %v3849_v8 = vmov 0.0   ;;  %vm32_vm1 = vcmask 261120   ;;  %s4437_s1 = inlined_call_operand.vmem [shape: f32[12,32,16], index: 1, kind: input, shape index: {}]   ;;  %s4438_s0 = inlined_call_operand.vmem [shape: f32[2,32], index: 0, kind: input, shape index: {}]   ;;  %s4439_s2 = inlined_call_operand.vmem [shape: f32[12,16,16], index: 2, kind: input, shape index: {}]   ;;  %s4440_s3 = inlined_call_operand.vmem [shape: f32[12,1,16], index: 3, kind: input, shape index: {}]   ;;  %s4441_s4 = inlined_call_operand.vmem [shape: f32[4,1,16], index: 4, kind: input, shape index: {}]   ;;  %s4442_s5 = inlined_call_operand.vmem [shape: f32[2,32], index: 5, kind: output, shape index: {}]  }
   0x1   :  { %3619 = vmatprep.subr.bf16.mxu0 %v3847_v0  ;;  %3625 = vmatprep.subr.bf16.mxu1 %v3847_v0  ;;  %v21_v1 = vld [vmem:[%s4437_s1] sm:$0xff]  ;;  %v22_v2 = vld [vmem:[%s4437_s1 + $0x8] sm:$0xff]  ;;  %v23_v6 = vld [vmem:[%s4437_s1 + $0x10] sm:$0xff]  ;;  %vm523_vm2 = vcmask 130048   ;;  %vm765_vm3 = vcmask 122880   ;;  %vm1018_vm4 = vcmask 123905  }
   0x2   :  { %v3032_v3 = vld [vmem:[%s4437_s1 + $0x20] sm:$0xff]  ;;  %v3620_v4 = vpack.c.bf16 %v22_v2, %v21_v1  ;;  %v3033_v5 = vld [vmem:[%s4437_s1 + $0x28] sm:$0xff]  ;;  %v24_v7 = vld [vmem:[%s4437_s1 + $0x18] sm:$0xff]  ;;  %3338 = vmatprep.mubr.msk.f32.mxu1 %vm3848_vm0, %v3849_v8  ;;  %3327 = vmatprep.mubr.msk.f32.mxu0 %vm3848_vm0, %v3849_v8  ;;  %vm3024_vm5 = vcmask 254976  }
   0x3   :  { %v3626_v9 = vpack.c.bf16 %v3033_v5, %v3032_v3  ;;  %v3034_v10 = vld [vmem:[%s4437_s1 + $0x30] sm:$0xff]  ;;  %v3035_v11 = vld [vmem:[%s4437_s1 + $0x38] sm:$0xff]  ;;  %v3623_v12 = vpack.c.bf16 %v24_v7, %v23_v6  ;;  %v3039_v14 = vld [vmem:[%s4437_s1 + $0x40] sm:$0xff] }
   0x4   :  { %3621 = vmatpush3.bf16.msra.mxu0 %v3620_v4  ;;  %v3629_v13 = vpack.c.bf16 %v3035_v11, %v3034_v10  ;;  %v3040_v15 = vld [vmem:[%s4437_s1 + $0x48] sm:$0xff]  ;;  %v3046_v16 = vld [vmem:[%s4437_s1 + $0x60] sm:$0xff]  ;;  %v3041_v21 = vld [vmem:[%s4437_s1 + $0x50] sm:$0xff] }
   0x5   :  { %3627 = vmatpush3.bf16.msra.mxu1 %v3626_v9  ;;  %3622 = vmatprep.subr.bf16.mxu0 %v3847_v0  ;;  %v3047_v17 = vld [vmem:[%s4437_s1 + $0x68] sm:$0xff]  ;;  %v20_v18 = vld [vmem:[%s4438_s0] sm:$0x3]  ;;  %v3632_v19 = vpack.c.bf16 %v3040_v15, %v3039_v14  ;;  %v3042_v22 = vld [vmem:[%s4437_s1 + $0x58] sm:$0xff]  ;;  %s3850_s0 = smov 16  }
   0x6   :  { %3628 = vmatprep.subr.bf16.mxu1 %v3847_v0  ;;  %v3638_v20 = vpack.c.bf16 %v3047_v17, %v3046_v16  ;;  %v3048_v23 = vld [vmem:[%s4437_s1 + $0x70] sm:$0xff]  ;;  %v3049_v24 = vld [vmem:[%s4437_s1 + $0x78] sm:$0xff]  ;;  %v3635_v25 = vpack.c.bf16 %v3042_v22, %v3041_v21  ;;  %v3053_v27 = vld [vmem:[%s4437_s1 + $0x80] sm:$0xff] }
   0x7   :  { %v3641_v26 = vpack.c.bf16 %v3049_v24, %v3048_v23  ;;  %v3054_v28 = vld [vmem:[%s4437_s1 + $0x88] sm:$0xff]  ;;  %v3060_v29 = vld [vmem:[%s4437_s1 + $0xa0] sm:$0xff]  ;;  %v3055_v33 = vld [vmem:[%s4437_s1 + $0x90] sm:$0xff] }
   0x8   :  { %3624 = vmatpush3.bf16.msra.mxu0 %v3623_v12  ;;  %v3061_v30 = vld [vmem:[%s4437_s1 + $0xa8] sm:$0xff]  ;;  %v3644_v31 = vpack.c.bf16 %v3054_v28, %v3053_v27  ;;  %v3056_v34 = vld [vmem:[%s4437_s1 + $0x98] sm:$0xff]  ;;  %v3062_v35 = vld [vmem:[%s4437_s1 + $0xb0] sm:$0xff] }
   0x9   :  { %3630 = vmatpush3.bf16.msra.mxu1 %v3629_v13  ;;  %3631 = vmatprep.subr.bf16.mxu0 %v3847_v0  ;;  %v3650_v32 = vpack.c.bf16 %v3061_v30, %v3060_v29  ;;  %v3063_v36 = vld [vmem:[%s4437_s1 + $0xb8] sm:$0xff]  ;;  %v3647_v37 = vpack.c.bf16 %v3056_v34, %v3055_v33  ;;  %v521_v39 = vld [vmem:[%s4439_s2] sm:$0xff]  ;;  %v522_v40 = vld [vmem:[%s4439_s2 + $0x8] sm:$0xff] }
   0xa   :  { %3637 = vmatprep.subr.bf16.mxu1 %v3847_v0  ;;  %v3653_v38 = vpack.c.bf16 %v3063_v36, %v3062_v35  ;;  %v3067_v41 = vld [vmem:[%s4439_s2 + $0x10] sm:$0xff]  ;;  %v3068_v42 = vld [vmem:[%s4439_s2 + $0x18] sm:$0xff]  ;;  %v3656_v43 = vpack.c.bf16 %v522_v40, %v521_v39  ;;  %v3069_v45 = vld [vmem:[%s4439_s2 + $0x20] sm:$0xff] }
   0xb   :  { %3328 = vmatmul.mubr.msk.f32.vlgmr.msra.gmra.mrb[0].mxu0 %vm32_vm1, %v20_v18  ;;  %v3659_v44 = vpack.c.bf16 %v3068_v42, %v3067_v41  ;;  %v3070_v46 = vld [vmem:[%s4439_s2 + $0x28] sm:$0xff]  ;;  %v3073_v47 = vld [vmem:[%s4439_s2 + $0x30] sm:$0xff]  ;;  %v3074_v48 = vld [vmem:[%s4439_s2 + $0x38] sm:$0xff] }
   0xc   :  { %3339 = vmatmul.mubr.msk.f32.vlgmr.msra.gmra.mrb[0].mxu1 %vm32_vm1, %v20_v18  ;;  %3633 = vmatpush3.bf16.msra.mxu0 %v3632_v19  ;;  %v4012_v49 = vpack.c.bf16 %v3070_v46, %v3069_v45  ;;  %v4016_v50 = vpack.c.bf16 %v3074_v48, %v3073_v47  ;;  %v3075_v51 = vld [vmem:[%s4439_s2 + $0x40] sm:$0xff]  ;;  %v3076_v52 = vld [vmem:[%s4439_s2 + $0x48] sm:$0xff]  ;;  %v3077_v53 = vld [vmem:[%s4439_s2 + $0x50] sm:$0xff] }
   0xd   :  { %3639 = vmatpush3.bf16.msra.mxu1 %v3638_v20  ;;  %3634 = vmatprep.subr.bf16.mxu0 %v3847_v0  ;;  %v3078_v54 = vld [vmem:[%s4439_s2 + $0x58] sm:$0xff]  ;;  %v4037_v55 = vpack.c.bf16 %v3076_v52, %v3075_v51  ;;  %v3030_v2 = vld [vmem:[%s4440_s3] ss:$0 sm:$0xff]  ;;  %v3037_v6 = vld [vmem:[%s4440_s3 + $0x1] ss:$0 sm:$0xff] }
   0xe   :  { %3640 = vmatprep.subr.bf16.mxu1 %v3847_v0  ;;  %3360 = vmatprep.mubr.msk.f32.mxu1 %vm3848_vm0, %v3849_v8  ;;  %v4042_v56 = vpack.c.bf16 %v3078_v54, %v3077_v53  ;;  %v3051_v16 = vld [vmem:[%s4440_s3 + $0x3] ss:$0 sm:$0xff]  ;;  %v3058_v23 = vld [vmem:[%s4440_s3 + $0x4] ss:$0 sm:$0xff]  ;;  %v673_v42 = vld [vmem:[%s4441_s4] sm:$0x1] }
   0xf   :  { %3349 = vmatprep.mubr.msk.f32.mxu0 %vm3848_vm0, %v3849_v8  ;;  %v3044_v45 = vld [vmem:[%s4440_s3 + $0x2] ss:$0 sm:$0xff] }
  0x10   :  { %3636 = vmatpush3.bf16.msra.mxu0 %v3635_v25 }
  0x11   :  { %3642 = vmatpush3.bf16.msra.mxu1 %v3641_v26  ;;  %3643 = vmatprep.subr.bf16.mxu0 %v3847_v0 }
  0x12   :  { %3649 = vmatprep.subr.bf16.mxu1 %v3847_v0 }
  0x13   :  { %3350 = vmatmul.mubr.msk.f32.vlgmr.msra.gmra.mrb[2].mxu0 %vm32_vm1, %v20_v18 }
  0x14   :  { %3361 = vmatmul.mubr.msk.f32.vlgmr.msra.gmra.mrb[2].mxu1 %vm32_vm1, %v20_v18  ;;  %3645 = vmatpush3.bf16.msra.mxu0 %v3644_v31 }
  0x15   :  { %3651 = vmatpush3.bf16.msra.mxu1 %v3650_v32  ;;  %3646 = vmatprep.subr.bf16.mxu0 %v3847_v0 }
  0x16   :  { %3652 = vmatprep.subr.bf16.mxu1 %v3847_v0  ;;  %3371 = vmatprep.mubr.msk.f32.mxu0 %vm3848_vm0, %v3849_v8 }
  0x17   :  { %3382 = vmatprep.mubr.msk.f32.mxu1 %vm3848_vm0, %v3849_v8 }
  0x18   :  { %3648 = vmatpush3.bf16.msra.mxu0 %v3647_v37 }
  0x19   :  { %3654 = vmatpush3.bf16.msra.mxu1 %v3653_v38  ;;  %3655 = vmatprep.subr.bf16.mxu0 %v3847_v0 }
  0x1a   :  { %3658 = vmatprep.subr.bf16.mxu1 %v3847_v0 }
  0x1b   :  { %3372 = vmatmul.mubr.msk.f32.vlgmr.msra.gmra.mrb[4].mxu0 %vm32_vm1, %v20_v18 }
  0x1c   :  { %3383 = vmatmul.mubr.msk.f32.vlgmr.msra.gmra.mrb[4].mxu1 %vm32_vm1, %v20_v18  ;;  %3657 = vmatpush3.bf16.msra.mxu0 %v3656_v43 }
  0x1d   :  { %3660 = vmatpush3.bf16.msra.mxu1 %v3659_v44  ;;  %3389 = vmatprep.mubr.msk.f32.mxu0 %vm3848_vm0, %v3849_v8 }
  0x1e   :  { %3396 = vmatprep.mubr.msk.f32.mxu1 %vm3848_vm0, %v3849_v8  ;;  %3661 = vmatprep.subr.bf16.mxu0 %v3847_v0 }
  0x1f   :  { %3390 = vmatmul.mubr.f32.vlgmr.msra.gmra.mrb[6].mxu0 %v3849_v8  ;;  %3664 = vmatprep.subr.bf16.mxu1 %v3847_v0 }
  0x20   :  { %3397 = vmatmul.mubr.f32.vlgmr.msra.gmra.mrb[6].mxu1 %v3849_v8  ;;  %3663 = vmatpush3.bf16.msra.mxu0 %v4012_v49 }
  0x21   :  { %3666 = vmatpush3.bf16.msra.mxu1 %v4016_v50  ;;  %3403 = vmatprep.mubr.msk.f32.mxu0 %vm3848_vm0, %v3849_v8 }
  0x22   :  { %3410 = vmatprep.mubr.msk.f32.mxu1 %vm3848_vm0, %v3849_v8  ;;  %3667 = vmatprep.subr.bf16.mxu0 %v3847_v0 }
  0x23   :  { %3404 = vmatmul.mubr.f32.vlgmr.msra.gmra.mrb[8].mxu0 %v3849_v8  ;;  %3670 = vmatprep.subr.bf16.mxu1 %v3847_v0 }
  0x24   :  { %3411 = vmatmul.mubr.f32.vlgmr.msra.gmra.mrb[8].mxu1 %v3849_v8  ;;  %3669 = vmatpush3.bf16.msra.mxu0 %v4037_v55 }
  0x25   :  { %3417 = vmatprep.mubr.msk.f32.mxu0 %vm3848_vm0, %v3849_v8  ;;  %3672 = vmatpush3.bf16.msra.mxu1 %v4042_v56 }
  0x26   :  { %3424 = vmatprep.mubr.msk.f32.mxu1 %vm3848_vm0, %v3849_v8  ;;  %3673 = vmatprep.subr.bf16.mxu0 %v3847_v0 }
  0x27   :  { %3418 = vmatmul.mubr.f32.vlgmr.msra.gmra.mrb[10].mxu0 %v3849_v8  ;;  %3676 = vmatprep.subr.bf16.mxu1 %v3847_v0 }
  0x28   :  { %3425 = vmatmul.mubr.f32.vlgmr.msra.gmra.mrb[10].mxu1 %v3849_v8  ;;  %3675 = vmatpush3.bf16.msra.mxu0 %v3656_v43 }
  0x29   :  { %3678 = vmatpush3.bf16.msra.mxu1 %v3659_v44  ;;  %3431 = vmatprep.mubr.msk.f32.mxu0 %vm3848_vm0, %v3849_v8  ;;  %v3079_v44 = vld [vmem:[%s4441_s4 + $0x1] sm:$0x1] }
  0x2a   :  { %3438 = vmatprep.mubr.msk.f32.mxu1 %vm3848_vm0, %v3849_v8  ;;  %3679 = vmatprep.subr.bf16.mxu0 %v3847_v0 }
  0x2b   :  { %3682 = vmatprep.subr.bf16.mxu1 %v3847_v0 }
  0xde   :  { %v102_v57 = vpop.f32.mrb[0].mxu0 }
  0xdf   :  { %v185_v58 = vpop.f32.mrb[0].mxu1  ;;  %v3329_v59 = vpop.f32.mrb[1].mxu0  ;;  %v4072_v9 = vadd.f32 %v3030_v2, %v102_v57 }
  0xe0   :  { %v3340_v60 = vpop.f32.mrb[1].mxu1  ;;  %v4074_v11 = vadd.f32 %v3037_v6, %v185_v58  ;;  %v3065_v59 = vld [vmem:[%s4440_s3 + $0x5] ss:$0 sm:$0xff] }
  0xe6   :  { %v268_v61 = vpop.f32.mrb[2].mxu0 }
  0xe7   :  { %v351_v62 = vpop.f32.mrb[2].mxu1  ;;  %v3351_v63 = vpop.f32.mrb[3].mxu0  ;;  %v4099_v52 = vadd.f32 %v3044_v45, %v268_v61 }
  0xe8   :  { %v3362_v1 = vpop.f32.mrb[3].mxu1  ;;  %v4081_v22 = vadd.f32 %v3051_v16, %v351_v62 }
  0xee   :  { %v434_v3 = vpop.f32.mrb[4].mxu0 }
  0xef   :  { %v517_v4 = vpop.f32.mrb[4].mxu1  ;;  %v3373_v5 = vpop.f32.mrb[5].mxu0  ;;  %v4087_v29 = vadd.f32 %v3058_v23, %v434_v3  ;;  %v3113_v23 = vld [vmem:[%s4437_s1 + $0xf8] sm:$0xff] }
  0xf0   :  { %v3384_v7 = vpop.f32.mrb[5].mxu1  ;;  %v4105_v62 = vadd.f32 %v3065_v59, %v517_v4 }
  0xf2   :  { %v593_v10 = vpop.f32.mrb[6].mxu0 }
  0xf3   :  { %v744_v12 = vadd.f32 %v593_v10, %v4072_v9  ;;  %v666_v13 = vpop.f32.mrb[6].mxu1  ;;  %v3391_v14 = vpop.f32.mrb[7].mxu0 }
  0xf4   :  { %v3398_v15 = vpop.f32.mrb[7].mxu1  ;;  %v751_v18 = vadd.f32 %v666_v13, %v4074_v11 }
  0xf5   :  { %v3071_v17 = vmul.f32 -1.442695, %v744_v12  ;;  %v3110_v15 = vld [vmem:[%s4437_s1 + $0xe0] sm:$0xff] }
  0xf6   :  { %v740_v19 = vpop.f32.mrb[8].mxu0  ;;  %v3072_v26 = vmul.f32 -1.442695, %v751_v18  ;;  %v3105_v18 = vld [vmem:[%s4437_s1 + $0xd0] sm:$0xff] }
  0xf7   :  { %3767 = vpow2.f32 %v3071_v17  ;;  %v836_v20 = vpop.f32.mrb[8].mxu1  ;;  %v3405_v21 = vpop.f32.mrb[9].mxu0  ;;  %v741_v46 = vadd.f32 %v740_v19, %v673_v42  ;;  %v3111_v17 = vld [vmem:[%s4437_s1 + $0xe8] sm:$0xff]  ;;  %v3106_v19 = vld [vmem:[%s4437_s1 + $0xd8] sm:$0xff] }
  0xf8   :  { %v989_v24 = vrot.slane %v836_v20, 7  ;;  %v3412_v25 = vpop.f32.mrb[9].mxu1  ;;  %3769 = vpow2.f32 %v3072_v26  ;;  %v3698_v20 = vpack.c.bf16 %v3111_v17, %v3110_v15  ;;  %v3112_v21 = vld [vmem:[%s4437_s1 + $0xf0] sm:$0xff] }
  0xf9   :  { %v3701_v25 = vpack.c.bf16 %v3113_v23, %v3112_v21  ;;  %v3125_v21 = vld [vmem:[%s4437_s1 + $0x128] sm:$0xff] }
  0xfa   :  { %v991_v27 = vadd.f32 %v989_v24, %v4081_v22  ;;  %v909_v28 = vpop.f32.mrb[10].mxu0  ;;  %v3695_v24 = vpack.c.bf16 %v3106_v19, %v3105_v18 }
  0xfb   :  { %v999_v30 = vrot.slane %v909_v28, 7  ;;  %v3419_v31 = vpop.f32.mrb[11].mxu0  ;;  %v984_v32 = vpop.f32.mrb[10].mxu1 }
  0xfc   :  { %v3080_v33 = vmul.f32 -1.442695, %v991_v27  ;;  %v3426_v34 = vpop.f32.mrb[11].mxu1  ;;  %v985_v48 = vadd.f32 %v3079_v44, %v984_v32 }
  0xfd   :  { %v1001_v35 = vadd.f32 %v999_v30, %v4087_v29 }
  0xfe   :  { %3771 = vpow2.f32 %v3080_v33  ;;  %v1009_v58 = vrot.slane %v985_v48, 7 }
  0xff   :  { %v3081_v37 = vmul.f32 -1.442695, %v1001_v35 }
 0x101   :  { %v3768_v36 = vpop.eup %3767 }
 0x102   :  { %v748_v38 = vadd.f32 1.0, %v3768_v36  ;;  %v3770_v39 = vpop.eup %3769 }
 0x103   :  { %v755_v43 = vadd.f32 1.0, %v3770_v39 }
 0x104   :  { %3773 = vrcp.f32 %v748_v38 }
 0x105   :  { %3775 = vpow2.f32 %v3081_v37 }
 0x108   :  { %v3772_v40 = vpop.eup %3771 }
 0x109   :  { %v995_v41 = vadd.f32 1.0, %v3772_v40 }
 0x10b   :  { %3777 = vrcp.f32 %v995_v41 }
 0x10c   :  { %3779 = vrcp.f32 %v755_v43 }
 0x10e   :  { %v3774_v47 = vpop.eup %3773 }
 0x10f   :  { %v3776_v51 = vpop.eup %3775  ;;  %v758_v53 = vmul.f32 %v3774_v47, %v741_v46 }
 0x110   :  { %v1005_v57 = vadd.f32 1.0, %v3776_v51 }
 0x111   :  { %v759_v54 = vadd.f32 %v758_v53, %v4099_v52 }
 0x113   :  { %3781 = vtanh.f32 %v759_v54 }
 0x114   :  { %3783 = vrcp.f32 %v1005_v57 }
 0x115   :  { %v3778_v60 = vpop.eup %3777 }
 0x116   :  { %v1011_v63 = vmul.f32 %v3778_v60, %v1009_v58  ;;  %v3780_v61 = vpop.eup %3779 }
 0x117   :  { %v761_v2 = vsub.f32 1.0, %v3780_v61  ;;  %v763_v6 = vmul.f32 0.0, %v3780_v61 }
 0x118   :  { %v1012_v1 = vadd.f32 %v1011_v63, %v4105_v62 }
 0x11a   :  { %3785 = vtanh.f32 %v1012_v1 }
 0x11d   :  { %v3782_v3 = vpop.eup %3781 }
 0x11e   :  { %v762_v5 = vmul.f32 %v3782_v3, %v761_v2  ;;  %v3784_v7 = vpop.eup %3783 }
 0x11f   :  { %v1014_v4 = vsub.f32 1.0, %v3784_v7  ;;  %v1016_v14 = vmul.f32 0.0, %v3784_v7 }
 0x120   :  { %v4108_v10 = vadd.f32 %v763_v6, %v762_v5  ;;  %v3099_v5 = vld [vmem:[%s4441_s4 + $0x1] sm:$0x1] }
 0x122   :  { %3432 = vmatmul.mubr.msk.f32.vlgmr.msra.gmra.mrb[12].mxu0 %vm523_vm2, %v4108_v10  ;;  %3439 = vmatmul.mubr.msk.f32.vlgmr.msra.gmra.mrb[12].mxu1 %vm523_vm2, %v4108_v10  ;;  %766 = vst.msk [vmem:[#allocation2] sm:$0x1] %vm765_vm3, %v4108_v10  ;;  %v1268_v63 = vrot.slane %v4108_v10, 7 }
 0x123   :  { %3681 = vmatpush3.bf16.msra.mxu0 %v4012_v49  ;;  %3445 = vmatprep.mubr.msk.f32.mxu0 %vm3848_vm0, %v3849_v8 }
 0x124   :  { %v3786_v12 = vpop.eup %3785  ;;  %3685 = vmatprep.subr.bf16.mxu0 %v3847_v0  ;;  %3684 = vmatpush3.bf16.msra.mxu1 %v4016_v50 }
 0x125   :  { %3452 = vmatprep.mubr.msk.f32.mxu1 %vm3848_vm0, %v3849_v8  ;;  %v1015_v13 = vmul.f32 %v3786_v12, %v1014_v4  ;;  %3688 = vmatprep.subr.bf16.mxu1 %v3847_v0 }
 0x126   :  { %3446 = vmatmul.mubr.msk.f32.vlgmr.msra.gmra.mrb[14].mxu0 %vm523_vm2, %v4108_v10 }
 0x127   :  { %3687 = vmatpush3.bf16.msra.mxu0 %v4037_v55  ;;  %3459 = vmatprep.mubr.msk.f32.mxu0 %vm3848_vm0, %v3849_v8  ;;  %v1017_v49 = vadd.f32 %v1016_v14, %v1015_v13  ;;  %v3103_v55 = vld [vmem:[%s4437_s1 + $0xc0] sm:$0xff] }
 0x128   :  { %3691 = vmatprep.subr.bf16.mxu0 %v3847_v0 }
 0x129   :  { %1019 = vst.msk [vmem:[#allocation3] sm:$0x2] %vm1018_vm4, %v1017_v49  ;;  %v4131_v50 = vrot.slane %v1017_v49, 1 }
 0x12b   :  { %3453 = vmatmul.mubr.msk.f32.vlgmr.msra.gmra.mrb[14].mxu1 %vm523_vm2, %v4131_v50  ;;  %3460 = vmatmul.mubr.msk.f32.vlgmr.msra.gmra.mrb[16].mxu0 %vm523_vm2, %v4131_v50 }
 0x12c   :  { %3690 = vmatpush3.bf16.msra.mxu1 %v4042_v56  ;;  %3466 = vmatprep.mubr.msk.f32.mxu1 %vm3848_vm0, %v3849_v8  ;;  %v3104_v56 = vld [vmem:[%s4437_s1 + $0xc8] sm:$0xff] }
 0x12d   :  { %3697 = vmatprep.subr.bf16.mxu1 %v3847_v0  ;;  %3477 = vmatprep.mubr.msk.f32.mxu0 %vm3848_vm0, %v3849_v8  ;;  %v3692_v16 = vpack.c.bf16 %v3104_v56, %v3103_v55 }
 0x12f   :  { %3467 = vmatmul.mubr.msk.f32.vlgmr.msra.gmra.mrb[16].mxu1 %vm523_vm2, %v4131_v50  ;;  %3693 = vmatpush3.bf16.msra.mxu0 %v3692_v16 }
 0x130   :  { %3488 = vmatprep.mubr.msk.f32.mxu1 %vm3848_vm0, %v3849_v8  ;;  %3699 = vmatpush3.bf16.msra.mxu1 %v3698_v20  ;;  %v3118_v20 = vld [vmem:[%s4437_s1 + $0x108] sm:$0xff] }
 0x131   :  { %3694 = vmatprep.subr.bf16.mxu0 %v3847_v0  ;;  %3700 = vmatprep.subr.bf16.mxu1 %v3847_v0 }
 0x133   :  { %3696 = vmatpush3.bf16.msra.mxu0 %v3695_v24 }
 0x134   :  { %3702 = vmatpush3.bf16.msra.mxu1 %v3701_v25  ;;  %3703 = vmatprep.subr.bf16.mxu0 %v3847_v0  ;;  %v3119_v25 = vld [vmem:[%s4437_s1 + $0x110] sm:$0xff] }
 0x135   :  { %3709 = vmatprep.subr.bf16.mxu1 %v3847_v0 }
 0x1f5   :  { %v1091_v26 = vpop.f32.mrb[12].mxu0  ;;  %v1163_v27 = vpop.f32.mrb[12].mxu1 }
 0x1f6   :  { %v1241_v28 = vrot.slane %v1091_v26, 7  ;;  %v1251_v30 = vrot.slane %v1163_v27, 7  ;;  %v3433_v31 = vpop.f32.mrb[13].mxu0  ;;  %v3440_v32 = vpop.f32.mrb[13].mxu1  ;;  %v3120_v26 = vld [vmem:[%s4437_s1 + $0x118] sm:$0xff] }
 0x1f7   :  { %v3127_v31 = vld [vmem:[%s4437_s1 + $0x138] sm:$0xff] }
 0x1f8   :  { %v1243_v33 = vadd.f32 %v1241_v28, %v4072_v9  ;;  %v1253_v34 = vadd.f32 %v1251_v30, %v4074_v11  ;;  %v3126_v30 = vld [vmem:[%s4437_s1 + $0x130] sm:$0xff] }
 0x1f9   :  { %v1236_v35 = vpop.f32.mrb[14].mxu0 }
 0x1fa   :  { %v3089_v36 = vmul.f32 -1.442695, %v1243_v33  ;;  %v3090_v37 = vmul.f32 -1.442695, %v1253_v34  ;;  %v3447_v38 = vpop.f32.mrb[15].mxu0  ;;  %v3707_v33 = vpack.c.bf16 %v3120_v26, %v3119_v25  ;;  %v3713_v34 = vpack.c.bf16 %v3127_v31, %v3126_v30 }
 0x1fb   :  { %v3139_v38 = vld [vmem:[%s4437_s1 + $0x168] sm:$0xff] }
 0x1fc   :  { %3787 = vpow2.f32 %v3089_v36  ;;  %v3132_v36 = vld [vmem:[%s4437_s1 + $0x148] sm:$0xff] }
 0x1fd   :  { %3789 = vpow2.f32 %v3090_v37  ;;  %v3138_v37 = vld [vmem:[%s4437_s1 + $0x160] sm:$0xff] }
 0x1fe   :  { %v1345_v39 = vpop.f32.mrb[14].mxu1  ;;  %v1417_v40 = vpop.f32.mrb[16].mxu0 }
 0x1ff   :  { %v1494_v41 = vadd.f32 %v1345_v39, %v4081_v22  ;;  %v3454_v42 = vpop.f32.mrb[15].mxu1  ;;  %v3461_v43 = vpop.f32.mrb[17].mxu0  ;;  %v1501_v44 = vadd.f32 %v1417_v40, %v4087_v29  ;;  %v1169_v22 = vld [vmem:[%s4441_s4] sm:$0x1]  ;;  %v3722_v40 = vpack.c.bf16 %v3139_v38, %v3138_v37 }
 0x200   :  { %v1237_v57 = vadd.f32 %v1236_v35, %v1169_v22  ;;  %v3131_v35 = vld [vmem:[%s4437_s1 + $0x140] sm:$0xff]  ;;  %v3134_v42 = vld [vmem:[%s4437_s1 + $0x158] sm:$0xff]  ;;  %v3140_v43 = vld [vmem:[%s4437_s1 + $0x170] sm:$0xff] }
 0x201   :  { %v3101_v45 = vmul.f32 -1.442695, %v1494_v41  ;;  %v3102_v47 = vmul.f32 -1.442695, %v1501_v44  ;;  %v3716_v39 = vpack.c.bf16 %v3132_v36, %v3131_v35  ;;  %v3133_v41 = vld [vmem:[%s4437_s1 + $0x150] sm:$0xff]  ;;  %v3141_v44 = vld [vmem:[%s4437_s1 + $0x178] sm:$0xff] }
 0x202   :  { %v1490_v46 = vpop.f32.mrb[16].mxu1  ;;  %v1261_v59 = vrot.slane %v1237_v57, 7  ;;  %v3149_v22 = vld [vmem:[%s4439_s2 + $0x80] sm:$0xff]  ;;  %v3154_v57 = vld [vmem:[%s4439_s2 + $0x90] sm:$0xff] }
 0x203   :  { %3791 = vpow2.f32 %v3101_v45  ;;  %v3468_v9 = vpop.f32.mrb[17].mxu1  ;;  %v1491_v7 = vadd.f32 %v3099_v5, %v1490_v46  ;;  %v3719_v45 = vpack.c.bf16 %v3134_v42, %v3133_v41  ;;  %v3725_v46 = vpack.c.bf16 %v3141_v44, %v3140_v43 }
 0x204   :  { %3793 = vpow2.f32 %v3102_v47  ;;  %v3145_v9 = vld [vmem:[%s4439_s2 + $0x60] sm:$0xff]  ;;  %v3146_v47 = vld [vmem:[%s4439_s2 + $0x68] sm:$0xff] }
 0x206   :  { %v3788_v11 = vpop.eup %3787 }
 0x207   :  { %v3790_v48 = vpop.eup %3789  ;;  %v1247_v51 = vadd.f32 1.0, %v3788_v11  ;;  %v3147_v11 = vld [vmem:[%s4439_s2 + $0x70] sm:$0xff] }
 0x208   :  { %v1257_v53 = vadd.f32 1.0, %v3790_v48  ;;  %v3148_v48 = vld [vmem:[%s4439_s2 + $0x78] sm:$0xff] }
 0x209   :  { %3795 = vrcp.f32 %v1247_v51  ;;  %v3728_v51 = vpack.c.bf16 %v3146_v47, %v3145_v9 }
 0x20a   :  { %3797 = vrcp.f32 %v1257_v53  ;;  %v3731_v53 = vpack.c.bf16 %v3148_v48, %v3147_v11  ;;  %v3151_v48 = vld [vmem:[%s4441_s4 + $0x2] sm:$0x1] }
 0x20d   :  { %v3792_v54 = vpop.eup %3791 }
 0x20e   :  { %v1498_v58 = vadd.f32 1.0, %v3792_v54  ;;  %v3794_v29 = vpop.eup %3793  ;;  %v3150_v54 = vld [vmem:[%s4439_s2 + $0x88] sm:$0xff] }
 0x20f   :  { %v1505_v6 = vadd.f32 1.0, %v3794_v29  ;;  %v4287_v29 = vpack.c.bf16 %v3150_v54, %v3149_v22  ;;  %v3122_v22 = vld [vmem:[%s4440_s3 + $0x8] ss:$0 sm:$0xff] }
 0x210   :  { %3799 = vrcp.f32 %v1498_v58  ;;  %v3155_v58 = vld [vmem:[%s4439_s2 + $0x98] sm:$0xff] }
 0x213   :  { %v3796_v60 = vpop.eup %3795 }
 0x214   :  { %v3798_v1 = vpop.eup %3797  ;;  %v1263_v61 = vmul.f32 %v3796_v60, %v1261_v59  ;;  %v4289_v59 = vpack.c.bf16 %v3155_v58, %v3154_v57  ;;  %v3156_v60 = vld [vmem:[%s4439_s2 + $0xa0] sm:$0xff] }
 0x215   :  { %v1270_v2 = vmul.f32 %v3798_v1, %v1268_v63  ;;  %v1266_v14 = vsub.f32 1.0, %v3798_v1  ;;  %v3157_v63 = vld [vmem:[%s4439_s2 + $0xa8] sm:$0xff]  ;;  %v3158_v1 = vld [vmem:[%s4439_s2 + $0xb0] sm:$0xff] }
 0x216   :  { %v1264_v3 = vadd.f32 %v1263_v61, %v4099_v52  ;;  %v3159_v61 = vld [vmem:[%s4439_s2 + $0xb8] sm:$0xff] }
 0x218   :  { %3801 = vtanh.f32 %v1264_v3  ;;  %v4319_v3 = vpack.c.bf16 %v3159_v61, %v3158_v1 }
 0x219   :  { %3803 = vrcp.f32 %v1505_v6 }
 0x21a   :  { %v3800_v4 = vpop.eup %3799 }
 0x21b   :  { %v1508_v12 = vmul.f32 %v3800_v4, %v1491_v7 }
 0x21d   :  { %v1509_v13 = vadd.f32 %v1508_v12, %v4105_v62  ;;  %v3117_v62 = vld [vmem:[%s4437_s1 + $0x100] sm:$0xff] }
 0x21e   :  { %v3704_v23 = vpack.c.bf16 %v3118_v20, %v3117_v62 }
 0x21f   :  { %3805 = vtanh.f32 %v1509_v13 }
 0x222   :  { %v3802_v10 = vpop.eup %3801 }
 0x223   :  { %v1267_v49 = vmul.f32 %v3802_v10, %v1266_v14  ;;  %v3804_v55 = vpop.eup %3803 }
 0x224   :  { %v1511_v52 = vsub.f32 1.0, %v3804_v55  ;;  %v1514_v16 = vmul.f32 %v3804_v55, %v4131_v50  ;;  %v3124_v50 = vld [vmem:[%s4437_s1 + $0x120] sm:$0xff] }
 0x225   :  { %v1271_v56 = vadd.f32 %v1270_v2, %v1267_v49  ;;  %v3710_v24 = vpack.c.bf16 %v3125_v21, %v3124_v50  ;;  %v4313_v2 = vpack.c.bf16 %v3157_v63, %v3156_v60  ;;  %v3108_v49 = vld [vmem:[%s4440_s3 + $0x6] ss:$0 sm:$0xff] }
 0x227   :  { %1272 = vst.msk [vmem:[#allocation2] sm:$0x2] %vm1018_vm4, %v1271_v56 }
 0x229   :  { %v3806_v15 = vpop.eup %3805 }
 0x22a   :  { %v1512_v17 = vmul.f32 %v3806_v15, %v1511_v52 }
 0x22c   :  { %v1515_v18 = vadd.f32 %v1514_v16, %v1512_v17  ;;  %v3115_v17 = vld [vmem:[%s4440_s3 + $0x7] ss:$0 sm:$0xff] }
 0x22e   :  { %1516 = vst.msk [vmem:[#allocation3] sm:$0x1] %vm765_vm3, %v1515_v18  ;;  %v1517_v27 = vld [vmem:[#allocation2] sm:$0x3] }
 0x235   :  { %v1518_v19 = vld [vmem:[#allocation3] sm:$0x3] }
 0x236   :  { %1520 = vrot.lane.b32.xlu0 %v1518_v19, %s3850_s0 }
 0x2a8   :  { %v1521_v28 = vpop.permute.xlu0 %1520 }
 0x2a9   :  { %v1523_v32 = vsel %vm523_vm2, %v1517_v27, %v1521_v28 }
 0x2aa   :  { %3478 = vmatmul.mubr.msk.f32.vlgmr.msra.gmra.mrb[18].mxu0 %vm32_vm1, %v1523_v32  ;;  %3489 = vmatmul.mubr.msk.f32.vlgmr.msra.gmra.mrb[18].mxu1 %vm32_vm1, %v1523_v32 }
 0x2ab   :  { %3705 = vmatpush3.bf16.msra.mxu0 %v3704_v23  ;;  %3711 = vmatpush3.bf16.msra.mxu1 %v3710_v24  ;;  %v3129_v23 = vld [vmem:[%s4440_s3 + $0x9] ss:$0 sm:$0xff] }
 0x2ac   :  { %3706 = vmatprep.subr.bf16.mxu0 %v3847_v0  ;;  %3712 = vmatprep.subr.bf16.mxu1 %v3847_v0 }
 0x2ad   :  { %3499 = vmatprep.mubr.msk.f32.mxu0 %vm3848_vm0, %v3849_v8  ;;  %3510 = vmatprep.mubr.msk.f32.mxu1 %vm3848_vm0, %v3849_v8 }
 0x2af   :  { %3708 = vmatpush3.bf16.msra.mxu0 %v3707_v33  ;;  %3714 = vmatpush3.bf16.msra.mxu1 %v3713_v34  ;;  %v3136_v33 = vld [vmem:[%s4440_s3 + $0xa] ss:$0 sm:$0xff] }
 0x2b0   :  { %3715 = vmatprep.subr.bf16.mxu0 %v3847_v0  ;;  %3721 = vmatprep.subr.bf16.mxu1 %v3847_v0 }
 0x2b2   :  { %3500 = vmatmul.mubr.msk.f32.vlgmr.msra.gmra.mrb[20].mxu0 %vm32_vm1, %v1523_v32  ;;  %3511 = vmatmul.mubr.msk.f32.vlgmr.msra.gmra.mrb[20].mxu1 %vm32_vm1, %v1523_v32 }
 0x2b3   :  { %3717 = vmatpush3.bf16.msra.mxu0 %v3716_v39  ;;  %3723 = vmatpush3.bf16.msra.mxu1 %v3722_v40 }
 0x2b4   :  { %3718 = vmatprep.subr.bf16.mxu0 %v3847_v0  ;;  %3724 = vmatprep.subr.bf16.mxu1 %v3847_v0 }
 0x2b5   :  { %3521 = vmatprep.mubr.msk.f32.mxu0 %vm3848_vm0, %v3849_v8  ;;  %3532 = vmatprep.mubr.msk.f32.mxu1 %vm3848_vm0, %v3849_v8 }
 0x2b7   :  { %3720 = vmatpush3.bf16.msra.mxu0 %v3719_v45  ;;  %3726 = vmatpush3.bf16.msra.mxu1 %v3725_v46 }
 0x2b8   :  { %3727 = vmatprep.subr.bf16.mxu0 %v3847_v0  ;;  %3730 = vmatprep.subr.bf16.mxu1 %v3847_v0 }
 0x2ba   :  { %3522 = vmatmul.mubr.msk.f32.vlgmr.msra.gmra.mrb[22].mxu0 %vm32_vm1, %v1523_v32  ;;  %3533 = vmatmul.mubr.msk.f32.vlgmr.msra.gmra.mrb[22].mxu1 %vm32_vm1, %v1523_v32 }
 0x2bb   :  { %3729 = vmatpush3.bf16.msra.mxu0 %v3728_v51  ;;  %3732 = vmatpush3.bf16.msra.mxu1 %v3731_v53 }
 0x2bc   :  { %3539 = vmatprep.mubr.msk.f32.mxu0 %vm3848_vm0, %v3849_v8  ;;  %3546 = vmatprep.mubr.msk.f32.mxu1 %vm3848_vm0, %v3849_v8 }
 0x2bd   :  { %3733 = vmatprep.subr.bf16.mxu0 %v3847_v0  ;;  %3736 = vmatprep.subr.bf16.mxu1 %v3847_v0 }
 0x2be   :  { %3540 = vmatmul.mubr.f32.vlgmr.msra.gmra.mrb[24].mxu0 %v3849_v8  ;;  %3547 = vmatmul.mubr.f32.vlgmr.msra.gmra.mrb[24].mxu1 %v3849_v8 }
 0x2bf   :  { %3735 = vmatpush3.bf16.msra.mxu0 %v4287_v29  ;;  %3738 = vmatpush3.bf16.msra.mxu1 %v4289_v59 }
 0x2c0   :  { %3553 = vmatprep.mubr.msk.f32.mxu0 %vm3848_vm0, %v3849_v8  ;;  %3560 = vmatprep.mubr.msk.f32.mxu1 %vm3848_vm0, %v3849_v8 }
 0x2c1   :  { %3739 = vmatprep.subr.bf16.mxu0 %v3847_v0  ;;  %3742 = vmatprep.subr.bf16.mxu1 %v3847_v0 }
 0x2c2   :  { %3554 = vmatmul.mubr.f32.vlgmr.msra.gmra.mrb[26].mxu0 %v3849_v8  ;;  %3561 = vmatmul.mubr.f32.vlgmr.msra.gmra.mrb[26].mxu1 %v3849_v8 }
 0x2c3   :  { %3741 = vmatpush3.bf16.msra.mxu0 %v4313_v2  ;;  %3567 = vmatprep.mubr.msk.f32.mxu0 %vm3848_vm0, %v3849_v8 }
 0x2c4   :  { %3744 = vmatpush3.bf16.msra.mxu1 %v4319_v3  ;;  %3574 = vmatprep.mubr.msk.f32.mxu1 %vm3848_vm0, %v3849_v8 }
 0x2c5   :  { %3745 = vmatprep.subr.bf16.mxu0 %v3847_v0  ;;  %3748 = vmatprep.subr.bf16.mxu1 %v3847_v0 }
 0x2c6   :  { %3568 = vmatmul.mubr.f32.vlgmr.msra.gmra.mrb[28].mxu0 %v3849_v8 }
 0x2c7   :  { %3575 = vmatmul.mubr.f32.vlgmr.msra.gmra.mrb[28].mxu1 %v3849_v8  ;;  %3747 = vmatpush3.bf16.msra.mxu0 %v3728_v51  ;;  %v3160_v51 = vld [vmem:[%s4441_s4 + $0x3] sm:$0x1] }
 0x2c8   :  { %3750 = vmatpush3.bf16.msra.mxu1 %v3731_v53  ;;  %3581 = vmatprep.mubr.msk.f32.mxu0 %vm3848_vm0, %v3849_v8 }
 0x2c9   :  { %3588 = vmatprep.mubr.msk.f32.mxu1 %vm3848_vm0, %v3849_v8  ;;  %3751 = vmatprep.subr.bf16.mxu0 %v3847_v0 }
 0x2ca   :  { %3754 = vmatprep.subr.bf16.mxu1 %v3847_v0 }
 0x37d   :  { %v1606_v5 = vpop.f32.mrb[18].mxu0  ;;  %v1689_v6 = vpop.f32.mrb[18].mxu1 }
 0x37e   :  { %v3479_v7 = vpop.f32.mrb[19].mxu0  ;;  %v3490_v4 = vpop.f32.mrb[19].mxu1  ;;  %v4344_v16 = vadd.f32 %v3108_v49, %v1606_v5  ;;  %v4350_v21 = vadd.f32 %v3115_v17, %v1689_v6 }
 0x37f   :  { %v3143_v7 = vld [vmem:[%s4440_s3 + $0xb] ss:$0 sm:$0xff] }
 0x385   :  { %v1772_v12 = vpop.f32.mrb[20].mxu0  ;;  %v1855_v13 = vpop.f32.mrb[20].mxu1 }
 0x386   :  { %v3501_v14 = vpop.f32.mrb[21].mxu0  ;;  %v3512_v10 = vpop.f32.mrb[21].mxu1  ;;  %v4356_v28 = vadd.f32 %v3129_v23, %v1855_v13  ;;  %v4374_v63 = vadd.f32 %v3122_v22, %v1772_v12 }
 0x38d   :  { %v1938_v55 = vpop.f32.mrb[22].mxu0  ;;  %v2021_v56 = vpop.f32.mrb[22].mxu1 }
 0x38e   :  { %v3523_v52 = vpop.f32.mrb[23].mxu0  ;;  %v3534_v15 = vpop.f32.mrb[23].mxu1  ;;  %v4362_v37 = vadd.f32 %v3136_v33, %v1938_v55  ;;  %v4380_v13 = vadd.f32 %v3143_v7, %v2021_v56 }
 0x391   :  { %v2094_v18 = vpop.f32.mrb[24].mxu0  ;;  %v2167_v19 = vpop.f32.mrb[24].mxu1 }
 0x392   :  { %v2246_v62 = vadd.f32 %v2094_v18, %v4344_v16  ;;  %v3548_v20 = vpop.f32.mrb[25].mxu1  ;;  %v3541_v50 = vpop.f32.mrb[25].mxu0  ;;  %v2253_v25 = vadd.f32 %v2167_v19, %v4350_v21 }
 0x394   :  { %v3152_v24 = vmul.f32 -1.442695, %v2246_v62  ;;  %v3153_v35 = vmul.f32 -1.442695, %v2253_v25 }
 0x395   :  { %v2337_v26 = vpop.f32.mrb[26].mxu1  ;;  %v2242_v27 = vpop.f32.mrb[26].mxu0 }
 0x396   :  { %3807 = vpow2.f32 %v3152_v24  ;;  %v2490_v30 = vrot.slane %v2337_v26, 7  ;;  %v3562_v31 = vpop.f32.mrb[27].mxu1  ;;  %v3555_v32 = vpop.f32.mrb[27].mxu0  ;;  %v2243_v57 = vadd.f32 %v3151_v48, %v2242_v27 }
 0x398   :  { %v2492_v34 = vadd.f32 %v2490_v30, %v4356_v28 }
 0x399   :  { %v2410_v36 = vpop.f32.mrb[28].mxu0 }
 0x39a   :  { %v3161_v38 = vmul.f32 -1.442695, %v2492_v34  ;;  %v2500_v39 = vrot.slane %v2410_v36, 7  ;;  %v3569_v40 = vpop.f32.mrb[29].mxu0  ;;  %v2485_v41 = vpop.f32.mrb[28].mxu1 }
 0x39b   :  { %v3576_v42 = vpop.f32.mrb[29].mxu1  ;;  %v2486_v58 = vadd.f32 %v3160_v51, %v2485_v41 }
 0x39c   :  { %3809 = vpow2.f32 %v3161_v38  ;;  %v2502_v43 = vadd.f32 %v2500_v39, %v4362_v37 }
 0x39d   :  { %3811 = vpow2.f32 %v3153_v35  ;;  %v2510_v6 = vrot.slane %v2486_v58, 7 }
 0x39e   :  { %v3162_v44 = vmul.f32 -1.442695, %v2502_v43 }
 0x3a0   :  { %v3808_v45 = vpop.eup %3807  ;;  %3813 = vpow2.f32 %v3162_v44 }
 0x3a1   :  { %v2250_v46 = vadd.f32 1.0, %v3808_v45 }
 0x3a3   :  { %3815 = vrcp.f32 %v2250_v46 }
 0x3a6   :  { %v3810_v9 = vpop.eup %3809 }
 0x3a7   :  { %v3812_v47 = vpop.eup %3811  ;;  %v2496_v11 = vadd.f32 1.0, %v3810_v9 }
 0x3a8   :  { %v2257_v53 = vadd.f32 1.0, %v3812_v47 }
 0x3a9   :  { %3817 = vrcp.f32 %v2496_v11 }
 0x3aa   :  { %v3814_v54 = vpop.eup %3813  ;;  %3819 = vrcp.f32 %v2257_v53 }
 0x3ab   :  { %v2506_v5 = vadd.f32 1.0, %v3814_v54  ;;  %v3183_v54 = vld [vmem:[%s4441_s4 + $0x3] sm:$0x1] }
 0x3ad   :  { %v3816_v60 = vpop.eup %3815 }
 0x3ae   :  { %v2260_v1 = vmul.f32 %v3816_v60, %v2243_v57 }
 0x3b0   :  { %v2261_v61 = vadd.f32 %v2260_v1, %v4374_v63 }
 0x3b2   :  { %3821 = vtanh.f32 %v2261_v61 }
 0x3b3   :  { %v3818_v4 = vpop.eup %3817  ;;  %3823 = vrcp.f32 %v2506_v5 }
 0x3b4   :  { %v2512_v14 = vmul.f32 %v3818_v4, %v2510_v6  ;;  %v3820_v12 = vpop.eup %3819 }
 0x3b5   :  { %v2263_v49 = vsub.f32 1.0, %v3820_v12  ;;  %v2265_v15 = vmul.f32 0.0, %v3820_v12 }
 0x3b6   :  { %v2513_v10 = vadd.f32 %v2512_v14, %v4380_v13 }
 0x3b8   :  { %3825 = vtanh.f32 %v2513_v10 }
 0x3bc   :  { %v3822_v55 = vpop.eup %3821 }
 0x3bd   :  { %v2264_v52 = vmul.f32 %v3822_v55, %v2263_v49  ;;  %v3824_v17 = vpop.eup %3823 }
 0x3be   :  { %v2515_v19 = vsub.f32 1.0, %v3824_v17  ;;  %v2517_v20 = vmul.f32 0.0, %v3824_v17 }
 0x3bf   :  { %v4383_v18 = vadd.f32 %v2265_v15, %v2264_v52 }
 0x3c1   :  { %2267 = vst.msk [vmem:[#allocation2] sm:$0x1] %vm765_vm3, %v4383_v18  ;;  %3582 = vmatmul.mubr.msk.f32.vlgmr.msra.gmra.mrb[30].mxu0 %vm523_vm2, %v4383_v18  ;;  %3589 = vmatmul.mubr.msk.f32.vlgmr.msra.gmra.mrb[30].mxu1 %vm523_vm2, %v4383_v18  ;;  %v2768_v48 = vrot.slane %v4383_v18, 7 }
 0x3c2   :  { %v3826_v56 = vpop.eup %3825  ;;  %3753 = vmatpush3.bf16.msra.mxu0 %v4287_v29  ;;  %3595 = vmatprep.mubr.msk.f32.mxu0 %vm3848_vm0, %v3849_v8 }
 0x3c3   :  { %3757 = vmatprep.subr.bf16.mxu0 %v3847_v0  ;;  %3756 = vmatpush3.bf16.msra.mxu1 %v4289_v59  ;;  %v2516_v62 = vmul.f32 %v3826_v56, %v2515_v19 }
 0x3c4   :  { %3602 = vmatprep.mubr.msk.f32.mxu1 %vm3848_vm0, %v3849_v8  ;;  %3760 = vmatprep.subr.bf16.mxu1 %v3847_v0 }
 0x3c5   :  { %3596 = vmatmul.mubr.msk.f32.vlgmr.msra.gmra.mrb[32].mxu0 %vm523_vm2, %v4383_v18  ;;  %v2518_v50 = vadd.f32 %v2517_v20, %v2516_v62 }
 0x3c6   :  { %3759 = vmatpush3.bf16.msra.mxu0 %v4313_v2  ;;  %3609 = vmatprep.mubr.msk.f32.mxu0 %vm3848_vm0, %v3849_v8 }
 0x3c7   :  { %2519 = vst.msk [vmem:[#allocation3] sm:$0x2] %vm1018_vm4, %v2518_v50  ;;  %v4405_v29 = vrot.slane %v2518_v50, 1 }
 0x3c9   :  { %3603 = vmatmul.mubr.msk.f32.vlgmr.msra.gmra.mrb[32].mxu1 %vm523_vm2, %v4405_v29  ;;  %3610 = vmatmul.mubr.msk.f32.vlgmr.msra.gmra.mrb[34].mxu0 %vm523_vm2, %v4405_v29 }
 0x3ca   :  { %3762 = vmatpush3.bf16.msra.mxu1 %v4319_v3  ;;  %3616 = vmatprep.mubr.msk.f32.mxu1 %vm3848_vm0, %v3849_v8 }
 0x3cd   :  { %3617 = vmatmul.mubr.msk.f32.vlgmr.msra.gmra.mrb[34].mxu1 %vm523_vm2, %v4405_v29 }
 0x494   :  { %v2591_v0 = vpop.f32.mrb[30].mxu0  ;;  %v2663_v59 = vpop.f32.mrb[30].mxu1 }
 0x495   :  { %v2741_v2 = vrot.slane %v2591_v0, 7  ;;  %v2751_v23 = vrot.slane %v2663_v59, 7  ;;  %v3583_v24 = vpop.f32.mrb[31].mxu0  ;;  %v3590_v25 = vpop.f32.mrb[31].mxu1 }
 0x497   :  { %v2743_v26 = vadd.f32 %v2741_v2, %v4344_v16  ;;  %v2753_v27 = vadd.f32 %v2751_v23, %v4350_v21 }
 0x498   :  { %v2736_v30 = vpop.f32.mrb[32].mxu0 }
 0x499   :  { %v3173_v31 = vmul.f32 -1.442695, %v2743_v26  ;;  %v3174_v32 = vmul.f32 -1.442695, %v2753_v27  ;;  %v3597_v3 = vpop.f32.mrb[33].mxu0 }
 0x49b   :  { %3827 = vpow2.f32 %v3173_v31 }
 0x49c   :  { %3829 = vpow2.f32 %v3174_v32  ;;  %v2845_v8 = vpop.f32.mrb[32].mxu1  ;;  %v2917_v33 = vpop.f32.mrb[34].mxu0 }
 0x49d   :  { %v2994_v34 = vadd.f32 %v2845_v8, %v4356_v28  ;;  %v3604_v35 = vpop.f32.mrb[33].mxu1  ;;  %v3611_v36 = vpop.f32.mrb[35].mxu0  ;;  %v3001_v39 = vadd.f32 %v2917_v33, %v4362_v37  ;;  %v3171_v28 = vld [vmem:[%s4441_s4 + $0x2] sm:$0x1] }
 0x49e   :  { %v2737_v9 = vadd.f32 %v3171_v28, %v2736_v30 }
 0x49f   :  { %v3185_v38 = vmul.f32 -1.442695, %v2994_v34  ;;  %v3186_v41 = vmul.f32 -1.442695, %v3001_v39 }
 0x4a0   :  { %v2990_v40 = vpop.f32.mrb[34].mxu1  ;;  %v2761_v47 = vrot.slane %v2737_v9, 7 }
 0x4a1   :  { %3831 = vpow2.f32 %v3185_v38  ;;  %v3618_v16 = vpop.f32.mrb[35].mxu1  ;;  %v2991_v60 = vadd.f32 %v3183_v54, %v2990_v40 }
 0x4a2   :  { %3833 = vpow2.f32 %v3186_v41 }
 0x4a5   :  { %v3828_v21 = vpop.eup %3827 }
 0x4a6   :  { %v3830_v42 = vpop.eup %3829  ;;  %v2747_v43 = vadd.f32 1.0, %v3828_v21 }
 0x4a7   :  { %v2757_v44 = vadd.f32 1.0, %v3830_v42 }
 0x4a8   :  { %3835 = vrcp.f32 %v2747_v43 }
 0x4a9   :  { %3837 = vrcp.f32 %v2757_v44 }
 0x4ab   :  { %v3832_v45 = vpop.eup %3831 }
 0x4ac   :  { %v2998_v46 = vadd.f32 1.0, %v3832_v45  ;;  %v3834_v37 = vpop.eup %3833 }
 0x4ad   :  { %v3005_v58 = vadd.f32 1.0, %v3834_v37 }
 0x4ae   :  { %3839 = vrcp.f32 %v2998_v46 }
 0x4b2   :  { %v3836_v11 = vpop.eup %3835 }
 0x4b3   :  { %v3838_v51 = vpop.eup %3837  ;;  %v2763_v53 = vmul.f32 %v3836_v11, %v2761_v47 }
 0x4b4   :  { %v2770_v22 = vmul.f32 %v3838_v51, %v2768_v48  ;;  %v2766_v6 = vsub.f32 1.0, %v3838_v51 }
 0x4b5   :  { %v2764_v57 = vadd.f32 %v2763_v53, %v4374_v63 }
 0x4b7   :  { %3841 = vtanh.f32 %v2764_v57 }
 0x4b8   :  { %v3840_v1 = vpop.eup %3839  ;;  %3843 = vrcp.f32 %v3005_v58 }
 0x4b9   :  { %v3008_v61 = vmul.f32 %v3840_v1, %v2991_v60 }
 0x4bb   :  { %v3009_v5 = vadd.f32 %v3008_v61, %v4380_v13 }
 0x4bd   :  { %3845 = vtanh.f32 %v3009_v5 }
 0x4c1   :  { %v3842_v7 = vpop.eup %3841 }
 0x4c2   :  { %v2767_v4 = vmul.f32 %v3842_v7, %v2766_v6  ;;  %v3844_v14 = vpop.eup %3843 }
 0x4c3   :  { %v3011_v12 = vsub.f32 1.0, %v3844_v14  ;;  %v3014_v63 = vmul.f32 %v3844_v14, %v4405_v29 }
 0x4c4   :  { %v2771_v10 = vadd.f32 %v2770_v22, %v2767_v4 }
 0x4c6   :  { %2772 = vst.msk [vmem:[#allocation2] sm:$0x2] %vm1018_vm4, %v2771_v10 }
 0x4c7   :  { %v3846_v49 = vpop.eup %3845 }
 0x4c8   :  { %v3012_v55 = vmul.f32 %v3846_v49, %v3011_v12 }
 0x4ca   :  { %v3015_v52 = vadd.f32 %v3014_v63, %v3012_v55 }
 0x4cc   :  { %3016 = vst.msk [vmem:[#allocation3] sm:$0x1] %vm765_vm3, %v3015_v52 }
 0x4cd   :  { %v3017_v13 = vld [vmem:[#allocation2] sm:$0x3] }
 0x4d3   :  { %v3018_v15 = vld [vmem:[#allocation3] sm:$0x3] }
 0x4d4   :  { %3020 = vrot.lane.b32.xlu0 %v3018_v15, %s3850_s0 }
 0x546   :  { %v3021_v17 = vpop.permute.xlu0 %3020 }
 0x547   :  { %v3023_v18 = vsel %vm523_vm2, %v3017_v13, %v3021_v17 }
 0x548   :  { %3025 = vst.msk [vmem:[%s4442_s5] sm:$0x3] %vm3024_vm5, %v3023_v18 }

// kernel: mash_rnn.14
= control target key start
LH: loop header
LB: loop body
LE: loop exit
PB: predicated region body
PF: predicated region fallthrough
CT: control target
= control target key end

     0   :  { %v5189_v0 = vmov 0.0|0.0   ;;  %vm5190_vm0 = vmmov 0   ;;  %v5191_v8 = vmov 0.0   ;;  %vm32_vm1 = vcmask 261120   ;;  %s5192_s21 = smov 16   ;;  %s5899_s1 = inlined_call_operand.vmem [shape: f32[12,32,16], index: 1, kind: input, shape index: {}]   ;;  %s5900_s0 = inlined_call_operand.vmem [shape: f32[6,32], index: 0, kind: input, shape index: {}]   ;;  %s5901_s2 = inlined_call_operand.vmem [shape: f32[12,16,16], index: 2, kind: input, shape index: {}]   ;;  %s5902_s3 = inlined_call_operand.vmem [shape: f32[12,1,16], index: 3, kind: input, shape index: {}]   ;;  %s5903_s4 = inlined_call_operand.vmem [shape: f32[4,1,16], index: 4, kind: input, shape index: {}]   ;;  %s5904_s5 = inlined_call_operand.vmem [shape: f32[6,32], index: 5, kind: output, shape index: {}]  }
   0x1   :  { %4885 = vmatprep.subr.bf16.mxu0 %v5189_v0  ;;  %4891 = vmatprep.subr.bf16.mxu1 %v5189_v0  ;;  %v21_v1 = vld [vmem:[%s5899_s1] sm:$0xff]  ;;  %v22_v2 = vld [vmem:[%s5899_s1 + $0x8] sm:$0xff]  ;;  %v23_v6 = vld [vmem:[%s5899_s1 + $0x10] sm:$0xff]  ;;  %vm523_vm2 = vcmask 130048   ;;  %vm771_vm3 = vcmask 123904   ;;  %vm1030_vm4 = vcmask 128004  }
   0x2   :  { %v4121_v3 = vld [vmem:[%s5899_s1 + $0x20] sm:$0xff]  ;;  %v4886_v4 = vpack.c.bf16 %v22_v2, %v21_v1  ;;  %v4122_v5 = vld [vmem:[%s5899_s1 + $0x28] sm:$0xff]  ;;  %v24_v7 = vld [vmem:[%s5899_s1 + $0x18] sm:$0xff]  ;;  %4520 = vmatprep.mubr.msk.f32.mxu1 %vm5190_vm0, %v5191_v8  ;;  %4509 = vmatprep.mubr.msk.f32.mxu0 %vm5190_vm0, %v5191_v8  ;;  %vm1290_vm5 = vcmask 125954   ;;  %vm4113_vm6 = vcmask 259072  }
   0x3   :  { %v4892_v9 = vpack.c.bf16 %v4122_v5, %v4121_v3  ;;  %v4123_v10 = vld [vmem:[%s5899_s1 + $0x30] sm:$0xff]  ;;  %v4124_v11 = vld [vmem:[%s5899_s1 + $0x38] sm:$0xff]  ;;  %v4889_v12 = vpack.c.bf16 %v24_v7, %v23_v6  ;;  %v4128_v14 = vld [vmem:[%s5899_s1 + $0x40] sm:$0xff] }
   0x4   :  { %4887 = vmatpush3.bf16.msra.mxu0 %v4886_v4  ;;  %v4895_v13 = vpack.c.bf16 %v4124_v11, %v4123_v10  ;;  %v4129_v15 = vld [vmem:[%s5899_s1 + $0x48] sm:$0xff]  ;;  %v4135_v16 = vld [vmem:[%s5899_s1 + $0x60] sm:$0xff]  ;;  %v4130_v21 = vld [vmem:[%s5899_s1 + $0x50] sm:$0xff] }
   0x5   :  { %4893 = vmatpush3.bf16.msra.mxu1 %v4892_v9  ;;  %4888 = vmatprep.subr.bf16.mxu0 %v5189_v0  ;;  %v4136_v17 = vld [vmem:[%s5899_s1 + $0x68] sm:$0xff]  ;;  %v20_v18 = vld [vmem:[%s5900_s0] sm:$0x3f]  ;;  %v4898_v19 = vpack.c.bf16 %v4129_v15, %v4128_v14  ;;  %v4131_v22 = vld [vmem:[%s5899_s1 + $0x58] sm:$0xff] }
   0x6   :  { %4894 = vmatprep.subr.bf16.mxu1 %v5189_v0  ;;  %v4904_v20 = vpack.c.bf16 %v4136_v17, %v4135_v16  ;;  %v4137_v23 = vld [vmem:[%s5899_s1 + $0x70] sm:$0xff]  ;;  %v4138_v24 = vld [vmem:[%s5899_s1 + $0x78] sm:$0xff]  ;;  %v4901_v25 = vpack.c.bf16 %v4131_v22, %v4130_v21  ;;  %v4142_v27 = vld [vmem:[%s5899_s1 + $0x80] sm:$0xff] }
   0x7   :  { %v4907_v26 = vpack.c.bf16 %v4138_v24, %v4137_v23  ;;  %v4143_v28 = vld [vmem:[%s5899_s1 + $0x88] sm:$0xff]  ;;  %v4149_v29 = vld [vmem:[%s5899_s1 + $0xa0] sm:$0xff]  ;;  %v4144_v33 = vld [vmem:[%s5899_s1 + $0x90] sm:$0xff] }
   0x8   :  { %4890 = vmatpush3.bf16.msra.mxu0 %v4889_v12  ;;  %v4150_v30 = vld [vmem:[%s5899_s1 + $0xa8] sm:$0xff]  ;;  %v4910_v31 = vpack.c.bf16 %v4143_v28, %v4142_v27  ;;  %v4145_v34 = vld [vmem:[%s5899_s1 + $0x98] sm:$0xff]  ;;  %v4151_v35 = vld [vmem:[%s5899_s1 + $0xb0] sm:$0xff] }
   0x9   :  { %4896 = vmatpush3.bf16.msra.mxu1 %v4895_v13  ;;  %4897 = vmatprep.subr.bf16.mxu0 %v5189_v0  ;;  %v4916_v32 = vpack.c.bf16 %v4150_v30, %v4149_v29  ;;  %v4152_v36 = vld [vmem:[%s5899_s1 + $0xb8] sm:$0xff]  ;;  %v4913_v37 = vpack.c.bf16 %v4145_v34, %v4144_v33  ;;  %v521_v39 = vld [vmem:[%s5901_s2] sm:$0xff]  ;;  %v522_v40 = vld [vmem:[%s5901_s2 + $0x8] sm:$0xff] }
   0xa   :  { %4903 = vmatprep.subr.bf16.mxu1 %v5189_v0  ;;  %v4919_v38 = vpack.c.bf16 %v4152_v36, %v4151_v35  ;;  %v4156_v41 = vld [vmem:[%s5901_s2 + $0x10] sm:$0xff]  ;;  %v4157_v42 = vld [vmem:[%s5901_s2 + $0x18] sm:$0xff]  ;;  %v5338_v43 = vpack.c.bf16 %v522_v40, %v521_v39  ;;  %v4158_v45 = vld [vmem:[%s5901_s2 + $0x20] sm:$0xff] }
   0xb   :  { %4510 = vmatmul.mubr.msk.f32.vlgmr.msra.gmra.mrb[0].mxu0 %vm32_vm1, %v20_v18  ;;  %v5341_v44 = vpack.c.bf16 %v4157_v42, %v4156_v41  ;;  %v4159_v46 = vld [vmem:[%s5901_s2 + $0x28] sm:$0xff]  ;;  %v4163_v47 = vld [vmem:[%s5901_s2 + $0x30] sm:$0xff]  ;;  %v4164_v48 = vld [vmem:[%s5901_s2 + $0x38] sm:$0xff] }
   0xc   :  { %4521 = vmatmul.mubr.msk.f32.vlgmr.msra.gmra.mrb[0].mxu1 %vm32_vm1, %v20_v18  ;;  %4899 = vmatpush3.bf16.msra.mxu0 %v4898_v19  ;;  %v5359_v49 = vpack.c.bf16 %v4159_v46, %v4158_v45  ;;  %v5364_v50 = vpack.c.bf16 %v4164_v48, %v4163_v47  ;;  %v4165_v51 = vld [vmem:[%s5901_s2 + $0x40] sm:$0xff]  ;;  %v4166_v52 = vld [vmem:[%s5901_s2 + $0x48] sm:$0xff]  ;;  %v4167_v53 = vld [vmem:[%s5901_s2 + $0x50] sm:$0xff] }
   0xd   :  { %4905 = vmatpush3.bf16.msra.mxu1 %v4904_v20  ;;  %4900 = vmatprep.subr.bf16.mxu0 %v5189_v0  ;;  %v4168_v54 = vld [vmem:[%s5901_s2 + $0x58] sm:$0xff]  ;;  %v5385_v55 = vpack.c.bf16 %v4166_v52, %v4165_v51  ;;  %v4119_v2 = vld [vmem:[%s5902_s3] ss:$0 sm:$0xff]  ;;  %v4126_v6 = vld [vmem:[%s5902_s3 + $0x1] ss:$0 sm:$0xff] }
   0xe   :  { %4906 = vmatprep.subr.bf16.mxu1 %v5189_v0  ;;  %4542 = vmatprep.mubr.msk.f32.mxu1 %vm5190_vm0, %v5191_v8  ;;  %v5390_v56 = vpack.c.bf16 %v4168_v54, %v4167_v53  ;;  %v4140_v16 = vld [vmem:[%s5902_s3 + $0x3] ss:$0 sm:$0xff]  ;;  %v4147_v23 = vld [vmem:[%s5902_s3 + $0x4] ss:$0 sm:$0xff]  ;;  %v5443_v42 = vld [vmem:[%s5903_s4] ss:$0 sm:$0xff] }
   0xf   :  { %4531 = vmatprep.mubr.msk.f32.mxu0 %vm5190_vm0, %v5191_v8  ;;  %v5448_v46 = vld [vmem:[%s5903_s4 + $0x1] ss:$0 sm:$0xff]  ;;  %v4133_v47 = vld [vmem:[%s5902_s3 + $0x2] ss:$0 sm:$0xff] }
  0x10   :  { %4902 = vmatpush3.bf16.msra.mxu0 %v4901_v25 }
  0x11   :  { %4908 = vmatpush3.bf16.msra.mxu1 %v4907_v26  ;;  %4909 = vmatprep.subr.bf16.mxu0 %v5189_v0 }
  0x12   :  { %4915 = vmatprep.subr.bf16.mxu1 %v5189_v0 }
  0x13   :  { %4532 = vmatmul.mubr.msk.f32.vlgmr.msra.gmra.mrb[2].mxu0 %vm32_vm1, %v20_v18 }
  0x14   :  { %4543 = vmatmul.mubr.msk.f32.vlgmr.msra.gmra.mrb[2].mxu1 %vm32_vm1, %v20_v18  ;;  %4911 = vmatpush3.bf16.msra.mxu0 %v4910_v31 }
  0x15   :  { %4917 = vmatpush3.bf16.msra.mxu1 %v4916_v32  ;;  %4912 = vmatprep.subr.bf16.mxu0 %v5189_v0 }
  0x16   :  { %4918 = vmatprep.subr.bf16.mxu1 %v5189_v0  ;;  %4553 = vmatprep.mubr.msk.f32.mxu0 %vm5190_vm0, %v5191_v8 }
  0x17   :  { %4564 = vmatprep.mubr.msk.f32.mxu1 %vm5190_vm0, %v5191_v8 }
  0x18   :  { %4914 = vmatpush3.bf16.msra.mxu0 %v4913_v37 }
  0x19   :  { %4920 = vmatpush3.bf16.msra.mxu1 %v4919_v38  ;;  %4921 = vmatprep.subr.bf16.mxu0 %v5189_v0 }
  0x1a   :  { %4924 = vmatprep.subr.bf16.mxu1 %v5189_v0 }
  0x1b   :  { %4554 = vmatmul.mubr.msk.f32.vlgmr.msra.gmra.mrb[4].mxu0 %vm32_vm1, %v20_v18 }
  0x1c   :  { %4565 = vmatmul.mubr.msk.f32.vlgmr.msra.gmra.mrb[4].mxu1 %vm32_vm1, %v20_v18  ;;  %4923 = vmatpush3.bf16.msra.mxu0 %v5338_v43 }
  0x1d   :  { %4926 = vmatpush3.bf16.msra.mxu1 %v5341_v44  ;;  %4571 = vmatprep.mubr.msk.f32.mxu0 %vm5190_vm0, %v5191_v8 }
  0x1e   :  { %4578 = vmatprep.mubr.msk.f32.mxu1 %vm5190_vm0, %v5191_v8  ;;  %4927 = vmatprep.subr.bf16.mxu0 %v5189_v0 }
  0x1f   :  { %4572 = vmatmul.mubr.f32.vlgmr.msra.gmra.mrb[6].mxu0 %v5191_v8  ;;  %4930 = vmatprep.subr.bf16.mxu1 %v5189_v0 }
  0x20   :  { %4579 = vmatmul.mubr.f32.vlgmr.msra.gmra.mrb[6].mxu1 %v5191_v8  ;;  %4929 = vmatpush3.bf16.msra.mxu0 %v5359_v49 }
  0x21   :  { %4932 = vmatpush3.bf16.msra.mxu1 %v5364_v50  ;;  %4585 = vmatprep.mubr.msk.f32.mxu0 %vm5190_vm0, %v5191_v8 }
  0x22   :  { %4592 = vmatprep.mubr.msk.f32.mxu1 %vm5190_vm0, %v5191_v8  ;;  %4933 = vmatprep.subr.bf16.mxu0 %v5189_v0 }
  0x23   :  { %4586 = vmatmul.mubr.f32.vlgmr.msra.gmra.mrb[8].mxu0 %v5191_v8  ;;  %4936 = vmatprep.subr.bf16.mxu1 %v5189_v0 }
  0x24   :  { %4593 = vmatmul.mubr.f32.vlgmr.msra.gmra.mrb[8].mxu1 %v5191_v8  ;;  %4935 = vmatpush3.bf16.msra.mxu0 %v5385_v55 }
  0x25   :  { %4599 = vmatprep.mubr.msk.f32.mxu0 %vm5190_vm0, %v5191_v8  ;;  %4938 = vmatpush3.bf16.msra.mxu1 %v5390_v56 }
  0x26   :  { %4606 = vmatprep.mubr.msk.f32.mxu1 %vm5190_vm0, %v5191_v8  ;;  %4939 = vmatprep.subr.bf16.mxu0 %v5189_v0 }
  0x27   :  { %4600 = vmatmul.mubr.f32.vlgmr.msra.gmra.mrb[10].mxu0 %v5191_v8  ;;  %4942 = vmatprep.subr.bf16.mxu1 %v5189_v0 }
  0x28   :  { %4607 = vmatmul.mubr.f32.vlgmr.msra.gmra.mrb[10].mxu1 %v5191_v8  ;;  %4941 = vmatpush3.bf16.msra.mxu0 %v5338_v43 }
  0x29   :  { %4944 = vmatpush3.bf16.msra.mxu1 %v5341_v44  ;;  %4613 = vmatprep.mubr.msk.f32.mxu0 %vm5190_vm0, %v5191_v8 }
  0x2a   :  { %4620 = vmatprep.mubr.msk.f32.mxu1 %vm5190_vm0, %v5191_v8  ;;  %4945 = vmatprep.subr.bf16.mxu0 %v5189_v0 }
  0x2b   :  { %4948 = vmatprep.subr.bf16.mxu1 %v5189_v0 }
  0xde   :  { %v102_v57 = vpop.f32.mrb[0].mxu0 }
  0xdf   :  { %v185_v58 = vpop.f32.mrb[0].mxu1  ;;  %v4511_v59 = vpop.f32.mrb[1].mxu0  ;;  %v5422_v9 = vadd.f32 %v4119_v2, %v102_v57 }
  0xe0   :  { %v4522_v60 = vpop.f32.mrb[1].mxu1  ;;  %v5424_v11 = vadd.f32 %v4126_v6, %v185_v58 }
  0xe6   :  { %v268_v61 = vpop.f32.mrb[2].mxu0 }
  0xe7   :  { %v351_v62 = vpop.f32.mrb[2].mxu1  ;;  %v4533_v63 = vpop.f32.mrb[3].mxu0  ;;  %v5455_v54 = vadd.f32 %v4133_v47, %v268_v61 }
  0xe8   :  { %v4544_v1 = vpop.f32.mrb[3].mxu1  ;;  %v5431_v22 = vadd.f32 %v4140_v16, %v351_v62  ;;  %v4154_v62 = vld [vmem:[%s5902_s3 + $0x5] ss:$0 sm:$0xff] }
  0xee   :  { %v434_v3 = vpop.f32.mrb[4].mxu0 }
  0xef   :  { %v517_v4 = vpop.f32.mrb[4].mxu1  ;;  %v4555_v5 = vpop.f32.mrb[5].mxu0  ;;  %v5437_v29 = vadd.f32 %v4147_v23, %v434_v3 }
  0xf0   :  { %v4566_v7 = vpop.f32.mrb[5].mxu1  ;;  %v5461_v1 = vadd.f32 %v4154_v62, %v517_v4 }
  0xf2   :  { %v593_v10 = vpop.f32.mrb[6].mxu0 }
  0xf3   :  { %v750_v12 = vadd.f32 %v593_v10, %v5422_v9  ;;  %v666_v13 = vpop.f32.mrb[6].mxu1  ;;  %v4573_v14 = vpop.f32.mrb[7].mxu0 }
  0xf4   :  { %v4580_v15 = vpop.f32.mrb[7].mxu1  ;;  %v757_v18 = vadd.f32 %v666_v13, %v5424_v11 }
  0xf5   :  { %v4161_v17 = vmul.f32 -1.442695, %v750_v12 }
  0xf6   :  { %v746_v19 = vpop.f32.mrb[8].mxu0  ;;  %v4162_v26 = vmul.f32 -1.442695, %v757_v18 }
  0xf7   :  { %5069 = vpow2.f32 %v4161_v17  ;;  %v842_v20 = vpop.f32.mrb[8].mxu1  ;;  %v4587_v21 = vpop.f32.mrb[9].mxu0  ;;  %v747_v48 = vadd.f32 %v5443_v42, %v746_v19 }
  0xf8   :  { %v1001_v24 = vrot.slane %v842_v20, 4  ;;  %v4594_v25 = vpop.f32.mrb[9].mxu1  ;;  %5071 = vpow2.f32 %v4162_v26 }
  0xfa   :  { %v1003_v27 = vadd.f32 %v1001_v24, %v5431_v22  ;;  %v915_v28 = vpop.f32.mrb[10].mxu0 }
  0xfb   :  { %v1011_v30 = vrot.slane %v915_v28, 4  ;;  %v4601_v31 = vpop.f32.mrb[11].mxu0  ;;  %v996_v32 = vpop.f32.mrb[10].mxu1 }
  0xfc   :  { %v4171_v33 = vmul.f32 -1.442695, %v1003_v27  ;;  %v4608_v34 = vpop.f32.mrb[11].mxu1  ;;  %v997_v52 = vadd.f32 %v5448_v46, %v996_v32 }
  0xfd   :  { %v1013_v35 = vadd.f32 %v1011_v30, %v5437_v29 }
  0xfe   :  { %5073 = vpow2.f32 %v4171_v33  ;;  %v1021_v60 = vrot.slane %v997_v52, 4 }
  0xff   :  { %v4172_v37 = vmul.f32 -1.442695, %v1013_v35 }
 0x101   :  { %v5070_v36 = vpop.eup %5069 }
 0x102   :  { %v754_v38 = vadd.f32 1.0, %v5070_v36  ;;  %v5072_v39 = vpop.eup %5071 }
 0x103   :  { %v761_v45 = vadd.f32 1.0, %v5072_v39 }
 0x104   :  { %5075 = vrcp.f32 %v754_v38 }
 0x105   :  { %5077 = vpow2.f32 %v4172_v37 }
 0x108   :  { %v5074_v40 = vpop.eup %5073 }
 0x109   :  { %v1007_v41 = vadd.f32 1.0, %v5074_v40 }
 0x10b   :  { %5079 = vrcp.f32 %v1007_v41 }
 0x10c   :  { %5081 = vrcp.f32 %v761_v45 }
 0x10e   :  { %v5076_v51 = vpop.eup %5075 }
 0x10f   :  { %v5078_v53 = vpop.eup %5077  ;;  %v764_v57 = vmul.f32 %v5076_v51, %v747_v48 }
 0x110   :  { %v1017_v59 = vadd.f32 1.0, %v5078_v53 }
 0x111   :  { %v765_v58 = vadd.f32 %v764_v57, %v5455_v54 }
 0x113   :  { %5083 = vtanh.f32 %v765_v58 }
 0x114   :  { %5085 = vrcp.f32 %v1017_v59 }
 0x115   :  { %v5080_v63 = vpop.eup %5079 }
 0x116   :  { %v1023_v2 = vmul.f32 %v5080_v63, %v1021_v60  ;;  %v5082_v61 = vpop.eup %5081 }
 0x117   :  { %v767_v5 = vsub.f32 1.0, %v5082_v61  ;;  %v769_v10 = vmul.f32 0.0, %v5082_v61 }
 0x118   :  { %v1024_v3 = vadd.f32 %v1023_v2, %v5461_v1 }
 0x11a   :  { %5087 = vtanh.f32 %v1024_v3 }
 0x11d   :  { %v5084_v6 = vpop.eup %5083 }
 0x11e   :  { %v768_v7 = vmul.f32 %v5084_v6, %v767_v5  ;;  %v5086_v12 = vpop.eup %5085 }
 0x11f   :  { %v1026_v4 = vsub.f32 1.0, %v5086_v12  ;;  %v1028_v15 = vmul.f32 0.0, %v5086_v12 }
 0x120   :  { %v5464_v13 = vadd.f32 %v769_v10, %v768_v7 }
 0x122   :  { %4614 = vmatmul.mubr.msk.f32.vlgmr.msra.gmra.mrb[12].mxu0 %vm523_vm2, %v5464_v13  ;;  %4621 = vmatmul.mubr.msk.f32.vlgmr.msra.gmra.mrb[12].mxu1 %vm523_vm2, %v5464_v13  ;;  %772 = vst.msk [vmem:[#allocation2] sm:$0x3] %vm771_vm3, %v5464_v13  ;;  %v1286_v2 = vrot.slane %v5464_v13, 6 }
 0x123   :  { %4947 = vmatpush3.bf16.msra.mxu0 %v5359_v49  ;;  %4627 = vmatprep.mubr.msk.f32.mxu0 %vm5190_vm0, %v5191_v8 }
 0x124   :  { %v5088_v14 = vpop.eup %5087  ;;  %4951 = vmatprep.subr.bf16.mxu0 %v5189_v0  ;;  %4950 = vmatpush3.bf16.msra.mxu1 %v5364_v50 }
 0x125   :  { %v1027_v16 = vmul.f32 %v5088_v14, %v1026_v4  ;;  %4634 = vmatprep.mubr.msk.f32.mxu1 %vm5190_vm0, %v5191_v8  ;;  %4954 = vmatprep.subr.bf16.mxu1 %v5189_v0 }
 0x126   :  { %4628 = vmatmul.mubr.msk.f32.vlgmr.msra.gmra.mrb[14].mxu0 %vm523_vm2, %v5464_v13 }
 0x127   :  { %4953 = vmatpush3.bf16.msra.mxu0 %v5385_v55  ;;  %4641 = vmatprep.mubr.msk.f32.mxu0 %vm5190_vm0, %v5191_v8  ;;  %v5485_v17 = vadd.f32 %v1028_v15, %v1027_v16 }
 0x128   :  { %4957 = vmatprep.subr.bf16.mxu0 %v5189_v0 }
 0x129   :  { %1031 = vst.msk [vmem:[#allocation3] sm:$0x30] %vm1030_vm4, %v5485_v17  ;;  %v1295_v18 = vrot.slane %v5485_v17, 4  ;;  %v1547_v4 = vrot.slane %v5485_v17, 2 }
 0x12b   :  { %4635 = vmatmul.mubr.msk.f32.vlgmr.msra.gmra.mrb[14].mxu1 %vm523_vm2, %v1295_v18  ;;  %4642 = vmatmul.mubr.msk.f32.vlgmr.msra.gmra.mrb[16].mxu0 %vm523_vm2, %v1295_v18 }
 0x12c   :  { %4956 = vmatpush3.bf16.msra.mxu1 %v5390_v56  ;;  %4648 = vmatprep.mubr.msk.f32.mxu1 %vm5190_vm0, %v5191_v8 }
 0x12d   :  { %4960 = vmatprep.subr.bf16.mxu1 %v5189_v0  ;;  %4959 = vmatpush3.bf16.msra.mxu0 %v5338_v43 }
 0x12e   :  { %4655 = vmatprep.mubr.msk.f32.mxu0 %vm5190_vm0, %v5191_v8  ;;  %4963 = vmatprep.subr.bf16.mxu0 %v5189_v0 }
 0x12f   :  { %4649 = vmatmul.mubr.msk.f32.vlgmr.msra.gmra.mrb[16].mxu1 %vm523_vm2, %v1295_v18 }
 0x130   :  { %4962 = vmatpush3.bf16.msra.mxu1 %v5341_v44  ;;  %4662 = vmatprep.mubr.msk.f32.mxu1 %vm5190_vm0, %v5191_v8 }
 0x131   :  { %4966 = vmatprep.subr.bf16.mxu1 %v5189_v0 }
 0x1f5   :  { %v1103_v19 = vpop.f32.mrb[12].mxu0  ;;  %v1175_v20 = vpop.f32.mrb[12].mxu1 }
 0x1f6   :  { %v1259_v21 = vrot.slane %v1103_v19, 6  ;;  %v1269_v23 = vrot.slane %v1175_v20, 6  ;;  %v4615_v24 = vpop.f32.mrb[13].mxu0  ;;  %v4622_v43 = vpop.f32.mrb[13].mxu1 }
 0x1f8   :  { %v1261_v25 = vadd.f32 %v1259_v21, %v5422_v9  ;;  %v1271_v26 = vadd.f32 %v1269_v23, %v5424_v11 }
 0x1f9   :  { %v1254_v27 = vpop.f32.mrb[14].mxu0 }
 0x1fa   :  { %v4181_v28 = vmul.f32 -1.442695, %v1261_v25  ;;  %v4182_v30 = vmul.f32 -1.442695, %v1271_v26  ;;  %v4629_v31 = vpop.f32.mrb[15].mxu0  ;;  %v1255_v53 = vadd.f32 %v5443_v42, %v1254_v27  ;;  %v4227_v27 = vld [vmem:[%s5899_s1 + $0xe8] sm:$0xff] }
 0x1fc   :  { %5089 = vpow2.f32 %v4181_v28  ;;  %v1279_v62 = vrot.slane %v1255_v53, 6  ;;  %v4221_v28 = vld [vmem:[%s5899_s1 + $0xd0] sm:$0xff] }
 0x1fd   :  { %5091 = vpow2.f32 %v4182_v30  ;;  %v4222_v30 = vld [vmem:[%s5899_s1 + $0xd8] sm:$0xff] }
 0x1fe   :  { %v1364_v44 = vpop.f32.mrb[14].mxu1  ;;  %v1436_v32 = vpop.f32.mrb[16].mxu0 }
 0x1ff   :  { %v1520_v33 = vrot.slane %v1364_v44, 6  ;;  %v1530_v34 = vrot.slane %v1436_v32, 6  ;;  %v4636_v35 = vpop.f32.mrb[15].mxu1  ;;  %v4643_v36 = vpop.f32.mrb[17].mxu0  ;;  %v4228_v44 = vld [vmem:[%s5899_s1 + $0xf0] sm:$0xff]  ;;  %v4229_v32 = vld [vmem:[%s5899_s1 + $0xf8] sm:$0xff] }
 0x201   :  { %v1522_v37 = vadd.f32 %v1520_v33, %v5431_v22  ;;  %v1532_v38 = vadd.f32 %v1530_v34, %v5437_v29  ;;  %v4979_v33 = vpack.c.bf16 %v4222_v30, %v4221_v28  ;;  %v4985_v34 = vpack.c.bf16 %v4229_v32, %v4228_v44  ;;  %v4234_v28 = vld [vmem:[%s5899_s1 + $0x108] sm:$0xff]  ;;  %v4235_v32 = vld [vmem:[%s5899_s1 + $0x110] sm:$0xff] }
 0x202   :  { %v1515_v39 = vpop.f32.mrb[16].mxu1  ;;  %v4241_v30 = vld [vmem:[%s5899_s1 + $0x128] sm:$0xff] }
 0x203   :  { %v4194_v40 = vmul.f32 -1.442695, %v1522_v37  ;;  %v4195_v41 = vmul.f32 -1.442695, %v1532_v38  ;;  %v4650_v45 = vpop.f32.mrb[17].mxu1  ;;  %v1516_v7 = vadd.f32 %v5448_v46, %v1515_v39 }
 0x205   :  { %5093 = vpow2.f32 %v4194_v40  ;;  %v1540_v10 = vrot.slane %v1516_v7, 6 }
 0x206   :  { %v5090_v47 = vpop.eup %5089  ;;  %5095 = vpow2.f32 %v4195_v41 }
 0x207   :  { %v5092_v48 = vpop.eup %5091  ;;  %v1265_v51 = vadd.f32 1.0, %v5090_v47 }
 0x208   :  { %v1275_v52 = vadd.f32 1.0, %v5092_v48 }
 0x209   :  { %5097 = vrcp.f32 %v1265_v51 }
 0x20a   :  { %5099 = vrcp.f32 %v1275_v52 }
 0x20f   :  { %v5094_v57 = vpop.eup %5093 }
 0x210   :  { %v5096_v58 = vpop.eup %5095  ;;  %v1526_v59 = vadd.f32 1.0, %v5094_v57 }
 0x211   :  { %v1536_v60 = vadd.f32 1.0, %v5096_v58 }
 0x212   :  { %5101 = vrcp.f32 %v1526_v59 }
 0x213   :  { %v5098_v63 = vpop.eup %5097  ;;  %5103 = vrcp.f32 %v1536_v60 }
 0x214   :  { %v5100_v3 = vpop.eup %5099  ;;  %v1281_v61 = vmul.f32 %v5098_v63, %v1279_v62 }
 0x215   :  { %v1288_v5 = vmul.f32 %v5100_v3, %v1286_v2  ;;  %v1284_v19 = vsub.f32 1.0, %v5100_v3 }
 0x216   :  { %v1282_v6 = vadd.f32 %v1281_v61, %v5455_v54 }
 0x218   :  { %5105 = vtanh.f32 %v1282_v6 }
 0x21c   :  { %v5102_v12 = vpop.eup %5101 }
 0x21d   :  { %v5104_v14 = vpop.eup %5103  ;;  %v1542_v15 = vmul.f32 %v5102_v12, %v1540_v10 }
 0x21e   :  { %v1549_v16 = vmul.f32 %v5104_v14, %v1547_v4  ;;  %v1545_v17 = vsub.f32 1.0, %v5104_v14 }
 0x21f   :  { %v1543_v18 = vadd.f32 %v1542_v15, %v5461_v1 }
 0x221   :  { %5107 = vtanh.f32 %v1543_v18 }
 0x222   :  { %v5106_v13 = vpop.eup %5105 }
 0x223   :  { %v1285_v20 = vmul.f32 %v5106_v13, %v1284_v19 }
 0x225   :  { %v5516_v21 = vadd.f32 %v1288_v5, %v1285_v20 }
 0x227   :  { %v1555_v23 = vrot.slane %v5516_v21, 2  ;;  %1291 = vst.msk [vmem:[#allocation2] sm:$0xc] %vm1290_vm5, %v5516_v21  ;;  %v1807_v14 = vrot.slane %v5516_v21, 6 }
 0x229   :  { %4656 = vmatmul.mubr.msk.f32.vlgmr.msra.gmra.mrb[18].mxu0 %vm523_vm2, %v1555_v23  ;;  %4663 = vmatmul.mubr.msk.f32.vlgmr.msra.gmra.mrb[18].mxu1 %vm523_vm2, %v1555_v23 }
 0x22a   :  { %4965 = vmatpush3.bf16.msra.mxu0 %v5359_v49  ;;  %4669 = vmatprep.mubr.msk.f32.mxu0 %vm5190_vm0, %v5191_v8 }
 0x22b   :  { %v5108_v24 = vpop.eup %5107  ;;  %4969 = vmatprep.subr.bf16.mxu0 %v5189_v0  ;;  %4968 = vmatpush3.bf16.msra.mxu1 %v5364_v50  ;;  %v4219_v50 = vld [vmem:[%s5899_s1 + $0xc0] sm:$0xff] }
 0x22c   :  { %4676 = vmatprep.mubr.msk.f32.mxu1 %vm5190_vm0, %v5191_v8  ;;  %v1546_v43 = vmul.f32 %v5108_v24, %v1545_v17  ;;  %4972 = vmatprep.subr.bf16.mxu1 %v5189_v0 }
 0x22d   :  { %4670 = vmatmul.mubr.msk.f32.vlgmr.msra.gmra.mrb[20].mxu0 %vm523_vm2, %v1555_v23 }
 0x22e   :  { %4971 = vmatpush3.bf16.msra.mxu0 %v5385_v55  ;;  %4683 = vmatprep.mubr.msk.f32.mxu0 %vm5190_vm0, %v5191_v8  ;;  %v1550_v49 = vadd.f32 %v1549_v16, %v1546_v43  ;;  %v4220_v55 = vld [vmem:[%s5899_s1 + $0xc8] sm:$0xff] }
 0x22f   :  { %4975 = vmatprep.subr.bf16.mxu0 %v5189_v0  ;;  %v4976_v26 = vpack.c.bf16 %v4220_v55, %v4219_v50 }
 0x230   :  { %1551 = vst.msk [vmem:[#allocation3] sm:$0xc] %vm1290_vm5, %v1550_v49  ;;  %v5537_v25 = vrot.slane %v1550_v49, 2 }
 0x232   :  { %4677 = vmatmul.mubr.msk.f32.vlgmr.msra.gmra.mrb[20].mxu1 %vm523_vm2, %v5537_v25  ;;  %4684 = vmatmul.mubr.msk.f32.vlgmr.msra.gmra.mrb[22].mxu0 %vm523_vm2, %v5537_v25 }
 0x233   :  { %4974 = vmatpush3.bf16.msra.mxu1 %v5390_v56  ;;  %4690 = vmatprep.mubr.msk.f32.mxu1 %vm5190_vm0, %v5191_v8  ;;  %v4226_v56 = vld [vmem:[%s5899_s1 + $0xe0] sm:$0xff] }
 0x234   :  { %4981 = vmatprep.subr.bf16.mxu1 %v5189_v0  ;;  %4701 = vmatprep.mubr.msk.f32.mxu0 %vm5190_vm0, %v5191_v8  ;;  %v4982_v31 = vpack.c.bf16 %v4227_v27, %v4226_v56 }
 0x235   :  { %4977 = vmatpush3.bf16.msra.mxu0 %v4976_v26 }
 0x236   :  { %4691 = vmatmul.mubr.msk.f32.vlgmr.msra.gmra.mrb[22].mxu1 %vm523_vm2, %v5537_v25  ;;  %4978 = vmatprep.subr.bf16.mxu0 %v5189_v0 }
 0x237   :  { %4712 = vmatprep.mubr.msk.f32.mxu1 %vm5190_vm0, %v5191_v8  ;;  %4983 = vmatpush3.bf16.msra.mxu1 %v4982_v31 }
 0x238   :  { %4984 = vmatprep.subr.bf16.mxu1 %v5189_v0 }
 0x239   :  { %4980 = vmatpush3.bf16.msra.mxu0 %v4979_v33  ;;  %v4236_v33 = vld [vmem:[%s5899_s1 + $0x118] sm:$0xff] }
 0x23a   :  { %4987 = vmatprep.subr.bf16.mxu0 %v5189_v0 }
 0x23b   :  { %4986 = vmatpush3.bf16.msra.mxu1 %v4985_v34 }
 0x23c   :  { %4993 = vmatprep.subr.bf16.mxu1 %v5189_v0 }
 0x2fc   :  { %v1624_v35 = vpop.f32.mrb[18].mxu0  ;;  %v1696_v36 = vpop.f32.mrb[18].mxu1 }
 0x2fd   :  { %v1780_v37 = vrot.slane %v1624_v35, 4  ;;  %v1790_v38 = vrot.slane %v1696_v36, 4  ;;  %v4657_v39 = vpop.f32.mrb[19].mxu0  ;;  %v4664_v40 = vpop.f32.mrb[19].mxu1  ;;  %v4242_v36 = vld [vmem:[%s5899_s1 + $0x130] sm:$0xff] }
 0x2fe   :  { %v4991_v39 = vpack.c.bf16 %v4236_v33, %v4235_v32 }
 0x2ff   :  { %v1782_v41 = vadd.f32 %v1780_v37, %v5422_v9  ;;  %v1792_v45 = vadd.f32 %v1790_v38, %v5424_v11  ;;  %v4243_v37 = vld [vmem:[%s5899_s1 + $0x138] sm:$0xff] }
 0x300   :  { %v1775_v47 = vpop.f32.mrb[20].mxu0  ;;  %v4997_v40 = vpack.c.bf16 %v4243_v37, %v4242_v36 }
 0x301   :  { %v4204_v48 = vmul.f32 -1.442695, %v1782_v41  ;;  %v4205_v51 = vmul.f32 -1.442695, %v1792_v45  ;;  %v4671_v52 = vpop.f32.mrb[21].mxu0  ;;  %v1776_v10 = vadd.f32 %v5443_v42, %v1775_v47  ;;  %v4247_v41 = vld [vmem:[%s5899_s1 + $0x140] sm:$0xff] }
 0x302   :  { %v4248_v45 = vld [vmem:[%s5899_s1 + $0x148] sm:$0xff]  ;;  %v4254_v47 = vld [vmem:[%s5899_s1 + $0x160] sm:$0xff] }
 0x303   :  { %5109 = vpow2.f32 %v4204_v48  ;;  %v1800_v4 = vrot.slane %v1776_v10, 4  ;;  %v4255_v48 = vld [vmem:[%s5899_s1 + $0x168] sm:$0xff]  ;;  %v4272_v10 = vld [vmem:[%s5901_s2 + $0x98] sm:$0xff] }
 0x304   :  { %5111 = vpow2.f32 %v4205_v51  ;;  %v5000_v51 = vpack.c.bf16 %v4248_v45, %v4247_v41  ;;  %v5006_v52 = vpack.c.bf16 %v4255_v48, %v4254_v47 }
 0x305   :  { %v1884_v53 = vpop.f32.mrb[20].mxu1  ;;  %v1956_v57 = vpop.f32.mrb[22].mxu0 }
 0x306   :  { %v2039_v58 = vadd.f32 %v1884_v53, %v5431_v22  ;;  %v4678_v59 = vpop.f32.mrb[21].mxu1  ;;  %v4685_v60 = vpop.f32.mrb[23].mxu0  ;;  %v2046_v62 = vadd.f32 %v1956_v57, %v5437_v29  ;;  %v4249_v53 = vld [vmem:[%s5899_s1 + $0x150] sm:$0xff]  ;;  %v4250_v57 = vld [vmem:[%s5899_s1 + $0x158] sm:$0xff] }
 0x307   :  { %v4257_v59 = vld [vmem:[%s5899_s1 + $0x178] sm:$0xff]  ;;  %v5003_v60 = vpack.c.bf16 %v4250_v57, %v4249_v53 }
 0x308   :  { %v4217_v63 = vmul.f32 -1.442695, %v2039_v58  ;;  %v4218_v3 = vmul.f32 -1.442695, %v2046_v62  ;;  %v4256_v58 = vld [vmem:[%s5899_s1 + $0x170] sm:$0xff] }
 0x309   :  { %v2035_v2 = vpop.f32.mrb[22].mxu1  ;;  %v5009_v62 = vpack.c.bf16 %v4257_v59, %v4256_v58 }
 0x30a   :  { %5113 = vpow2.f32 %v4217_v63  ;;  %v4692_v9 = vpop.f32.mrb[23].mxu1  ;;  %v2036_v20 = vadd.f32 %v5448_v46, %v2035_v2  ;;  %v4261_v63 = vld [vmem:[%s5901_s2 + $0x60] sm:$0xff]  ;;  %v4262_v2 = vld [vmem:[%s5901_s2 + $0x68] sm:$0xff] }
 0x30b   :  { %5115 = vpow2.f32 %v4218_v3  ;;  %v4263_v9 = vld [vmem:[%s5901_s2 + $0x70] sm:$0xff]  ;;  %v4264_v3 = vld [vmem:[%s5901_s2 + $0x78] sm:$0xff] }
 0x30d   :  { %v5110_v11 = vpop.eup %5109 }
 0x30e   :  { %v5112_v61 = vpop.eup %5111  ;;  %v1786_v5 = vadd.f32 1.0, %v5110_v11  ;;  %v5673_v11 = vpack.c.bf16 %v4262_v2, %v4261_v63 }
 0x30f   :  { %v1796_v6 = vadd.f32 1.0, %v5112_v61  ;;  %v5675_v61 = vpack.c.bf16 %v4264_v3, %v4263_v9  ;;  %v5778_v3 = vld [vmem:[%s5903_s4 + $0x2] ss:$0 sm:$0xff] }
 0x310   :  { %5117 = vrcp.f32 %v1786_v5  ;;  %v4265_v5 = vld [vmem:[%s5901_s2 + $0x80] sm:$0xff] }
 0x311   :  { %5119 = vrcp.f32 %v1796_v6  ;;  %v4266_v6 = vld [vmem:[%s5901_s2 + $0x88] sm:$0xff] }
 0x314   :  { %v5114_v7 = vpop.eup %5113 }
 0x315   :  { %v2043_v22 = vadd.f32 1.0, %v5114_v7  ;;  %v5116_v12 = vpop.eup %5115  ;;  %v4271_v7 = vld [vmem:[%s5901_s2 + $0x90] sm:$0xff] }
 0x316   :  { %v2050_v13 = vadd.f32 1.0, %v5116_v12  ;;  %v5697_v12 = vpack.c.bf16 %v4272_v10, %v4271_v7  ;;  %v4238_v7 = vld [vmem:[%s5902_s3 + $0x8] ss:$0 sm:$0xff] }
 0x317   :  { %5121 = vrcp.f32 %v2043_v22  ;;  %v5695_v22 = vpack.c.bf16 %v4266_v6, %v4265_v5  ;;  %v5783_v5 = vld [vmem:[%s5903_s4 + $0x3] ss:$0 sm:$0xff] }
 0x31a   :  { %v5118_v29 = vpop.eup %5117 }
 0x31b   :  { %v5120_v15 = vpop.eup %5119  ;;  %v1802_v16 = vmul.f32 %v5118_v29, %v1800_v4  ;;  %v4273_v4 = vld [vmem:[%s5901_s2 + $0xa0] sm:$0xff]  ;;  %v4274_v29 = vld [vmem:[%s5901_s2 + $0xa8] sm:$0xff] }
 0x31c   :  { %v1809_v18 = vmul.f32 %v5120_v15, %v1807_v14  ;;  %v1805_v24 = vsub.f32 1.0, %v5120_v15  ;;  %v4275_v14 = vld [vmem:[%s5901_s2 + $0xb0] sm:$0xff]  ;;  %v4276_v15 = vld [vmem:[%s5901_s2 + $0xb8] sm:$0xff] }
 0x31d   :  { %v1803_v19 = vadd.f32 %v1802_v16, %v5455_v54  ;;  %v5721_v16 = vpack.c.bf16 %v4274_v29, %v4273_v4 }
 0x31f   :  { %5123 = vtanh.f32 %v1803_v19 }
 0x320   :  { %5125 = vrcp.f32 %v2050_v13 }
 0x321   :  { %v5122_v23 = vpop.eup %5121 }
 0x322   :  { %v2053_v17 = vmul.f32 %v5122_v23, %v2036_v20 }
 0x324   :  { %v2054_v42 = vadd.f32 %v2053_v17, %v5461_v1  ;;  %v4233_v1 = vld [vmem:[%s5899_s1 + $0x100] sm:$0xff] }
 0x325   :  { %v4988_v31 = vpack.c.bf16 %v4234_v28, %v4233_v1 }
 0x326   :  { %5127 = vtanh.f32 %v2054_v42 }
 0x329   :  { %v5124_v43 = vpop.eup %5123 }
 0x32a   :  { %v1806_v49 = vmul.f32 %v5124_v43, %v1805_v24  ;;  %v5126_v50 = vpop.eup %5125 }
 0x32b   :  { %v2056_v55 = vsub.f32 1.0, %v5126_v50  ;;  %v2059_v54 = vmul.f32 %v5126_v50, %v5537_v25  ;;  %v4240_v25 = vld [vmem:[%s5899_s1 + $0x120] sm:$0xff] }
 0x32c   :  { %v1810_v21 = vadd.f32 %v1809_v18, %v1806_v49  ;;  %v4994_v44 = vpack.c.bf16 %v4241_v30, %v4240_v25  ;;  %v5727_v18 = vpack.c.bf16 %v4276_v15, %v4275_v14  ;;  %v4224_v49 = vld [vmem:[%s5902_s3 + $0x6] ss:$0 sm:$0xff] }
 0x32e   :  { %1811 = vst.msk [vmem:[#allocation2] sm:$0x30] %vm1030_vm4, %v1810_v21 }
 0x330   :  { %v5128_v56 = vpop.eup %5127 }
 0x331   :  { %v2057_v26 = vmul.f32 %v5128_v56, %v2056_v55 }
 0x333   :  { %v2060_v27 = vadd.f32 %v2059_v54, %v2057_v26  ;;  %v4231_v26 = vld [vmem:[%s5902_s3 + $0x7] ss:$0 sm:$0xff] }
 0x335   :  { %2061 = vst.msk [vmem:[#allocation3] sm:$0x3] %vm771_vm3, %v2060_v27  ;;  %v2062_v34 = vld [vmem:[#allocation2] sm:$0x3f] }
 0x33c   :  { %v2063_v46 = vld [vmem:[#allocation3] sm:$0x3f] }
 0x33d   :  { %2065 = vrot.lane.b32.xlu0 %v2063_v46, %s5192_s21 }
 0x3af   :  { %v2066_v35 = vpop.permute.xlu0 %2065 }
 0x3b0   :  { %v2068_v38 = vsel %vm523_vm2, %v2062_v34, %v2066_v35 }
 0x3b1   :  { %4702 = vmatmul.mubr.msk.f32.vlgmr.msra.gmra.mrb[24].mxu0 %vm32_vm1, %v2068_v38  ;;  %4713 = vmatmul.mubr.msk.f32.vlgmr.msra.gmra.mrb[24].mxu1 %vm32_vm1, %v2068_v38 }
 0x3b2   :  { %4989 = vmatpush3.bf16.msra.mxu0 %v4988_v31  ;;  %4995 = vmatpush3.bf16.msra.mxu1 %v4994_v44  ;;  %v4245_v31 = vld [vmem:[%s5902_s3 + $0x9] ss:$0 sm:$0xff] }
 0x3b3   :  { %4990 = vmatprep.subr.bf16.mxu0 %v5189_v0  ;;  %4996 = vmatprep.subr.bf16.mxu1 %v5189_v0 }
 0x3b4   :  { %4723 = vmatprep.mubr.msk.f32.mxu0 %vm5190_vm0, %v5191_v8  ;;  %4734 = vmatprep.mubr.msk.f32.mxu1 %vm5190_vm0, %v5191_v8 }
 0x3b6   :  { %4992 = vmatpush3.bf16.msra.mxu0 %v4991_v39  ;;  %4998 = vmatpush3.bf16.msra.mxu1 %v4997_v40  ;;  %v4252_v39 = vld [vmem:[%s5902_s3 + $0xa] ss:$0 sm:$0xff] }
 0x3b7   :  { %4999 = vmatprep.subr.bf16.mxu0 %v5189_v0  ;;  %5005 = vmatprep.subr.bf16.mxu1 %v5189_v0 }
 0x3b9   :  { %4724 = vmatmul.mubr.msk.f32.vlgmr.msra.gmra.mrb[26].mxu0 %vm32_vm1, %v2068_v38  ;;  %4735 = vmatmul.mubr.msk.f32.vlgmr.msra.gmra.mrb[26].mxu1 %vm32_vm1, %v2068_v38 }
 0x3ba   :  { %5001 = vmatpush3.bf16.msra.mxu0 %v5000_v51  ;;  %5007 = vmatpush3.bf16.msra.mxu1 %v5006_v52 }
 0x3bb   :  { %5002 = vmatprep.subr.bf16.mxu0 %v5189_v0  ;;  %5008 = vmatprep.subr.bf16.mxu1 %v5189_v0 }
 0x3bc   :  { %4745 = vmatprep.mubr.msk.f32.mxu0 %vm5190_vm0, %v5191_v8  ;;  %4756 = vmatprep.mubr.msk.f32.mxu1 %vm5190_vm0, %v5191_v8 }
 0x3be   :  { %5004 = vmatpush3.bf16.msra.mxu0 %v5003_v60  ;;  %5010 = vmatpush3.bf16.msra.mxu1 %v5009_v62 }
 0x3bf   :  { %5011 = vmatprep.subr.bf16.mxu0 %v5189_v0  ;;  %5014 = vmatprep.subr.bf16.mxu1 %v5189_v0 }
 0x3c1   :  { %4746 = vmatmul.mubr.msk.f32.vlgmr.msra.gmra.mrb[28].mxu0 %vm32_vm1, %v2068_v38  ;;  %4757 = vmatmul.mubr.msk.f32.vlgmr.msra.gmra.mrb[28].mxu1 %vm32_vm1, %v2068_v38 }
 0x3c2   :  { %5013 = vmatpush3.bf16.msra.mxu0 %v5673_v11  ;;  %5016 = vmatpush3.bf16.msra.mxu1 %v5675_v61 }
 0x3c3   :  { %4763 = vmatprep.mubr.msk.f32.mxu0 %vm5190_vm0, %v5191_v8  ;;  %4770 = vmatprep.mubr.msk.f32.mxu1 %vm5190_vm0, %v5191_v8 }
 0x3c4   :  { %5017 = vmatprep.subr.bf16.mxu0 %v5189_v0  ;;  %5020 = vmatprep.subr.bf16.mxu1 %v5189_v0 }
 0x3c5   :  { %4764 = vmatmul.mubr.f32.vlgmr.msra.gmra.mrb[30].mxu0 %v5191_v8  ;;  %4771 = vmatmul.mubr.f32.vlgmr.msra.gmra.mrb[30].mxu1 %v5191_v8 }
 0x3c6   :  { %5019 = vmatpush3.bf16.msra.mxu0 %v5695_v22  ;;  %5022 = vmatpush3.bf16.msra.mxu1 %v5697_v12 }
 0x3c7   :  { %4777 = vmatprep.mubr.msk.f32.mxu0 %vm5190_vm0, %v5191_v8  ;;  %4784 = vmatprep.mubr.msk.f32.mxu1 %vm5190_vm0, %v5191_v8 }
 0x3c8   :  { %5023 = vmatprep.subr.bf16.mxu0 %v5189_v0  ;;  %5026 = vmatprep.subr.bf16.mxu1 %v5189_v0 }
 0x3c9   :  { %4778 = vmatmul.mubr.f32.vlgmr.msra.gmra.mrb[32].mxu0 %v5191_v8  ;;  %4785 = vmatmul.mubr.f32.vlgmr.msra.gmra.mrb[32].mxu1 %v5191_v8 }
 0x3ca   :  { %5025 = vmatpush3.bf16.msra.mxu0 %v5721_v16  ;;  %4791 = vmatprep.mubr.msk.f32.mxu0 %vm5190_vm0, %v5191_v8 }
 0x3cb   :  { %5028 = vmatpush3.bf16.msra.mxu1 %v5727_v18  ;;  %4798 = vmatprep.mubr.msk.f32.mxu1 %vm5190_vm0, %v5191_v8 }
 0x3cc   :  { %5029 = vmatprep.subr.bf16.mxu0 %v5189_v0  ;;  %5032 = vmatprep.subr.bf16.mxu1 %v5189_v0 }
 0x3cd   :  { %4792 = vmatmul.mubr.f32.vlgmr.msra.gmra.mrb[34].mxu0 %v5191_v8 }
 0x3ce   :  { %4799 = vmatmul.mubr.f32.vlgmr.msra.gmra.mrb[34].mxu1 %v5191_v8  ;;  %5031 = vmatpush3.bf16.msra.mxu0 %v5673_v11 }
 0x3cf   :  { %5034 = vmatpush3.bf16.msra.mxu1 %v5675_v61  ;;  %4805 = vmatprep.mubr.msk.f32.mxu0 %vm5190_vm0, %v5191_v8 }
 0x3d0   :  { %4812 = vmatprep.mubr.msk.f32.mxu1 %vm5190_vm0, %v5191_v8  ;;  %5035 = vmatprep.subr.bf16.mxu0 %v5189_v0 }
 0x3d1   :  { %5038 = vmatprep.subr.bf16.mxu1 %v5189_v0 }
 0x484   :  { %v2151_v19 = vpop.f32.mrb[24].mxu0  ;;  %v2234_v13 = vpop.f32.mrb[24].mxu1 }
 0x485   :  { %v4703_v20 = vpop.f32.mrb[25].mxu0  ;;  %v4714_v23 = vpop.f32.mrb[25].mxu1  ;;  %v5754_v54 = vadd.f32 %v4224_v49, %v2151_v19  ;;  %v5760_v30 = vadd.f32 %v4231_v26, %v2234_v13 }
 0x48c   :  { %v2317_v17 = vpop.f32.mrb[26].mxu0  ;;  %v2400_v42 = vpop.f32.mrb[26].mxu1 }
 0x48d   :  { %v4725_v24 = vpop.f32.mrb[27].mxu0  ;;  %v4736_v43 = vpop.f32.mrb[27].mxu1  ;;  %v5766_v35 = vadd.f32 %v4245_v31, %v2400_v42  ;;  %v5790_v15 = vadd.f32 %v4238_v7, %v2317_v17  ;;  %v4259_v42 = vld [vmem:[%s5902_s3 + $0xb] ss:$0 sm:$0xff] }
 0x494   :  { %v2483_v50 = vpop.f32.mrb[28].mxu0  ;;  %v2566_v21 = vpop.f32.mrb[28].mxu1 }
 0x495   :  { %v4747_v55 = vpop.f32.mrb[29].mxu0  ;;  %v4758_v56 = vpop.f32.mrb[29].mxu1  ;;  %v5772_v47 = vadd.f32 %v4252_v39, %v2483_v50  ;;  %v5796_v43 = vadd.f32 %v4259_v42, %v2566_v21 }
 0x498   :  { %v2639_v27 = vpop.f32.mrb[30].mxu0  ;;  %v2712_v46 = vpop.f32.mrb[30].mxu1 }
 0x499   :  { %v2797_v1 = vadd.f32 %v2639_v27, %v5754_v54  ;;  %v4772_v28 = vpop.f32.mrb[31].mxu1  ;;  %v4765_v25 = vpop.f32.mrb[31].mxu0  ;;  %v2804_v32 = vadd.f32 %v2712_v46, %v5760_v30 }
 0x49b   :  { %v4269_v44 = vmul.f32 -1.442695, %v2797_v1  ;;  %v4270_v41 = vmul.f32 -1.442695, %v2804_v32 }
 0x49c   :  { %v2888_v33 = vpop.f32.mrb[32].mxu1  ;;  %v2793_v34 = vpop.f32.mrb[32].mxu0 }
 0x49d   :  { %5129 = vpow2.f32 %v4269_v44  ;;  %v3047_v36 = vrot.slane %v2888_v33, 4  ;;  %v4786_v37 = vpop.f32.mrb[33].mxu1  ;;  %v4779_v38 = vpop.f32.mrb[33].mxu0  ;;  %v2794_v4 = vadd.f32 %v5778_v3, %v2793_v34 }
 0x49f   :  { %v3049_v40 = vadd.f32 %v3047_v36, %v5766_v35 }
 0x4a0   :  { %v2961_v45 = vpop.f32.mrb[34].mxu0 }
 0x4a1   :  { %v4279_v48 = vmul.f32 -1.442695, %v3049_v40  ;;  %v3057_v51 = vrot.slane %v2961_v45, 4  ;;  %v4793_v52 = vpop.f32.mrb[35].mxu0  ;;  %v3042_v53 = vpop.f32.mrb[34].mxu1 }
 0x4a2   :  { %v4800_v57 = vpop.f32.mrb[35].mxu1  ;;  %v3043_v29 = vadd.f32 %v5783_v5, %v3042_v53 }
 0x4a3   :  { %5131 = vpow2.f32 %v4279_v48  ;;  %v3059_v58 = vadd.f32 %v3057_v51, %v5772_v47 }
 0x4a4   :  { %5133 = vpow2.f32 %v4270_v41  ;;  %v3067_v23 = vrot.slane %v3043_v29, 4 }
 0x4a5   :  { %v4280_v59 = vmul.f32 -1.442695, %v3059_v58 }
 0x4a7   :  { %v5130_v60 = vpop.eup %5129  ;;  %5135 = vpow2.f32 %v4280_v59 }
 0x4a8   :  { %v2801_v62 = vadd.f32 1.0, %v5130_v60 }
 0x4aa   :  { %5137 = vrcp.f32 %v2801_v62 }
 0x4ad   :  { %v5132_v63 = vpop.eup %5131 }
 0x4ae   :  { %v5134_v2 = vpop.eup %5133  ;;  %v3053_v9 = vadd.f32 1.0, %v5132_v63 }
 0x4af   :  { %v2808_v6 = vadd.f32 1.0, %v5134_v2 }
 0x4b0   :  { %5139 = vrcp.f32 %v3053_v9 }
 0x4b1   :  { %v5136_v10 = vpop.eup %5135  ;;  %5141 = vrcp.f32 %v2808_v6 }
 0x4b2   :  { %v3063_v20 = vadd.f32 1.0, %v5136_v10 }
 0x4b4   :  { %v5138_v14 = vpop.eup %5137 }
 0x4b5   :  { %v2811_v19 = vmul.f32 %v5138_v14, %v2794_v4 }
 0x4b7   :  { %v2812_v13 = vadd.f32 %v2811_v19, %v5790_v15 }
 0x4b9   :  { %5143 = vtanh.f32 %v2812_v13 }
 0x4ba   :  { %v5140_v24 = vpop.eup %5139  ;;  %5145 = vrcp.f32 %v3063_v20 }
 0x4bb   :  { %v3069_v49 = vmul.f32 %v5140_v24, %v3067_v23  ;;  %v5142_v17 = vpop.eup %5141 }
 0x4bc   :  { %v2814_v55 = vsub.f32 1.0, %v5142_v17  ;;  %v2816_v27 = vmul.f32 0.0, %v5142_v17 }
 0x4bd   :  { %v3070_v50 = vadd.f32 %v3069_v49, %v5796_v43 }
 0x4bf   :  { %5147 = vtanh.f32 %v3070_v50 }
 0x4c3   :  { %v5144_v56 = vpop.eup %5143 }
 0x4c4   :  { %v2815_v26 = vmul.f32 %v5144_v56, %v2814_v55  ;;  %v5146_v46 = vpop.eup %5145 }
 0x4c5   :  { %v3072_v28 = vsub.f32 1.0, %v5146_v46  ;;  %v3074_v25 = vmul.f32 0.0, %v5146_v46 }
 0x4c6   :  { %v5799_v1 = vadd.f32 %v2816_v27, %v2815_v26 }
 0x4c8   :  { %2818 = vst.msk [vmem:[#allocation2] sm:$0x3] %vm771_vm3, %v5799_v1  ;;  %4806 = vmatmul.mubr.msk.f32.vlgmr.msra.gmra.mrb[36].mxu0 %vm523_vm2, %v5799_v1  ;;  %4813 = vmatmul.mubr.msk.f32.vlgmr.msra.gmra.mrb[36].mxu1 %vm523_vm2, %v5799_v1  ;;  %v3331_v49 = vrot.slane %v5799_v1, 6 }
 0x4c9   :  { %v5148_v21 = vpop.eup %5147  ;;  %5037 = vmatpush3.bf16.msra.mxu0 %v5695_v22  ;;  %4819 = vmatprep.mubr.msk.f32.mxu0 %vm5190_vm0, %v5191_v8 }
 0x4ca   :  { %v3073_v31 = vmul.f32 %v5148_v21, %v3072_v28  ;;  %5041 = vmatprep.subr.bf16.mxu0 %v5189_v0  ;;  %5040 = vmatpush3.bf16.msra.mxu1 %v5697_v12 }
 0x4cb   :  { %4826 = vmatprep.mubr.msk.f32.mxu1 %vm5190_vm0, %v5191_v8  ;;  %5044 = vmatprep.subr.bf16.mxu1 %v5189_v0 }
 0x4cc   :  { %4820 = vmatmul.mubr.msk.f32.vlgmr.msra.gmra.mrb[38].mxu0 %vm523_vm2, %v5799_v1  ;;  %v5817_v44 = vadd.f32 %v3074_v25, %v3073_v31 }
 0x4cd   :  { %5043 = vmatpush3.bf16.msra.mxu0 %v5721_v16  ;;  %4833 = vmatprep.mubr.msk.f32.mxu0 %vm5190_vm0, %v5191_v8 }
 0x4ce   :  { %3076 = vst.msk [vmem:[#allocation3] sm:$0x30] %vm1030_vm4, %v5817_v44  ;;  %v3339_v32 = vrot.slane %v5817_v44, 4  ;;  %5047 = vmatprep.subr.bf16.mxu0 %v5189_v0  ;;  %v3591_v28 = vrot.slane %v5817_v44, 2 }
 0x4d0   :  { %4827 = vmatmul.mubr.msk.f32.vlgmr.msra.gmra.mrb[38].mxu1 %vm523_vm2, %v3339_v32  ;;  %4834 = vmatmul.mubr.msk.f32.vlgmr.msra.gmra.mrb[40].mxu0 %vm523_vm2, %v3339_v32 }
 0x4d1   :  { %5046 = vmatpush3.bf16.msra.mxu1 %v5727_v18  ;;  %4840 = vmatprep.mubr.msk.f32.mxu1 %vm5190_vm0, %v5191_v8 }
 0x4d2   :  { %5050 = vmatprep.subr.bf16.mxu1 %v5189_v0  ;;  %5049 = vmatpush3.bf16.msra.mxu0 %v5673_v11 }
 0x4d3   :  { %4847 = vmatprep.mubr.msk.f32.mxu0 %vm5190_vm0, %v5191_v8  ;;  %5053 = vmatprep.subr.bf16.mxu0 %v5189_v0 }
 0x4d4   :  { %4841 = vmatmul.mubr.msk.f32.vlgmr.msra.gmra.mrb[40].mxu1 %vm523_vm2, %v3339_v32 }
 0x4d5   :  { %5052 = vmatpush3.bf16.msra.mxu1 %v5675_v61  ;;  %4854 = vmatprep.mubr.msk.f32.mxu1 %vm5190_vm0, %v5191_v8 }
 0x4d6   :  { %5056 = vmatprep.subr.bf16.mxu1 %v5189_v0 }
 0x59b   :  { %v3148_v33 = vpop.f32.mrb[36].mxu0  ;;  %v3220_v34 = vpop.f32.mrb[36].mxu1 }
 0x59c   :  { %v3304_v36 = vrot.slane %v3148_v33, 6  ;;  %v3314_v37 = vrot.slane %v3220_v34, 6  ;;  %v4807_v38 = vpop.f32.mrb[37].mxu0  ;;  %v4814_v11 = vpop.f32.mrb[37].mxu1 }
 0x59e   :  { %v3306_v39 = vadd.f32 %v3304_v36, %v5754_v54  ;;  %v3316_v40 = vadd.f32 %v3314_v37, %v5760_v30 }
 0x59f   :  { %v3299_v41 = vpop.f32.mrb[38].mxu0 }
 0x5a0   :  { %v4292_v45 = vmul.f32 -1.442695, %v3306_v39  ;;  %v4293_v48 = vmul.f32 -1.442695, %v3316_v40  ;;  %v4821_v51 = vpop.f32.mrb[39].mxu0  ;;  %v3300_v19 = vadd.f32 %v5778_v3, %v3299_v41 }
 0x5a2   :  { %5149 = vpow2.f32 %v4292_v45  ;;  %v3324_v42 = vrot.slane %v3300_v19, 6 }
 0x5a3   :  { %5151 = vpow2.f32 %v4293_v48  ;;  %v3408_v61 = vpop.f32.mrb[38].mxu1  ;;  %v3480_v52 = vpop.f32.mrb[40].mxu0 }
 0x5a4   :  { %v3564_v53 = vrot.slane %v3408_v61, 6  ;;  %v3574_v57 = vrot.slane %v3480_v52, 6  ;;  %v4828_v58 = vpop.f32.mrb[39].mxu1  ;;  %v4835_v59 = vpop.f32.mrb[41].mxu0 }
 0x5a6   :  { %v3566_v60 = vadd.f32 %v3564_v53, %v5766_v35  ;;  %v3576_v62 = vadd.f32 %v3574_v57, %v5772_v47 }
 0x5a7   :  { %v3559_v63 = vpop.f32.mrb[40].mxu1 }
 0x5a8   :  { %v4305_v2 = vmul.f32 -1.442695, %v3566_v60  ;;  %v4306_v9 = vmul.f32 -1.442695, %v3576_v62  ;;  %v4842_v6 = vpop.f32.mrb[41].mxu1  ;;  %v3560_v26 = vadd.f32 %v5783_v5, %v3559_v63 }
 0x5aa   :  { %5153 = vpow2.f32 %v4305_v2  ;;  %v3584_v27 = vrot.slane %v3560_v26, 6 }
 0x5ab   :  { %5155 = vpow2.f32 %v4306_v9 }
 0x5ac   :  { %v5150_v7 = vpop.eup %5149 }
 0x5ad   :  { %v5152_v10 = vpop.eup %5151  ;;  %v3310_v4 = vadd.f32 1.0, %v5150_v7 }
 0x5ae   :  { %v3320_v29 = vadd.f32 1.0, %v5152_v10 }
 0x5af   :  { %5157 = vrcp.f32 %v3310_v4 }
 0x5b0   :  { %5159 = vrcp.f32 %v3320_v29 }
 0x5b4   :  { %v5154_v14 = vpop.eup %5153 }
 0x5b5   :  { %v5156_v13 = vpop.eup %5155  ;;  %v3570_v20 = vadd.f32 1.0, %v5154_v14 }
 0x5b6   :  { %v3580_v23 = vadd.f32 1.0, %v5156_v13 }
 0x5b7   :  { %5161 = vrcp.f32 %v3570_v20 }
 0x5b8   :  { %5163 = vrcp.f32 %v3580_v23 }
 0x5b9   :  { %v5158_v24 = vpop.eup %5157 }
 0x5ba   :  { %v5160_v50 = vpop.eup %5159  ;;  %v3326_v17 = vmul.f32 %v5158_v24, %v3324_v42 }
 0x5bb   :  { %v3333_v55 = vmul.f32 %v5160_v50, %v3331_v49  ;;  %v3329_v33 = vsub.f32 1.0, %v5160_v50 }
 0x5bc   :  { %v3327_v56 = vadd.f32 %v3326_v17, %v5790_v15 }
 0x5be   :  { %5165 = vtanh.f32 %v3327_v56 }
 0x5c1   :  { %v5162_v46 = vpop.eup %5161 }
 0x5c2   :  { %v5164_v21 = vpop.eup %5163  ;;  %v3586_v25 = vmul.f32 %v5162_v46, %v3584_v27 }
 0x5c3   :  { %v3593_v31 = vmul.f32 %v5164_v21, %v3591_v28  ;;  %v3589_v38 = vsub.f32 1.0, %v5164_v21 }
 0x5c4   :  { %v3587_v32 = vadd.f32 %v3586_v25, %v5796_v43 }
 0x5c6   :  { %5167 = vtanh.f32 %v3587_v32 }
 0x5c8   :  { %v5166_v1 = vpop.eup %5165 }
 0x5c9   :  { %v3330_v34 = vmul.f32 %v5166_v1, %v3329_v33 }
 0x5cb   :  { %v5851_v36 = vadd.f32 %v3333_v55, %v3330_v34 }
 0x5cd   :  { %3335 = vst.msk [vmem:[#allocation2] sm:$0xc] %vm1290_vm5, %v5851_v36  ;;  %v3599_v37 = vrot.slane %v5851_v36, 2 }
 0x5cf   :  { %4848 = vmatmul.mubr.msk.f32.vlgmr.msra.gmra.mrb[42].mxu0 %vm523_vm2, %v3599_v37  ;;  %4855 = vmatmul.mubr.msk.f32.vlgmr.msra.gmra.mrb[42].mxu1 %vm523_vm2, %v3599_v37 }
 0x5d0   :  { %v5168_v44 = vpop.eup %5167  ;;  %5055 = vmatpush3.bf16.msra.mxu0 %v5695_v22  ;;  %4861 = vmatprep.mubr.msk.f32.mxu0 %vm5190_vm0, %v5191_v8 }
 0x5d1   :  { %5059 = vmatprep.subr.bf16.mxu0 %v5189_v0  ;;  %5058 = vmatpush3.bf16.msra.mxu1 %v5697_v12  ;;  %v3590_v11 = vmul.f32 %v5168_v44, %v3589_v38 }
 0x5d2   :  { %4868 = vmatprep.mubr.msk.f32.mxu1 %vm5190_vm0, %v5191_v8  ;;  %5062 = vmatprep.subr.bf16.mxu1 %v5189_v0 }
 0x5d3   :  { %4862 = vmatmul.mubr.msk.f32.vlgmr.msra.gmra.mrb[44].mxu0 %vm523_vm2, %v3599_v37  ;;  %v3594_v39 = vadd.f32 %v3593_v31, %v3590_v11 }
 0x5d4   :  { %5061 = vmatpush3.bf16.msra.mxu0 %v5721_v16  ;;  %4875 = vmatprep.mubr.msk.f32.mxu0 %vm5190_vm0, %v5191_v8 }
 0x5d5   :  { %3595 = vst.msk [vmem:[#allocation3] sm:$0xc] %vm1290_vm5, %v3594_v39  ;;  %v5871_v22 = vrot.slane %v3594_v39, 2 }
 0x5d7   :  { %4869 = vmatmul.mubr.msk.f32.vlgmr.msra.gmra.mrb[44].mxu1 %vm523_vm2, %v5871_v22  ;;  %4876 = vmatmul.mubr.msk.f32.vlgmr.msra.gmra.mrb[46].mxu0 %vm523_vm2, %v5871_v22 }
 0x5d8   :  { %5064 = vmatpush3.bf16.msra.mxu1 %v5727_v18  ;;  %4882 = vmatprep.mubr.msk.f32.mxu1 %vm5190_vm0, %v5191_v8 }
 0x5db   :  { %4883 = vmatmul.mubr.msk.f32.vlgmr.msra.gmra.mrb[46].mxu1 %vm523_vm2, %v5871_v22 }
 0x6a2   :  { %v3668_v0 = vpop.f32.mrb[42].mxu0  ;;  %v3740_v12 = vpop.f32.mrb[42].mxu1 }
 0x6a3   :  { %v3824_v16 = vrot.slane %v3668_v0, 4  ;;  %v3834_v40 = vrot.slane %v3740_v12, 4  ;;  %v4849_v41 = vpop.f32.mrb[43].mxu0  ;;  %v4856_v45 = vpop.f32.mrb[43].mxu1 }
 0x6a5   :  { %v3826_v48 = vadd.f32 %v3824_v16, %v5754_v54  ;;  %v3836_v51 = vadd.f32 %v3834_v40, %v5760_v30 }
 0x6a6   :  { %v3819_v61 = vpop.f32.mrb[44].mxu0 }
 0x6a7   :  { %v4318_v52 = vmul.f32 -1.442695, %v3826_v48  ;;  %v4319_v53 = vmul.f32 -1.442695, %v3836_v51  ;;  %v4863_v18 = vpop.f32.mrb[45].mxu0 }
 0x6a9   :  { %5169 = vpow2.f32 %v4318_v52 }
 0x6aa   :  { %5171 = vpow2.f32 %v4319_v53  ;;  %v3928_v8 = vpop.f32.mrb[44].mxu1  ;;  %v4000_v57 = vpop.f32.mrb[46].mxu0 }
 0x6ab   :  { %v4083_v58 = vadd.f32 %v3928_v8, %v5766_v35  ;;  %v4870_v59 = vpop.f32.mrb[45].mxu1  ;;  %v4877_v60 = vpop.f32.mrb[47].mxu0  ;;  %v4090_v63 = vadd.f32 %v4000_v57, %v5772_v47  ;;  %v3820_v35 = vadd.f32 %v5778_v3, %v3819_v61  ;;  %v3851_v47 = vrot.slane %v5851_v36, 6 }
 0x6ad   :  { %v4331_v62 = vmul.f32 -1.442695, %v4083_v58  ;;  %v4332_v9 = vmul.f32 -1.442695, %v4090_v63  ;;  %v3844_v19 = vrot.slane %v3820_v35, 4 }
 0x6ae   :  { %v4079_v2 = vpop.f32.mrb[46].mxu1 }
 0x6af   :  { %5173 = vpow2.f32 %v4331_v62  ;;  %v4884_v54 = vpop.f32.mrb[47].mxu1  ;;  %v4080_v50 = vadd.f32 %v5783_v5, %v4079_v2 }
 0x6b0   :  { %5175 = vpow2.f32 %v4332_v9 }
 0x6b3   :  { %v5170_v30 = vpop.eup %5169 }
 0x6b4   :  { %v5172_v6 = vpop.eup %5171  ;;  %v3830_v7 = vadd.f32 1.0, %v5170_v30 }
 0x6b5   :  { %v3840_v10 = vadd.f32 1.0, %v5172_v6 }
 0x6b6   :  { %5177 = vrcp.f32 %v3830_v7 }
 0x6b7   :  { %5179 = vrcp.f32 %v3840_v10 }
 0x6b9   :  { %v5174_v4 = vpop.eup %5173 }
 0x6ba   :  { %v4087_v29 = vadd.f32 1.0, %v5174_v4  ;;  %v5176_v14 = vpop.eup %5175 }
 0x6bb   :  { %v4094_v49 = vadd.f32 1.0, %v5176_v14 }
 0x6bc   :  { %5181 = vrcp.f32 %v4087_v29 }
 0x6c0   :  { %v5178_v13 = vpop.eup %5177 }
 0x6c1   :  { %v5180_v20 = vpop.eup %5179  ;;  %v3846_v23 = vmul.f32 %v5178_v13, %v3844_v19 }
 0x6c2   :  { %v3853_v42 = vmul.f32 %v5180_v20, %v3851_v47  ;;  %v3849_v56 = vsub.f32 1.0, %v5180_v20 }
 0x6c3   :  { %v3847_v24 = vadd.f32 %v3846_v23, %v5790_v15 }
 0x6c5   :  { %5183 = vtanh.f32 %v3847_v24 }
 0x6c6   :  { %v5182_v17 = vpop.eup %5181  ;;  %5185 = vrcp.f32 %v4094_v49 }
 0x6c7   :  { %v4097_v55 = vmul.f32 %v5182_v17, %v4080_v50 }
 0x6c9   :  { %v4098_v3 = vadd.f32 %v4097_v55, %v5796_v43 }
 0x6cb   :  { %5187 = vtanh.f32 %v4098_v3 }
 0x6cf   :  { %v5184_v26 = vpop.eup %5183 }
 0x6d0   :  { %v3850_v27 = vmul.f32 %v5184_v26, %v3849_v56  ;;  %v5186_v46 = vpop.eup %5185 }
 0x6d1   :  { %v4100_v21 = vsub.f32 1.0, %v5186_v46  ;;  %v4103_v15 = vmul.f32 %v5186_v46, %v5871_v22 }
 0x6d2   :  { %v3854_v28 = vadd.f32 %v3853_v42, %v3850_v27 }
 0x6d4   :  { %3855 = vst.msk [vmem:[#allocation2] sm:$0x30] %vm1030_vm4, %v3854_v28 }
 0x6d5   :  { %v5188_v25 = vpop.eup %5187 }
 0x6d6   :  { %v4101_v31 = vmul.f32 %v5188_v25, %v4100_v21 }
 0x6d8   :  { %v4104_v32 = vadd.f32 %v4103_v15, %v4101_v31 }
 0x6da   :  { %4105 = vst.msk [vmem:[#allocation3] sm:$0x3] %vm771_vm3, %v4104_v32 }
 0x6db   :  { %v4106_v43 = vld [vmem:[#allocation2] sm:$0x3f] }
 0x6e1   :  { %v4107_v5 = vld [vmem:[#allocation3] sm:$0x3f] }
 0x6e2   :  { %4109 = vrot.lane.b32.xlu0 %v4107_v5, %s5192_s21 }
 0x754   :  { %v4110_v33 = vpop.permute.xlu0 %4109 }
 0x755   :  { %v4112_v1 = vsel %vm523_vm2, %v4106_v43, %v4110_v33 }
 0x756   :  { %4114 = vst.msk [vmem:[%s5904_s5] sm:$0x3f] %vm4113_vm6, %v4112_v1 }

// kernel: mash_rnn.9
= control target key start
LH: loop header
LB: loop body
LE: loop exit
PB: predicated region body
PF: predicated region fallthrough
CT: control target
= control target key end

     0   :  { %vm36_vm0 = vcmask 261120   ;;  %v307_v0 = vmov 0.0|0.0   ;;  %vm308_vm2 = vmmov 0   ;;  %v309_v4 = vmov 0.0   ;;  %s406_s1 = inlined_call_operand.vmem [shape: f32[32,32], index: 1, kind: input, shape index: {}]   ;;  %s407_s0 = inlined_call_operand.vmem [shape: f32[1,24,32], index: 0, kind: input, shape index: {}]   ;;  %s408_s4 = inlined_call_operand.<no memory space> [shape: f32[1,1], index: 4, kind: input, shape index: {}]   ;;  %s409_s2 = inlined_call_operand.vmem [shape: f32[1,32], index: 2, kind: input, shape index: {}]   ;;  %s410_s3 = inlined_call_operand.vmem [shape: f32[1,32], index: 3, kind: input, shape index: {}]   ;;  %s411_s5 = inlined_call_operand.vmem [shape: f32[1,1,32], index: 5, kind: output, shape index: {}]  }
   0x1   :  { %275 = vmatprep.subr.bf16.mxu0 %v307_v0  ;;  %283 = vmatprep.subr.bf16.mxu1 %v307_v0  ;;  %v25_v1 = vld [vmem:[%s406_s1] sm:$0xff]  ;;  %v26_v2 = vld [vmem:[%s406_s1 + $0x8] sm:$0xff]  ;;  %vm277_vm1 = vmpackc.low %vm36_vm0, %vm36_vm0  ;;  %v10_v11 = vstv %s408_s4  ;;  %v310_v32 = vmov 0   ;;  %vm170_vm3 = vcmask 7168   ;;  %vm235_vm4 = vcmask 253952  }
   0x2   :  { %v276_v3 = vpack.c.bf16 %v26_v2, %v25_v1  ;;  %266 = vmatprep.mubr.msk.f32.mxu0 %vm308_vm2, %v309_v4  ;;  %269 = vmatprep.mubr.msk.f32.mxu1 %vm308_vm2, %v309_v4  ;;  %v27_v5 = vld [vmem:[%s406_s1 + $0x10] sm:$0xff]  ;;  %v28_v6 = vld [vmem:[%s406_s1 + $0x18] sm:$0xff]  ;;  %v360_v8 = vld [vmem:[%s407_s0] sm:$0xff]  ;;  %11 = vst [vmem:[#allocation2] sm:$0x1] %v10_v11 }
   0x3   :  { %v280_v7 = vpack.c.bf16 %v28_v6, %v27_v5  ;;  %v365_v9 = vld [vmem:[%s407_s0 + $0x8] sm:$0xff]  ;;  %v375_v10 = vld [vmem:[%s407_s0 + $0x10] sm:$0xff]  ;;  %v241_v12 = vld [vmem:[%s409_s2] ss:$0 sm:$0xff]  ;;  %292 = vset.pattern.permute.xlu0 %v310_v32  ;;  %291 = vset.pattern.permute.xlu1 %v310_v32 }
   0x4   :  { %278 = vmatpush3.bf16.xpose.msk.msra.mxu0 %vm277_vm1, %v276_v3  ;;  %285 = vmatpush3.bf16.xpose.msk.msra.mxu1 %vm277_vm1, %v276_v3  ;;  %v249_v22 = vld [vmem:[%s410_s3] ss:$0 sm:$0xff] }
   0x5   :  { %279 = vmatprep.subr.bf16.mxu0 %v307_v0  ;;  %284 = vmatprep.subr.bf16.mxu1 %v307_v0 }
   0x9   :  { %v250_v33 = vld [vmem:[#allocation2] ss:$0 sm:$0xff] }
   0xc   :  { %282 = vmatpush3.bf16.xpose.msk.msra.mxu0 %vm277_vm1, %v280_v7  ;;  %286 = vmatpush3.bf16.xpose.msk.msra.mxu1 %vm277_vm1, %v280_v7 }
  0x13   :  { %267 = vmatmul.mubr.msk.f32.vlgmr.msra.gmra.mrb[0].mxu0 %vm36_vm0, %v360_v8  ;;  %270 = vmatmul.mubr.msk.f32.vlgmr.msra.gmra.mrb[0].mxu1 %vm36_vm0, %v365_v9 }
  0x14   :  { %272 = vmatprep.mubr.msk.f32.mxu1 %vm308_vm2, %v309_v4 }
  0x17   :  { %273 = vmatmul.mubr.msk.f32.gmra.mrb[2].mxu1 %vm36_vm0, %v375_v10 }
  0xe6   :  { %v124_v13 = vpop.f32.mrb[0].mxu0  ;;  %v129_v14 = vpop.f32.mrb[0].mxu1 }
  0xe7   :  { %v125_v15 = vadd.f32 %v241_v12, %v124_v13  ;;  %v268_v16 = vpop.f32.mrb[1].mxu0  ;;  %v130_v17 = vadd.f32 %v241_v12, %v129_v14  ;;  %v271_v18 = vpop.f32.mrb[1].mxu1 }
  0xe9   :  { %293 = vtanh.f32 %v125_v15 }
  0xea   :  { %295 = vtanh.f32 %v130_v17  ;;  %v134_v19 = vpop.f32.mrb[2].mxu1 }
  0xeb   :  { %v135_v20 = vadd.f32 %v241_v12, %v134_v19  ;;  %v274_v21 = vpop.f32.mrb[3].mxu1 }
  0xed   :  { %297 = vtanh.f32 %v135_v20 }
  0xf3   :  { %v294_v23 = vpop.eup %293 }
  0xf4   :  { %v296_v24 = vpop.eup %295  ;;  %v148_v25 = vmul.f32 %v294_v23, %v249_v22 }
  0xf5   :  { %v149_v27 = vmul.f32 %v296_v24, %v249_v22 }
  0xf6   :  { %v151_v26 = vsel %vm36_vm0, %v148_v25, 0.0 }
  0xf7   :  { %v298_v28 = vpop.eup %297  ;;  %152 = vadd.xlane.f32.xlu0 %v151_v26  ;;  %v154_v30 = vsel %vm36_vm0, %v149_v27, 0.0 }
  0xf8   :  { %v150_v29 = vmul.f32 %v298_v28, %v249_v22 }
  0xfa   :  { %v157_v31 = vsel %vm36_vm0, %v150_v29, 0.0 }
  0xfb   :  { %155 = vadd.xlane.f32.xlu0 %v154_v30  ;;  %158 = vadd.xlane.f32.xlu1 %v157_v31 }
 0x184   :  { %v153_v34 = vpop.xlane.xlu0 %152 }
 0x185   :  { %v167_v35 = vadd.f32 %v250_v33, %v153_v34 }
 0x187   :  { %v171_v40 = vsel %vm170_vm3, %v167_v35, -inf }
 0x188   :  { %v156_v36 = vpop.xlane.xlu0 %155  ;;  %v159_v37 = vpop.xlane.xlu1 %158 }
 0x189   :  { %v168_v38 = vadd.f32 %v250_v33, %v156_v36  ;;  %v169_v39 = vadd.f32 %v250_v33, %v159_v37 }
 0x18b   :  { %v172_v41 = vsel %vm170_vm3, %v168_v38, -inf  ;;  %v173_v42 = vsel %vm170_vm3, %v169_v39, -inf }
 0x18c   :  { %v174_v43 = vmax.f32 %v171_v40, %v172_v41 }
 0x18e   :  { %v175_v44 = vmax.f32 %v174_v43, %v173_v42 }
 0x190   :  { %v176_v45 = vrot.slane %v175_v44, 4 }
 0x192   :  { %v177_v46 = vmax.f32 %v175_v44, %v176_v45 }
 0x194   :  { %v178_v47 = vrot.slane %v177_v46, 2 }
 0x196   :  { %v179_v48 = vmax.f32 %v177_v46, %v178_v47 }
 0x198   :  { %v180_v49 = vrot.slane %v179_v48, 1 }
 0x19a   :  { %v181_v50 = vmax.f32 %v179_v48, %v180_v49 }
 0x19c   :  { %v182_v51 = vsub.f32 %v167_v35, %v181_v50  ;;  %v183_v52 = vsub.f32 %v168_v38, %v181_v50  ;;  %v184_v53 = vsub.f32 %v169_v39, %v181_v50 }
 0x19e   :  { %v185_v54 = vmul.f32 1.442695, %v182_v51  ;;  %v187_v55 = vmul.f32 1.442695, %v183_v52  ;;  %v189_v56 = vmul.f32 1.442695, %v184_v53 }
 0x1a0   :  { %299 = vpow2.f32 %v185_v54 }
 0x1a1   :  { %301 = vpow2.f32 %v187_v55 }
 0x1a2   :  { %303 = vpow2.f32 %v189_v56 }
 0x1aa   :  { %v300_v57 = vpop.eup %299 }
 0x1ab   :  { %v302_v58 = vpop.eup %301  ;;  %v191_v59 = vsel %vm170_vm3, %v300_v57, 0.0 }
 0x1ac   :  { %v304_v60 = vpop.eup %303  ;;  %v192_v61 = vsel %vm170_vm3, %v302_v58, 0.0 }
 0x1ad   :  { %v193_v62 = vadd.f32 %v192_v61, %v191_v59  ;;  %v194_v63 = vsel %vm170_vm3, %v304_v60, 0.0 }
 0x1af   :  { %v195_v0 = vadd.f32 %v194_v63, %v193_v62 }
 0x1b1   :  { %v196_v1 = vrot.slane %v195_v0, 4 }
 0x1b3   :  { %v197_v2 = vadd.f32 %v196_v1, %v195_v0 }
 0x1b5   :  { %v198_v3 = vrot.slane %v197_v2, 2 }
 0x1b7   :  { %v199_v4 = vadd.f32 %v198_v3, %v197_v2 }
 0x1b9   :  { %v200_v5 = vrot.slane %v199_v4, 1 }
 0x1bb   :  { %v201_v6 = vadd.f32 %v200_v5, %v199_v4 }
 0x1bd   :  { %305 = vrcp.f32 %v201_v6 }
 0x1c7   :  { %v306_v7 = vpop.eup %305 }
 0x1c8   :  { %v204_v11 = vmul.f32 %v306_v7, %v302_v58  ;;  %v203_v12 = vmul.f32 %v306_v7, %v300_v57  ;;  %v205_v13 = vmul.f32 %v306_v7, %v304_v60 }
 0x1ca   :  { %213 = vperm.xlu0 %292, %v204_v11   ;;  %208 = vperm.xlu1 %291, %v203_v12  }
 0x1ce   :  { %218 = vperm.xlu1 %291, %v205_v13  }
 0x249   :  { %v214_v14 = vpop.permute.xlu0 %213  ;;  %v209_v15 = vpop.permute.xlu1 %208 }
 0x24a   :  { %v222_v16 = vmul.f32 %v214_v14, %v365_v9  ;;  %v221_v17 = vmul.f32 %v209_v15, %v360_v8 }
 0x24c   :  { %v225_v18 = vsel %vm36_vm0, %v222_v16, 0.0  ;;  %v224_v19 = vsel %vm36_vm0, %v221_v17, 0.0 }
 0x24d   :  { %v219_v20 = vpop.permute.xlu1 %218  ;;  %v226_v22 = vadd.f32 %v225_v18, %v224_v19 }
 0x24e   :  { %v223_v21 = vmul.f32 %v219_v20, %v375_v10 }
 0x250   :  { %v227_v23 = vsel %vm36_vm0, %v223_v21, 0.0 }
 0x251   :  { %v228_v24 = vadd.f32 %v227_v23, %v226_v22 }
 0x253   :  { %v229_v25 = vrot.slane %v228_v24, 4 }
 0x255   :  { %v230_v26 = vadd.f32 %v229_v25, %v228_v24 }
 0x257   :  { %v231_v27 = vrot.slane %v230_v26, 2 }
 0x259   :  { %v232_v28 = vadd.f32 %v231_v27, %v230_v26 }
 0x25b   :  { %v233_v29 = vrot.slane %v232_v28, 1 }
 0x25d   :  { %v234_v9 = vadd.f32 %v233_v29, %v232_v28 }
 0x25f   :  { %236 = vst.msk [vmem:[%s411_s5] sm:$0x1] %vm235_vm4, %v234_v9 }

// kernel: mash_rnn.11
= control target key start
LH: loop header
LB: loop body
LE: loop exit
PB: predicated region body
PF: predicated region fallthrough
CT: control target
= control target key end

     0   :  { %v8879_v0 = vmov 0.0|0.0   ;;  %vm8880_vm0 = vmmov 0   ;;  %v8881_v8 = vmov 0.0   ;;  %vm32_vm1 = vcmask 261120   ;;  %s8882_s13 = smov 16   ;;  %s9977_s1 = inlined_call_operand.vmem [shape: f32[12,32,16], index: 1, kind: input, shape index: {}]   ;;  %s9978_s0 = inlined_call_operand.vmem [shape: f32[6,32], index: 0, kind: input, shape index: {}]   ;;  %s9979_s2 = inlined_call_operand.vmem [shape: f32[12,16,16], index: 2, kind: input, shape index: {}]   ;;  %s9980_s3 = inlined_call_operand.vmem [shape: f32[12,1,16], index: 3, kind: input, shape index: {}]   ;;  %s9981_s4 = inlined_call_operand.vmem [shape: f32[4,1,16], index: 4, kind: input, shape index: {}]   ;;  %s9982_s5 = inlined_call_operand.vmem [shape: f32[6,32], index: 5, kind: output, shape index: {}]  }
   0x1   :  { %8347 = vmatprep.subr.bf16.mxu0 %v8879_v0  ;;  %8353 = vmatprep.subr.bf16.mxu1 %v8879_v0  ;;  %v21_v1 = vld [vmem:[%s9977_s1] sm:$0xff]  ;;  %v22_v2 = vld [vmem:[%s9977_s1 + $0x8] sm:$0xff]  ;;  %v23_v6 = vld [vmem:[%s9977_s1 + $0x10] sm:$0xff]  ;;  %vm523_vm2 = vcmask 130048   ;;  %vm765_vm3 = vcmask 122880   ;;  %vm1018_vm4 = vcmask 128005  }
   0x2   :  { %v7100_v3 = vld [vmem:[%s9977_s1 + $0x20] sm:$0xff]  ;;  %v8348_v4 = vpack.c.bf16 %v22_v2, %v21_v1  ;;  %v7101_v5 = vld [vmem:[%s9977_s1 + $0x28] sm:$0xff]  ;;  %v24_v7 = vld [vmem:[%s9977_s1 + $0x18] sm:$0xff]  ;;  %7730 = vmatprep.mubr.msk.f32.mxu1 %vm8880_vm0, %v8881_v8  ;;  %7719 = vmatprep.mubr.msk.f32.mxu0 %vm8880_vm0, %v8881_v8  ;;  %vm1272_vm5 = vcmask 123905   ;;  %vm1527_vm6 = vcmask 126980   ;;  %vm1782_vm7 = vcmask 124930  }
   0x3   :  { %v8354_v9 = vpack.c.bf16 %v7101_v5, %v7100_v3  ;;  %v7102_v10 = vld [vmem:[%s9977_s1 + $0x30] sm:$0xff]  ;;  %v7103_v11 = vld [vmem:[%s9977_s1 + $0x38] sm:$0xff]  ;;  %v8351_v12 = vpack.c.bf16 %v24_v7, %v23_v6  ;;  %v7107_v14 = vld [vmem:[%s9977_s1 + $0x40] sm:$0xff]  ;;  %vm2037_vm8 = vcmask 125955   ;;  %vm7092_vm9 = vcmask 259072  }
   0x4   :  { %8349 = vmatpush3.bf16.msra.mxu0 %v8348_v4  ;;  %v8357_v13 = vpack.c.bf16 %v7103_v11, %v7102_v10  ;;  %v7108_v15 = vld [vmem:[%s9977_s1 + $0x48] sm:$0xff]  ;;  %v7114_v16 = vld [vmem:[%s9977_s1 + $0x60] sm:$0xff]  ;;  %v7109_v21 = vld [vmem:[%s9977_s1 + $0x50] sm:$0xff] }
   0x5   :  { %8355 = vmatpush3.bf16.msra.mxu1 %v8354_v9  ;;  %8350 = vmatprep.subr.bf16.mxu0 %v8879_v0  ;;  %v7115_v17 = vld [vmem:[%s9977_s1 + $0x68] sm:$0xff]  ;;  %v20_v18 = vld [vmem:[%s9978_s0] sm:$0x3f]  ;;  %v8360_v19 = vpack.c.bf16 %v7108_v15, %v7107_v14  ;;  %v7110_v22 = vld [vmem:[%s9977_s1 + $0x58] sm:$0xff] }
   0x6   :  { %8356 = vmatprep.subr.bf16.mxu1 %v8879_v0  ;;  %v8366_v20 = vpack.c.bf16 %v7115_v17, %v7114_v16  ;;  %v7116_v23 = vld [vmem:[%s9977_s1 + $0x70] sm:$0xff]  ;;  %v7117_v24 = vld [vmem:[%s9977_s1 + $0x78] sm:$0xff]  ;;  %v8363_v25 = vpack.c.bf16 %v7110_v22, %v7109_v21  ;;  %v7121_v27 = vld [vmem:[%s9977_s1 + $0x80] sm:$0xff] }
   0x7   :  { %v8369_v26 = vpack.c.bf16 %v7117_v24, %v7116_v23  ;;  %v7122_v28 = vld [vmem:[%s9977_s1 + $0x88] sm:$0xff]  ;;  %v7128_v29 = vld [vmem:[%s9977_s1 + $0xa0] sm:$0xff]  ;;  %v7123_v33 = vld [vmem:[%s9977_s1 + $0x90] sm:$0xff] }
   0x8   :  { %8352 = vmatpush3.bf16.msra.mxu0 %v8351_v12  ;;  %v7129_v30 = vld [vmem:[%s9977_s1 + $0xa8] sm:$0xff]  ;;  %v8372_v31 = vpack.c.bf16 %v7122_v28, %v7121_v27  ;;  %v7124_v34 = vld [vmem:[%s9977_s1 + $0x98] sm:$0xff]  ;;  %v7130_v35 = vld [vmem:[%s9977_s1 + $0xb0] sm:$0xff] }
   0x9   :  { %8358 = vmatpush3.bf16.msra.mxu1 %v8357_v13  ;;  %8359 = vmatprep.subr.bf16.mxu0 %v8879_v0  ;;  %v8378_v32 = vpack.c.bf16 %v7129_v30, %v7128_v29  ;;  %v7131_v36 = vld [vmem:[%s9977_s1 + $0xb8] sm:$0xff]  ;;  %v8375_v37 = vpack.c.bf16 %v7124_v34, %v7123_v33  ;;  %v521_v39 = vld [vmem:[%s9979_s2] sm:$0xff]  ;;  %v522_v40 = vld [vmem:[%s9979_s2 + $0x8] sm:$0xff] }
   0xa   :  { %8365 = vmatprep.subr.bf16.mxu1 %v8879_v0  ;;  %v8381_v38 = vpack.c.bf16 %v7131_v36, %v7130_v35  ;;  %v7135_v41 = vld [vmem:[%s9979_s2 + $0x10] sm:$0xff]  ;;  %v7136_v42 = vld [vmem:[%s9979_s2 + $0x18] sm:$0xff]  ;;  %v9028_v43 = vpack.c.bf16 %v522_v40, %v521_v39  ;;  %v7137_v45 = vld [vmem:[%s9979_s2 + $0x20] sm:$0xff] }
   0xb   :  { %7720 = vmatmul.mubr.msk.f32.vlgmr.msra.gmra.mrb[0].mxu0 %vm32_vm1, %v20_v18  ;;  %v9031_v44 = vpack.c.bf16 %v7136_v42, %v7135_v41  ;;  %v7138_v46 = vld [vmem:[%s9979_s2 + $0x28] sm:$0xff]  ;;  %v7141_v47 = vld [vmem:[%s9979_s2 + $0x30] sm:$0xff]  ;;  %v7142_v48 = vld [vmem:[%s9979_s2 + $0x38] sm:$0xff] }
   0xc   :  { %7731 = vmatmul.mubr.msk.f32.vlgmr.msra.gmra.mrb[0].mxu1 %vm32_vm1, %v20_v18  ;;  %8361 = vmatpush3.bf16.msra.mxu0 %v8360_v19  ;;  %v9049_v49 = vpack.c.bf16 %v7138_v46, %v7137_v45  ;;  %v9054_v50 = vpack.c.bf16 %v7142_v48, %v7141_v47  ;;  %v7143_v51 = vld [vmem:[%s9979_s2 + $0x40] sm:$0xff]  ;;  %v7144_v52 = vld [vmem:[%s9979_s2 + $0x48] sm:$0xff]  ;;  %v7145_v53 = vld [vmem:[%s9979_s2 + $0x50] sm:$0xff] }
   0xd   :  { %8367 = vmatpush3.bf16.msra.mxu1 %v8366_v20  ;;  %8362 = vmatprep.subr.bf16.mxu0 %v8879_v0  ;;  %v7146_v54 = vld [vmem:[%s9979_s2 + $0x58] sm:$0xff]  ;;  %v9075_v55 = vpack.c.bf16 %v7144_v52, %v7143_v51  ;;  %v7098_v2 = vld [vmem:[%s9980_s3] ss:$0 sm:$0xff]  ;;  %v7105_v6 = vld [vmem:[%s9980_s3 + $0x1] ss:$0 sm:$0xff] }
   0xe   :  { %8368 = vmatprep.subr.bf16.mxu1 %v8879_v0  ;;  %7752 = vmatprep.mubr.msk.f32.mxu1 %vm8880_vm0, %v8881_v8  ;;  %v9080_v56 = vpack.c.bf16 %v7146_v54, %v7145_v53  ;;  %v7119_v16 = vld [vmem:[%s9980_s3 + $0x3] ss:$0 sm:$0xff]  ;;  %v7126_v23 = vld [vmem:[%s9980_s3 + $0x4] ss:$0 sm:$0xff]  ;;  %v673_v42 = vld [vmem:[%s9981_s4] sm:$0x1] }
   0xf   :  { %7741 = vmatprep.mubr.msk.f32.mxu0 %vm8880_vm0, %v8881_v8  ;;  %v7147_v46 = vld [vmem:[%s9981_s4 + $0x1] sm:$0x1]  ;;  %v7112_v47 = vld [vmem:[%s9980_s3 + $0x2] ss:$0 sm:$0xff] }
  0x10   :  { %8364 = vmatpush3.bf16.msra.mxu0 %v8363_v25 }
  0x11   :  { %8370 = vmatpush3.bf16.msra.mxu1 %v8369_v26  ;;  %8371 = vmatprep.subr.bf16.mxu0 %v8879_v0 }
  0x12   :  { %8377 = vmatprep.subr.bf16.mxu1 %v8879_v0 }
  0x13   :  { %7742 = vmatmul.mubr.msk.f32.vlgmr.msra.gmra.mrb[2].mxu0 %vm32_vm1, %v20_v18 }
  0x14   :  { %7753 = vmatmul.mubr.msk.f32.vlgmr.msra.gmra.mrb[2].mxu1 %vm32_vm1, %v20_v18  ;;  %8373 = vmatpush3.bf16.msra.mxu0 %v8372_v31 }
  0x15   :  { %8379 = vmatpush3.bf16.msra.mxu1 %v8378_v32  ;;  %8374 = vmatprep.subr.bf16.mxu0 %v8879_v0 }
  0x16   :  { %8380 = vmatprep.subr.bf16.mxu1 %v8879_v0  ;;  %7763 = vmatprep.mubr.msk.f32.mxu0 %vm8880_vm0, %v8881_v8 }
  0x17   :  { %7774 = vmatprep.mubr.msk.f32.mxu1 %vm8880_vm0, %v8881_v8 }
  0x18   :  { %8376 = vmatpush3.bf16.msra.mxu0 %v8375_v37 }
  0x19   :  { %8382 = vmatpush3.bf16.msra.mxu1 %v8381_v38  ;;  %8383 = vmatprep.subr.bf16.mxu0 %v8879_v0 }
  0x1a   :  { %8386 = vmatprep.subr.bf16.mxu1 %v8879_v0 }
  0x1b   :  { %7764 = vmatmul.mubr.msk.f32.vlgmr.msra.gmra.mrb[4].mxu0 %vm32_vm1, %v20_v18 }
  0x1c   :  { %7775 = vmatmul.mubr.msk.f32.vlgmr.msra.gmra.mrb[4].mxu1 %vm32_vm1, %v20_v18  ;;  %8385 = vmatpush3.bf16.msra.mxu0 %v9028_v43 }
  0x1d   :  { %8388 = vmatpush3.bf16.msra.mxu1 %v9031_v44  ;;  %7781 = vmatprep.mubr.msk.f32.mxu0 %vm8880_vm0, %v8881_v8 }
  0x1e   :  { %7788 = vmatprep.mubr.msk.f32.mxu1 %vm8880_vm0, %v8881_v8  ;;  %8389 = vmatprep.subr.bf16.mxu0 %v8879_v0 }
  0x1f   :  { %7782 = vmatmul.mubr.f32.vlgmr.msra.gmra.mrb[6].mxu0 %v8881_v8  ;;  %8392 = vmatprep.subr.bf16.mxu1 %v8879_v0 }
  0x20   :  { %7789 = vmatmul.mubr.f32.vlgmr.msra.gmra.mrb[6].mxu1 %v8881_v8  ;;  %8391 = vmatpush3.bf16.msra.mxu0 %v9049_v49 }
  0x21   :  { %8394 = vmatpush3.bf16.msra.mxu1 %v9054_v50  ;;  %7795 = vmatprep.mubr.msk.f32.mxu0 %vm8880_vm0, %v8881_v8 }
  0x22   :  { %7802 = vmatprep.mubr.msk.f32.mxu1 %vm8880_vm0, %v8881_v8  ;;  %8395 = vmatprep.subr.bf16.mxu0 %v8879_v0 }
  0x23   :  { %7796 = vmatmul.mubr.f32.vlgmr.msra.gmra.mrb[8].mxu0 %v8881_v8  ;;  %8398 = vmatprep.subr.bf16.mxu1 %v8879_v0 }
  0x24   :  { %7803 = vmatmul.mubr.f32.vlgmr.msra.gmra.mrb[8].mxu1 %v8881_v8  ;;  %8397 = vmatpush3.bf16.msra.mxu0 %v9075_v55 }
  0x25   :  { %7809 = vmatprep.mubr.msk.f32.mxu0 %vm8880_vm0, %v8881_v8  ;;  %8400 = vmatpush3.bf16.msra.mxu1 %v9080_v56 }
  0x26   :  { %7816 = vmatprep.mubr.msk.f32.mxu1 %vm8880_vm0, %v8881_v8  ;;  %8401 = vmatprep.subr.bf16.mxu0 %v8879_v0 }
  0x27   :  { %7810 = vmatmul.mubr.f32.vlgmr.msra.gmra.mrb[10].mxu0 %v8881_v8  ;;  %8404 = vmatprep.subr.bf16.mxu1 %v8879_v0 }
  0x28   :  { %7817 = vmatmul.mubr.f32.vlgmr.msra.gmra.mrb[10].mxu1 %v8881_v8  ;;  %8403 = vmatpush3.bf16.msra.mxu0 %v9028_v43 }
  0x29   :  { %8406 = vmatpush3.bf16.msra.mxu1 %v9031_v44  ;;  %7823 = vmatprep.mubr.msk.f32.mxu0 %vm8880_vm0, %v8881_v8 }
  0x2a   :  { %7830 = vmatprep.mubr.msk.f32.mxu1 %vm8880_vm0, %v8881_v8  ;;  %8407 = vmatprep.subr.bf16.mxu0 %v8879_v0 }
  0x2b   :  { %8410 = vmatprep.subr.bf16.mxu1 %v8879_v0 }
  0xde   :  { %v102_v57 = vpop.f32.mrb[0].mxu0 }
  0xdf   :  { %v185_v58 = vpop.f32.mrb[0].mxu1  ;;  %v7721_v59 = vpop.f32.mrb[1].mxu0  ;;  %v9112_v9 = vadd.f32 %v7098_v2, %v102_v57 }
  0xe0   :  { %v7732_v60 = vpop.f32.mrb[1].mxu1  ;;  %v9114_v11 = vadd.f32 %v7105_v6, %v185_v58 }
  0xe6   :  { %v268_v61 = vpop.f32.mrb[2].mxu0 }
  0xe7   :  { %v351_v62 = vpop.f32.mrb[2].mxu1  ;;  %v7743_v63 = vpop.f32.mrb[3].mxu0  ;;  %v9139_v54 = vadd.f32 %v7112_v47, %v268_v61 }
  0xe8   :  { %v7754_v1 = vpop.f32.mrb[3].mxu1  ;;  %v9121_v22 = vadd.f32 %v7119_v16, %v351_v62  ;;  %v7133_v62 = vld [vmem:[%s9980_s3 + $0x5] ss:$0 sm:$0xff] }
  0xee   :  { %v434_v3 = vpop.f32.mrb[4].mxu0 }
  0xef   :  { %v517_v4 = vpop.f32.mrb[4].mxu1  ;;  %v7765_v5 = vpop.f32.mrb[5].mxu0  ;;  %v9127_v29 = vadd.f32 %v7126_v23, %v434_v3 }
  0xf0   :  { %v7776_v7 = vpop.f32.mrb[5].mxu1  ;;  %v9145_v1 = vadd.f32 %v7133_v62, %v517_v4 }
  0xf2   :  { %v593_v10 = vpop.f32.mrb[6].mxu0 }
  0xf3   :  { %v744_v12 = vadd.f32 %v593_v10, %v9112_v9  ;;  %v666_v13 = vpop.f32.mrb[6].mxu1  ;;  %v7783_v14 = vpop.f32.mrb[7].mxu0 }
  0xf4   :  { %v7790_v15 = vpop.f32.mrb[7].mxu1  ;;  %v751_v18 = vadd.f32 %v666_v13, %v9114_v11 }
  0xf5   :  { %v7139_v17 = vmul.f32 -1.442695, %v744_v12 }
  0xf6   :  { %v740_v19 = vpop.f32.mrb[8].mxu0  ;;  %v7140_v26 = vmul.f32 -1.442695, %v751_v18 }
  0xf7   :  { %8639 = vpow2.f32 %v7139_v17  ;;  %v836_v20 = vpop.f32.mrb[8].mxu1  ;;  %v7797_v21 = vpop.f32.mrb[9].mxu0  ;;  %v741_v48 = vadd.f32 %v740_v19, %v673_v42 }
  0xf8   :  { %v989_v24 = vrot.slane %v836_v20, 3  ;;  %v7804_v25 = vpop.f32.mrb[9].mxu1  ;;  %8641 = vpow2.f32 %v7140_v26 }
  0xfa   :  { %v991_v27 = vadd.f32 %v989_v24, %v9121_v22  ;;  %v909_v28 = vpop.f32.mrb[10].mxu0 }
  0xfb   :  { %v999_v30 = vrot.slane %v909_v28, 3  ;;  %v7811_v31 = vpop.f32.mrb[11].mxu0  ;;  %v984_v32 = vpop.f32.mrb[10].mxu1 }
  0xfc   :  { %v7148_v33 = vmul.f32 -1.442695, %v991_v27  ;;  %v7818_v34 = vpop.f32.mrb[11].mxu1  ;;  %v985_v52 = vadd.f32 %v7147_v46, %v984_v32 }
  0xfd   :  { %v1001_v35 = vadd.f32 %v999_v30, %v9127_v29 }
  0xfe   :  { %8643 = vpow2.f32 %v7148_v33  ;;  %v1009_v60 = vrot.slane %v985_v52, 3 }
  0xff   :  { %v7149_v37 = vmul.f32 -1.442695, %v1001_v35 }
 0x101   :  { %v8640_v36 = vpop.eup %8639 }
 0x102   :  { %v748_v38 = vadd.f32 1.0, %v8640_v36  ;;  %v8642_v39 = vpop.eup %8641 }
 0x103   :  { %v755_v45 = vadd.f32 1.0, %v8642_v39 }
 0x104   :  { %8645 = vrcp.f32 %v748_v38 }
 0x105   :  { %8647 = vpow2.f32 %v7149_v37 }
 0x108   :  { %v8644_v40 = vpop.eup %8643 }
 0x109   :  { %v995_v41 = vadd.f32 1.0, %v8644_v40 }
 0x10b   :  { %8649 = vrcp.f32 %v995_v41 }
 0x10c   :  { %8651 = vrcp.f32 %v755_v45 }
 0x10e   :  { %v8646_v51 = vpop.eup %8645 }
 0x10f   :  { %v8648_v53 = vpop.eup %8647  ;;  %v758_v57 = vmul.f32 %v8646_v51, %v741_v48 }
 0x110   :  { %v1005_v59 = vadd.f32 1.0, %v8648_v53  ;;  %v1169_v53 = vld [vmem:[%s9981_s4] sm:$0x1] }
 0x111   :  { %v759_v58 = vadd.f32 %v758_v57, %v9139_v54 }
 0x113   :  { %8653 = vtanh.f32 %v759_v58 }
 0x114   :  { %8655 = vrcp.f32 %v1005_v59 }
 0x115   :  { %v8650_v63 = vpop.eup %8649 }
 0x116   :  { %v1011_v2 = vmul.f32 %v8650_v63, %v1009_v60  ;;  %v8652_v61 = vpop.eup %8651 }
 0x117   :  { %v761_v5 = vsub.f32 1.0, %v8652_v61  ;;  %v763_v10 = vmul.f32 0.0, %v8652_v61 }
 0x118   :  { %v1012_v3 = vadd.f32 %v1011_v2, %v9145_v1 }
 0x11a   :  { %8657 = vtanh.f32 %v1012_v3 }
 0x11d   :  { %v8654_v6 = vpop.eup %8653 }
 0x11e   :  { %v762_v7 = vmul.f32 %v8654_v6, %v761_v5  ;;  %v8656_v12 = vpop.eup %8655  ;;  %v7167_v6 = vld [vmem:[%s9981_s4 + $0x1] sm:$0x1] }
 0x11f   :  { %v1014_v4 = vsub.f32 1.0, %v8656_v12  ;;  %v1016_v15 = vmul.f32 0.0, %v8656_v12 }
 0x120   :  { %v9148_v13 = vadd.f32 %v763_v10, %v762_v7 }
 0x122   :  { %7824 = vmatmul.mubr.msk.f32.vlgmr.msra.gmra.mrb[12].mxu0 %vm523_vm2, %v9148_v13  ;;  %7831 = vmatmul.mubr.msk.f32.vlgmr.msra.gmra.mrb[12].mxu1 %vm523_vm2, %v9148_v13  ;;  %766 = vst.msk [vmem:[#allocation2] sm:$0x1] %vm765_vm3, %v9148_v13  ;;  %v1268_v3 = vrot.slane %v9148_v13, 7 }
 0x123   :  { %8409 = vmatpush3.bf16.msra.mxu0 %v9049_v49  ;;  %7837 = vmatprep.mubr.msk.f32.mxu0 %vm8880_vm0, %v8881_v8 }
 0x124   :  { %v8658_v14 = vpop.eup %8657  ;;  %8413 = vmatprep.subr.bf16.mxu0 %v8879_v0  ;;  %8412 = vmatpush3.bf16.msra.mxu1 %v9054_v50 }
 0x125   :  { %v1015_v16 = vmul.f32 %v8658_v14, %v1014_v4  ;;  %7844 = vmatprep.mubr.msk.f32.mxu1 %vm8880_vm0, %v8881_v8  ;;  %8416 = vmatprep.subr.bf16.mxu1 %v8879_v0 }
 0x126   :  { %7838 = vmatmul.mubr.msk.f32.vlgmr.msra.gmra.mrb[14].mxu0 %vm523_vm2, %v9148_v13 }
 0x127   :  { %8415 = vmatpush3.bf16.msra.mxu0 %v9075_v55  ;;  %7851 = vmatprep.mubr.msk.f32.mxu0 %vm8880_vm0, %v8881_v8  ;;  %v9169_v17 = vadd.f32 %v1016_v15, %v1015_v16 }
 0x128   :  { %8419 = vmatprep.subr.bf16.mxu0 %v8879_v0 }
 0x129   :  { %1019 = vst.msk [vmem:[#allocation3] sm:$0x20] %vm1018_vm4, %v9169_v17  ;;  %v1277_v18 = vrot.slane %v9169_v17, 5  ;;  %v1523_v15 = vrot.slane %v9169_v17, 1 }
 0x12b   :  { %7845 = vmatmul.mubr.msk.f32.vlgmr.msra.gmra.mrb[14].mxu1 %vm523_vm2, %v1277_v18  ;;  %7852 = vmatmul.mubr.msk.f32.vlgmr.msra.gmra.mrb[16].mxu0 %vm523_vm2, %v1277_v18 }
 0x12c   :  { %8418 = vmatpush3.bf16.msra.mxu1 %v9080_v56  ;;  %7858 = vmatprep.mubr.msk.f32.mxu1 %vm8880_vm0, %v8881_v8 }
 0x12d   :  { %8422 = vmatprep.subr.bf16.mxu1 %v8879_v0  ;;  %8421 = vmatpush3.bf16.msra.mxu0 %v9028_v43 }
 0x12e   :  { %7865 = vmatprep.mubr.msk.f32.mxu0 %vm8880_vm0, %v8881_v8  ;;  %8425 = vmatprep.subr.bf16.mxu0 %v8879_v0 }
 0x12f   :  { %7859 = vmatmul.mubr.msk.f32.vlgmr.msra.gmra.mrb[16].mxu1 %vm523_vm2, %v1277_v18 }
 0x130   :  { %8424 = vmatpush3.bf16.msra.mxu1 %v9031_v44  ;;  %7872 = vmatprep.mubr.msk.f32.mxu1 %vm8880_vm0, %v8881_v8 }
 0x131   :  { %8428 = vmatprep.subr.bf16.mxu1 %v8879_v0 }
 0x1f5   :  { %v1091_v19 = vpop.f32.mrb[12].mxu0  ;;  %v1163_v20 = vpop.f32.mrb[12].mxu1 }
 0x1f6   :  { %v1241_v21 = vrot.slane %v1091_v19, 7  ;;  %v1251_v23 = vrot.slane %v1163_v20, 7  ;;  %v7825_v24 = vpop.f32.mrb[13].mxu0  ;;  %v7832_v25 = vpop.f32.mrb[13].mxu1 }
 0x1f8   :  { %v1243_v26 = vadd.f32 %v1241_v21, %v9112_v9  ;;  %v1253_v27 = vadd.f32 %v1251_v23, %v9114_v11 }
 0x1f9   :  { %v1236_v28 = vpop.f32.mrb[14].mxu0 }
 0x1fa   :  { %v7157_v30 = vmul.f32 -1.442695, %v1243_v26  ;;  %v7158_v31 = vmul.f32 -1.442695, %v1253_v27  ;;  %v7839_v32 = vpop.f32.mrb[15].mxu0  ;;  %v1237_v57 = vadd.f32 %v1236_v28, %v1169_v53 }
 0x1fc   :  { %8659 = vpow2.f32 %v7157_v30  ;;  %v1261_v63 = vrot.slane %v1237_v57, 7 }
 0x1fd   :  { %8661 = vpow2.f32 %v7158_v31 }
 0x1fe   :  { %v1346_v33 = vpop.f32.mrb[14].mxu1  ;;  %v1418_v34 = vpop.f32.mrb[16].mxu0 }
 0x1ff   :  { %v1496_v35 = vrot.slane %v1346_v33, 4  ;;  %v1506_v36 = vrot.slane %v1418_v34, 4  ;;  %v7846_v37 = vpop.f32.mrb[15].mxu1  ;;  %v7853_v38 = vpop.f32.mrb[17].mxu0 }
 0x201   :  { %v1498_v39 = vadd.f32 %v1496_v35, %v9121_v22  ;;  %v1508_v40 = vadd.f32 %v1506_v36, %v9127_v29 }
 0x202   :  { %v1491_v41 = vpop.f32.mrb[16].mxu1 }
 0x203   :  { %v7169_v42 = vmul.f32 -1.442695, %v1498_v39  ;;  %v7170_v45 = vmul.f32 -1.442695, %v1508_v40  ;;  %v7860_v46 = vpop.f32.mrb[17].mxu1  ;;  %v1492_v12 = vadd.f32 %v7167_v6, %v1491_v41 }
 0x205   :  { %8663 = vpow2.f32 %v7169_v42  ;;  %v1516_v4 = vrot.slane %v1492_v12, 4 }
 0x206   :  { %v8660_v47 = vpop.eup %8659  ;;  %8665 = vpow2.f32 %v7170_v45 }
 0x207   :  { %v8662_v48 = vpop.eup %8661  ;;  %v1247_v51 = vadd.f32 1.0, %v8660_v47 }
 0x208   :  { %v1257_v52 = vadd.f32 1.0, %v8662_v48 }
 0x209   :  { %8667 = vrcp.f32 %v1247_v51 }
 0x20a   :  { %8669 = vrcp.f32 %v1257_v52 }
 0x20f   :  { %v8664_v58 = vpop.eup %8663 }
 0x210   :  { %v8666_v59 = vpop.eup %8665  ;;  %v1502_v60 = vadd.f32 1.0, %v8664_v58 }
 0x211   :  { %v1512_v62 = vadd.f32 1.0, %v8666_v59 }
 0x212   :  { %8671 = vrcp.f32 %v1502_v60 }
 0x213   :  { %v8668_v2 = vpop.eup %8667  ;;  %8673 = vrcp.f32 %v1512_v62 }
 0x214   :  { %v8670_v61 = vpop.eup %8669  ;;  %v1263_v5 = vmul.f32 %v8668_v2, %v1261_v63 }
 0x215   :  { %v1270_v7 = vmul.f32 %v8670_v61, %v1268_v3  ;;  %v1266_v20 = vsub.f32 1.0, %v8670_v61 }
 0x216   :  { %v1264_v10 = vadd.f32 %v1263_v5, %v9139_v54  ;;  %v1679_v5 = vld [vmem:[%s9981_s4] sm:$0x1] }
 0x218   :  { %8675 = vtanh.f32 %v1264_v10 }
 0x21c   :  { %v8672_v14 = vpop.eup %8671 }
 0x21d   :  { %v8674_v16 = vpop.eup %8673  ;;  %v1518_v18 = vmul.f32 %v8672_v14, %v1516_v4 }
 0x21e   :  { %v1525_v19 = vmul.f32 %v8674_v16, %v1523_v15  ;;  %v1521_v17 = vsub.f32 1.0, %v8674_v16 }
 0x21f   :  { %v1519_v13 = vadd.f32 %v1518_v18, %v9145_v1 }
 0x221   :  { %8677 = vtanh.f32 %v1519_v13  ;;  %v7188_v13 = vld [vmem:[%s9981_s4 + $0x1] sm:$0x1] }
 0x222   :  { %v8676_v21 = vpop.eup %8675 }
 0x223   :  { %v1267_v23 = vmul.f32 %v8676_v21, %v1266_v20 }
 0x225   :  { %v9204_v24 = vadd.f32 %v1270_v7, %v1267_v23 }
 0x227   :  { %v1532_v25 = vrot.slane %v9204_v24, 1  ;;  %1273 = vst.msk [vmem:[#allocation2] sm:$0x2] %vm1272_vm5, %v9204_v24  ;;  %v1778_v16 = vrot.slane %v9204_v24, 7 }
 0x229   :  { %7866 = vmatmul.mubr.msk.f32.vlgmr.msra.gmra.mrb[18].mxu0 %vm523_vm2, %v1532_v25  ;;  %7873 = vmatmul.mubr.msk.f32.vlgmr.msra.gmra.mrb[18].mxu1 %vm523_vm2, %v1532_v25 }
 0x22a   :  { %8427 = vmatpush3.bf16.msra.mxu0 %v9049_v49  ;;  %7879 = vmatprep.mubr.msk.f32.mxu0 %vm8880_vm0, %v8881_v8 }
 0x22b   :  { %v8678_v26 = vpop.eup %8677  ;;  %8431 = vmatprep.subr.bf16.mxu0 %v8879_v0  ;;  %8430 = vmatpush3.bf16.msra.mxu1 %v9054_v50 }
 0x22c   :  { %v1522_v27 = vmul.f32 %v8678_v26, %v1521_v17  ;;  %7886 = vmatprep.mubr.msk.f32.mxu1 %vm8880_vm0, %v8881_v8  ;;  %8434 = vmatprep.subr.bf16.mxu1 %v8879_v0 }
 0x22d   :  { %7880 = vmatmul.mubr.msk.f32.vlgmr.msra.gmra.mrb[20].mxu0 %vm523_vm2, %v1532_v25 }
 0x22e   :  { %8433 = vmatpush3.bf16.msra.mxu0 %v9075_v55  ;;  %7893 = vmatprep.mubr.msk.f32.mxu0 %vm8880_vm0, %v8881_v8  ;;  %v9223_v28 = vadd.f32 %v1525_v19, %v1522_v27 }
 0x22f   :  { %8437 = vmatprep.subr.bf16.mxu0 %v8879_v0 }
 0x230   :  { %1528 = vst.msk [vmem:[#allocation3] sm:$0x10] %vm1527_vm6, %v9223_v28  ;;  %v1787_v30 = vrot.slane %v9223_v28, 4  ;;  %v2033_v26 = vrot.slane %v9223_v28, 1 }
 0x232   :  { %7887 = vmatmul.mubr.msk.f32.vlgmr.msra.gmra.mrb[20].mxu1 %vm523_vm2, %v1787_v30  ;;  %7894 = vmatmul.mubr.msk.f32.vlgmr.msra.gmra.mrb[22].mxu0 %vm523_vm2, %v1787_v30 }
 0x233   :  { %8436 = vmatpush3.bf16.msra.mxu1 %v9080_v56  ;;  %7900 = vmatprep.mubr.msk.f32.mxu1 %vm8880_vm0, %v8881_v8 }
 0x234   :  { %8440 = vmatprep.subr.bf16.mxu1 %v8879_v0  ;;  %8439 = vmatpush3.bf16.msra.mxu0 %v9028_v43 }
 0x235   :  { %7907 = vmatprep.mubr.msk.f32.mxu0 %vm8880_vm0, %v8881_v8  ;;  %8443 = vmatprep.subr.bf16.mxu0 %v8879_v0 }
 0x236   :  { %7901 = vmatmul.mubr.msk.f32.vlgmr.msra.gmra.mrb[22].mxu1 %vm523_vm2, %v1787_v30 }
 0x237   :  { %8442 = vmatpush3.bf16.msra.mxu1 %v9031_v44  ;;  %7914 = vmatprep.mubr.msk.f32.mxu1 %vm8880_vm0, %v8881_v8 }
 0x238   :  { %8446 = vmatprep.subr.bf16.mxu1 %v8879_v0 }
 0x2fc   :  { %v1601_v31 = vpop.f32.mrb[18].mxu0  ;;  %v1673_v32 = vpop.f32.mrb[18].mxu1 }
 0x2fd   :  { %v1751_v33 = vrot.slane %v1601_v31, 6  ;;  %v1761_v34 = vrot.slane %v1673_v32, 6  ;;  %v7867_v35 = vpop.f32.mrb[19].mxu0  ;;  %v7874_v36 = vpop.f32.mrb[19].mxu1 }
 0x2ff   :  { %v1753_v37 = vadd.f32 %v1751_v33, %v9112_v9  ;;  %v1763_v38 = vadd.f32 %v1761_v34, %v9114_v11 }
 0x300   :  { %v1746_v39 = vpop.f32.mrb[20].mxu0 }
 0x301   :  { %v7178_v40 = vmul.f32 -1.442695, %v1753_v37  ;;  %v7179_v41 = vmul.f32 -1.442695, %v1763_v38  ;;  %v7881_v42 = vpop.f32.mrb[21].mxu0  ;;  %v1747_v6 = vadd.f32 %v1746_v39, %v1679_v5 }
 0x303   :  { %8679 = vpow2.f32 %v7178_v40  ;;  %v1771_v14 = vrot.slane %v1747_v6, 6 }
 0x304   :  { %8681 = vpow2.f32 %v7179_v41 }
 0x305   :  { %v1856_v45 = vpop.f32.mrb[20].mxu1  ;;  %v1928_v46 = vpop.f32.mrb[22].mxu0 }
 0x306   :  { %v2006_v47 = vrot.slane %v1856_v45, 5  ;;  %v2016_v48 = vrot.slane %v1928_v46, 5  ;;  %v7888_v51 = vpop.f32.mrb[21].mxu1  ;;  %v7895_v52 = vpop.f32.mrb[23].mxu0 }
 0x308   :  { %v2008_v53 = vadd.f32 %v2006_v47, %v9121_v22  ;;  %v2018_v57 = vadd.f32 %v2016_v48, %v9127_v29 }
 0x309   :  { %v2001_v58 = vpop.f32.mrb[22].mxu1 }
 0x30a   :  { %v7190_v59 = vmul.f32 -1.442695, %v2008_v53  ;;  %v7191_v60 = vmul.f32 -1.442695, %v2018_v57  ;;  %v7902_v62 = vpop.f32.mrb[23].mxu1  ;;  %v2002_v23 = vadd.f32 %v7188_v13, %v2001_v58 }
 0x30c   :  { %8683 = vpow2.f32 %v7190_v59  ;;  %v2026_v25 = vrot.slane %v2002_v23, 5 }
 0x30d   :  { %v8680_v63 = vpop.eup %8679  ;;  %8685 = vpow2.f32 %v7191_v60 }
 0x30e   :  { %v8682_v2 = vpop.eup %8681  ;;  %v1757_v3 = vadd.f32 1.0, %v8680_v63 }
 0x30f   :  { %v1767_v61 = vadd.f32 1.0, %v8682_v2 }
 0x310   :  { %8687 = vrcp.f32 %v1757_v3 }
 0x311   :  { %8689 = vrcp.f32 %v1767_v61 }
 0x316   :  { %v8684_v7 = vpop.eup %8683 }
 0x317   :  { %v8686_v10 = vpop.eup %8685  ;;  %v2012_v12 = vadd.f32 1.0, %v8684_v7 }
 0x318   :  { %v2022_v4 = vadd.f32 1.0, %v8686_v10 }
 0x319   :  { %8691 = vrcp.f32 %v2012_v12 }
 0x31a   :  { %v8688_v15 = vpop.eup %8687  ;;  %8693 = vrcp.f32 %v2022_v4 }
 0x31b   :  { %v8690_v18 = vpop.eup %8689  ;;  %v1773_v19 = vmul.f32 %v8688_v15, %v1771_v14 }
 0x31c   :  { %v1780_v20 = vmul.f32 %v8690_v18, %v1778_v16  ;;  %v1776_v32 = vsub.f32 1.0, %v8690_v18  ;;  %v2189_v16 = vld [vmem:[%s9981_s4] sm:$0x1] }
 0x31d   :  { %v1774_v21 = vadd.f32 %v1773_v19, %v9139_v54 }
 0x31f   :  { %8695 = vtanh.f32 %v1774_v21 }
 0x323   :  { %v8692_v17 = vpop.eup %8691 }
 0x324   :  { %v8694_v27 = vpop.eup %8693  ;;  %v2028_v30 = vmul.f32 %v8692_v17, %v2026_v25 }
 0x325   :  { %v2035_v31 = vmul.f32 %v8694_v27, %v2033_v26  ;;  %v2031_v28 = vsub.f32 1.0, %v8694_v27 }
 0x326   :  { %v2029_v24 = vadd.f32 %v2028_v30, %v9145_v1  ;;  %v7209_v30 = vld [vmem:[%s9981_s4 + $0x1] sm:$0x1] }
 0x328   :  { %8697 = vtanh.f32 %v2029_v24 }
 0x329   :  { %v8696_v33 = vpop.eup %8695 }
 0x32a   :  { %v1777_v34 = vmul.f32 %v8696_v33, %v1776_v32 }
 0x32c   :  { %v9258_v35 = vadd.f32 %v1780_v20, %v1777_v34 }
 0x32e   :  { %1783 = vst.msk [vmem:[#allocation2] sm:$0x4] %vm1782_vm7, %v9258_v35  ;;  %v2042_v36 = vrot.slane %v9258_v35, 2  ;;  %v2288_v17 = vrot.slane %v9258_v35, 7 }
 0x330   :  { %7908 = vmatmul.mubr.msk.f32.vlgmr.msra.gmra.mrb[24].mxu0 %vm523_vm2, %v2042_v36  ;;  %7915 = vmatmul.mubr.msk.f32.vlgmr.msra.gmra.mrb[24].mxu1 %vm523_vm2, %v2042_v36 }
 0x331   :  { %8445 = vmatpush3.bf16.msra.mxu0 %v9049_v49  ;;  %7921 = vmatprep.mubr.msk.f32.mxu0 %vm8880_vm0, %v8881_v8 }
 0x332   :  { %v8698_v37 = vpop.eup %8697  ;;  %8449 = vmatprep.subr.bf16.mxu0 %v8879_v0  ;;  %8448 = vmatpush3.bf16.msra.mxu1 %v9054_v50 }
 0x333   :  { %v2032_v38 = vmul.f32 %v8698_v37, %v2031_v28  ;;  %7928 = vmatprep.mubr.msk.f32.mxu1 %vm8880_vm0, %v8881_v8  ;;  %8452 = vmatprep.subr.bf16.mxu1 %v8879_v0 }
 0x334   :  { %7922 = vmatmul.mubr.msk.f32.vlgmr.msra.gmra.mrb[26].mxu0 %vm523_vm2, %v2042_v36 }
 0x335   :  { %8451 = vmatpush3.bf16.msra.mxu0 %v9075_v55  ;;  %7935 = vmatprep.mubr.msk.f32.mxu0 %vm8880_vm0, %v8881_v8  ;;  %v9277_v39 = vadd.f32 %v2035_v31, %v2032_v38 }
 0x336   :  { %8455 = vmatprep.subr.bf16.mxu0 %v8879_v0 }
 0x337   :  { %2038 = vst.msk [vmem:[#allocation3] sm:$0x8] %vm2037_vm8, %v9277_v39  ;;  %v2296_v40 = vrot.slane %v9277_v39, 3  ;;  %v2542_v36 = vrot.slane %v9277_v39, 1 }
 0x339   :  { %7929 = vmatmul.mubr.msk.f32.vlgmr.msra.gmra.mrb[26].mxu1 %vm523_vm2, %v2296_v40  ;;  %7936 = vmatmul.mubr.msk.f32.vlgmr.msra.gmra.mrb[28].mxu0 %vm523_vm2, %v2296_v40 }
 0x33a   :  { %8454 = vmatpush3.bf16.msra.mxu1 %v9080_v56  ;;  %7942 = vmatprep.mubr.msk.f32.mxu1 %vm8880_vm0, %v8881_v8 }
 0x33b   :  { %8458 = vmatprep.subr.bf16.mxu1 %v8879_v0  ;;  %8457 = vmatpush3.bf16.msra.mxu0 %v9028_v43 }
 0x33c   :  { %7949 = vmatprep.mubr.msk.f32.mxu0 %vm8880_vm0, %v8881_v8  ;;  %8461 = vmatprep.subr.bf16.mxu0 %v8879_v0 }
 0x33d   :  { %7943 = vmatmul.mubr.msk.f32.vlgmr.msra.gmra.mrb[28].mxu1 %vm523_vm2, %v2296_v40 }
 0x33e   :  { %8460 = vmatpush3.bf16.msra.mxu1 %v9031_v44  ;;  %7956 = vmatprep.mubr.msk.f32.mxu1 %vm8880_vm0, %v8881_v8 }
 0x33f   :  { %8464 = vmatprep.subr.bf16.mxu1 %v8879_v0 }
 0x403   :  { %v2111_v41 = vpop.f32.mrb[24].mxu0  ;;  %v2183_v42 = vpop.f32.mrb[24].mxu1 }
 0x404   :  { %v2261_v45 = vrot.slane %v2111_v41, 5  ;;  %v2271_v46 = vrot.slane %v2183_v42, 5  ;;  %v7909_v47 = vpop.f32.mrb[25].mxu0  ;;  %v7916_v43 = vpop.f32.mrb[25].mxu1 }
 0x406   :  { %v2263_v48 = vadd.f32 %v2261_v45, %v9112_v9  ;;  %v2273_v51 = vadd.f32 %v2271_v46, %v9114_v11 }
 0x407   :  { %v2256_v52 = vpop.f32.mrb[26].mxu0 }
 0x408   :  { %v7199_v53 = vmul.f32 -1.442695, %v2263_v48  ;;  %v7200_v57 = vmul.f32 -1.442695, %v2273_v51  ;;  %v7923_v58 = vpop.f32.mrb[27].mxu0  ;;  %v2257_v18 = vadd.f32 %v2256_v52, %v2189_v16  ;;  %v7235_v48 = vld [vmem:[%s9979_s2 + $0x10] sm:$0xff] }
 0x409   :  { %v7236_v52 = vld [vmem:[%s9979_s2 + $0x18] sm:$0xff] }
 0x40a   :  { %8699 = vpow2.f32 %v7199_v53  ;;  %v2281_v23 = vrot.slane %v2257_v18, 5  ;;  %v8477_v53 = vpack.c.bf16 %v7236_v52, %v7235_v48  ;;  %v7238_v52 = vld [vmem:[%s9979_s2 + $0x20] sm:$0xff] }
 0x40b   :  { %8701 = vpow2.f32 %v7200_v57 }
 0x40c   :  { %v2365_v44 = vpop.f32.mrb[26].mxu1  ;;  %v2437_v59 = vpop.f32.mrb[28].mxu0 }
 0x40d   :  { %v2515_v60 = vrot.slane %v2365_v44, 6  ;;  %v2525_v62 = vrot.slane %v2437_v59, 6  ;;  %v7930_v63 = vpop.f32.mrb[27].mxu1  ;;  %v7937_v2 = vpop.f32.mrb[29].mxu0 }
 0x40f   :  { %v2517_v3 = vadd.f32 %v2515_v60, %v9121_v22  ;;  %v2527_v61 = vadd.f32 %v2525_v62, %v9127_v29 }
 0x410   :  { %v2510_v5 = vpop.f32.mrb[28].mxu1 }
 0x411   :  { %v7211_v6 = vmul.f32 -1.442695, %v2517_v3  ;;  %v7212_v7 = vmul.f32 -1.442695, %v2527_v61  ;;  %v7944_v10 = vpop.f32.mrb[29].mxu1  ;;  %v2511_v32 = vadd.f32 %v7209_v30, %v2510_v5 }
 0x413   :  { %8703 = vpow2.f32 %v7211_v6  ;;  %v2535_v33 = vrot.slane %v2511_v32, 6 }
 0x414   :  { %v8700_v12 = vpop.eup %8699  ;;  %8705 = vpow2.f32 %v7212_v7 }
 0x415   :  { %v8702_v4 = vpop.eup %8701  ;;  %v2267_v14 = vadd.f32 1.0, %v8700_v12 }
 0x416   :  { %v2277_v15 = vadd.f32 1.0, %v8702_v4 }
 0x417   :  { %8707 = vrcp.f32 %v2267_v14 }
 0x418   :  { %8709 = vrcp.f32 %v2277_v15 }
 0x41d   :  { %v8704_v19 = vpop.eup %8703 }
 0x41e   :  { %v8706_v13 = vpop.eup %8705  ;;  %v2521_v20 = vadd.f32 1.0, %v8704_v19 }
 0x41f   :  { %v2531_v21 = vadd.f32 1.0, %v8706_v13 }
 0x420   :  { %8711 = vrcp.f32 %v2521_v20 }
 0x421   :  { %v8708_v25 = vpop.eup %8707  ;;  %8713 = vrcp.f32 %v2531_v21 }
 0x422   :  { %v8710_v26 = vpop.eup %8709  ;;  %v2283_v27 = vmul.f32 %v8708_v25, %v2281_v23 }
 0x423   :  { %v2290_v31 = vmul.f32 %v8710_v26, %v2288_v17  ;;  %v2286_v40 = vsub.f32 1.0, %v8710_v26 }
 0x424   :  { %v2284_v24 = vadd.f32 %v2283_v27, %v9139_v54  ;;  %v2697_v27 = vld [vmem:[%s9981_s4] sm:$0x1] }
 0x426   :  { %8715 = vtanh.f32 %v2284_v24 }
 0x42a   :  { %v8712_v34 = vpop.eup %8711 }
 0x42b   :  { %v8714_v28 = vpop.eup %8713  ;;  %v2537_v37 = vmul.f32 %v8712_v34, %v2535_v33 }
 0x42c   :  { %v2544_v38 = vmul.f32 %v8714_v28, %v2542_v36  ;;  %v2540_v39 = vsub.f32 1.0, %v8714_v28 }
 0x42d   :  { %v2538_v35 = vadd.f32 %v2537_v37, %v9145_v1 }
 0x42f   :  { %8717 = vtanh.f32 %v2538_v35  ;;  %v7230_v35 = vld [vmem:[%s9981_s4 + $0x1] sm:$0x1] }
 0x430   :  { %v8716_v41 = vpop.eup %8715 }
 0x431   :  { %v2287_v42 = vmul.f32 %v8716_v41, %v2286_v40 }
 0x433   :  { %v9312_v45 = vadd.f32 %v2290_v31, %v2287_v42 }
 0x435   :  { %2292 = vst.msk [vmem:[#allocation2] sm:$0x8] %vm2037_vm8, %v9312_v45  ;;  %v2550_v46 = vrot.slane %v9312_v45, 3  ;;  %v2796_v28 = vrot.slane %v9312_v45, 7 }
 0x437   :  { %7950 = vmatmul.mubr.msk.f32.vlgmr.msra.gmra.mrb[30].mxu0 %vm523_vm2, %v2550_v46  ;;  %7957 = vmatmul.mubr.msk.f32.vlgmr.msra.gmra.mrb[30].mxu1 %vm523_vm2, %v2550_v46 }
 0x438   :  { %8463 = vmatpush3.bf16.msra.mxu0 %v9049_v49  ;;  %7963 = vmatprep.mubr.msk.f32.mxu0 %vm8880_vm0, %v8881_v8 }
 0x439   :  { %v8718_v47 = vpop.eup %8717  ;;  %8467 = vmatprep.subr.bf16.mxu0 %v8879_v0  ;;  %8466 = vmatpush3.bf16.msra.mxu1 %v9054_v50 }
 0x43a   :  { %v2541_v43 = vmul.f32 %v8718_v47, %v2540_v39  ;;  %7970 = vmatprep.mubr.msk.f32.mxu1 %vm8880_vm0, %v8881_v8  ;;  %8470 = vmatprep.subr.bf16.mxu1 %v8879_v0 }
 0x43b   :  { %7964 = vmatmul.mubr.msk.f32.vlgmr.msra.gmra.mrb[32].mxu0 %vm523_vm2, %v2550_v46 }
 0x43c   :  { %8469 = vmatpush3.bf16.msra.mxu0 %v9075_v55  ;;  %7977 = vmatprep.mubr.msk.f32.mxu0 %vm8880_vm0, %v8881_v8  ;;  %v9331_v49 = vadd.f32 %v2544_v38, %v2541_v43  ;;  %v3055_v55 = vld [vmem:[%s9979_s2] sm:$0xff] }
 0x43d   :  { %8473 = vmatprep.subr.bf16.mxu0 %v8879_v0 }
 0x43e   :  { %2546 = vst.msk [vmem:[#allocation3] sm:$0x4] %vm1782_vm7, %v9331_v49  ;;  %v2804_v50 = vrot.slane %v9331_v49, 2  ;;  %v3050_v47 = vrot.slane %v9331_v49, 1  ;;  %v7243_v49 = vld [vmem:[%s9979_s2 + $0x30] sm:$0xff] }
 0x440   :  { %7971 = vmatmul.mubr.msk.f32.vlgmr.msra.gmra.mrb[32].mxu1 %vm523_vm2, %v2804_v50  ;;  %7978 = vmatmul.mubr.msk.f32.vlgmr.msra.gmra.mrb[34].mxu0 %vm523_vm2, %v2804_v50 }
 0x441   :  { %8472 = vmatpush3.bf16.msra.mxu1 %v9080_v56  ;;  %7984 = vmatprep.mubr.msk.f32.mxu1 %vm8880_vm0, %v8881_v8  ;;  %v3056_v56 = vld [vmem:[%s9979_s2 + $0x8] sm:$0xff] }
 0x442   :  { %8476 = vmatprep.subr.bf16.mxu1 %v8879_v0  ;;  %7991 = vmatprep.mubr.msk.f32.mxu0 %vm8880_vm0, %v8881_v8  ;;  %v8474_v51 = vpack.c.bf16 %v3056_v56, %v3055_v55 }
 0x444   :  { %7985 = vmatmul.mubr.msk.f32.vlgmr.msra.gmra.mrb[34].mxu1 %vm523_vm2, %v2804_v50  ;;  %8475 = vmatpush3.bf16.msra.mxu0 %v8474_v51 }
 0x445   :  { %7998 = vmatprep.mubr.msk.f32.mxu1 %vm8880_vm0, %v8881_v8  ;;  %8478 = vmatpush3.bf16.msra.mxu1 %v8477_v53  ;;  %v7239_v53 = vld [vmem:[%s9979_s2 + $0x28] sm:$0xff] }
 0x446   :  { %8479 = vmatprep.subr.bf16.mxu0 %v8879_v0  ;;  %8482 = vmatprep.subr.bf16.mxu1 %v8879_v0 }
 0x50a   :  { %v2619_v57 = vpop.f32.mrb[30].mxu0  ;;  %v2691_v58 = vpop.f32.mrb[30].mxu1 }
 0x50b   :  { %v2769_v44 = vrot.slane %v2619_v57, 4  ;;  %v2779_v59 = vrot.slane %v2691_v58, 4  ;;  %v7951_v60 = vpop.f32.mrb[31].mxu0  ;;  %v7958_v62 = vpop.f32.mrb[31].mxu1  ;;  %v7244_v57 = vld [vmem:[%s9979_s2 + $0x38] sm:$0xff] }
 0x50c   :  { %v8483_v60 = vpack.c.bf16 %v7244_v57, %v7243_v49  ;;  %v7246_v62 = vld [vmem:[%s9979_s2 + $0x40] sm:$0xff] }
 0x50d   :  { %v2771_v63 = vadd.f32 %v2769_v44, %v9112_v9  ;;  %v2781_v2 = vadd.f32 %v2779_v59, %v9114_v11  ;;  %v8480_v44 = vpack.c.bf16 %v7239_v53, %v7238_v52 }
 0x50e   :  { %v2764_v3 = vpop.f32.mrb[32].mxu0 }
 0x50f   :  { %v7220_v61 = vmul.f32 -1.442695, %v2771_v63  ;;  %v7221_v5 = vmul.f32 -1.442695, %v2781_v2  ;;  %v7965_v6 = vpop.f32.mrb[33].mxu0  ;;  %v2765_v30 = vadd.f32 %v2764_v3, %v2697_v27  ;;  %v7247_v63 = vld [vmem:[%s9979_s2 + $0x48] sm:$0xff] }
 0x510   :  { %v8486_v3 = vpack.c.bf16 %v7247_v63, %v7246_v62  ;;  %v7249_v6 = vld [vmem:[%s9979_s2 + $0x50] sm:$0xff] }
 0x511   :  { %8719 = vpow2.f32 %v7220_v61  ;;  %v2789_v34 = vrot.slane %v2765_v30, 4 }
 0x512   :  { %8721 = vpow2.f32 %v7221_v5 }
 0x513   :  { %v2873_v7 = vpop.f32.mrb[32].mxu1  ;;  %v2945_v10 = vpop.f32.mrb[34].mxu0 }
 0x514   :  { %v3023_v12 = vrot.slane %v2873_v7, 7  ;;  %v3033_v4 = vrot.slane %v2945_v10, 7  ;;  %v7972_v14 = vpop.f32.mrb[33].mxu1  ;;  %v7979_v15 = vpop.f32.mrb[35].mxu0  ;;  %v7250_v7 = vld [vmem:[%s9979_s2 + $0x58] sm:$0xff] }
 0x515   :  { %v7255_v14 = vld [vmem:[%s9977_s1 + $0xc0] sm:$0xff]  ;;  %v7256_v15 = vld [vmem:[%s9977_s1 + $0xc8] sm:$0xff] }
 0x516   :  { %v3025_v16 = vadd.f32 %v3023_v12, %v9121_v22  ;;  %v3035_v18 = vadd.f32 %v3033_v4, %v9127_v29  ;;  %v8489_v12 = vpack.c.bf16 %v7250_v7, %v7249_v6 }
 0x517   :  { %v3018_v19 = vpop.f32.mrb[34].mxu1 }
 0x518   :  { %v7232_v13 = vmul.f32 -1.442695, %v3025_v16  ;;  %v7233_v20 = vmul.f32 -1.442695, %v3035_v18  ;;  %v7986_v21 = vpop.f32.mrb[35].mxu1  ;;  %v3019_v42 = vadd.f32 %v7230_v35, %v3018_v19  ;;  %v7262_v16 = vld [vmem:[%s9977_s1 + $0xe0] sm:$0xff]  ;;  %v8492_v18 = vpack.c.bf16 %v7256_v15, %v7255_v14 }
 0x519   :  { %v7263_v19 = vld [vmem:[%s9977_s1 + $0xe8] sm:$0xff] }
 0x51a   :  { %8723 = vpow2.f32 %v7232_v13  ;;  %v3043_v46 = vrot.slane %v3019_v42, 7  ;;  %v7257_v13 = vld [vmem:[%s9977_s1 + $0xd0] sm:$0xff]  ;;  %v8498_v21 = vpack.c.bf16 %v7263_v19, %v7262_v16 }
 0x51b   :  { %v8720_v23 = vpop.eup %8719  ;;  %8725 = vpow2.f32 %v7233_v20  ;;  %v7258_v20 = vld [vmem:[%s9977_s1 + $0xd8] sm:$0xff] }
 0x51c   :  { %v8722_v25 = vpop.eup %8721  ;;  %v2775_v17 = vadd.f32 1.0, %v8720_v23  ;;  %v7264_v23 = vld [vmem:[%s9977_s1 + $0xf0] sm:$0xff] }
 0x51d   :  { %v2785_v26 = vadd.f32 1.0, %v8722_v25  ;;  %v7265_v25 = vld [vmem:[%s9977_s1 + $0xf8] sm:$0xff] }
 0x51e   :  { %8727 = vrcp.f32 %v2775_v17  ;;  %v8495_v17 = vpack.c.bf16 %v7258_v20, %v7257_v13 }
 0x51f   :  { %8729 = vrcp.f32 %v2785_v26  ;;  %v8501_v26 = vpack.c.bf16 %v7265_v25, %v7264_v23  ;;  %v7277_v23 = vld [vmem:[%s9977_s1 + $0x128] sm:$0xff] }
 0x524   :  { %v8724_v31 = vpop.eup %8723 }
 0x525   :  { %v8726_v24 = vpop.eup %8725  ;;  %v3029_v32 = vadd.f32 1.0, %v8724_v31 }
 0x526   :  { %v3039_v33 = vadd.f32 1.0, %v8726_v24 }
 0x527   :  { %8731 = vrcp.f32 %v3029_v32 }
 0x528   :  { %v8728_v36 = vpop.eup %8727  ;;  %8733 = vrcp.f32 %v3039_v33 }
 0x529   :  { %v8730_v37 = vpop.eup %8729  ;;  %v2791_v38 = vmul.f32 %v8728_v36, %v2789_v34 }
 0x52a   :  { %v2798_v40 = vmul.f32 %v8730_v37, %v2796_v28  ;;  %v2794_v56 = vsub.f32 1.0, %v8730_v37 }
 0x52b   :  { %v2792_v41 = vadd.f32 %v2791_v38, %v9139_v54 }
 0x52d   :  { %8735 = vtanh.f32 %v2792_v41 }
 0x531   :  { %v8732_v39 = vpop.eup %8731 }
 0x532   :  { %v8734_v43 = vpop.eup %8733  ;;  %v3045_v50 = vmul.f32 %v8732_v39, %v3043_v46 }
 0x533   :  { %v3052_v55 = vmul.f32 %v8734_v43, %v3050_v47  ;;  %v3048_v2 = vsub.f32 1.0, %v8734_v43 }
 0x534   :  { %v3046_v45 = vadd.f32 %v3045_v50, %v9145_v1 }
 0x536   :  { %8737 = vtanh.f32 %v3046_v45 }
 0x537   :  { %v8736_v48 = vpop.eup %8735 }
 0x538   :  { %v2795_v51 = vmul.f32 %v8736_v48, %v2794_v56 }
 0x53a   :  { %v9388_v58 = vadd.f32 %v2798_v40, %v2795_v51 }
 0x53c   :  { %2800 = vst.msk [vmem:[#allocation2] sm:$0x10] %vm1527_vm6, %v9388_v58  ;;  %v3058_v59 = vrot.slane %v9388_v58, 4 }
 0x53e   :  { %7992 = vmatmul.mubr.msk.f32.vlgmr.msra.gmra.mrb[36].mxu0 %vm523_vm2, %v3058_v59  ;;  %7999 = vmatmul.mubr.msk.f32.vlgmr.msra.gmra.mrb[36].mxu1 %vm523_vm2, %v3058_v59 }
 0x53f   :  { %8481 = vmatpush3.bf16.msra.mxu0 %v8480_v44  ;;  %8005 = vmatprep.mubr.msk.f32.mxu0 %vm8880_vm0, %v8881_v8  ;;  %v3304_v44 = vrot.slane %v9388_v58, 7 }
 0x540   :  { %v8738_v61 = vpop.eup %8737  ;;  %8485 = vmatprep.subr.bf16.mxu0 %v8879_v0  ;;  %8484 = vmatpush3.bf16.msra.mxu1 %v8483_v60 }
 0x541   :  { %8012 = vmatprep.mubr.msk.f32.mxu1 %vm8880_vm0, %v8881_v8  ;;  %v3049_v5 = vmul.f32 %v8738_v61, %v3048_v2  ;;  %8488 = vmatprep.subr.bf16.mxu1 %v8879_v0  ;;  %v7251_v2 = vld [vmem:[%s9981_s4 + $0x1] sm:$0x1] }
 0x542   :  { %8006 = vmatmul.mubr.msk.f32.vlgmr.msra.gmra.mrb[38].mxu0 %vm523_vm2, %v3058_v59 }
 0x543   :  { %8487 = vmatpush3.bf16.msra.mxu0 %v8486_v3  ;;  %8019 = vmatprep.mubr.msk.f32.mxu0 %vm8880_vm0, %v8881_v8  ;;  %v3053_v10 = vadd.f32 %v3052_v55, %v3049_v5 }
 0x544   :  { %8491 = vmatprep.subr.bf16.mxu0 %v8879_v0 }
 0x545   :  { %3054 = vst.msk [vmem:[#allocation3] sm:$0x2] %vm1272_vm5, %v3053_v10  ;;  %v9418_v4 = vrot.slane %v3053_v10, 1 }
 0x547   :  { %8013 = vmatmul.mubr.msk.f32.vlgmr.msra.gmra.mrb[38].mxu1 %vm523_vm2, %v9418_v4  ;;  %8020 = vmatmul.mubr.msk.f32.vlgmr.msra.gmra.mrb[40].mxu0 %vm523_vm2, %v9418_v4 }
 0x548   :  { %8490 = vmatpush3.bf16.msra.mxu1 %v8489_v12  ;;  %8026 = vmatprep.mubr.msk.f32.mxu1 %vm8880_vm0, %v8881_v8 }
 0x549   :  { %8497 = vmatprep.subr.bf16.mxu1 %v8879_v0  ;;  %8037 = vmatprep.mubr.msk.f32.mxu0 %vm8880_vm0, %v8881_v8 }
 0x54a   :  { %8493 = vmatpush3.bf16.msra.mxu0 %v8492_v18 }
 0x54b   :  { %8027 = vmatmul.mubr.msk.f32.vlgmr.msra.gmra.mrb[40].mxu1 %vm523_vm2, %v9418_v4  ;;  %8494 = vmatprep.subr.bf16.mxu0 %v8879_v0 }
 0x54c   :  { %8048 = vmatprep.mubr.msk.f32.mxu1 %vm8880_vm0, %v8881_v8  ;;  %8499 = vmatpush3.bf16.msra.mxu1 %v8498_v21  ;;  %v7270_v21 = vld [vmem:[%s9977_s1 + $0x108] sm:$0xff] }
 0x54d   :  { %8500 = vmatprep.subr.bf16.mxu1 %v8879_v0 }
 0x54e   :  { %8496 = vmatpush3.bf16.msra.mxu0 %v8495_v17 }
 0x54f   :  { %8503 = vmatprep.subr.bf16.mxu0 %v8879_v0 }
 0x550   :  { %8502 = vmatpush3.bf16.msra.mxu1 %v8501_v26  ;;  %v7271_v26 = vld [vmem:[%s9977_s1 + $0x110] sm:$0xff] }
 0x551   :  { %8509 = vmatprep.subr.bf16.mxu1 %v8879_v0 }
 0x611   :  { %v3127_v27 = vpop.f32.mrb[36].mxu0  ;;  %v3199_v30 = vpop.f32.mrb[36].mxu1 }
 0x612   :  { %v3277_v31 = vrot.slane %v3127_v27, 3  ;;  %v3287_v24 = vrot.slane %v3199_v30, 3  ;;  %v7993_v32 = vpop.f32.mrb[37].mxu0  ;;  %v8000_v33 = vpop.f32.mrb[37].mxu1  ;;  %v7272_v27 = vld [vmem:[%s9977_s1 + $0x118] sm:$0xff] }
 0x613   :  { %v7279_v32 = vld [vmem:[%s9977_s1 + $0x138] sm:$0xff] }
 0x614   :  { %v3279_v34 = vadd.f32 %v3277_v31, %v9112_v9  ;;  %v3289_v36 = vadd.f32 %v3287_v24, %v9114_v11  ;;  %v7278_v24 = vld [vmem:[%s9977_s1 + $0x130] sm:$0xff] }
 0x615   :  { %v3272_v28 = vpop.f32.mrb[38].mxu0 }
 0x616   :  { %v7241_v37 = vmul.f32 -1.442695, %v3279_v34  ;;  %v7242_v38 = vmul.f32 -1.442695, %v3289_v36  ;;  %v8007_v35 = vpop.f32.mrb[39].mxu0  ;;  %v8507_v34 = vpack.c.bf16 %v7272_v27, %v7271_v26  ;;  %v8513_v36 = vpack.c.bf16 %v7279_v32, %v7278_v24 }
 0x617   :  { %v7291_v35 = vld [vmem:[%s9977_s1 + $0x168] sm:$0xff] }
 0x618   :  { %8739 = vpow2.f32 %v7241_v37  ;;  %v7284_v37 = vld [vmem:[%s9977_s1 + $0x148] sm:$0xff] }
 0x619   :  { %8741 = vpow2.f32 %v7242_v38  ;;  %v7290_v38 = vld [vmem:[%s9977_s1 + $0x160] sm:$0xff] }
 0x61a   :  { %v3381_v40 = vpop.f32.mrb[38].mxu1  ;;  %v3453_v41 = vpop.f32.mrb[40].mxu0 }
 0x61b   :  { %v3530_v42 = vadd.f32 %v3381_v40, %v9121_v22  ;;  %v8014_v46 = vpop.f32.mrb[39].mxu1  ;;  %v8021_v39 = vpop.f32.mrb[41].mxu0  ;;  %v3537_v47 = vadd.f32 %v3453_v41, %v9127_v29  ;;  %v3205_v22 = vld [vmem:[%s9981_s4] sm:$0x1]  ;;  %v8522_v41 = vpack.c.bf16 %v7291_v35, %v7290_v38 }
 0x61c   :  { %v3273_v52 = vadd.f32 %v3272_v28, %v3205_v22  ;;  %v7283_v28 = vld [vmem:[%s9977_s1 + $0x140] sm:$0xff]  ;;  %v7286_v46 = vld [vmem:[%s9977_s1 + $0x158] sm:$0xff]  ;;  %v7292_v39 = vld [vmem:[%s9977_s1 + $0x170] sm:$0xff] }
 0x61d   :  { %v7253_v43 = vmul.f32 -1.442695, %v3530_v42  ;;  %v7254_v55 = vmul.f32 -1.442695, %v3537_v47  ;;  %v8516_v40 = vpack.c.bf16 %v7284_v37, %v7283_v28  ;;  %v7285_v42 = vld [vmem:[%s9977_s1 + $0x150] sm:$0xff]  ;;  %v7293_v47 = vld [vmem:[%s9977_s1 + $0x178] sm:$0xff] }
 0x61e   :  { %v3526_v50 = vpop.f32.mrb[40].mxu1  ;;  %v3297_v49 = vrot.slane %v3273_v52, 3  ;;  %v7301_v22 = vld [vmem:[%s9979_s2 + $0x80] sm:$0xff]  ;;  %v7306_v52 = vld [vmem:[%s9979_s2 + $0x90] sm:$0xff] }
 0x61f   :  { %8743 = vpow2.f32 %v7253_v43  ;;  %v8028_v9 = vpop.f32.mrb[41].mxu1  ;;  %v3527_v61 = vadd.f32 %v7251_v2, %v3526_v50  ;;  %v8519_v43 = vpack.c.bf16 %v7286_v46, %v7285_v42  ;;  %v8525_v50 = vpack.c.bf16 %v7293_v47, %v7292_v39 }
 0x620   :  { %8745 = vpow2.f32 %v7254_v55  ;;  %v7297_v9 = vld [vmem:[%s9979_s2 + $0x60] sm:$0xff]  ;;  %v7298_v55 = vld [vmem:[%s9979_s2 + $0x68] sm:$0xff] }
 0x622   :  { %v8740_v11 = vpop.eup %8739 }
 0x623   :  { %v8742_v45 = vpop.eup %8741  ;;  %v3283_v56 = vadd.f32 1.0, %v8740_v11  ;;  %v7299_v11 = vld [vmem:[%s9979_s2 + $0x70] sm:$0xff] }
 0x624   :  { %v3293_v48 = vadd.f32 1.0, %v8742_v45  ;;  %v7300_v45 = vld [vmem:[%s9979_s2 + $0x78] sm:$0xff] }
 0x625   :  { %8747 = vrcp.f32 %v3283_v56  ;;  %v9557_v56 = vpack.c.bf16 %v7298_v55, %v7297_v9 }
 0x626   :  { %8749 = vrcp.f32 %v3293_v48  ;;  %v9559_v48 = vpack.c.bf16 %v7300_v45, %v7299_v11  ;;  %v7303_v45 = vld [vmem:[%s9981_s4 + $0x2] sm:$0x1] }
 0x629   :  { %v8744_v51 = vpop.eup %8743 }
 0x62a   :  { %v3534_v53 = vadd.f32 1.0, %v8744_v51  ;;  %v8746_v29 = vpop.eup %8745  ;;  %v7302_v51 = vld [vmem:[%s9979_s2 + $0x88] sm:$0xff] }
 0x62b   :  { %v3541_v3 = vadd.f32 1.0, %v8746_v29  ;;  %v9579_v29 = vpack.c.bf16 %v7302_v51, %v7301_v22  ;;  %v7312_v22 = vld [vmem:[%s9981_s4 + $0x3] sm:$0x1] }
 0x62c   :  { %8751 = vrcp.f32 %v3534_v53  ;;  %v7307_v53 = vld [vmem:[%s9979_s2 + $0x98] sm:$0xff] }
 0x62f   :  { %v8748_v57 = vpop.eup %8747 }
 0x630   :  { %v8750_v59 = vpop.eup %8749  ;;  %v3299_v60 = vmul.f32 %v8748_v57, %v3297_v49  ;;  %v9581_v49 = vpack.c.bf16 %v7307_v53, %v7306_v52  ;;  %v7308_v57 = vld [vmem:[%s9979_s2 + $0xa0] sm:$0xff]  ;;  %v7274_v52 = vld [vmem:[%s9980_s3 + $0x8] ss:$0 sm:$0xff] }
 0x631   :  { %v3306_v62 = vmul.f32 %v8750_v59, %v3304_v44  ;;  %v3302_v10 = vsub.f32 1.0, %v8750_v59  ;;  %v7309_v44 = vld [vmem:[%s9979_s2 + $0xa8] sm:$0xff]  ;;  %v7310_v59 = vld [vmem:[%s9979_s2 + $0xb0] sm:$0xff] }
 0x632   :  { %v3300_v63 = vadd.f32 %v3299_v60, %v9139_v54  ;;  %v7311_v60 = vld [vmem:[%s9979_s2 + $0xb8] sm:$0xff] }
 0x634   :  { %8753 = vtanh.f32 %v3300_v63  ;;  %v9611_v63 = vpack.c.bf16 %v7311_v60, %v7310_v59 }
 0x635   :  { %8755 = vrcp.f32 %v3541_v3 }
 0x636   :  { %v8752_v5 = vpop.eup %8751 }
 0x637   :  { %v3544_v6 = vmul.f32 %v8752_v5, %v3527_v61 }
 0x639   :  { %v3545_v7 = vadd.f32 %v3544_v6, %v9145_v1  ;;  %v7269_v1 = vld [vmem:[%s9977_s1 + $0x100] sm:$0xff] }
 0x63a   :  { %v8504_v25 = vpack.c.bf16 %v7270_v21, %v7269_v1 }
 0x63b   :  { %8757 = vtanh.f32 %v3545_v7 }
 0x63e   :  { %v8754_v58 = vpop.eup %8753 }
 0x63f   :  { %v3303_v12 = vmul.f32 %v8754_v58, %v3302_v10  ;;  %v8756_v14 = vpop.eup %8755 }
 0x640   :  { %v3547_v54 = vsub.f32 1.0, %v8756_v14  ;;  %v3550_v18 = vmul.f32 %v8756_v14, %v9418_v4  ;;  %v7276_v4 = vld [vmem:[%s9977_s1 + $0x120] sm:$0xff] }
 0x641   :  { %v3307_v15 = vadd.f32 %v3306_v62, %v3303_v12  ;;  %v8510_v17 = vpack.c.bf16 %v7277_v23, %v7276_v4  ;;  %v9605_v62 = vpack.c.bf16 %v7309_v44, %v7308_v57  ;;  %v7260_v12 = vld [vmem:[%s9980_s3 + $0x6] ss:$0 sm:$0xff] }
 0x643   :  { %3308 = vst.msk [vmem:[#allocation2] sm:$0x20] %vm1018_vm4, %v3307_v15 }
 0x645   :  { %v8758_v16 = vpop.eup %8757 }
 0x646   :  { %v3548_v19 = vmul.f32 %v8758_v16, %v3547_v54 }
 0x648   :  { %v3551_v13 = vadd.f32 %v3550_v18, %v3548_v19  ;;  %v7267_v19 = vld [vmem:[%s9980_s3 + $0x7] ss:$0 sm:$0xff] }
 0x64a   :  { %3552 = vst.msk [vmem:[#allocation3] sm:$0x1] %vm765_vm3, %v3551_v13  ;;  %v3553_v30 = vld [vmem:[#allocation2] sm:$0x3f] }
 0x651   :  { %v3554_v20 = vld [vmem:[#allocation3] sm:$0x3f] }
 0x652   :  { %3556 = vrot.lane.b32.xlu0 %v3554_v20, %s8882_s13 }
 0x6c4   :  { %v3557_v31 = vpop.permute.xlu0 %3556 }
 0x6c5   :  { %v3559_v33 = vsel %vm523_vm2, %v3553_v30, %v3557_v31 }
 0x6c6   :  { %8038 = vmatmul.mubr.msk.f32.vlgmr.msra.gmra.mrb[42].mxu0 %vm32_vm1, %v3559_v33  ;;  %8049 = vmatmul.mubr.msk.f32.vlgmr.msra.gmra.mrb[42].mxu1 %vm32_vm1, %v3559_v33 }
 0x6c7   :  { %8505 = vmatpush3.bf16.msra.mxu0 %v8504_v25  ;;  %8511 = vmatpush3.bf16.msra.mxu1 %v8510_v17  ;;  %v7281_v25 = vld [vmem:[%s9980_s3 + $0x9] ss:$0 sm:$0xff] }
 0x6c8   :  { %8506 = vmatprep.subr.bf16.mxu0 %v8879_v0  ;;  %8512 = vmatprep.subr.bf16.mxu1 %v8879_v0 }
 0x6c9   :  { %8059 = vmatprep.mubr.msk.f32.mxu0 %vm8880_vm0, %v8881_v8  ;;  %8070 = vmatprep.mubr.msk.f32.mxu1 %vm8880_vm0, %v8881_v8 }
 0x6cb   :  { %8508 = vmatpush3.bf16.msra.mxu0 %v8507_v34  ;;  %8514 = vmatpush3.bf16.msra.mxu1 %v8513_v36  ;;  %v7288_v34 = vld [vmem:[%s9980_s3 + $0xa] ss:$0 sm:$0xff] }
 0x6cc   :  { %8515 = vmatprep.subr.bf16.mxu0 %v8879_v0  ;;  %8521 = vmatprep.subr.bf16.mxu1 %v8879_v0 }
 0x6ce   :  { %8060 = vmatmul.mubr.msk.f32.vlgmr.msra.gmra.mrb[44].mxu0 %vm32_vm1, %v3559_v33  ;;  %8071 = vmatmul.mubr.msk.f32.vlgmr.msra.gmra.mrb[44].mxu1 %vm32_vm1, %v3559_v33 }
 0x6cf   :  { %8517 = vmatpush3.bf16.msra.mxu0 %v8516_v40  ;;  %8523 = vmatpush3.bf16.msra.mxu1 %v8522_v41 }
 0x6d0   :  { %8518 = vmatprep.subr.bf16.mxu0 %v8879_v0  ;;  %8524 = vmatprep.subr.bf16.mxu1 %v8879_v0 }
 0x6d1   :  { %8081 = vmatprep.mubr.msk.f32.mxu0 %vm8880_vm0, %v8881_v8  ;;  %8092 = vmatprep.mubr.msk.f32.mxu1 %vm8880_vm0, %v8881_v8 }
 0x6d3   :  { %8520 = vmatpush3.bf16.msra.mxu0 %v8519_v43  ;;  %8526 = vmatpush3.bf16.msra.mxu1 %v8525_v50 }
 0x6d4   :  { %8527 = vmatprep.subr.bf16.mxu0 %v8879_v0  ;;  %8530 = vmatprep.subr.bf16.mxu1 %v8879_v0 }
 0x6d6   :  { %8082 = vmatmul.mubr.msk.f32.vlgmr.msra.gmra.mrb[46].mxu0 %vm32_vm1, %v3559_v33  ;;  %8093 = vmatmul.mubr.msk.f32.vlgmr.msra.gmra.mrb[46].mxu1 %vm32_vm1, %v3559_v33 }
 0x6d7   :  { %8529 = vmatpush3.bf16.msra.mxu0 %v9557_v56  ;;  %8532 = vmatpush3.bf16.msra.mxu1 %v9559_v48 }
 0x6d8   :  { %8099 = vmatprep.mubr.msk.f32.mxu0 %vm8880_vm0, %v8881_v8  ;;  %8106 = vmatprep.mubr.msk.f32.mxu1 %vm8880_vm0, %v8881_v8 }
 0x6d9   :  { %8533 = vmatprep.subr.bf16.mxu0 %v8879_v0  ;;  %8536 = vmatprep.subr.bf16.mxu1 %v8879_v0 }
 0x6da   :  { %8100 = vmatmul.mubr.f32.vlgmr.msra.gmra.mrb[48].mxu0 %v8881_v8  ;;  %8107 = vmatmul.mubr.f32.vlgmr.msra.gmra.mrb[48].mxu1 %v8881_v8 }
 0x6db   :  { %8535 = vmatpush3.bf16.msra.mxu0 %v9579_v29  ;;  %8538 = vmatpush3.bf16.msra.mxu1 %v9581_v49 }
 0x6dc   :  { %8113 = vmatprep.mubr.msk.f32.mxu0 %vm8880_vm0, %v8881_v8  ;;  %8120 = vmatprep.mubr.msk.f32.mxu1 %vm8880_vm0, %v8881_v8 }
 0x6dd   :  { %8539 = vmatprep.subr.bf16.mxu0 %v8879_v0  ;;  %8542 = vmatprep.subr.bf16.mxu1 %v8879_v0 }
 0x6de   :  { %8114 = vmatmul.mubr.f32.vlgmr.msra.gmra.mrb[50].mxu0 %v8881_v8  ;;  %8121 = vmatmul.mubr.f32.vlgmr.msra.gmra.mrb[50].mxu1 %v8881_v8 }
 0x6df   :  { %8541 = vmatpush3.bf16.msra.mxu0 %v9605_v62  ;;  %8127 = vmatprep.mubr.msk.f32.mxu0 %vm8880_vm0, %v8881_v8 }
 0x6e0   :  { %8544 = vmatpush3.bf16.msra.mxu1 %v9611_v63  ;;  %8134 = vmatprep.mubr.msk.f32.mxu1 %vm8880_vm0, %v8881_v8 }
 0x6e1   :  { %8545 = vmatprep.subr.bf16.mxu0 %v8879_v0  ;;  %8548 = vmatprep.subr.bf16.mxu1 %v8879_v0 }
 0x6e2   :  { %8128 = vmatmul.mubr.f32.vlgmr.msra.gmra.mrb[52].mxu0 %v8881_v8 }
 0x6e3   :  { %8135 = vmatmul.mubr.f32.vlgmr.msra.gmra.mrb[52].mxu1 %v8881_v8  ;;  %8547 = vmatpush3.bf16.msra.mxu0 %v9557_v56 }
 0x6e4   :  { %8550 = vmatpush3.bf16.msra.mxu1 %v9559_v48  ;;  %8141 = vmatprep.mubr.msk.f32.mxu0 %vm8880_vm0, %v8881_v8 }
 0x6e5   :  { %8148 = vmatprep.mubr.msk.f32.mxu1 %vm8880_vm0, %v8881_v8  ;;  %8551 = vmatprep.subr.bf16.mxu0 %v8879_v0 }
 0x6e6   :  { %8554 = vmatprep.subr.bf16.mxu1 %v8879_v0 }
 0x799   :  { %v3642_v2 = vpop.f32.mrb[42].mxu0  ;;  %v3725_v3 = vpop.f32.mrb[42].mxu1 }
 0x79a   :  { %v8039_v61 = vpop.f32.mrb[43].mxu0  ;;  %v8050_v5 = vpop.f32.mrb[43].mxu1  ;;  %v9638_v18 = vadd.f32 %v7260_v12, %v3642_v2  ;;  %v9644_v23 = vadd.f32 %v7267_v19, %v3725_v3 }
 0x7a1   :  { %v3808_v6 = vpop.f32.mrb[44].mxu0  ;;  %v3891_v7 = vpop.f32.mrb[44].mxu1 }
 0x7a2   :  { %v8061_v10 = vpop.f32.mrb[45].mxu0  ;;  %v8072_v58 = vpop.f32.mrb[45].mxu1  ;;  %v9650_v31 = vadd.f32 %v7281_v25, %v3891_v7  ;;  %v9668_v60 = vadd.f32 %v7274_v52, %v3808_v6  ;;  %v7295_v7 = vld [vmem:[%s9980_s3 + $0xb] ss:$0 sm:$0xff] }
 0x7a9   :  { %v3974_v14 = vpop.f32.mrb[46].mxu0  ;;  %v4057_v15 = vpop.f32.mrb[46].mxu1 }
 0x7aa   :  { %v8083_v54 = vpop.f32.mrb[47].mxu0  ;;  %v8094_v16 = vpop.f32.mrb[47].mxu1  ;;  %v9656_v38 = vadd.f32 %v7288_v34, %v3974_v14  ;;  %v9674_v58 = vadd.f32 %v7295_v7, %v4057_v15 }
 0x7ad   :  { %v4130_v13 = vpop.f32.mrb[48].mxu0  ;;  %v4203_v20 = vpop.f32.mrb[48].mxu1 }
 0x7ae   :  { %v4282_v1 = vadd.f32 %v4130_v13, %v9638_v18  ;;  %v8108_v21 = vpop.f32.mrb[49].mxu1  ;;  %v8101_v4 = vpop.f32.mrb[49].mxu0  ;;  %v4289_v26 = vadd.f32 %v4203_v20, %v9644_v23 }
 0x7b0   :  { %v7304_v17 = vmul.f32 -1.442695, %v4282_v1  ;;  %v7305_v28 = vmul.f32 -1.442695, %v4289_v26 }
 0x7b1   :  { %v4373_v27 = vpop.f32.mrb[50].mxu1  ;;  %v4278_v30 = vpop.f32.mrb[50].mxu0 }
 0x7b2   :  { %8759 = vpow2.f32 %v7304_v17  ;;  %v4526_v24 = vrot.slane %v4373_v27, 3  ;;  %v8122_v32 = vpop.f32.mrb[51].mxu1  ;;  %v8115_v33 = vpop.f32.mrb[51].mxu0  ;;  %v4279_v57 = vadd.f32 %v7303_v45, %v4278_v30 }
 0x7b4   :  { %v4528_v36 = vadd.f32 %v4526_v24, %v9650_v31 }
 0x7b5   :  { %v4446_v37 = vpop.f32.mrb[52].mxu0 }
 0x7b6   :  { %v7313_v35 = vmul.f32 -1.442695, %v4528_v36  ;;  %v4536_v40 = vrot.slane %v4446_v37, 3  ;;  %v8129_v41 = vpop.f32.mrb[53].mxu0  ;;  %v4521_v42 = vpop.f32.mrb[52].mxu1 }
 0x7b7   :  { %v8136_v46 = vpop.f32.mrb[53].mxu1  ;;  %v4522_v44 = vadd.f32 %v7312_v22, %v4521_v42 }
 0x7b8   :  { %8761 = vpow2.f32 %v7313_v35  ;;  %v4538_v39 = vadd.f32 %v4536_v40, %v9656_v38 }
 0x7b9   :  { %8763 = vpow2.f32 %v7305_v28  ;;  %v4546_v5 = vrot.slane %v4522_v44, 3 }
 0x7ba   :  { %v7314_v47 = vmul.f32 -1.442695, %v4538_v39 }
 0x7bc   :  { %v8760_v43 = vpop.eup %8759  ;;  %8765 = vpow2.f32 %v7314_v47 }
 0x7bd   :  { %v4286_v50 = vadd.f32 1.0, %v8760_v43 }
 0x7bf   :  { %8767 = vrcp.f32 %v4286_v50 }
 0x7c2   :  { %v8762_v9 = vpop.eup %8761 }
 0x7c3   :  { %v8764_v55 = vpop.eup %8763  ;;  %v4532_v11 = vadd.f32 1.0, %v8762_v9 }
 0x7c4   :  { %v4293_v51 = vadd.f32 1.0, %v8764_v55 }
 0x7c5   :  { %8769 = vrcp.f32 %v4532_v11 }
 0x7c6   :  { %v8766_v53 = vpop.eup %8765  ;;  %8771 = vrcp.f32 %v4293_v51 }
 0x7c7   :  { %v4542_v61 = vadd.f32 1.0, %v8766_v53 }
 0x7c9   :  { %v8768_v59 = vpop.eup %8767 }
 0x7ca   :  { %v4296_v2 = vmul.f32 %v8768_v59, %v4279_v57  ;;  %v7323_v59 = vld [vmem:[%s9981_s4 + $0x2] sm:$0x1] }
 0x7cc   :  { %v4297_v3 = vadd.f32 %v4296_v2, %v9668_v60 }
 0x7ce   :  { %8773 = vtanh.f32 %v4297_v3 }
 0x7cf   :  { %v8770_v10 = vpop.eup %8769  ;;  %8775 = vrcp.f32 %v4542_v61 }
 0x7d0   :  { %v4548_v12 = vmul.f32 %v8770_v10, %v4546_v5  ;;  %v8772_v6 = vpop.eup %8771 }
 0x7d1   :  { %v4299_v54 = vsub.f32 1.0, %v8772_v6  ;;  %v4301_v13 = vmul.f32 0.0, %v8772_v6  ;;  %v7335_v6 = vld [vmem:[%s9981_s4 + $0x3] sm:$0x1] }
 0x7d2   :  { %v4549_v14 = vadd.f32 %v4548_v12, %v9674_v58 }
 0x7d4   :  { %8777 = vtanh.f32 %v4549_v14 }
 0x7d8   :  { %v8774_v16 = vpop.eup %8773 }
 0x7d9   :  { %v4300_v19 = vmul.f32 %v8774_v16, %v4299_v54  ;;  %v8776_v20 = vpop.eup %8775 }
 0x7da   :  { %v4551_v21 = vsub.f32 1.0, %v8776_v20  ;;  %v4553_v4 = vmul.f32 0.0, %v8776_v20 }
 0x7db   :  { %v9677_v1 = vadd.f32 %v4301_v13, %v4300_v19 }
 0x7dd   :  { %4303 = vst.msk [vmem:[#allocation2] sm:$0x1] %vm765_vm3, %v9677_v1  ;;  %8142 = vmatmul.mubr.msk.f32.vlgmr.msra.gmra.mrb[54].mxu0 %vm523_vm2, %v9677_v1  ;;  %8149 = vmatmul.mubr.msk.f32.vlgmr.msra.gmra.mrb[54].mxu1 %vm523_vm2, %v9677_v1  ;;  %v4804_v14 = vrot.slane %v9677_v1, 7 }
 0x7de   :  { %v8778_v15 = vpop.eup %8777  ;;  %8553 = vmatpush3.bf16.msra.mxu0 %v9579_v29  ;;  %8155 = vmatprep.mubr.msk.f32.mxu0 %vm8880_vm0, %v8881_v8 }
 0x7df   :  { %v4552_v25 = vmul.f32 %v8778_v15, %v4551_v21  ;;  %8557 = vmatprep.subr.bf16.mxu0 %v8879_v0  ;;  %8556 = vmatpush3.bf16.msra.mxu1 %v9581_v49 }
 0x7e0   :  { %8162 = vmatprep.mubr.msk.f32.mxu1 %vm8880_vm0, %v8881_v8  ;;  %8560 = vmatprep.subr.bf16.mxu1 %v8879_v0 }
 0x7e1   :  { %8156 = vmatmul.mubr.msk.f32.vlgmr.msra.gmra.mrb[56].mxu0 %vm523_vm2, %v9677_v1  ;;  %v9695_v17 = vadd.f32 %v4553_v4, %v4552_v25 }
 0x7e2   :  { %8559 = vmatpush3.bf16.msra.mxu0 %v9605_v62  ;;  %8169 = vmatprep.mubr.msk.f32.mxu0 %vm8880_vm0, %v8881_v8 }
 0x7e3   :  { %4555 = vst.msk [vmem:[#allocation3] sm:$0x20] %vm1018_vm4, %v9695_v17  ;;  %v4812_v26 = vrot.slane %v9695_v17, 5  ;;  %8563 = vmatprep.subr.bf16.mxu0 %v8879_v0  ;;  %v5058_v4 = vrot.slane %v9695_v17, 1 }
 0x7e5   :  { %8163 = vmatmul.mubr.msk.f32.vlgmr.msra.gmra.mrb[56].mxu1 %vm523_vm2, %v4812_v26  ;;  %8170 = vmatmul.mubr.msk.f32.vlgmr.msra.gmra.mrb[58].mxu0 %vm523_vm2, %v4812_v26 }
 0x7e6   :  { %8562 = vmatpush3.bf16.msra.mxu1 %v9611_v63  ;;  %8176 = vmatprep.mubr.msk.f32.mxu1 %vm8880_vm0, %v8881_v8 }
 0x7e7   :  { %8566 = vmatprep.subr.bf16.mxu1 %v8879_v0  ;;  %8565 = vmatpush3.bf16.msra.mxu0 %v9557_v56 }
 0x7e8   :  { %8183 = vmatprep.mubr.msk.f32.mxu0 %vm8880_vm0, %v8881_v8  ;;  %8569 = vmatprep.subr.bf16.mxu0 %v8879_v0 }
 0x7e9   :  { %8177 = vmatmul.mubr.msk.f32.vlgmr.msra.gmra.mrb[58].mxu1 %vm523_vm2, %v4812_v26 }
 0x7ea   :  { %8568 = vmatpush3.bf16.msra.mxu1 %v9559_v48  ;;  %8190 = vmatprep.mubr.msk.f32.mxu1 %vm8880_vm0, %v8881_v8 }
 0x7eb   :  { %8572 = vmatprep.subr.bf16.mxu1 %v8879_v0 }
 0x8b0   :  { %v4627_v27 = vpop.f32.mrb[54].mxu0  ;;  %v4699_v30 = vpop.f32.mrb[54].mxu1 }
 0x8b1   :  { %v4777_v24 = vrot.slane %v4627_v27, 7  ;;  %v4787_v32 = vrot.slane %v4699_v30, 7  ;;  %v8143_v33 = vpop.f32.mrb[55].mxu0  ;;  %v8150_v34 = vpop.f32.mrb[55].mxu1 }
 0x8b3   :  { %v4779_v36 = vadd.f32 %v4777_v24, %v9638_v18  ;;  %v4789_v28 = vadd.f32 %v4787_v32, %v9644_v23 }
 0x8b4   :  { %v4772_v37 = vpop.f32.mrb[56].mxu0 }
 0x8b5   :  { %v7325_v35 = vmul.f32 -1.442695, %v4779_v36  ;;  %v7326_v40 = vmul.f32 -1.442695, %v4789_v28  ;;  %v8157_v41 = vpop.f32.mrb[57].mxu0  ;;  %v4773_v3 = vadd.f32 %v7323_v59, %v4772_v37 }
 0x8b7   :  { %8779 = vpow2.f32 %v7325_v35  ;;  %v4797_v10 = vrot.slane %v4773_v3, 7 }
 0x8b8   :  { %8781 = vpow2.f32 %v7326_v40  ;;  %v4881_v42 = vpop.f32.mrb[56].mxu1  ;;  %v4953_v46 = vpop.f32.mrb[58].mxu0 }
 0x8b9   :  { %v5031_v39 = vrot.slane %v4881_v42, 4  ;;  %v5041_v47 = vrot.slane %v4953_v46, 4  ;;  %v8164_v43 = vpop.f32.mrb[57].mxu1  ;;  %v8171_v50 = vpop.f32.mrb[59].mxu0 }
 0x8bb   :  { %v5033_v9 = vadd.f32 %v5031_v39, %v9650_v31  ;;  %v5043_v55 = vadd.f32 %v5041_v47, %v9656_v38 }
 0x8bc   :  { %v5026_v11 = vpop.f32.mrb[58].mxu1 }
 0x8bd   :  { %v7337_v45 = vmul.f32 -1.442695, %v5033_v9  ;;  %v7338_v22 = vmul.f32 -1.442695, %v5043_v55  ;;  %v8178_v51 = vpop.f32.mrb[59].mxu1  ;;  %v5027_v20 = vadd.f32 %v7335_v6, %v5026_v11 }
 0x8bf   :  { %8783 = vpow2.f32 %v7337_v45  ;;  %v5051_v21 = vrot.slane %v5027_v20, 4 }
 0x8c0   :  { %8785 = vpow2.f32 %v7338_v22 }
 0x8c1   :  { %v8780_v52 = vpop.eup %8779 }
 0x8c2   :  { %v8782_v53 = vpop.eup %8781  ;;  %v4783_v57 = vadd.f32 1.0, %v8780_v52 }
 0x8c3   :  { %v4793_v44 = vadd.f32 1.0, %v8782_v53 }
 0x8c4   :  { %8787 = vrcp.f32 %v4783_v57 }
 0x8c5   :  { %8789 = vrcp.f32 %v4793_v44 }
 0x8c9   :  { %v8784_v2 = vpop.eup %8783 }
 0x8ca   :  { %v8786_v61 = vpop.eup %8785  ;;  %v5037_v5 = vadd.f32 1.0, %v8784_v2 }
 0x8cb   :  { %v5047_v7 = vadd.f32 1.0, %v8786_v61 }
 0x8cc   :  { %8791 = vrcp.f32 %v5037_v5 }
 0x8cd   :  { %8793 = vrcp.f32 %v5047_v7 }
 0x8ce   :  { %v8788_v12 = vpop.eup %8787 }
 0x8cf   :  { %v8790_v54 = vpop.eup %8789  ;;  %v4799_v16 = vmul.f32 %v8788_v12, %v4797_v10 }
 0x8d0   :  { %v4806_v19 = vmul.f32 %v8790_v54, %v4804_v14  ;;  %v4802_v30 = vsub.f32 1.0, %v8790_v54  ;;  %v7347_v54 = vld [vmem:[%s9981_s4 + $0x2] sm:$0x1] }
 0x8d1   :  { %v4800_v13 = vadd.f32 %v4799_v16, %v9668_v60 }
 0x8d3   :  { %8795 = vtanh.f32 %v4800_v13 }
 0x8d6   :  { %v8792_v15 = vpop.eup %8791 }
 0x8d7   :  { %v8794_v25 = vpop.eup %8793  ;;  %v5053_v26 = vmul.f32 %v8792_v15, %v5051_v21 }
 0x8d8   :  { %v5060_v27 = vmul.f32 %v8794_v25, %v5058_v4  ;;  %v5056_v36 = vsub.f32 1.0, %v8794_v25 }
 0x8d9   :  { %v5054_v1 = vadd.f32 %v5053_v26, %v9674_v58  ;;  %v7359_v26 = vld [vmem:[%s9981_s4 + $0x3] sm:$0x1] }
 0x8db   :  { %8797 = vtanh.f32 %v5054_v1 }
 0x8dd   :  { %v8796_v24 = vpop.eup %8795 }
 0x8de   :  { %v4803_v32 = vmul.f32 %v8796_v24, %v4802_v30 }
 0x8e0   :  { %v9733_v33 = vadd.f32 %v4806_v19, %v4803_v32 }
 0x8e2   :  { %4808 = vst.msk [vmem:[#allocation2] sm:$0x2] %vm1272_vm5, %v9733_v33  ;;  %v5066_v34 = vrot.slane %v9733_v33, 1  ;;  %v5312_v25 = vrot.slane %v9733_v33, 7 }
 0x8e4   :  { %8184 = vmatmul.mubr.msk.f32.vlgmr.msra.gmra.mrb[60].mxu0 %vm523_vm2, %v5066_v34  ;;  %8191 = vmatmul.mubr.msk.f32.vlgmr.msra.gmra.mrb[60].mxu1 %vm523_vm2, %v5066_v34 }
 0x8e5   :  { %v8798_v17 = vpop.eup %8797  ;;  %8571 = vmatpush3.bf16.msra.mxu0 %v9579_v29  ;;  %8197 = vmatprep.mubr.msk.f32.mxu0 %vm8880_vm0, %v8881_v8 }
 0x8e6   :  { %v5057_v28 = vmul.f32 %v8798_v17, %v5056_v36  ;;  %8575 = vmatprep.subr.bf16.mxu0 %v8879_v0  ;;  %8574 = vmatpush3.bf16.msra.mxu1 %v9581_v49 }
 0x8e7   :  { %8204 = vmatprep.mubr.msk.f32.mxu1 %vm8880_vm0, %v8881_v8  ;;  %8578 = vmatprep.subr.bf16.mxu1 %v8879_v0 }
 0x8e8   :  { %8198 = vmatmul.mubr.msk.f32.vlgmr.msra.gmra.mrb[62].mxu0 %vm523_vm2, %v5066_v34  ;;  %v9749_v37 = vadd.f32 %v5060_v27, %v5057_v28 }
 0x8e9   :  { %8577 = vmatpush3.bf16.msra.mxu0 %v9605_v62  ;;  %8211 = vmatprep.mubr.msk.f32.mxu0 %vm8880_vm0, %v8881_v8 }
 0x8ea   :  { %5062 = vst.msk [vmem:[#allocation3] sm:$0x10] %vm1527_vm6, %v9749_v37  ;;  %v5320_v35 = vrot.slane %v9749_v37, 4  ;;  %8581 = vmatprep.subr.bf16.mxu0 %v8879_v0  ;;  %v5566_v17 = vrot.slane %v9749_v37, 1 }
 0x8ec   :  { %8205 = vmatmul.mubr.msk.f32.vlgmr.msra.gmra.mrb[62].mxu1 %vm523_vm2, %v5320_v35  ;;  %8212 = vmatmul.mubr.msk.f32.vlgmr.msra.gmra.mrb[64].mxu0 %vm523_vm2, %v5320_v35 }
 0x8ed   :  { %8580 = vmatpush3.bf16.msra.mxu1 %v9611_v63  ;;  %8218 = vmatprep.mubr.msk.f32.mxu1 %vm8880_vm0, %v8881_v8 }
 0x8ee   :  { %8584 = vmatprep.subr.bf16.mxu1 %v8879_v0  ;;  %8583 = vmatpush3.bf16.msra.mxu0 %v9557_v56 }
 0x8ef   :  { %8225 = vmatprep.mubr.msk.f32.mxu0 %vm8880_vm0, %v8881_v8  ;;  %8587 = vmatprep.subr.bf16.mxu0 %v8879_v0 }
 0x8f0   :  { %8219 = vmatmul.mubr.msk.f32.vlgmr.msra.gmra.mrb[64].mxu1 %vm523_vm2, %v5320_v35 }
 0x8f1   :  { %8586 = vmatpush3.bf16.msra.mxu1 %v9559_v48  ;;  %8232 = vmatprep.mubr.msk.f32.mxu1 %vm8880_vm0, %v8881_v8 }
 0x8f2   :  { %8590 = vmatprep.subr.bf16.mxu1 %v8879_v0 }
 0x9b7   :  { %v5135_v40 = vpop.f32.mrb[60].mxu0  ;;  %v5207_v41 = vpop.f32.mrb[60].mxu1 }
 0x9b8   :  { %v5285_v42 = vrot.slane %v5135_v40, 6  ;;  %v5295_v46 = vrot.slane %v5207_v41, 6  ;;  %v8185_v39 = vpop.f32.mrb[61].mxu0  ;;  %v8192_v47 = vpop.f32.mrb[61].mxu1 }
 0x9ba   :  { %v5287_v43 = vadd.f32 %v5285_v42, %v9638_v18  ;;  %v5297_v50 = vadd.f32 %v5295_v46, %v9644_v23 }
 0x9bb   :  { %v5280_v9 = vpop.f32.mrb[62].mxu0 }
 0x9bc   :  { %v7349_v55 = vmul.f32 -1.442695, %v5287_v43  ;;  %v7350_v11 = vmul.f32 -1.442695, %v5297_v50  ;;  %v8199_v45 = vpop.f32.mrb[63].mxu0  ;;  %v5281_v19 = vadd.f32 %v7347_v54, %v5280_v9 }
 0x9be   :  { %8799 = vpow2.f32 %v7349_v55  ;;  %v5305_v15 = vrot.slane %v5281_v19, 6 }
 0x9bf   :  { %8801 = vpow2.f32 %v7350_v11  ;;  %v5389_v22 = vpop.f32.mrb[62].mxu1  ;;  %v5461_v51 = vpop.f32.mrb[64].mxu0 }
 0x9c0   :  { %v5539_v52 = vrot.slane %v5389_v22, 5  ;;  %v5549_v53 = vrot.slane %v5461_v51, 5  ;;  %v8206_v57 = vpop.f32.mrb[63].mxu1  ;;  %v8213_v44 = vpop.f32.mrb[65].mxu0 }
 0x9c2   :  { %v5541_v59 = vadd.f32 %v5539_v52, %v9650_v31  ;;  %v5551_v2 = vadd.f32 %v5549_v53, %v9656_v38 }
 0x9c3   :  { %v5534_v3 = vpop.f32.mrb[64].mxu1 }
 0x9c4   :  { %v7361_v61 = vmul.f32 -1.442695, %v5541_v59  ;;  %v7362_v5 = vmul.f32 -1.442695, %v5551_v2  ;;  %v8220_v7 = vpop.f32.mrb[65].mxu1  ;;  %v5535_v32 = vadd.f32 %v7359_v26, %v5534_v3 }
 0x9c6   :  { %8803 = vpow2.f32 %v7361_v61  ;;  %v5559_v34 = vrot.slane %v5535_v32, 5 }
 0x9c7   :  { %8805 = vpow2.f32 %v7362_v5 }
 0x9c8   :  { %v8800_v10 = vpop.eup %8799 }
 0x9c9   :  { %v8802_v12 = vpop.eup %8801  ;;  %v5291_v14 = vadd.f32 1.0, %v8800_v10 }
 0x9ca   :  { %v5301_v6 = vadd.f32 1.0, %v8802_v12 }
 0x9cb   :  { %8807 = vrcp.f32 %v5291_v14 }
 0x9cc   :  { %8809 = vrcp.f32 %v5301_v6 }
 0x9d0   :  { %v8804_v16 = vpop.eup %8803 }
 0x9d1   :  { %v8806_v13 = vpop.eup %8805  ;;  %v5545_v20 = vadd.f32 1.0, %v8804_v16 }
 0x9d2   :  { %v5555_v21 = vadd.f32 1.0, %v8806_v13 }
 0x9d3   :  { %8811 = vrcp.f32 %v5545_v20 }
 0x9d4   :  { %8813 = vrcp.f32 %v5555_v21 }
 0x9d5   :  { %v8808_v4 = vpop.eup %8807 }
 0x9d6   :  { %v8810_v27 = vpop.eup %8809  ;;  %v5307_v1 = vmul.f32 %v8808_v4, %v5305_v15 }
 0x9d7   :  { %v5314_v30 = vmul.f32 %v8810_v27, %v5312_v25  ;;  %v5310_v41 = vsub.f32 1.0, %v8810_v27  ;;  %v7371_v25 = vld [vmem:[%s9981_s4 + $0x2] sm:$0x1] }
 0x9d8   :  { %v5308_v24 = vadd.f32 %v5307_v1, %v9668_v60 }
 0x9da   :  { %8815 = vtanh.f32 %v5308_v24 }
 0x9dd   :  { %v8812_v36 = vpop.eup %8811 }
 0x9de   :  { %v8814_v28 = vpop.eup %8813  ;;  %v5561_v35 = vmul.f32 %v8812_v36, %v5559_v34 }
 0x9df   :  { %v5568_v40 = vmul.f32 %v8814_v28, %v5566_v17  ;;  %v5564_v43 = vsub.f32 1.0, %v8814_v28  ;;  %v7383_v17 = vld [vmem:[%s9981_s4 + $0x3] sm:$0x1] }
 0x9e0   :  { %v5562_v33 = vadd.f32 %v5561_v35, %v9674_v58 }
 0x9e2   :  { %8817 = vtanh.f32 %v5562_v33 }
 0x9e4   :  { %v8816_v42 = vpop.eup %8815 }
 0x9e5   :  { %v5311_v46 = vmul.f32 %v8816_v42, %v5310_v41 }
 0x9e7   :  { %v9787_v39 = vadd.f32 %v5314_v30, %v5311_v46 }
 0x9e9   :  { %5316 = vst.msk [vmem:[#allocation2] sm:$0x4] %vm1782_vm7, %v9787_v39  ;;  %v5574_v47 = vrot.slane %v9787_v39, 2  ;;  %v5820_v36 = vrot.slane %v9787_v39, 7 }
 0x9eb   :  { %8226 = vmatmul.mubr.msk.f32.vlgmr.msra.gmra.mrb[66].mxu0 %vm523_vm2, %v5574_v47  ;;  %8233 = vmatmul.mubr.msk.f32.vlgmr.msra.gmra.mrb[66].mxu1 %vm523_vm2, %v5574_v47 }
 0x9ec   :  { %v8818_v37 = vpop.eup %8817  ;;  %8589 = vmatpush3.bf16.msra.mxu0 %v9579_v29  ;;  %8239 = vmatprep.mubr.msk.f32.mxu0 %vm8880_vm0, %v8881_v8 }
 0x9ed   :  { %v5565_v50 = vmul.f32 %v8818_v37, %v5564_v43  ;;  %8593 = vmatprep.subr.bf16.mxu0 %v8879_v0  ;;  %8592 = vmatpush3.bf16.msra.mxu1 %v9581_v49 }
 0x9ee   :  { %8246 = vmatprep.mubr.msk.f32.mxu1 %vm8880_vm0, %v8881_v8  ;;  %8596 = vmatprep.subr.bf16.mxu1 %v8879_v0 }
 0x9ef   :  { %8240 = vmatmul.mubr.msk.f32.vlgmr.msra.gmra.mrb[68].mxu0 %vm523_vm2, %v5574_v47  ;;  %v9803_v9 = vadd.f32 %v5568_v40, %v5565_v50 }
 0x9f0   :  { %8595 = vmatpush3.bf16.msra.mxu0 %v9605_v62  ;;  %8253 = vmatprep.mubr.msk.f32.mxu0 %vm8880_vm0, %v8881_v8 }
 0x9f1   :  { %5570 = vst.msk [vmem:[#allocation3] sm:$0x8] %vm2037_vm8, %v9803_v9  ;;  %v5828_v55 = vrot.slane %v9803_v9, 3  ;;  %8599 = vmatprep.subr.bf16.mxu0 %v8879_v0  ;;  %v6074_v47 = vrot.slane %v9803_v9, 1 }
 0x9f3   :  { %8247 = vmatmul.mubr.msk.f32.vlgmr.msra.gmra.mrb[68].mxu1 %vm523_vm2, %v5828_v55  ;;  %8254 = vmatmul.mubr.msk.f32.vlgmr.msra.gmra.mrb[70].mxu0 %vm523_vm2, %v5828_v55 }
 0x9f4   :  { %8598 = vmatpush3.bf16.msra.mxu1 %v9611_v63  ;;  %8260 = vmatprep.mubr.msk.f32.mxu1 %vm8880_vm0, %v8881_v8 }
 0x9f5   :  { %8602 = vmatprep.subr.bf16.mxu1 %v8879_v0  ;;  %8601 = vmatpush3.bf16.msra.mxu0 %v9557_v56 }
 0x9f6   :  { %8267 = vmatprep.mubr.msk.f32.mxu0 %vm8880_vm0, %v8881_v8  ;;  %8605 = vmatprep.subr.bf16.mxu0 %v8879_v0 }
 0x9f7   :  { %8261 = vmatmul.mubr.msk.f32.vlgmr.msra.gmra.mrb[70].mxu1 %vm523_vm2, %v5828_v55 }
 0x9f8   :  { %8604 = vmatpush3.bf16.msra.mxu1 %v9559_v48  ;;  %8274 = vmatprep.mubr.msk.f32.mxu1 %vm8880_vm0, %v8881_v8 }
 0x9f9   :  { %8608 = vmatprep.subr.bf16.mxu1 %v8879_v0 }
 0xabe   :  { %v5643_v11 = vpop.f32.mrb[66].mxu0  ;;  %v5715_v45 = vpop.f32.mrb[66].mxu1 }
 0xabf   :  { %v5793_v22 = vrot.slane %v5643_v11, 5  ;;  %v5803_v51 = vrot.slane %v5715_v45, 5  ;;  %v8227_v52 = vpop.f32.mrb[67].mxu0  ;;  %v8234_v56 = vpop.f32.mrb[67].mxu1 }
 0xac1   :  { %v5795_v53 = vadd.f32 %v5793_v22, %v9638_v18  ;;  %v5805_v57 = vadd.f32 %v5803_v51, %v9644_v23 }
 0xac2   :  { %v5788_v44 = vpop.f32.mrb[68].mxu0 }
 0xac3   :  { %v7373_v59 = vmul.f32 -1.442695, %v5795_v53  ;;  %v7374_v2 = vmul.f32 -1.442695, %v5805_v57  ;;  %v8241_v3 = vpop.f32.mrb[69].mxu0  ;;  %v5789_v27 = vadd.f32 %v7371_v25, %v5788_v44  ;;  %v7415_v44 = vld [vmem:[%s9979_s2 + $0x78] sm:$0xff] }
 0xac5   :  { %8819 = vpow2.f32 %v7373_v59  ;;  %v5813_v32 = vrot.slane %v5789_v27, 5 }
 0xac6   :  { %8821 = vpow2.f32 %v7374_v2  ;;  %v5897_v48 = vpop.f32.mrb[68].mxu1  ;;  %v5969_v61 = vpop.f32.mrb[70].mxu0 }
 0xac7   :  { %v6047_v5 = vrot.slane %v5897_v48, 6  ;;  %v6057_v7 = vrot.slane %v5969_v61, 6  ;;  %v8248_v10 = vpop.f32.mrb[69].mxu1  ;;  %v8255_v12 = vpop.f32.mrb[71].mxu0 }
 0xac9   :  { %v6049_v14 = vadd.f32 %v6047_v5, %v9650_v31  ;;  %v6059_v6 = vadd.f32 %v6057_v7, %v9656_v38 }
 0xaca   :  { %v6042_v54 = vpop.f32.mrb[70].mxu1 }
 0xacb   :  { %v7385_v16 = vmul.f32 -1.442695, %v6049_v14  ;;  %v7386_v19 = vmul.f32 -1.442695, %v6059_v6  ;;  %v8262_v13 = vpop.f32.mrb[71].mxu1  ;;  %v6043_v41 = vadd.f32 %v7383_v17, %v6042_v54 }
 0xacd   :  { %8823 = vpow2.f32 %v7385_v16  ;;  %v6067_v42 = vrot.slane %v6043_v41, 6 }
 0xace   :  { %8825 = vpow2.f32 %v7386_v19 }
 0xacf   :  { %v8820_v20 = vpop.eup %8819 }
 0xad0   :  { %v8822_v21 = vpop.eup %8821  ;;  %v5799_v15 = vadd.f32 1.0, %v8820_v20 }
 0xad1   :  { %v5809_v4 = vadd.f32 1.0, %v8822_v21 }
 0xad2   :  { %8827 = vrcp.f32 %v5799_v15 }
 0xad3   :  { %8829 = vrcp.f32 %v5809_v4 }
 0xad7   :  { %v8824_v26 = vpop.eup %8823 }
 0xad8   :  { %v8826_v1 = vpop.eup %8825  ;;  %v6053_v30 = vadd.f32 1.0, %v8824_v26 }
 0xad9   :  { %v6063_v24 = vadd.f32 1.0, %v8826_v1 }
 0xada   :  { %8831 = vrcp.f32 %v6053_v30 }
 0xadb   :  { %8833 = vrcp.f32 %v6063_v24 }
 0xadc   :  { %v8828_v34 = vpop.eup %8827 }
 0xadd   :  { %v8830_v28 = vpop.eup %8829  ;;  %v5815_v35 = vmul.f32 %v8828_v34, %v5813_v32 }
 0xade   :  { %v5822_v40 = vmul.f32 %v8830_v28, %v5820_v36  ;;  %v5818_v55 = vsub.f32 1.0, %v8830_v28  ;;  %v7395_v28 = vld [vmem:[%s9981_s4 + $0x2] sm:$0x1] }
 0xadf   :  { %v5816_v33 = vadd.f32 %v5815_v35, %v9668_v60 }
 0xae1   :  { %8835 = vtanh.f32 %v5816_v33 }
 0xae4   :  { %v8832_v46 = vpop.eup %8831 }
 0xae5   :  { %v8834_v43 = vpop.eup %8833  ;;  %v6069_v37 = vmul.f32 %v8832_v46, %v6067_v42 }
 0xae6   :  { %v6076_v50 = vmul.f32 %v8834_v43, %v6074_v47  ;;  %v6072_v52 = vsub.f32 1.0, %v8834_v43 }
 0xae7   :  { %v6070_v39 = vadd.f32 %v6069_v37, %v9674_v58  ;;  %v7407_v37 = vld [vmem:[%s9981_s4 + $0x3] sm:$0x1] }
 0xae9   :  { %8837 = vtanh.f32 %v6070_v39 }
 0xaeb   :  { %v8836_v11 = vpop.eup %8835 }
 0xaec   :  { %v5819_v45 = vmul.f32 %v8836_v11, %v5818_v55 }
 0xaee   :  { %v9841_v22 = vadd.f32 %v5822_v40, %v5819_v45 }
 0xaf0   :  { %5824 = vst.msk [vmem:[#allocation2] sm:$0x8] %vm2037_vm8, %v9841_v22  ;;  %v6082_v51 = vrot.slane %v9841_v22, 3  ;;  %v6328_v43 = vrot.slane %v9841_v22, 7 }
 0xaf2   :  { %8268 = vmatmul.mubr.msk.f32.vlgmr.msra.gmra.mrb[72].mxu0 %vm523_vm2, %v6082_v51  ;;  %8275 = vmatmul.mubr.msk.f32.vlgmr.msra.gmra.mrb[72].mxu1 %vm523_vm2, %v6082_v51 }
 0xaf3   :  { %v8838_v9 = vpop.eup %8837  ;;  %8607 = vmatpush3.bf16.msra.mxu0 %v9579_v29  ;;  %8281 = vmatprep.mubr.msk.f32.mxu0 %vm8880_vm0, %v8881_v8 }
 0xaf4   :  { %v6073_v56 = vmul.f32 %v8838_v9, %v6072_v52  ;;  %8611 = vmatprep.subr.bf16.mxu0 %v8879_v0  ;;  %8610 = vmatpush3.bf16.msra.mxu1 %v9581_v49  ;;  %v7411_v49 = vld [vmem:[%s9979_s2 + $0x60] sm:$0xff] }
 0xaf5   :  { %8288 = vmatprep.mubr.msk.f32.mxu1 %vm8880_vm0, %v8881_v8  ;;  %8614 = vmatprep.subr.bf16.mxu1 %v8879_v0 }
 0xaf6   :  { %8282 = vmatmul.mubr.msk.f32.vlgmr.msra.gmra.mrb[74].mxu0 %vm523_vm2, %v6082_v51  ;;  %v9857_v53 = vadd.f32 %v6076_v50, %v6073_v56 }
 0xaf7   :  { %8613 = vmatpush3.bf16.msra.mxu0 %v9605_v62  ;;  %8295 = vmatprep.mubr.msk.f32.mxu0 %vm8880_vm0, %v8881_v8  ;;  %v7412_v62 = vld [vmem:[%s9979_s2 + $0x68] sm:$0xff] }
 0xaf8   :  { %6078 = vst.msk [vmem:[#allocation3] sm:$0x4] %vm1782_vm7, %v9857_v53  ;;  %v6336_v29 = vrot.slane %v9857_v53, 2  ;;  %8617 = vmatprep.subr.bf16.mxu0 %v8879_v0  ;;  %v8618_v57 = vpack.c.bf16 %v7412_v62, %v7411_v49  ;;  %v6582_v9 = vrot.slane %v9857_v53, 1  ;;  %v7423_v53 = vld [vmem:[%s9979_s2 + $0x90] sm:$0xff] }
 0xafa   :  { %8289 = vmatmul.mubr.msk.f32.vlgmr.msra.gmra.mrb[74].mxu1 %vm523_vm2, %v6336_v29  ;;  %8296 = vmatmul.mubr.msk.f32.vlgmr.msra.gmra.mrb[76].mxu0 %vm523_vm2, %v6336_v29 }
 0xafb   :  { %8616 = vmatpush3.bf16.msra.mxu1 %v9611_v63  ;;  %8302 = vmatprep.mubr.msk.f32.mxu1 %vm8880_vm0, %v8881_v8  ;;  %v7414_v63 = vld [vmem:[%s9979_s2 + $0x70] sm:$0xff] }
 0xafc   :  { %8620 = vmatprep.subr.bf16.mxu1 %v8879_v0  ;;  %8309 = vmatprep.mubr.msk.f32.mxu0 %vm8880_vm0, %v8881_v8  ;;  %v8621_v59 = vpack.c.bf16 %v7415_v44, %v7414_v63  ;;  %v7417_v44 = vld [vmem:[%s9979_s2 + $0x80] sm:$0xff] }
 0xafd   :  { %8619 = vmatpush3.bf16.msra.mxu0 %v8618_v57 }
 0xafe   :  { %8303 = vmatmul.mubr.msk.f32.vlgmr.msra.gmra.mrb[76].mxu1 %vm523_vm2, %v6336_v29  ;;  %8623 = vmatprep.subr.bf16.mxu0 %v8879_v0 }
 0xaff   :  { %8316 = vmatprep.mubr.msk.f32.mxu1 %vm8880_vm0, %v8881_v8  ;;  %8622 = vmatpush3.bf16.msra.mxu1 %v8621_v59  ;;  %v7418_v59 = vld [vmem:[%s9979_s2 + $0x88] sm:$0xff] }
 0xb00   :  { %8626 = vmatprep.subr.bf16.mxu1 %v8879_v0 }
 0xbc5   :  { %v6151_v2 = vpop.f32.mrb[72].mxu0  ;;  %v6223_v3 = vpop.f32.mrb[72].mxu1 }
 0xbc6   :  { %v6301_v48 = vrot.slane %v6151_v2, 4  ;;  %v6311_v61 = vrot.slane %v6223_v3, 4  ;;  %v8269_v5 = vpop.f32.mrb[73].mxu0  ;;  %v8276_v7 = vpop.f32.mrb[73].mxu1  ;;  %v7424_v2 = vld [vmem:[%s9979_s2 + $0x98] sm:$0xff] }
 0xbc7   :  { %v8627_v5 = vpack.c.bf16 %v7424_v2, %v7423_v53  ;;  %v7426_v7 = vld [vmem:[%s9979_s2 + $0xa0] sm:$0xff] }
 0xbc8   :  { %v6303_v10 = vadd.f32 %v6301_v48, %v9638_v18  ;;  %v6313_v12 = vadd.f32 %v6311_v61, %v9644_v23  ;;  %v8624_v48 = vpack.c.bf16 %v7418_v59, %v7417_v44 }
 0xbc9   :  { %v6296_v14 = vpop.f32.mrb[74].mxu0 }
 0xbca   :  { %v7397_v6 = vmul.f32 -1.442695, %v6303_v10  ;;  %v7398_v54 = vmul.f32 -1.442695, %v6313_v12  ;;  %v8283_v16 = vpop.f32.mrb[75].mxu0  ;;  %v6297_v40 = vadd.f32 %v7395_v28, %v6296_v14  ;;  %v7427_v10 = vld [vmem:[%s9979_s2 + $0xa8] sm:$0xff] }
 0xbcb   :  { %v7429_v16 = vld [vmem:[%s9979_s2 + $0xb0] sm:$0xff] }
 0xbcc   :  { %8839 = vpow2.f32 %v7397_v6  ;;  %v6321_v46 = vrot.slane %v6297_v40, 4  ;;  %v8630_v6 = vpack.c.bf16 %v7427_v10, %v7426_v7 }
 0xbcd   :  { %8841 = vpow2.f32 %v7398_v54  ;;  %v6405_v19 = vpop.f32.mrb[74].mxu1  ;;  %v6477_v13 = vpop.f32.mrb[76].mxu0 }
 0xbce   :  { %v6555_v20 = vrot.slane %v6405_v19, 7  ;;  %v6565_v21 = vrot.slane %v6477_v13, 7  ;;  %v8290_v15 = vpop.f32.mrb[75].mxu1  ;;  %v8297_v4 = vpop.f32.mrb[77].mxu0  ;;  %v7430_v19 = vld [vmem:[%s9979_s2 + $0xb8] sm:$0xff] }
 0xbd0   :  { %v6557_v25 = vadd.f32 %v6555_v20, %v9650_v31  ;;  %v6567_v26 = vadd.f32 %v6565_v21, %v9656_v38  ;;  %v8633_v20 = vpack.c.bf16 %v7430_v19, %v7429_v16 }
 0xbd1   :  { %v6550_v27 = vpop.f32.mrb[76].mxu1 }
 0xbd2   :  { %v7409_v1 = vmul.f32 -1.442695, %v6557_v25  ;;  %v7410_v30 = vmul.f32 -1.442695, %v6567_v26  ;;  %v8304_v24 = vpop.f32.mrb[77].mxu1  ;;  %v6551_v45 = vadd.f32 %v7407_v37, %v6550_v27 }
 0xbd4   :  { %8843 = vpow2.f32 %v7409_v1  ;;  %v6575_v51 = vrot.slane %v6551_v45, 7 }
 0xbd5   :  { %8845 = vpow2.f32 %v7410_v30 }
 0xbd6   :  { %v8840_v32 = vpop.eup %8839 }
 0xbd7   :  { %v8842_v34 = vpop.eup %8841  ;;  %v6307_v36 = vadd.f32 1.0, %v8840_v32 }
 0xbd8   :  { %v6317_v17 = vadd.f32 1.0, %v8842_v34 }
 0xbd9   :  { %8847 = vrcp.f32 %v6307_v36 }
 0xbda   :  { %8849 = vrcp.f32 %v6317_v17 }
 0xbde   :  { %v8844_v35 = vpop.eup %8843 }
 0xbdf   :  { %v8846_v33 = vpop.eup %8845  ;;  %v6561_v41 = vadd.f32 1.0, %v8844_v35 }
 0xbe0   :  { %v6571_v42 = vadd.f32 1.0, %v8846_v33 }
 0xbe1   :  { %8851 = vrcp.f32 %v6561_v41 }
 0xbe2   :  { %8853 = vrcp.f32 %v6571_v42 }
 0xbe3   :  { %v8848_v47 = vpop.eup %8847 }
 0xbe4   :  { %v8850_v50 = vpop.eup %8849  ;;  %v6323_v39 = vmul.f32 %v8848_v47, %v6321_v46 }
 0xbe5   :  { %v6330_v55 = vmul.f32 %v8850_v50, %v6328_v43  ;;  %v6326_v62 = vsub.f32 1.0, %v8850_v50 }
 0xbe6   :  { %v6324_v11 = vadd.f32 %v6323_v39, %v9668_v60 }
 0xbe8   :  { %8855 = vtanh.f32 %v6324_v11 }
 0xbeb   :  { %v8852_v52 = vpop.eup %8851 }
 0xbec   :  { %v8854_v56 = vpop.eup %8853  ;;  %v6577_v29 = vmul.f32 %v8852_v52, %v6575_v51 }
 0xbed   :  { %v6584_v49 = vmul.f32 %v8854_v56, %v6582_v9  ;;  %v6580_v12 = vsub.f32 1.0, %v8854_v56 }
 0xbee   :  { %v6578_v22 = vadd.f32 %v6577_v29, %v9674_v58  ;;  %v7431_v29 = vld [vmem:[%s9981_s4 + $0x3] sm:$0x1] }
 0xbf0   :  { %8857 = vtanh.f32 %v6578_v22 }
 0xbf2   :  { %v8856_v63 = vpop.eup %8855 }
 0xbf3   :  { %v6327_v57 = vmul.f32 %v8856_v63, %v6326_v62 }
 0xbf5   :  { %v9917_v3 = vadd.f32 %v6330_v55, %v6327_v57 }
 0xbf7   :  { %6332 = vst.msk [vmem:[#allocation2] sm:$0x10] %vm1527_vm6, %v9917_v3  ;;  %v6590_v61 = vrot.slane %v9917_v3, 4  ;;  %v6836_v51 = vrot.slane %v9917_v3, 7 }
 0xbf9   :  { %8310 = vmatmul.mubr.msk.f32.vlgmr.msra.gmra.mrb[78].mxu0 %vm523_vm2, %v6590_v61  ;;  %8317 = vmatmul.mubr.msk.f32.vlgmr.msra.gmra.mrb[78].mxu1 %vm523_vm2, %v6590_v61 }
 0xbfa   :  { %v8858_v14 = vpop.eup %8857  ;;  %8625 = vmatpush3.bf16.msra.mxu0 %v8624_v48  ;;  %8323 = vmatprep.mubr.msk.f32.mxu0 %vm8880_vm0, %v8881_v8 }
 0xbfb   :  { %8629 = vmatprep.subr.bf16.mxu0 %v8879_v0  ;;  %8628 = vmatpush3.bf16.msra.mxu1 %v8627_v5  ;;  %v6581_v54 = vmul.f32 %v8858_v14, %v6580_v12 }
 0xbfc   :  { %8330 = vmatprep.mubr.msk.f32.mxu1 %vm8880_vm0, %v8881_v8  ;;  %8632 = vmatprep.subr.bf16.mxu1 %v8879_v0 }
 0xbfd   :  { %8324 = vmatmul.mubr.msk.f32.vlgmr.msra.gmra.mrb[80].mxu0 %vm523_vm2, %v6590_v61  ;;  %v6585_v13 = vadd.f32 %v6584_v49, %v6581_v54 }
 0xbfe   :  { %8631 = vmatpush3.bf16.msra.mxu0 %v8630_v6  ;;  %8337 = vmatprep.mubr.msk.f32.mxu0 %vm8880_vm0, %v8881_v8 }
 0xbff   :  { %6586 = vst.msk [vmem:[#allocation3] sm:$0x2] %vm1272_vm5, %v6585_v13  ;;  %v9946_v21 = vrot.slane %v6585_v13, 1 }
 0xc01   :  { %8331 = vmatmul.mubr.msk.f32.vlgmr.msra.gmra.mrb[80].mxu1 %vm523_vm2, %v9946_v21  ;;  %8338 = vmatmul.mubr.msk.f32.vlgmr.msra.gmra.mrb[82].mxu0 %vm523_vm2, %v9946_v21 }
 0xc02   :  { %8634 = vmatpush3.bf16.msra.mxu1 %v8633_v20  ;;  %8344 = vmatprep.mubr.msk.f32.mxu1 %vm8880_vm0, %v8881_v8 }
 0xc05   :  { %8345 = vmatmul.mubr.msk.f32.vlgmr.msra.gmra.mrb[82].mxu1 %vm523_vm2, %v9946_v21 }
 0xccc   :  { %v6659_v0 = vpop.f32.mrb[78].mxu0  ;;  %v6731_v15 = vpop.f32.mrb[78].mxu1 }
 0xccd   :  { %v6809_v4 = vrot.slane %v6659_v0, 3  ;;  %v6819_v25 = vrot.slane %v6731_v15, 3  ;;  %v8311_v26 = vpop.f32.mrb[79].mxu0  ;;  %v8318_v27 = vpop.f32.mrb[79].mxu1 }
 0xccf   :  { %v6811_v1 = vadd.f32 %v6809_v4, %v9638_v18  ;;  %v6821_v30 = vadd.f32 %v6819_v25, %v9644_v23 }
 0xcd0   :  { %v6804_v24 = vpop.f32.mrb[80].mxu0 }
 0xcd1   :  { %v7421_v32 = vmul.f32 -1.442695, %v6811_v1  ;;  %v7422_v34 = vmul.f32 -1.442695, %v6821_v30  ;;  %v8325_v36 = vpop.f32.mrb[81].mxu0 }
 0xcd3   :  { %8859 = vpow2.f32 %v7421_v32 }
 0xcd4   :  { %8861 = vpow2.f32 %v7422_v34  ;;  %v6913_v8 = vpop.f32.mrb[80].mxu1  ;;  %v6985_v17 = vpop.f32.mrb[82].mxu0 }
 0xcd5   :  { %v7062_v28 = vadd.f32 %v6913_v8, %v9650_v31  ;;  %v8332_v35 = vpop.f32.mrb[81].mxu1  ;;  %v8339_v40 = vpop.f32.mrb[83].mxu0  ;;  %v7069_v41 = vadd.f32 %v6985_v17, %v9656_v38  ;;  %v7419_v31 = vld [vmem:[%s9981_s4 + $0x2] sm:$0x1] }
 0xcd6   :  { %v6805_v55 = vadd.f32 %v7419_v31, %v6804_v24 }
 0xcd7   :  { %v7433_v33 = vmul.f32 -1.442695, %v7062_v28  ;;  %v7434_v46 = vmul.f32 -1.442695, %v7069_v41 }
 0xcd8   :  { %v7058_v42 = vpop.f32.mrb[82].mxu1  ;;  %v6829_v11 = vrot.slane %v6805_v55, 3 }
 0xcd9   :  { %8863 = vpow2.f32 %v7433_v33  ;;  %v8346_v18 = vpop.f32.mrb[83].mxu1  ;;  %v7059_v62 = vadd.f32 %v7431_v29, %v7058_v42 }
 0xcda   :  { %8865 = vpow2.f32 %v7434_v46 }
 0xcdd   :  { %v8860_v23 = vpop.eup %8859 }
 0xcde   :  { %v8862_v47 = vpop.eup %8861  ;;  %v6815_v43 = vadd.f32 1.0, %v8860_v23 }
 0xcdf   :  { %v6825_v37 = vadd.f32 1.0, %v8862_v47 }
 0xce0   :  { %8867 = vrcp.f32 %v6815_v43 }
 0xce1   :  { %8869 = vrcp.f32 %v6825_v37 }
 0xce3   :  { %v8864_v50 = vpop.eup %8863 }
 0xce4   :  { %v7066_v39 = vadd.f32 1.0, %v8864_v50  ;;  %v8866_v38 = vpop.eup %8865 }
 0xce5   :  { %v7073_v22 = vadd.f32 1.0, %v8866_v38 }
 0xce6   :  { %8871 = vrcp.f32 %v7066_v39 }
 0xcea   :  { %v8868_v45 = vpop.eup %8867 }
 0xceb   :  { %v8870_v52 = vpop.eup %8869  ;;  %v6831_v9 = vmul.f32 %v8868_v45, %v6829_v11 }
 0xcec   :  { %v6838_v56 = vmul.f32 %v8870_v52, %v6836_v51  ;;  %v6834_v59 = vsub.f32 1.0, %v8870_v52 }
 0xced   :  { %v6832_v49 = vadd.f32 %v6831_v9, %v9668_v60 }
 0xcef   :  { %8873 = vtanh.f32 %v6832_v49 }
 0xcf0   :  { %v8872_v63 = vpop.eup %8871  ;;  %8875 = vrcp.f32 %v7073_v22 }
 0xcf1   :  { %v7076_v57 = vmul.f32 %v8872_v63, %v7059_v62 }
 0xcf3   :  { %v7077_v44 = vadd.f32 %v7076_v57, %v9674_v58 }
 0xcf5   :  { %8877 = vtanh.f32 %v7077_v44 }
 0xcf9   :  { %v8874_v53 = vpop.eup %8873 }
 0xcfa   :  { %v6835_v2 = vmul.f32 %v8874_v53, %v6834_v59  ;;  %v8876_v3 = vpop.eup %8875 }
 0xcfb   :  { %v7079_v61 = vsub.f32 1.0, %v8876_v3  ;;  %v7082_v60 = vmul.f32 %v8876_v3, %v9946_v21 }
 0xcfc   :  { %v6839_v48 = vadd.f32 %v6838_v56, %v6835_v2 }
 0xcfe   :  { %6840 = vst.msk [vmem:[#allocation2] sm:$0x20] %vm1018_vm4, %v6839_v48 }
 0xcff   :  { %v8878_v5 = vpop.eup %8877 }
 0xd00   :  { %v7080_v7 = vmul.f32 %v8878_v5, %v7079_v61 }
 0xd02   :  { %v7083_v10 = vadd.f32 %v7082_v60, %v7080_v7 }
 0xd04   :  { %7084 = vst.msk [vmem:[#allocation3] sm:$0x1] %vm765_vm3, %v7083_v10 }
 0xd05   :  { %v7085_v58 = vld [vmem:[#allocation2] sm:$0x3f] }
 0xd0b   :  { %v7086_v12 = vld [vmem:[#allocation3] sm:$0x3f] }
 0xd0c   :  { %7088 = vrot.lane.b32.xlu0 %v7086_v12, %s8882_s13 }
 0xd7e   :  { %v7089_v14 = vpop.permute.xlu0 %7088 }
 0xd7f   :  { %v7091_v6 = vsel %vm523_vm2, %v7085_v58, %v7089_v14 }
 0xd80   :  { %7093 = vst.msk [vmem:[%s9982_s5] sm:$0x3f] %vm7092_vm9, %v7091_v6 }

</bundles_post_ra>
